<compile_context>
chip_gen: v7x
topology: tpu7x:2x2x1
jax: 0.10.0
libtpu: 0.0.40
codegen_flags: <defaults>
</compile_context>

<pallas_src>
import numpy as np
import jax
import jax.numpy as jnp
from jax.experimental import pallas as pl
from jax.experimental.pallas import tpu as pltpu

LANE = 128
B = 16          # images per grid step (multiple of 8; 16 keeps bf16 sublane tiles aligned)


# ----------------------------------------------------------------------------
# The single fused kernel (one grid step == B images)
# ----------------------------------------------------------------------------
def _fused_net_kernel(x_ref, w1_ref, b1_ref, w2_ref, b2_ref,
                      wf1_ref, bf1_ref, wf2_ref, bf2_ref,
                      out_ref, p1s_ref, im2_ref, act_ref):
    """Whole Net forward for one block of B images.

    x_ref  : (36B, 64) bf16   rows = (m*6+v)*B + img ; lanes = merged 2x2 conv1 taps
    w1_ref : (64, 512) bf16   conv1, phase-shifted so pool1 emits dense 80-ch rows
    b1_ref : (1, 128) f32     conv1 bias tiled at lane offsets 0/20/40/60
    w2_ref : (1152, 512) bf16 conv2, all nine 3x3 taps merged into K
    b2_ref : (1, 128) f32     conv2 bias (50 valid lanes)
    wf1_ref: (2048, 512) bf16 fc1 (800 -> 500), K/N zero-padded
    bf1_ref: (1, 512) f32
    wf2_ref: (512, 128) bf16  fc2 (500 -> 10), K/N zero-padded
    bf2_ref: (1, 128) f32
    out_ref: (B, 128) f32     lane-dense log-probabilities (lanes >= 10 are junk)
    p1s_ref: (36B, 128) bf16  scratch: densified s2d(2) of the pool1 output
    im2_ref: (16B, 1152) bf16 scratch: conv2 im2col
    act_ref: (B, 2048) bf16   scratch: fc1 activation (NCHW flatten order)
    """
    # ---- conv1 (5x5, 1->20) as one matmul + fused 2x2 max-pool + bias + ReLU ----
    acc1 = jnp.dot(x_ref[...], w1_ref[...],
                   preferred_element_type=jnp.float32)                    # (36B, 512)
    hi1 = jnp.maximum(jnp.maximum(acc1[:, 0 * LANE:1 * LANE], acc1[:, 1 * LANE:2 * LANE]),
                      jnp.maximum(acc1[:, 2 * LANE:3 * LANE], acc1[:, 3 * LANE:4 * LANE]))
    p1s_ref[...] = jnp.maximum(hi1 + b1_ref[...], 0.0).astype(jnp.bfloat16)

    # ---- build the conv2 im2col (16B, 1152): 36 aligned tile copies ------------
    for al in range(3):
        for be in range(3):
            tap = al * 3 + be
            for mm in range(4):
                src = ((mm + al) * 6 + be) * B
                im2_ref[mm * 4 * B:(mm + 1) * 4 * B,
                        tap * LANE:(tap + 1) * LANE] = p1s_ref[src:src + 4 * B, :]

    # ---- conv2 (5x5, 20->50) as one matmul + fused 2x2 max-pool + bias + ReLU ---
    acc2 = jnp.dot(im2_ref[...], w2_ref[...],
                   preferred_element_type=jnp.float32)                    # (16B, 512)
    hi2 = jnp.maximum(jnp.maximum(acc2[:, 0 * LANE:1 * LANE], acc2[:, 1 * LANE:2 * LANE]),
                      jnp.maximum(acc2[:, 2 * LANE:3 * LANE], acc2[:, 3 * LANE:4 * LANE]))
    pooled = jnp.maximum(hi2 + b2_ref[...], 0.0).astype(jnp.bfloat16)     # (16B, 128)

    # ---- fc1 activation assembly (PyTorch NCHW flatten baked into WF1) ---------
    for pos in range(16):
        act_ref[:, pos * LANE:(pos + 1) * LANE] = pooled[pos * B:(pos + 1) * B, :]

    # ---- fc1 + ReLU -------------------------------------------------------------
    # TODO(synk): F.dropout / nn.Dropout2d are identity in eval mode; skipped.
    h1 = jnp.dot(act_ref[...], wf1_ref[...],
                 preferred_element_type=jnp.float32)                      # (B, 512)
    h1 = jnp.maximum(h1 + bf1_ref[...], 0.0).astype(jnp.bfloat16)

    # ---- fc2 + log_softmax (lane-dense 128-wide output) -------------------------
    logits = jnp.dot(h1, wf2_ref[...],
                     preferred_element_type=jnp.float32) + bf2_ref[...]   # (B, 128)
    lane = jax.lax.broadcasted_iota(jnp.int32, logits.shape, 1)
    logits = jnp.where(lane < 10, logits, -1e30)            # neutralize padded lanes
    mx = jnp.max(logits, axis=-1, keepdims=True)
    sh = logits - mx
    lse = jnp.log(jnp.sum(jnp.exp(sh), axis=-1, keepdims=True))
    out_ref[...] = sh - lse


# ----------------------------------------------------------------------------
# Parameters (PyTorch layout) and one-time packing to kernel layout
# ----------------------------------------------------------------------------
def init_params(key):
    k = jax.random.split(key, 8)
    return {
        "conv1_w": 0.1 * jax.random.normal(k[0], (20, 1, 5, 5), jnp.float32),
        "conv1_b": 0.1 * jax.random.normal(k[1], (20,), jnp.float32),
        "conv2_w": 0.05 * jax.random.normal(k[2], (50, 20, 5, 5), jnp.float32),
        "conv2_b": 0.1 * jax.random.normal(k[3], (50,), jnp.float32),
        "fc1_w": 0.05 * jax.random.normal(k[4], (500, 800), jnp.float32),
        "fc1_b": 0.1 * jax.random.normal(k[5], (500,), jnp.float32),
        "fc2_w": 0.05 * jax.random.normal(k[6], (10, 500), jnp.float32),
        "fc2_b": 0.1 * jax.random.normal(k[7], (10,), jnp.float32),
    }


def pack_params(params):
    """One-time repack of PyTorch-layout weights into the kernel's padded,
    phase-expanded / densified, bf16 layouts (done once at init, never per step)."""
    w1 = np.asarray(params["conv1_w"], np.float32)     # (20, 1, 5, 5)
    b1 = np.asarray(params["conv1_b"], np.float32)     # (20,)
    w2 = np.asarray(params["conv2_w"], np.float32)     # (50, 20, 5, 5)
    b2 = np.asarray(params["conv2_b"], np.float32)     # (50,)
    f1w = np.asarray(params["fc1_w"], np.float32)      # (500, 800)
    f1b = np.asarray(params["fc1_b"], np.float32)
    f2w = np.asarray(params["fc2_w"], np.float32)      # (10, 500)
    f2b = np.asarray(params["fc2_b"], np.float32)

    # conv1: 5x5 conv on 28x28 == 2x2 conv (4 taps x 16 ch merged into K=64) on the
    # 4x space-to-depth image.  Output lane block j holds, at lanes o*20+ch, the
    # conv1 phase (p, q) that is member j of pool-group o, so the 4-block max in
    # the kernel directly produces the densified pool1 row.
    W1 = np.zeros((64, 4 * LANE), np.float32)
    for o in range(4):                       # pool-phase group (ay, ax) = (o//2, o%2)
        for j in range(4):                   # member of group -> conv1 phase (p, q)
            p = 2 * (o // 2) + (j // 2)
            q = 2 * (o % 2) + (j % 2)
            col0 = j * LANE + o * 20
            for al in range(2):
                for be in range(2):
                    for a in range(4):
                        for b in range(4):
                            dy = 4 * al + a - p
                            dx = 4 * be + b - q
                            if 0 <= dy < 5 and 0 <= dx < 5:
                                W1[(al * 2 + be) * 16 + 4 * a + b,
                                   col0:col0 + 20] = w1[:, 0, dy, dx]
    b1t = np.zeros((1, LANE), np.float32)
    for o in range(4):
        b1t[0, o * 20:o * 20 + 20] = b1

    # conv2: 5x5 conv on pool1 (12x12x20) == 3x3 conv over the densified s2d(2)
    # pool1 rows (4 phases x 20 ch at lane offsets 0/20/40/60); all 9 taps are
    # merged into a single K=1152 contraction (matching the in-kernel im2col).
    W2 = np.zeros((9 * LANE, 4 * LANE), np.float32)
    for al in range(3):
        for be in range(3):
            tap = al * 3 + be
            for s in range(2):
                for t in range(2):
                    col0 = (2 * s + t) * LANE
                    for ay in range(2):
                        for ax in range(2):
                            ey = 2 * al + ay - s
                            ex = 2 * be + ax - t
                            if 0 <= ey < 5 and 0 <= ex < 5:
                                row0 = tap * LANE + (2 * ay + ax) * 20
                                W2[row0:row0 + 20, col0:col0 + 50] = w2[:, :, ey, ex].T
    b2p = np.zeros((1, LANE), np.float32)
    b2p[0, :50] = b2

    # fc1: PyTorch flatten index is c*16 + y*4 + x; kernel lane is (y*4+x)*128 + c.
    WF1 = np.zeros((16 * LANE, 512), np.float32)
    for pos in range(16):
        for c in range(50):
            WF1[pos * LANE + c, :500] = f1w[:, c * 16 + pos]
    bf1 = np.zeros((1, 512), np.float32)
    bf1[0, :500] = f1b

    WF2 = np.zeros((512, LANE), np.float32)
    WF2[:500, :10] = f2w.T
    bf2 = np.zeros((1, LANE), np.float32)
    bf2[0, :10] = f2b

    return {
        "W1": jnp.asarray(W1, jnp.bfloat16), "b1": jnp.asarray(b1t),
        "W2": jnp.asarray(W2, jnp.bfloat16), "b2": jnp.asarray(b2p),
        "WF1": jnp.asarray(WF1, jnp.bfloat16), "bf1": jnp.asarray(bf1),
        "WF2": jnp.asarray(WF2, jnp.bfloat16), "bf2": jnp.asarray(bf2),
    }


# ----------------------------------------------------------------------------
# Forward (single pallas_call; wrapper only does tiny layout plumbing)
# ----------------------------------------------------------------------------
def _pack_input(x, npad):
    """(n,1,28,28) f32 -> (npad*36, 64) bf16 rows ordered (blk, m, v, img)."""
    n = x.shape[0]
    if npad != n:
        x = jnp.pad(x, ((0, npad - n), (0, 0), (0, 0), (0, 0)))
    # space-to-depth(4): x4[i, u, v, 4a+b] = x[i, 0, 4u+a, 4v+b]
    x4 = x.reshape(npad, 7, 4, 7, 4).transpose(0, 1, 3, 2, 4).reshape(npad, 7, 7, 16)
    # merge the 2x2 conv1 taps into K=64: x4im[i, m, v, (al*2+be)*16+k] = x4[i, m+al, v+be, k]
    taps = [x4[:, al:al + 6, be:be + 6, :] for al in range(2) for be in range(2)]
    x4im = jnp.stack(taps, axis=3).reshape(npad, 6, 6, 64)
    # batch blocks of B images, rows ordered (m*6+v)*B + img_in_block
    nb = npad // B
    x4im = x4im.reshape(nb, B, 6, 6, 64).transpose(0, 2, 3, 1, 4)
    return x4im.reshape(nb * 36 * B, 64).astype(jnp.bfloat16)


def _const_spec(shape):
    """Constant-index (VMEM-resident) block; single-buffered when supported."""
    index_map = lambda i: (0,) * len(shape)
    buffered = getattr(pl, "Buffered", None)
    if buffered is not None:
        try:
            return pl.BlockSpec(shape, index_map, pipeline_mode=buffered(1))
        except Exception:
            pass
    return pl.BlockSpec(shape, index_map)


def net_forward(packed, x):
    n = x.shape[0]
    nb = -(-n // B)
    npad = nb * B
    xk = _pack_input(x, npad)

    out = pl.pallas_call(
        _fused_net_kernel,
        out_shape=jax.ShapeDtypeStruct((npad, LANE), jnp.float32),
        grid=(nb,),
        in_specs=[
            pl.BlockSpec((36 * B, 64), lambda i: (i, 0)),     # packed input
            _const_spec((64, 4 * LANE)),                      # W1
            _const_spec((1, LANE)),                           # b1 (tiled)
            _const_spec((9 * LANE, 4 * LANE)),                # W2
            _const_spec((1, LANE)),                           # b2
            _const_spec((16 * LANE, 512)),                    # WF1
            _const_spec((1, 512)),                            # bf1
            _const_spec((512, LANE)),                         # WF2
            _const_spec((1, LANE)),                           # bf2
        ],
        out_specs=pl.BlockSpec((B, LANE), lambda i: (i, 0)),
        scratch_shapes=[
            pltpu.VMEM((36 * B, LANE), jnp.bfloat16),         # p1s (dense pool1)
            pltpu.VMEM((16 * B, 9 * LANE), jnp.bfloat16),     # conv2 im2col
            pltpu.VMEM((B, 16 * LANE), jnp.bfloat16),         # fc1 activation
        ],
        compiler_params=pltpu.CompilerParams(
            dimension_semantics=("parallel",),
            # ~10 MiB actually used; 32 MiB is safe on v5e/v6e (128 MiB) and v7x (64 MiB).
            vmem_limit_bytes=32 * 1024 * 1024,
        ),
    )(xk, packed["W1"], packed["b1"], packed["W2"], packed["b2"],
      packed["WF1"], packed["bf1"], packed["WF2"], packed["bf2"])
    # lane-dense kernel output; slice the 10 real classes (and drop batch padding) here
    return out[:n, :10]


# ----------------------------------------------------------------------------
# Pure-JAX reference (PyTorch semantics) for validation
# ----------------------------------------------------------------------------
def reference_forward(params, x):
    def conv(z, w, b):
        y = jax.lax.conv_general_dilated(
            z, w, window_strides=(1, 1), padding="VALID",
            dimension_numbers=("NCHW", "OIHW", "NCHW"))
        return y + b.reshape(1, -1, 1, 1)

    def pool2x2(z):
        n, c, h, w = z.shape
        return z.reshape(n, c, h // 2, 2, w // 2, 2).max(axis=(3, 5))

    y = jax.nn.relu(conv(x, params["conv1_w"], params["conv1_b"]))
    y = pool2x2(y)
    y = jax.nn.relu(conv(y, params["conv2_w"], params["conv2_b"]))
    y = pool2x2(y)                                   # dropout2d: identity (eval)
    y = y.reshape(y.shape[0], -1)                    # NCHW flatten -> (N, 800)
    y = jax.nn.relu(y @ params["fc1_w"].T + params["fc1_b"])
    y = y @ params["fc2_w"].T + params["fc2_b"]      # dropout: identity (eval)
    return jax.nn.log_softmax(y, axis=-1)


if __name__ == "__main__":
    key = jax.random.PRNGKey(0)
    pkey, xkey = jax.random.split(key)
    params = init_params(pkey)
    packed = pack_params(params)

    x = jax.random.normal(xkey, (2, 1, 28, 28), jnp.float32)   # MNIST-shaped, batch=2

    fwd = jax.jit(net_forward)
    out = jax.block_until_ready(fwd(packed, x))

    assert out.shape == (2, 10)
    assert bool(jnp.all(jnp.isfinite(out)))
    # rows of log_softmax should sum (in prob space) to ~1
    assert jnp.allclose(jnp.sum(jnp.exp(out), axis=1), 1.0, atol=1e-3)
    # validate against the pure-JAX reference (bf16 matmuls -> loose tolerance)
    ref = reference_forward(params, x)
    max_err = float(jnp.max(jnp.abs(out - ref)))
    assert max_err < 0.15, f"kernel/reference mismatch: max|diff|={max_err:.4f}"
    print("KERNEL_OK")
</pallas_src>

<mosaic_0001>
module attributes {stable_mosaic.version = 11 : i64} {
  func.func @_fused_net_kernel(%arg0: i32, %arg1: memref<576x64xbf16, #tpu.memory_space<vmem>>, %arg2: memref<64x512xbf16, #tpu.memory_space<vmem>>, %arg3: memref<1x128xf32, #tpu.memory_space<vmem>>, %arg4: memref<1152x512xbf16, #tpu.memory_space<vmem>>, %arg5: memref<1x128xf32, #tpu.memory_space<vmem>>, %arg6: memref<2048x512xbf16, #tpu.memory_space<vmem>>, %arg7: memref<1x512xf32, #tpu.memory_space<vmem>>, %arg8: memref<512x128xbf16, #tpu.memory_space<vmem>>, %arg9: memref<1x128xf32, #tpu.memory_space<vmem>>, %arg10: memref<16x128xf32, #tpu.memory_space<vmem>>, %arg11: memref<576x128xbf16, #tpu.memory_space<vmem>>, %arg12: memref<256x1152xbf16, #tpu.memory_space<vmem>>, %arg13: memref<16x2048xbf16, #tpu.memory_space<vmem>>) attributes {dimension_semantics = [#tpu.dimension_semantics<parallel>], iteration_bounds = array<i64: 1>, scalar_prefetch = 0 : i64, scratch_operands = 3 : i64, tpu.core_type = #tpu.core_type<tc>, window_params = [{transform_indices = @transform_0, window_bounds = array<i64: 576, 64>}, {pipeline_mode = #tpu.pipeline_mode<synchronous>, transform_indices = @transform_1, window_bounds = array<i64: 64, 512>}, {pipeline_mode = #tpu.pipeline_mode<synchronous>, transform_indices = @transform_2, window_bounds = array<i64: 1, 128>}, {pipeline_mode = #tpu.pipeline_mode<synchronous>, transform_indices = @transform_3, window_bounds = array<i64: 1152, 512>}, {pipeline_mode = #tpu.pipeline_mode<synchronous>, transform_indices = @transform_4, window_bounds = array<i64: 1, 128>}, {pipeline_mode = #tpu.pipeline_mode<synchronous>, transform_indices = @transform_5, window_bounds = array<i64: 2048, 512>}, {pipeline_mode = #tpu.pipeline_mode<synchronous>, transform_indices = @transform_6, window_bounds = array<i64: 1, 512>}, {pipeline_mode = #tpu.pipeline_mode<synchronous>, transform_indices = @transform_7, window_bounds = array<i64: 512, 128>}, {pipeline_mode = #tpu.pipeline_mode<synchronous>, transform_indices = @transform_8, window_bounds = array<i64: 1, 128>}, {transform_indices = @transform_9, window_bounds = array<i64: 16, 128>}]} {
    %c0 = arith.constant 0 : index
    %c0_0 = arith.constant 0 : index
    %0 = vector.load %arg1[%c0, %c0_0] : memref<576x64xbf16, #tpu.memory_space<vmem>>, vector<576x64xbf16>
    %c0_1 = arith.constant 0 : index
    %c0_2 = arith.constant 0 : index
    %1 = vector.load %arg2[%c0_1, %c0_2] : memref<64x512xbf16, #tpu.memory_space<vmem>>, vector<64x512xbf16>
    %cst = arith.constant dense<0.000000e+00> : vector<576x512xf32>
    %2 = tpu.matmul %0, %1, %cst {dimension_numbers = #tpu.dot_dimension_numbers<[1], [0], [0], [1], [0, 0, 1, 1], [], []>} : vector<576x64xbf16>, vector<64x512xbf16>, vector<576x512xf32> -> vector<576x512xf32>
    %3 = vector.extract_strided_slice %2 {offsets = [0, 0], sizes = [576, 128], strides = [1, 1]} : vector<576x512xf32> to vector<576x128xf32>
    %4 = vector.extract_strided_slice %2 {offsets = [0, 128], sizes = [576, 128], strides = [1, 1]} : vector<576x512xf32> to vector<576x128xf32>
    %5 = arith.maximumf %3, %4 : vector<576x128xf32>
    %6 = vector.extract_strided_slice %2 {offsets = [0, 256], sizes = [576, 128], strides = [1, 1]} : vector<576x512xf32> to vector<576x128xf32>
    %7 = vector.extract_strided_slice %2 {offsets = [0, 384], sizes = [576, 128], strides = [1, 1]} : vector<576x512xf32> to vector<576x128xf32>
    %8 = arith.maximumf %6, %7 : vector<576x128xf32>
    %9 = arith.maximumf %5, %8 : vector<576x128xf32>
    %c0_3 = arith.constant 0 : index
    %c0_4 = arith.constant 0 : index
    %10 = vector.load %arg3[%c0_3, %c0_4] : memref<1x128xf32, #tpu.memory_space<vmem>>, vector<1x128xf32>
    %11 = vector.broadcast %10 : vector<1x128xf32> to vector<576x128xf32>
    %12 = arith.addf %9, %11 : vector<576x128xf32>
    %cst_5 = arith.constant 0.000000e+00 : f32
    %13 = vector.broadcast %cst_5 : f32 to vector<576x128xf32>
    %14 = arith.maximumf %12, %13 : vector<576x128xf32>
    %15 = arith.truncf %14 : vector<576x128xf32> to vector<576x128xbf16>
    %c0_6 = arith.constant 0 : index
    %c0_7 = arith.constant 0 : index
    %16 = vector.load %arg11[%c0_6, %c0_7] : memref<576x128xbf16, #tpu.memory_space<vmem>>, vector<576x128xbf16>
    tpu.vector_store %arg11[%c0_6, %c0_7], %15 {strides = array<i32>} : memref<576x128xbf16, #tpu.memory_space<vmem>>, vector<576x128xbf16>,
    %c0_8 = arith.constant 0 : index
    %c0_9 = arith.constant 0 : index
    %17 = vector.load %arg11[%c0_8, %c0_9] : memref<576x128xbf16, #tpu.memory_space<vmem>>, vector<64x128xbf16>
    %c0_10 = arith.constant 0 : index
    %c0_11 = arith.constant 0 : index
    %18 = vector.load %arg12[%c0_10, %c0_11] : memref<256x1152xbf16, #tpu.memory_space<vmem>>, vector<64x128xbf16>
    tpu.vector_store %arg12[%c0_10, %c0_11], %17 {strides = array<i32>} : memref<256x1152xbf16, #tpu.memory_space<vmem>>, vector<64x128xbf16>,
    %c96 = arith.constant 96 : index
    %c0_12 = arith.constant 0 : index
    %19 = vector.load %arg11[%c96, %c0_12] : memref<576x128xbf16, #tpu.memory_space<vmem>>, vector<64x128xbf16>
    %c64 = arith.constant 64 : index
    %c0_13 = arith.constant 0 : index
    %20 = vector.load %arg12[%c64, %c0_13] : memref<256x1152xbf16, #tpu.memory_space<vmem>>, vector<64x128xbf16>
    tpu.vector_store %arg12[%c64, %c0_13], %19 {strides = array<i32>} : memref<256x1152xbf16, #tpu.memory_space<vmem>>, vector<64x128xbf16>,
    %c192 = arith.constant 192 : index
    %c0_14 = arith.constant 0 : index
    %21 = vector.load %arg11[%c192, %c0_14] : memref<576x128xbf16, #tpu.memory_space<vmem>>, vector<64x128xbf16>
    %c128 = arith.constant 128 : index
    %c0_15 = arith.constant 0 : index
    %22 = vector.load %arg12[%c128, %c0_15] : memref<256x1152xbf16, #tpu.memory_space<vmem>>, vector<64x128xbf16>
    tpu.vector_store %arg12[%c128, %c0_15], %21 {strides = array<i32>} : memref<256x1152xbf16, #tpu.memory_space<vmem>>, vector<64x128xbf16>,
    %c288 = arith.constant 288 : index
    %c0_16 = arith.constant 0 : index
    %23 = vector.load %arg11[%c288, %c0_16] : memref<576x128xbf16, #tpu.memory_space<vmem>>, vector<64x128xbf16>
    %c192_17 = arith.constant 192 : index
    %c0_18 = arith.constant 0 : index
    %24 = vector.load %arg12[%c192_17, %c0_18] : memref<256x1152xbf16, #tpu.memory_space<vmem>>, vector<64x128xbf16>
    tpu.vector_store %arg12[%c192_17, %c0_18], %23 {strides = array<i32>} : memref<256x1152xbf16, #tpu.memory_space<vmem>>, vector<64x128xbf16>,
    %c16 = arith.constant 16 : index
    %c0_19 = arith.constant 0 : index
    %25 = vector.load %arg11[%c16, %c0_19] : memref<576x128xbf16, #tpu.memory_space<vmem>>, vector<64x128xbf16>
    %c0_20 = arith.constant 0 : index
    %c128_21 = arith.constant 128 : index
    %26 = vector.load %arg12[%c0_20, %c128_21] : memref<256x1152xbf16, #tpu.memory_space<vmem>>, vector<64x128xbf16>
    tpu.vector_store %arg12[%c0_20, %c128_21], %25 {strides = array<i32>} : memref<256x1152xbf16, #tpu.memory_space<vmem>>, vector<64x128xbf16>,
    %c112 = arith.constant 112 : index
    %c0_22 = arith.constant 0 : index
    %27 = vector.load %arg11[%c112, %c0_22] : memref<576x128xbf16, #tpu.memory_space<vmem>>, vector<64x128xbf16>
    %c64_23 = arith.constant 64 : index
    %c128_24 = arith.constant 128 : index
    %28 = vector.load %arg12[%c64_23, %c128_24] : memref<256x1152xbf16, #tpu.memory_space<vmem>>, vector<64x128xbf16>
    tpu.vector_store %arg12[%c64_23, %c128_24], %27 {strides = array<i32>} : memref<256x1152xbf16, #tpu.memory_space<vmem>>, vector<64x128xbf16>,
    %c208 = arith.constant 208 : index
    %c0_25 = arith.constant 0 : index
    %29 = vector.load %arg11[%c208, %c0_25] : memref<576x128xbf16, #tpu.memory_space<vmem>>, vector<64x128xbf16>
    %c128_26 = arith.constant 128 : index
    %c128_27 = arith.constant 128 : index
    %30 = vector.load %arg12[%c128_26, %c128_27] : memref<256x1152xbf16, #tpu.memory_space<vmem>>, vector<64x128xbf16>
    tpu.vector_store %arg12[%c128_26, %c128_27], %29 {strides = array<i32>} : memref<256x1152xbf16, #tpu.memory_space<vmem>>, vector<64x128xbf16>,
    %c304 = arith.constant 304 : index
    %c0_28 = arith.constant 0 : index
    %31 = vector.load %arg11[%c304, %c0_28] : memref<576x128xbf16, #tpu.memory_space<vmem>>, vector<64x128xbf16>
    %c192_29 = arith.constant 192 : index
    %c128_30 = arith.constant 128 : index
    %32 = vector.load %arg12[%c192_29, %c128_30] : memref<256x1152xbf16, #tpu.memory_space<vmem>>, vector<64x128xbf16>
    tpu.vector_store %arg12[%c192_29, %c128_30], %31 {strides = array<i32>} : memref<256x1152xbf16, #tpu.memory_space<vmem>>, vector<64x128xbf16>,
    %c32 = arith.constant 32 : index
    %c0_31 = arith.constant 0 : index
    %33 = vector.load %arg11[%c32, %c0_31] : memref<576x128xbf16, #tpu.memory_space<vmem>>, vector<64x128xbf16>
    %c0_32 = arith.constant 0 : index
    %c256 = arith.constant 256 : index
    %34 = vector.load %arg12[%c0_32, %c256] : memref<256x1152xbf16, #tpu.memory_space<vmem>>, vector<64x128xbf16>
    tpu.vector_store %arg12[%c0_32, %c256], %33 {strides = array<i32>} : memref<256x1152xbf16, #tpu.memory_space<vmem>>, vector<64x128xbf16>,
    %c128_33 = arith.constant 128 : index
    %c0_34 = arith.constant 0 : index
    %35 = vector.load %arg11[%c128_33, %c0_34] : memref<576x128xbf16, #tpu.memory_space<vmem>>, vector<64x128xbf16>
    %c64_35 = arith.constant 64 : index
    %c256_36 = arith.constant 256 : index
    %36 = vector.load %arg12[%c64_35, %c256_36] : memref<256x1152xbf16, #tpu.memory_space<vmem>>, vector<64x128xbf16>
    tpu.vector_store %arg12[%c64_35, %c256_36], %35 {strides = array<i32>} : memref<256x1152xbf16, #tpu.memory_space<vmem>>, vector<64x128xbf16>,
    %c224 = arith.constant 224 : index
    %c0_37 = arith.constant 0 : index
    %37 = vector.load %arg11[%c224, %c0_37] : memref<576x128xbf16, #tpu.memory_space<vmem>>, vector<64x128xbf16>
    %c128_38 = arith.constant 128 : index
    %c256_39 = arith.constant 256 : index
    %38 = vector.load %arg12[%c128_38, %c256_39] : memref<256x1152xbf16, #tpu.memory_space<vmem>>, vector<64x128xbf16>
    tpu.vector_store %arg12[%c128_38, %c256_39], %37 {strides = array<i32>} : memref<256x1152xbf16, #tpu.memory_space<vmem>>, vector<64x128xbf16>,
    %c320 = arith.constant 320 : index
    %c0_40 = arith.constant 0 : index
    %39 = vector.load %arg11[%c320, %c0_40] : memref<576x128xbf16, #tpu.memory_space<vmem>>, vector<64x128xbf16>
    %c192_41 = arith.constant 192 : index
    %c256_42 = arith.constant 256 : index
    %40 = vector.load %arg12[%c192_41, %c256_42] : memref<256x1152xbf16, #tpu.memory_space<vmem>>, vector<64x128xbf16>
    tpu.vector_store %arg12[%c192_41, %c256_42], %39 {strides = array<i32>} : memref<256x1152xbf16, #tpu.memory_space<vmem>>, vector<64x128xbf16>,
    %c96_43 = arith.constant 96 : index
    %c0_44 = arith.constant 0 : index
    %41 = vector.load %arg11[%c96_43, %c0_44] : memref<576x128xbf16, #tpu.memory_space<vmem>>, vector<64x128xbf16>
    %c0_45 = arith.constant 0 : index
    %c384 = arith.constant 384 : index
    %42 = vector.load %arg12[%c0_45, %c384] : memref<256x1152xbf16, #tpu.memory_space<vmem>>, vector<64x128xbf16>
    tpu.vector_store %arg12[%c0_45, %c384], %41 {strides = array<i32>} : memref<256x1152xbf16, #tpu.memory_space<vmem>>, vector<64x128xbf16>,
    %c192_46 = arith.constant 192 : index
    %c0_47 = arith.constant 0 : index
    %43 = vector.load %arg11[%c192_46, %c0_47] : memref<576x128xbf16, #tpu.memory_space<vmem>>, vector<64x128xbf16>
    %c64_48 = arith.constant 64 : index
    %c384_49 = arith.constant 384 : index
    %44 = vector.load %arg12[%c64_48, %c384_49] : memref<256x1152xbf16, #tpu.memory_space<vmem>>, vector<64x128xbf16>
    tpu.vector_store %arg12[%c64_48, %c384_49], %43 {strides = array<i32>} : memref<256x1152xbf16, #tpu.memory_space<vmem>>, vector<64x128xbf16>,
    %c288_50 = arith.constant 288 : index
    %c0_51 = arith.constant 0 : index
    %45 = vector.load %arg11[%c288_50, %c0_51] : memref<576x128xbf16, #tpu.memory_space<vmem>>, vector<64x128xbf16>
    %c128_52 = arith.constant 128 : index
    %c384_53 = arith.constant 384 : index
    %46 = vector.load %arg12[%c128_52, %c384_53] : memref<256x1152xbf16, #tpu.memory_space<vmem>>, vector<64x128xbf16>
    tpu.vector_store %arg12[%c128_52, %c384_53], %45 {strides = array<i32>} : memref<256x1152xbf16, #tpu.memory_space<vmem>>, vector<64x128xbf16>,
    %c384_54 = arith.constant 384 : index
    %c0_55 = arith.constant 0 : index
    %47 = vector.load %arg11[%c384_54, %c0_55] : memref<576x128xbf16, #tpu.memory_space<vmem>>, vector<64x128xbf16>
    %c192_56 = arith.constant 192 : index
    %c384_57 = arith.constant 384 : index
    %48 = vector.load %arg12[%c192_56, %c384_57] : memref<256x1152xbf16, #tpu.memory_space<vmem>>, vector<64x128xbf16>
    tpu.vector_store %arg12[%c192_56, %c384_57], %47 {strides = array<i32>} : memref<256x1152xbf16, #tpu.memory_space<vmem>>, vector<64x128xbf16>,
    %c112_58 = arith.constant 112 : index
    %c0_59 = arith.constant 0 : index
    %49 = vector.load %arg11[%c112_58, %c0_59] : memref<576x128xbf16, #tpu.memory_space<vmem>>, vector<64x128xbf16>
    %c0_60 = arith.constant 0 : index
    %c512 = arith.constant 512 : index
    %50 = vector.load %arg12[%c0_60, %c512] : memref<256x1152xbf16, #tpu.memory_space<vmem>>, vector<64x128xbf16>
    tpu.vector_store %arg12[%c0_60, %c512], %49 {strides = array<i32>} : memref<256x1152xbf16, #tpu.memory_space<vmem>>, vector<64x128xbf16>,
    %c208_61 = arith.constant 208 : index
    %c0_62 = arith.constant 0 : index
    %51 = vector.load %arg11[%c208_61, %c0_62] : memref<576x128xbf16, #tpu.memory_space<vmem>>, vector<64x128xbf16>
    %c64_63 = arith.constant 64 : index
    %c512_64 = arith.constant 512 : index
    %52 = vector.load %arg12[%c64_63, %c512_64] : memref<256x1152xbf16, #tpu.memory_space<vmem>>, vector<64x128xbf16>
    tpu.vector_store %arg12[%c64_63, %c512_64], %51 {strides = array<i32>} : memref<256x1152xbf16, #tpu.memory_space<vmem>>, vector<64x128xbf16>,
    %c304_65 = arith.constant 304 : index
    %c0_66 = arith.constant 0 : index
    %53 = vector.load %arg11[%c304_65, %c0_66] : memref<576x128xbf16, #tpu.memory_space<vmem>>, vector<64x128xbf16>
    %c128_67 = arith.constant 128 : index
    %c512_68 = arith.constant 512 : index
    %54 = vector.load %arg12[%c128_67, %c512_68] : memref<256x1152xbf16, #tpu.memory_space<vmem>>, vector<64x128xbf16>
    tpu.vector_store %arg12[%c128_67, %c512_68], %53 {strides = array<i32>} : memref<256x1152xbf16, #tpu.memory_space<vmem>>, vector<64x128xbf16>,
    %c400 = arith.constant 400 : index
    %c0_69 = arith.constant 0 : index
    %55 = vector.load %arg11[%c400, %c0_69] : memref<576x128xbf16, #tpu.memory_space<vmem>>, vector<64x128xbf16>
    %c192_70 = arith.constant 192 : index
    %c512_71 = arith.constant 512 : index
    %56 = vector.load %arg12[%c192_70, %c512_71] : memref<256x1152xbf16, #tpu.memory_space<vmem>>, vector<64x128xbf16>
    tpu.vector_store %arg12[%c192_70, %c512_71], %55 {strides = array<i32>} : memref<256x1152xbf16, #tpu.memory_space<vmem>>, vector<64x128xbf16>,
    %c128_72 = arith.constant 128 : index
    %c0_73 = arith.constant 0 : index
    %57 = vector.load %arg11[%c128_72, %c0_73] : memref<576x128xbf16, #tpu.memory_space<vmem>>, vector<64x128xbf16>
    %c0_74 = arith.constant 0 : index
    %c640 = arith.constant 640 : index
    %58 = vector.load %arg12[%c0_74, %c640] : memref<256x1152xbf16, #tpu.memory_space<vmem>>, vector<64x128xbf16>
    tpu.vector_store %arg12[%c0_74, %c640], %57 {strides = array<i32>} : memref<256x1152xbf16, #tpu.memory_space<vmem>>, vector<64x128xbf16>,
    %c224_75 = arith.constant 224 : index
    %c0_76 = arith.constant 0 : index
    %59 = vector.load %arg11[%c224_75, %c0_76] : memref<576x128xbf16, #tpu.memory_space<vmem>>, vector<64x128xbf16>
    %c64_77 = arith.constant 64 : index
    %c640_78 = arith.constant 640 : index
    %60 = vector.load %arg12[%c64_77, %c640_78] : memref<256x1152xbf16, #tpu.memory_space<vmem>>, vector<64x128xbf16>
    tpu.vector_store %arg12[%c64_77, %c640_78], %59 {strides = array<i32>} : memref<256x1152xbf16, #tpu.memory_space<vmem>>, vector<64x128xbf16>,
    %c320_79 = arith.constant 320 : index
    %c0_80 = arith.constant 0 : index
    %61 = vector.load %arg11[%c320_79, %c0_80] : memref<576x128xbf16, #tpu.memory_space<vmem>>, vector<64x128xbf16>
    %c128_81 = arith.constant 128 : index
    %c640_82 = arith.constant 640 : index
    %62 = vector.load %arg12[%c128_81, %c640_82] : memref<256x1152xbf16, #tpu.memory_space<vmem>>, vector<64x128xbf16>
    tpu.vector_store %arg12[%c128_81, %c640_82], %61 {strides = array<i32>} : memref<256x1152xbf16, #tpu.memory_space<vmem>>, vector<64x128xbf16>,
    %c416 = arith.constant 416 : index
    %c0_83 = arith.constant 0 : index
    %63 = vector.load %arg11[%c416, %c0_83] : memref<576x128xbf16, #tpu.memory_space<vmem>>, vector<64x128xbf16>
    %c192_84 = arith.constant 192 : index
    %c640_85 = arith.constant 640 : index
    %64 = vector.load %arg12[%c192_84, %c640_85] : memref<256x1152xbf16, #tpu.memory_space<vmem>>, vector<64x128xbf16>
    tpu.vector_store %arg12[%c192_84, %c640_85], %63 {strides = array<i32>} : memref<256x1152xbf16, #tpu.memory_space<vmem>>, vector<64x128xbf16>,
    %c192_86 = arith.constant 192 : index
    %c0_87 = arith.constant 0 : index
    %65 = vector.load %arg11[%c192_86, %c0_87] : memref<576x128xbf16, #tpu.memory_space<vmem>>, vector<64x128xbf16>
    %c0_88 = arith.constant 0 : index
    %c768 = arith.constant 768 : index
    %66 = vector.load %arg12[%c0_88, %c768] : memref<256x1152xbf16, #tpu.memory_space<vmem>>, vector<64x128xbf16>
    tpu.vector_store %arg12[%c0_88, %c768], %65 {strides = array<i32>} : memref<256x1152xbf16, #tpu.memory_space<vmem>>, vector<64x128xbf16>,
    %c288_89 = arith.constant 288 : index
    %c0_90 = arith.constant 0 : index
    %67 = vector.load %arg11[%c288_89, %c0_90] : memref<576x128xbf16, #tpu.memory_space<vmem>>, vector<64x128xbf16>
    %c64_91 = arith.constant 64 : index
    %c768_92 = arith.constant 768 : index
    %68 = vector.load %arg12[%c64_91, %c768_92] : memref<256x1152xbf16, #tpu.memory_space<vmem>>, vector<64x128xbf16>
    tpu.vector_store %arg12[%c64_91, %c768_92], %67 {strides = array<i32>} : memref<256x1152xbf16, #tpu.memory_space<vmem>>, vector<64x128xbf16>,
    %c384_93 = arith.constant 384 : index
    %c0_94 = arith.constant 0 : index
    %69 = vector.load %arg11[%c384_93, %c0_94] : memref<576x128xbf16, #tpu.memory_space<vmem>>, vector<64x128xbf16>
    %c128_95 = arith.constant 128 : index
    %c768_96 = arith.constant 768 : index
    %70 = vector.load %arg12[%c128_95, %c768_96] : memref<256x1152xbf16, #tpu.memory_space<vmem>>, vector<64x128xbf16>
    tpu.vector_store %arg12[%c128_95, %c768_96], %69 {strides = array<i32>} : memref<256x1152xbf16, #tpu.memory_space<vmem>>, vector<64x128xbf16>,
    %c480 = arith.constant 480 : index
    %c0_97 = arith.constant 0 : index
    %71 = vector.load %arg11[%c480, %c0_97] : memref<576x128xbf16, #tpu.memory_space<vmem>>, vector<64x128xbf16>
    %c192_98 = arith.constant 192 : index
    %c768_99 = arith.constant 768 : index
    %72 = vector.load %arg12[%c192_98, %c768_99] : memref<256x1152xbf16, #tpu.memory_space<vmem>>, vector<64x128xbf16>
    tpu.vector_store %arg12[%c192_98, %c768_99], %71 {strides = array<i32>} : memref<256x1152xbf16, #tpu.memory_space<vmem>>, vector<64x128xbf16>,
    %c208_100 = arith.constant 208 : index
    %c0_101 = arith.constant 0 : index
    %73 = vector.load %arg11[%c208_100, %c0_101] : memref<576x128xbf16, #tpu.memory_space<vmem>>, vector<64x128xbf16>
    %c0_102 = arith.constant 0 : index
    %c896 = arith.constant 896 : index
    %74 = vector.load %arg12[%c0_102, %c896] : memref<256x1152xbf16, #tpu.memory_space<vmem>>, vector<64x128xbf16>
    tpu.vector_store %arg12[%c0_102, %c896], %73 {strides = array<i32>} : memref<256x1152xbf16, #tpu.memory_space<vmem>>, vector<64x128xbf16>,
    %c304_103 = arith.constant 304 : index
    %c0_104 = arith.constant 0 : index
    %75 = vector.load %arg11[%c304_103, %c0_104] : memref<576x128xbf16, #tpu.memory_space<vmem>>, vector<64x128xbf16>
    %c64_105 = arith.constant 64 : index
    %c896_106 = arith.constant 896 : index
    %76 = vector.load %arg12[%c64_105, %c896_106] : memref<256x1152xbf16, #tpu.memory_space<vmem>>, vector<64x128xbf16>
    tpu.vector_store %arg12[%c64_105, %c896_106], %75 {strides = array<i32>} : memref<256x1152xbf16, #tpu.memory_space<vmem>>, vector<64x128xbf16>,
    %c400_107 = arith.constant 400 : index
    %c0_108 = arith.constant 0 : index
    %77 = vector.load %arg11[%c400_107, %c0_108] : memref<576x128xbf16, #tpu.memory_space<vmem>>, vector<64x128xbf16>
    %c128_109 = arith.constant 128 : index
    %c896_110 = arith.constant 896 : index
    %78 = vector.load %arg12[%c128_109, %c896_110] : memref<256x1152xbf16, #tpu.memory_space<vmem>>, vector<64x128xbf16>
    tpu.vector_store %arg12[%c128_109, %c896_110], %77 {strides = array<i32>} : memref<256x1152xbf16, #tpu.memory_space<vmem>>, vector<64x128xbf16>,
    %c496 = arith.constant 496 : index
    %c0_111 = arith.constant 0 : index
    %79 = vector.load %arg11[%c496, %c0_111] : memref<576x128xbf16, #tpu.memory_space<vmem>>, vector<64x128xbf16>
    %c192_112 = arith.constant 192 : index
    %c896_113 = arith.constant 896 : index
    %80 = vector.load %arg12[%c192_112, %c896_113] : memref<256x1152xbf16, #tpu.memory_space<vmem>>, vector<64x128xbf16>
    tpu.vector_store %arg12[%c192_112, %c896_113], %79 {strides = array<i32>} : memref<256x1152xbf16, #tpu.memory_space<vmem>>, vector<64x128xbf16>,
    %c224_114 = arith.constant 224 : index
    %c0_115 = arith.constant 0 : index
    %81 = vector.load %arg11[%c224_114, %c0_115] : memref<576x128xbf16, #tpu.memory_space<vmem>>, vector<64x128xbf16>
    %c0_116 = arith.constant 0 : index
    %c1024 = arith.constant 1024 : index
    %82 = vector.load %arg12[%c0_116, %c1024] : memref<256x1152xbf16, #tpu.memory_space<vmem>>, vector<64x128xbf16>
    tpu.vector_store %arg12[%c0_116, %c1024], %81 {strides = array<i32>} : memref<256x1152xbf16, #tpu.memory_space<vmem>>, vector<64x128xbf16>,
    %c320_117 = arith.constant 320 : index
    %c0_118 = arith.constant 0 : index
    %83 = vector.load %arg11[%c320_117, %c0_118] : memref<576x128xbf16, #tpu.memory_space<vmem>>, vector<64x128xbf16>
    %c64_119 = arith.constant 64 : index
    %c1024_120 = arith.constant 1024 : index
    %84 = vector.load %arg12[%c64_119, %c1024_120] : memref<256x1152xbf16, #tpu.memory_space<vmem>>, vector<64x128xbf16>
    tpu.vector_store %arg12[%c64_119, %c1024_120], %83 {strides = array<i32>} : memref<256x1152xbf16, #tpu.memory_space<vmem>>, vector<64x128xbf16>,
    %c416_121 = arith.constant 416 : index
    %c0_122 = arith.constant 0 : index
    %85 = vector.load %arg11[%c416_121, %c0_122] : memref<576x128xbf16, #tpu.memory_space<vmem>>, vector<64x128xbf16>
    %c128_123 = arith.constant 128 : index
    %c1024_124 = arith.constant 1024 : index
    %86 = vector.load %arg12[%c128_123, %c1024_124] : memref<256x1152xbf16, #tpu.memory_space<vmem>>, vector<64x128xbf16>
    tpu.vector_store %arg12[%c128_123, %c1024_124], %85 {strides = array<i32>} : memref<256x1152xbf16, #tpu.memory_space<vmem>>, vector<64x128xbf16>,
    %c512_125 = arith.constant 512 : index
    %c0_126 = arith.constant 0 : index
    %87 = vector.load %arg11[%c512_125, %c0_126] : memref<576x128xbf16, #tpu.memory_space<vmem>>, vector<64x128xbf16>
    %c192_127 = arith.constant 192 : index
    %c1024_128 = arith.constant 1024 : index
    %88 = vector.load %arg12[%c192_127, %c1024_128] : memref<256x1152xbf16, #tpu.memory_space<vmem>>, vector<64x128xbf16>
    tpu.vector_store %arg12[%c192_127, %c1024_128], %87 {strides = array<i32>} : memref<256x1152xbf16, #tpu.memory_space<vmem>>, vector<64x128xbf16>,
    %c0_129 = arith.constant 0 : index
    %c0_130 = arith.constant 0 : index
    %89 = vector.load %arg12[%c0_129, %c0_130] : memref<256x1152xbf16, #tpu.memory_space<vmem>>, vector<256x1152xbf16>
    %c0_131 = arith.constant 0 : index
    %c0_132 = arith.constant 0 : index
    %90 = vector.load %arg4[%c0_131, %c0_132] : memref<1152x512xbf16, #tpu.memory_space<vmem>>, vector<1152x512xbf16>
    %cst_133 = arith.constant dense<0.000000e+00> : vector<256x512xf32>
    %91 = tpu.matmul %89, %90, %cst_133 {dimension_numbers = #tpu.dot_dimension_numbers<[1], [0], [0], [1], [0, 0, 1, 1], [], []>} : vector<256x1152xbf16>, vector<1152x512xbf16>, vector<256x512xf32> -> vector<256x512xf32>
    %92 = vector.extract_strided_slice %91 {offsets = [0, 0], sizes = [256, 128], strides = [1, 1]} : vector<256x512xf32> to vector<256x128xf32>
    %93 = vector.extract_strided_slice %91 {offsets = [0, 128], sizes = [256, 128], strides = [1, 1]} : vector<256x512xf32> to vector<256x128xf32>
    %94 = arith.maximumf %92, %93 : vector<256x128xf32>
    %95 = vector.extract_strided_slice %91 {offsets = [0, 256], sizes = [256, 128], strides = [1, 1]} : vector<256x512xf32> to vector<256x128xf32>
    %96 = vector.extract_strided_slice %91 {offsets = [0, 384], sizes = [256, 128], strides = [1, 1]} : vector<256x512xf32> to vector<256x128xf32>
    %97 = arith.maximumf %95, %96 : vector<256x128xf32>
    %98 = arith.maximumf %94, %97 : vector<256x128xf32>
    %c0_134 = arith.constant 0 : index
    %c0_135 = arith.constant 0 : index
    %99 = vector.load %arg5[%c0_134, %c0_135] : memref<1x128xf32, #tpu.memory_space<vmem>>, vector<1x128xf32>
    %100 = vector.broadcast %99 : vector<1x128xf32> to vector<256x128xf32>
    %101 = arith.addf %98, %100 : vector<256x128xf32>
    %cst_136 = arith.constant 0.000000e+00 : f32
    %102 = vector.broadcast %cst_136 : f32 to vector<256x128xf32>
    %103 = arith.maximumf %101, %102 : vector<256x128xf32>
    %104 = arith.truncf %103 : vector<256x128xf32> to vector<256x128xbf16>
    %105 = vector.extract_strided_slice %104 {offsets = [0, 0], sizes = [16, 128], strides = [1, 1]} : vector<256x128xbf16> to vector<16x128xbf16>
    %c0_137 = arith.constant 0 : index
    %c0_138 = arith.constant 0 : index
    %106 = vector.load %arg13[%c0_137, %c0_138] : memref<16x2048xbf16, #tpu.memory_space<vmem>>, vector<16x128xbf16>
    tpu.vector_store %arg13[%c0_137, %c0_138], %105 {strides = array<i32>} : memref<16x2048xbf16, #tpu.memory_space<vmem>>, vector<16x128xbf16>,
    %107 = vector.extract_strided_slice %104 {offsets = [16, 0], sizes = [16, 128], strides = [1, 1]} : vector<256x128xbf16> to vector<16x128xbf16>
    %c0_139 = arith.constant 0 : index
    %c128_140 = arith.constant 128 : index
    %108 = vector.load %arg13[%c0_139, %c128_140] : memref<16x2048xbf16, #tpu.memory_space<vmem>>, vector<16x128xbf16>
    tpu.vector_store %arg13[%c0_139, %c128_140], %107 {strides = array<i32>} : memref<16x2048xbf16, #tpu.memory_space<vmem>>, vector<16x128xbf16>,
    %109 = vector.extract_strided_slice %104 {offsets = [32, 0], sizes = [16, 128], strides = [1, 1]} : vector<256x128xbf16> to vector<16x128xbf16>
    %c0_141 = arith.constant 0 : index
    %c256_142 = arith.constant 256 : index
    %110 = vector.load %arg13[%c0_141, %c256_142] : memref<16x2048xbf16, #tpu.memory_space<vmem>>, vector<16x128xbf16>
    tpu.vector_store %arg13[%c0_141, %c256_142], %109 {strides = array<i32>} : memref<16x2048xbf16, #tpu.memory_space<vmem>>, vector<16x128xbf16>,
    %111 = vector.extract_strided_slice %104 {offsets = [48, 0], sizes = [16, 128], strides = [1, 1]} : vector<256x128xbf16> to vector<16x128xbf16>
    %c0_143 = arith.constant 0 : index
    %c384_144 = arith.constant 384 : index
    %112 = vector.load %arg13[%c0_143, %c384_144] : memref<16x2048xbf16, #tpu.memory_space<vmem>>, vector<16x128xbf16>
    tpu.vector_store %arg13[%c0_143, %c384_144], %111 {strides = array<i32>} : memref<16x2048xbf16, #tpu.memory_space<vmem>>, vector<16x128xbf16>,
    %113 = vector.extract_strided_slice %104 {offsets = [64, 0], sizes = [16, 128], strides = [1, 1]} : vector<256x128xbf16> to vector<16x128xbf16>
    %c0_145 = arith.constant 0 : index
    %c512_146 = arith.constant 512 : index
    %114 = vector.load %arg13[%c0_145, %c512_146] : memref<16x2048xbf16, #tpu.memory_space<vmem>>, vector<16x128xbf16>
    tpu.vector_store %arg13[%c0_145, %c512_146], %113 {strides = array<i32>} : memref<16x2048xbf16, #tpu.memory_space<vmem>>, vector<16x128xbf16>,
    %115 = vector.extract_strided_slice %104 {offsets = [80, 0], sizes = [16, 128], strides = [1, 1]} : vector<256x128xbf16> to vector<16x128xbf16>
    %c0_147 = arith.constant 0 : index
    %c640_148 = arith.constant 640 : index
    %116 = vector.load %arg13[%c0_147, %c640_148] : memref<16x2048xbf16, #tpu.memory_space<vmem>>, vector<16x128xbf16>
    tpu.vector_store %arg13[%c0_147, %c640_148], %115 {strides = array<i32>} : memref<16x2048xbf16, #tpu.memory_space<vmem>>, vector<16x128xbf16>,
    %117 = vector.extract_strided_slice %104 {offsets = [96, 0], sizes = [16, 128], strides = [1, 1]} : vector<256x128xbf16> to vector<16x128xbf16>
    %c0_149 = arith.constant 0 : index
    %c768_150 = arith.constant 768 : index
    %118 = vector.load %arg13[%c0_149, %c768_150] : memref<16x2048xbf16, #tpu.memory_space<vmem>>, vector<16x128xbf16>
    tpu.vector_store %arg13[%c0_149, %c768_150], %117 {strides = array<i32>} : memref<16x2048xbf16, #tpu.memory_space<vmem>>, vector<16x128xbf16>,
    %119 = vector.extract_strided_slice %104 {offsets = [112, 0], sizes = [16, 128], strides = [1, 1]} : vector<256x128xbf16> to vector<16x128xbf16>
    %c0_151 = arith.constant 0 : index
    %c896_152 = arith.constant 896 : index
    %120 = vector.load %arg13[%c0_151, %c896_152] : memref<16x2048xbf16, #tpu.memory_space<vmem>>, vector<16x128xbf16>
    tpu.vector_store %arg13[%c0_151, %c896_152], %119 {strides = array<i32>} : memref<16x2048xbf16, #tpu.memory_space<vmem>>, vector<16x128xbf16>,
    %121 = vector.extract_strided_slice %104 {offsets = [128, 0], sizes = [16, 128], strides = [1, 1]} : vector<256x128xbf16> to vector<16x128xbf16>
    %c0_153 = arith.constant 0 : index
    %c1024_154 = arith.constant 1024 : index
    %122 = vector.load %arg13[%c0_153, %c1024_154] : memref<16x2048xbf16, #tpu.memory_space<vmem>>, vector<16x128xbf16>
    tpu.vector_store %arg13[%c0_153, %c1024_154], %121 {strides = array<i32>} : memref<16x2048xbf16, #tpu.memory_space<vmem>>, vector<16x128xbf16>,
    %123 = vector.extract_strided_slice %104 {offsets = [144, 0], sizes = [16, 128], strides = [1, 1]} : vector<256x128xbf16> to vector<16x128xbf16>
    %c0_155 = arith.constant 0 : index
    %c1152 = arith.constant 1152 : index
    %124 = vector.load %arg13[%c0_155, %c1152] : memref<16x2048xbf16, #tpu.memory_space<vmem>>, vector<16x128xbf16>
    tpu.vector_store %arg13[%c0_155, %c1152], %123 {strides = array<i32>} : memref<16x2048xbf16, #tpu.memory_space<vmem>>, vector<16x128xbf16>,
    %125 = vector.extract_strided_slice %104 {offsets = [160, 0], sizes = [16, 128], strides = [1, 1]} : vector<256x128xbf16> to vector<16x128xbf16>
    %c0_156 = arith.constant 0 : index
    %c1280 = arith.constant 1280 : index
    %126 = vector.load %arg13[%c0_156, %c1280] : memref<16x2048xbf16, #tpu.memory_space<vmem>>, vector<16x128xbf16>
    tpu.vector_store %arg13[%c0_156, %c1280], %125 {strides = array<i32>} : memref<16x2048xbf16, #tpu.memory_space<vmem>>, vector<16x128xbf16>,
    %127 = vector.extract_strided_slice %104 {offsets = [176, 0], sizes = [16, 128], strides = [1, 1]} : vector<256x128xbf16> to vector<16x128xbf16>
    %c0_157 = arith.constant 0 : index
    %c1408 = arith.constant 1408 : index
    %128 = vector.load %arg13[%c0_157, %c1408] : memref<16x2048xbf16, #tpu.memory_space<vmem>>, vector<16x128xbf16>
    tpu.vector_store %arg13[%c0_157, %c1408], %127 {strides = array<i32>} : memref<16x2048xbf16, #tpu.memory_space<vmem>>, vector<16x128xbf16>,
    %129 = vector.extract_strided_slice %104 {offsets = [192, 0], sizes = [16, 128], strides = [1, 1]} : vector<256x128xbf16> to vector<16x128xbf16>
    %c0_158 = arith.constant 0 : index
    %c1536 = arith.constant 1536 : index
    %130 = vector.load %arg13[%c0_158, %c1536] : memref<16x2048xbf16, #tpu.memory_space<vmem>>, vector<16x128xbf16>
    tpu.vector_store %arg13[%c0_158, %c1536], %129 {strides = array<i32>} : memref<16x2048xbf16, #tpu.memory_space<vmem>>, vector<16x128xbf16>,
    %131 = vector.extract_strided_slice %104 {offsets = [208, 0], sizes = [16, 128], strides = [1, 1]} : vector<256x128xbf16> to vector<16x128xbf16>
    %c0_159 = arith.constant 0 : index
    %c1664 = arith.constant 1664 : index
    %132 = vector.load %arg13[%c0_159, %c1664] : memref<16x2048xbf16, #tpu.memory_space<vmem>>, vector<16x128xbf16>
    tpu.vector_store %arg13[%c0_159, %c1664], %131 {strides = array<i32>} : memref<16x2048xbf16, #tpu.memory_space<vmem>>, vector<16x128xbf16>,
    %133 = vector.extract_strided_slice %104 {offsets = [224, 0], sizes = [16, 128], strides = [1, 1]} : vector<256x128xbf16> to vector<16x128xbf16>
    %c0_160 = arith.constant 0 : index
    %c1792 = arith.constant 1792 : index
    %134 = vector.load %arg13[%c0_160, %c1792] : memref<16x2048xbf16, #tpu.memory_space<vmem>>, vector<16x128xbf16>
    tpu.vector_store %arg13[%c0_160, %c1792], %133 {strides = array<i32>} : memref<16x2048xbf16, #tpu.memory_space<vmem>>, vector<16x128xbf16>,
    %135 = vector.extract_strided_slice %104 {offsets = [240, 0], sizes = [16, 128], strides = [1, 1]} : vector<256x128xbf16> to vector<16x128xbf16>
    %c0_161 = arith.constant 0 : index
    %c1920 = arith.constant 1920 : index
    %136 = vector.load %arg13[%c0_161, %c1920] : memref<16x2048xbf16, #tpu.memory_space<vmem>>, vector<16x128xbf16>
    tpu.vector_store %arg13[%c0_161, %c1920], %135 {strides = array<i32>} : memref<16x2048xbf16, #tpu.memory_space<vmem>>, vector<16x128xbf16>,
    %c0_162 = arith.constant 0 : index
    %c0_163 = arith.constant 0 : index
    %137 = vector.load %arg13[%c0_162, %c0_163] : memref<16x2048xbf16, #tpu.memory_space<vmem>>, vector<16x2048xbf16>
    %c0_164 = arith.constant 0 : index
    %c0_165 = arith.constant 0 : index
    %138 = vector.load %arg6[%c0_164, %c0_165] : memref<2048x512xbf16, #tpu.memory_space<vmem>>, vector<2048x512xbf16>
    %cst_166 = arith.constant dense<0.000000e+00> : vector<16x512xf32>
    %139 = tpu.matmul %137, %138, %cst_166 {dimension_numbers = #tpu.dot_dimension_numbers<[1], [0], [0], [1], [0, 0, 1, 1], [], []>} : vector<16x2048xbf16>, vector<2048x512xbf16>, vector<16x512xf32> -> vector<16x512xf32>
    %c0_167 = arith.constant 0 : index
    %c0_168 = arith.constant 0 : index
    %140 = vector.load %arg7[%c0_167, %c0_168] : memref<1x512xf32, #tpu.memory_space<vmem>>, vector<1x512xf32>
    %141 = vector.broadcast %140 : vector<1x512xf32> to vector<16x512xf32>
    %142 = arith.addf %139, %141 : vector<16x512xf32>
    %cst_169 = arith.constant 0.000000e+00 : f32
    %143 = vector.broadcast %cst_169 : f32 to vector<16x512xf32>
    %144 = arith.maximumf %142, %143 : vector<16x512xf32>
    %145 = arith.truncf %144 : vector<16x512xf32> to vector<16x512xbf16>
    %c0_170 = arith.constant 0 : index
    %c0_171 = arith.constant 0 : index
    %146 = vector.load %arg8[%c0_170, %c0_171] : memref<512x128xbf16, #tpu.memory_space<vmem>>, vector<512x128xbf16>
    %cst_172 = arith.constant dense<0.000000e+00> : vector<16x128xf32>
    %147 = tpu.matmul %145, %146, %cst_172 {dimension_numbers = #tpu.dot_dimension_numbers<[1], [0], [0], [1], [0, 0, 1, 1], [], []>} : vector<16x512xbf16>, vector<512x128xbf16>, vector<16x128xf32> -> vector<16x128xf32>
    %c0_173 = arith.constant 0 : index
    %c0_174 = arith.constant 0 : index
    %148 = vector.load %arg9[%c0_173, %c0_174] : memref<1x128xf32, #tpu.memory_space<vmem>>, vector<1x128xf32>
    %149 = vector.broadcast %148 : vector<1x128xf32> to vector<16x128xf32>
    %150 = arith.addf %147, %149 : vector<16x128xf32>
    %151 = tpu.iota {dimensions = array<i32: 1>} : vector<16x128xi32>
    %c10_i32 = arith.constant 10 : i32
    %152 = vector.broadcast %c10_i32 : i32 to vector<16x128xi32>
    %153 = arith.cmpi slt, %151, %152 : vector<16x128xi32>
    %cst_175 = arith.constant -1.000000e+30 : f32
    %154 = vector.broadcast %cst_175 : f32 to vector<16x128xf32>
    %155 = arith.select %153, %150, %154 : vector<16x128xi1>, vector<16x128xf32>
    %cst_176 = arith.constant dense<0xFF800000> : vector<16xf32>
    %156 = vector.multi_reduction <maximumf>, %155, %cst_176 [1] : vector<16x128xf32> to vector<16xf32>
    %157 = vector.shape_cast %156 : vector<16xf32> to vector<16x1xf32>
    %158 = vector.broadcast %157 : vector<16x1xf32> to vector<16x128xf32>
    %159 = arith.subf %155, %158 : vector<16x128xf32>
    %160 = math.exp %159 : vector<16x128xf32>
    %cst_177 = arith.constant dense<0.000000e+00> : vector<16xf32>
    %161 = vector.multi_reduction <add>, %160, %cst_177 [1] : vector<16x128xf32> to vector<16xf32>
    %162 = vector.shape_cast %161 : vector<16xf32> to vector<16x1xf32>
    %163 = math.log %162 : vector<16x1xf32>
    %164 = vector.broadcast %163 : vector<16x1xf32> to vector<16x128xf32>
    %165 = arith.subf %159, %164 : vector<16x128xf32>
    %c0_178 = arith.constant 0 : index
    %c0_179 = arith.constant 0 : index
    %166 = vector.load %arg10[%c0_178, %c0_179] : memref<16x128xf32, #tpu.memory_space<vmem>>, vector<16x128xf32>
    tpu.vector_store %arg10[%c0_178, %c0_179], %165 {strides = array<i32>} : memref<16x128xf32, #tpu.memory_space<vmem>>, vector<16x128xf32>,
    return
  }
  func.func @transform_0(%arg0: i32) -> (i32, i32) {
    %c0_i32 = arith.constant 0 : i32
    %c0_i32_0 = arith.constant 0 : i32
    return %arg0, %c0_i32 : i32, i32
  }
  func.func @transform_1(%arg0: i32) -> (i32, i32) {
    %c0_i32 = arith.constant 0 : i32
    %c0_i32_0 = arith.constant 0 : i32
    %c0_i32_1 = arith.constant 0 : i32
    return %c0_i32, %c0_i32_0 : i32, i32
  }
  func.func @transform_2(%arg0: i32) -> (i32, i32) {
    %c0_i32 = arith.constant 0 : i32
    %c0_i32_0 = arith.constant 0 : i32
    %c0_i32_1 = arith.constant 0 : i32
    return %c0_i32, %c0_i32_0 : i32, i32
  }
  func.func @transform_3(%arg0: i32) -> (i32, i32) {
    %c0_i32 = arith.constant 0 : i32
    %c0_i32_0 = arith.constant 0 : i32
    %c0_i32_1 = arith.constant 0 : i32
    return %c0_i32, %c0_i32_0 : i32, i32
  }
  func.func @transform_4(%arg0: i32) -> (i32, i32) {
    %c0_i32 = arith.constant 0 : i32
    %c0_i32_0 = arith.constant 0 : i32
    %c0_i32_1 = arith.constant 0 : i32
    return %c0_i32, %c0_i32_0 : i32, i32
  }
  func.func @transform_5(%arg0: i32) -> (i32, i32) {
    %c0_i32 = arith.constant 0 : i32
    %c0_i32_0 = arith.constant 0 : i32
    %c0_i32_1 = arith.constant 0 : i32
    return %c0_i32, %c0_i32_0 : i32, i32
  }
  func.func @transform_6(%arg0: i32) -> (i32, i32) {
    %c0_i32 = arith.constant 0 : i32
    %c0_i32_0 = arith.constant 0 : i32
    %c0_i32_1 = arith.constant 0 : i32
    return %c0_i32, %c0_i32_0 : i32, i32
  }
  func.func @transform_7(%arg0: i32) -> (i32, i32) {
    %c0_i32 = arith.constant 0 : i32
    %c0_i32_0 = arith.constant 0 : i32
    %c0_i32_1 = arith.constant 0 : i32
    return %c0_i32, %c0_i32_0 : i32, i32
  }
  func.func @transform_8(%arg0: i32) -> (i32, i32) {
    %c0_i32 = arith.constant 0 : i32
    %c0_i32_0 = arith.constant 0 : i32
    %c0_i32_1 = arith.constant 0 : i32
    return %c0_i32, %c0_i32_0 : i32, i32
  }
  func.func @transform_9(%arg0: i32) -> (i32, i32) {
    %c0_i32 = arith.constant 0 : i32
    %c0_i32_0 = arith.constant 0 : i32
    return %arg0, %c0_i32 : i32, i32
  }
}

</mosaic_0001>

<bundles_post_ra>
// kernel: net_forward.1
= control target key start
LH: loop header
LB: loop body
LE: loop exit
PB: predicated region body
PF: predicated region fallthrough
CT: control target
= control target key end

     0   :  { %v13073_v1 = vmov 0   ;;  %vm381_vm0 = vcmask 523264   ;;  %s16496_s1 = inlined_call_operand.vmem [shape: bf16[64,512], index: 1, kind: input, shape index: {}]   ;;  %s16497_s0 = inlined_call_operand.vmem [shape: bf16[576,64], index: 0, kind: input, shape index: {}]   ;;  %s16498_s3 = inlined_call_operand.vmem [shape: bf16[1152,512], index: 3, kind: input, shape index: {}]   ;;  %s16499_s2 = inlined_call_operand.vmem [shape: f32[1,128], index: 2, kind: input, shape index: {}]   ;;  %s16500_s5 = inlined_call_operand.vmem [shape: bf16[2048,512], index: 5, kind: input, shape index: {}]   ;;  %s16501_s4 = inlined_call_operand.vmem [shape: f32[1,128], index: 4, kind: input, shape index: {}]   ;;  %s16502_s7 = inlined_call_operand.vmem [shape: bf16[512,128], index: 7, kind: input, shape index: {}]   ;;  %s16503_s6 = inlined_call_operand.vmem [shape: f32[1,512], index: 6, kind: input, shape index: {}]   ;;  %s16504_s8 = inlined_call_operand.vmem [shape: f32[1,128], index: 8, kind: input, shape index: {}]   ;;  %s16505_s9 = inlined_call_operand.vmem [shape: f32[16,128], index: 9, kind: output, shape index: {}]  }
   0x1   :  { %v11770_v0 = vld [vmem:[%s16496_s1 + $0x4] ss:$16 sps:$4 sm:$0xff]   ;;  %522 = vmatprep.mubr.bf16.mxu0 %v13073_v1  ;;  %915 = vmatprep.mubr.bf16.mxu1 %v13073_v1  ;;  %v11772_v2 = vld [vmem:[%s16496_s1 + $0xc] ss:$16 sps:$4 sm:$0xff]   ;;  %v11774_v3 = vld [vmem:[%s16496_s1] ss:$16 sps:$4 sm:$0xff]  }
   0x2   :  { %490 = vmatprep.subr.bf16.mxu0 %v11770_v0  ;;  %v11775_v4 = vld [vmem:[%s16496_s1 + $0x8] ss:$16 sps:$4 sm:$0xff]   ;;  %883 = vmatprep.subr.bf16.mxu1 %v11772_v2  ;;  %v11776_v5 = vld [vmem:[%s16496_s1 + $0x24] ss:$16 sps:$4 sm:$0xff]   ;;  %v11778_v6 = vld [vmem:[%s16496_s1 + $0x2c] ss:$16 sps:$4 sm:$0xff]  }
   0x3   :  { %491 = vmatpush1.bf16.msra.mxu0 %v11774_v3  ;;  %884 = vmatpush1.bf16.msra.mxu1 %v11775_v4  ;;  %v11780_v7 = vld [vmem:[%s16496_s1 + $0x20] ss:$16 sps:$4 sm:$0xff]   ;;  %v11781_v8 = vld [vmem:[%s16496_s1 + $0x28] ss:$16 sps:$4 sm:$0xff]   ;;  %v11782_v9 = vld [vmem:[%s16496_s1 + $0x44] ss:$16 sps:$4 sm:$0xff]  }
   0x4   :  { %492 = vmatprep.subr.bf16.mxu0 %v11776_v5  ;;  %885 = vmatprep.subr.bf16.mxu1 %v11778_v6  ;;  %v11784_v10 = vld [vmem:[%s16496_s1 + $0x4c] ss:$16 sps:$4 sm:$0xff]   ;;  %v11786_v11 = vld [vmem:[%s16496_s1 + $0x40] ss:$16 sps:$4 sm:$0xff]   ;;  %v11787_v12 = vld [vmem:[%s16496_s1 + $0x48] ss:$16 sps:$4 sm:$0xff]  }
   0x5   :  { %v11788_v13 = vld [vmem:[%s16496_s1 + $0x64] ss:$16 sps:$4 sm:$0xff]   ;;  %v11790_v14 = vld [vmem:[%s16496_s1 + $0x6c] ss:$16 sps:$4 sm:$0xff]   ;;  %v11792_v15 = vld [vmem:[%s16496_s1 + $0x60] ss:$16 sps:$4 sm:$0xff]  }
   0x6   :  { %v11793_v16 = vld [vmem:[%s16496_s1 + $0x68] ss:$16 sps:$4 sm:$0xff]   ;;  %v11794_v17 = vld [vmem:[%s16497_s0] sm:$0xff]   ;;  %v11800_v19 = vld [vmem:[%s16498_s3 + $0xc] ss:$16 sps:$4 sm:$0xff]  }
   0x7   :  { %493 = vmatpush1.bf16.msra.mxu0 %v11780_v7  ;;  %886 = vmatpush1.bf16.msra.mxu1 %v11781_v8  ;;  %v11797_v18 = vld [vmem:[%s16498_s3 + $0x4] ss:$16 sps:$4 sm:$0xff]   ;;  %v11795_v20 = vld [vmem:[%s16498_s3] ss:$16 sps:$4 sm:$0xff]   ;;  %v11798_v21 = vld [vmem:[%s16498_s3 + $0x8] ss:$16 sps:$4 sm:$0xff]  }
   0x8   :  { %494 = vmatprep.subr.bf16.mxu0 %v11782_v9  ;;  %887 = vmatprep.subr.bf16.mxu1 %v11784_v10  ;;  %v11805_v22 = vld [vmem:[%s16498_s3 + $0x24] ss:$16 sps:$4 sm:$0xff]   ;;  %v11808_v23 = vld [vmem:[%s16498_s3 + $0x2c] ss:$16 sps:$4 sm:$0xff]   ;;  %v11803_v24 = vld [vmem:[%s16498_s3 + $0x20] ss:$16 sps:$4 sm:$0xff]  }
   0x9   :  { %v11806_v25 = vld [vmem:[%s16498_s3 + $0x28] ss:$16 sps:$4 sm:$0xff]   ;;  %v11813_v26 = vld [vmem:[%s16498_s3 + $0x44] ss:$16 sps:$4 sm:$0xff]   ;;  %v11816_v28 = vld [vmem:[%s16498_s3 + $0x4c] ss:$16 sps:$4 sm:$0xff]  }
   0xa   :  { %v11801_v27 = vld [vmem:[%s16497_s0 + $0x8] sm:$0xff]   ;;  %v11811_v29 = vld [vmem:[%s16498_s3 + $0x40] ss:$16 sps:$4 sm:$0xff]   ;;  %v11821_v31 = vld [vmem:[%s16498_s3 + $0x64] ss:$16 sps:$4 sm:$0xff]  }
   0xb   :  { %495 = vmatpush1.bf16.msra.mxu0 %v11786_v11  ;;  %888 = vmatpush1.bf16.msra.mxu1 %v11787_v12  ;;  %v11814_v30 = vld [vmem:[%s16498_s3 + $0x48] ss:$16 sps:$4 sm:$0xff]   ;;  %v11819_v32 = vld [vmem:[%s16498_s3 + $0x60] ss:$16 sps:$4 sm:$0xff]   ;;  %v11824_v33 = vld [vmem:[%s16498_s3 + $0x6c] ss:$16 sps:$4 sm:$0xff]  }
   0xc   :  { %496 = vmatprep.subr.bf16.mxu0 %v11788_v13  ;;  %889 = vmatprep.subr.bf16.mxu1 %v11790_v14  ;;  %v11822_v34 = vld [vmem:[%s16498_s3 + $0x68] ss:$16 sps:$4 sm:$0xff]   ;;  %v11802_v35 = vld [vmem:[%s16497_s0 + $0x10] sm:$0xff]   ;;  %v11833_v38 = vld [vmem:[%s16498_s3 + $0x8c] ss:$16 sps:$4 sm:$0xff]  }
   0xd   :  { %v11830_v36 = vld [vmem:[%s16498_s3 + $0x84] ss:$16 sps:$4 sm:$0xff]   ;;  %v11828_v37 = vld [vmem:[%s16498_s3 + $0x80] ss:$16 sps:$4 sm:$0xff]   ;;  %v11831_v39 = vld [vmem:[%s16498_s3 + $0x88] ss:$16 sps:$4 sm:$0xff]  }
   0xe   :  { %v11836_v40 = vld [vmem:[%s16498_s3 + $0xa0] ss:$16 sps:$4 sm:$0xff]   ;;  %v11838_v41 = vld [vmem:[%s16498_s3 + $0xa4] ss:$16 sps:$4 sm:$0xff]   ;;  %v11839_v42 = vld [vmem:[%s16498_s3 + $0xa8] ss:$16 sps:$4 sm:$0xff]  }
   0xf   :  { %497 = vmatpush1.bf16.msra.mxu0 %v11792_v15  ;;  %890 = vmatpush1.bf16.msra.mxu1 %v11793_v16  ;;  %v11841_v43 = vld [vmem:[%s16498_s3 + $0xac] ss:$16 sps:$4 sm:$0xff]   ;;  %v11844_v45 = vld [vmem:[%s16498_s3 + $0xc0] ss:$16 sps:$4 sm:$0xff]   ;;  %v11846_v46 = vld [vmem:[%s16498_s3 + $0xc4] ss:$16 sps:$4 sm:$0xff]  }
  0x10   :  { %3875 = vmatprep.subr.bf16.mxu0 %v11797_v18  ;;  %4840 = vmatprep.subr.bf16.mxu1 %v11800_v19  ;;  %v11809_v44 = vld [vmem:[%s16497_s0 + $0x18] sm:$0xff]   ;;  %v11810_v49 = vld [vmem:[%s16497_s0 + $0x20] sm:$0xff]   ;;  %v11817_v58 = vld [vmem:[%s16497_s0 + $0x28] sm:$0xff]  }
  0x11   :  { %v11847_v47 = vld [vmem:[%s16498_s3 + $0xc8] ss:$16 sps:$4 sm:$0xff]   ;;  %v11849_v48 = vld [vmem:[%s16498_s3 + $0xcc] ss:$16 sps:$4 sm:$0xff]   ;;  %v11852_v50 = vld [vmem:[%s16498_s3 + $0xe0] ss:$16 sps:$4 sm:$0xff]  }
  0x12   :  { %10242 = vmatmul.mubr.msk.bf16.vlgmr.msra.gmra.mrb[0].mxu0 %vm381_vm0, %v11794_v17  ;;  %10278 = vmatmul.mubr.msk.bf16.vlgmr.msra.gmra.mrb[0].mxu1 %vm381_vm0, %v11794_v17  ;;  %v11854_v51 = vld [vmem:[%s16498_s3 + $0xe4] ss:$16 sps:$4 sm:$0xff]   ;;  %v11855_v52 = vld [vmem:[%s16498_s3 + $0xe8] ss:$16 sps:$4 sm:$0xff]   ;;  %v11857_v53 = vld [vmem:[%s16498_s3 + $0xec] ss:$16 sps:$4 sm:$0xff]  }
  0x13   :  { %3876 = vmatpush1.bf16.msra.mxu0 %v11795_v20  ;;  %4841 = vmatpush1.bf16.msra.mxu1 %v11798_v21  ;;  %v11861_v54 = vld [vmem:[%s16498_s3 + $0x100] ss:$16 sps:$4 sm:$0xff]   ;;  %v11863_v55 = vld [vmem:[%s16498_s3 + $0x104] ss:$16 sps:$4 sm:$0xff]   ;;  %v11864_v56 = vld [vmem:[%s16498_s3 + $0x108] ss:$16 sps:$4 sm:$0xff]  }
  0x14   :  { %532 = vmatprep.mubr.bf16.mxu0 %v13073_v1  ;;  %925 = vmatprep.mubr.bf16.mxu1 %v13073_v1  ;;  %v11866_v57 = vld [vmem:[%s16498_s3 + $0x10c] ss:$16 sps:$4 sm:$0xff]   ;;  %v11869_v59 = vld [vmem:[%s16498_s3 + $0x120] ss:$16 sps:$4 sm:$0xff]   ;;  %v11871_v60 = vld [vmem:[%s16498_s3 + $0x124] ss:$16 sps:$4 sm:$0xff]  }
  0x15   :  { %3877 = vmatprep.subr.bf16.mxu0 %v11805_v22  ;;  %4842 = vmatprep.subr.bf16.mxu1 %v11808_v23  ;;  %v11872_v61 = vld [vmem:[%s16498_s3 + $0x128] ss:$16 sps:$4 sm:$0xff]   ;;  %v11874_v62 = vld [vmem:[%s16498_s3 + $0x12c] ss:$16 sps:$4 sm:$0xff]   ;;  %v11818_v63 = vld [vmem:[%s16497_s0 + $0x30] sm:$0xff]  }
  0x16   :  { %v11877_v0 = vld [vmem:[%s16498_s3 + $0x140] ss:$16 sps:$4 sm:$0xff]   ;;  %v11879_v2 = vld [vmem:[%s16498_s3 + $0x144] ss:$16 sps:$4 sm:$0xff]   ;;  %v11880_v3 = vld [vmem:[%s16498_s3 + $0x148] ss:$16 sps:$4 sm:$0xff]  }
  0x17   :  { %3878 = vmatpush1.bf16.msra.mxu0 %v11803_v24  ;;  %4843 = vmatpush1.bf16.msra.mxu1 %v11806_v25  ;;  %v11882_v4 = vld [vmem:[%s16498_s3 + $0x14c] ss:$16 sps:$4 sm:$0xff]   ;;  %v11826_v6 = vld [vmem:[%s16497_s0 + $0x40] sm:$0xff]   ;;  %v11888_v9 = vld [vmem:[%s16498_s3 + $0x168] ss:$16 sps:$4 sm:$0xff]  }
  0x18   :  { %3879 = vmatprep.subr.bf16.mxu0 %v11813_v26  ;;  %4844 = vmatprep.subr.bf16.mxu1 %v11816_v28  ;;  %v11825_v5 = vld [vmem:[%s16497_s0 + $0x38] sm:$0xff]   ;;  %v11885_v7 = vld [vmem:[%s16498_s3 + $0x160] ss:$16 sps:$4 sm:$0xff]   ;;  %v11887_v8 = vld [vmem:[%s16498_s3 + $0x164] ss:$16 sps:$4 sm:$0xff]  }
  0x19   :  { %v11890_v10 = vld [vmem:[%s16498_s3 + $0x16c] ss:$16 sps:$4 sm:$0xff]   ;;  %v11834_v12 = vld [vmem:[%s16497_s0 + $0x50] sm:$0xff]   ;;  %v11842_v14 = vld [vmem:[%s16497_s0 + $0x60] sm:$0xff]  }
  0x1a   :  { %10243 = vmatmul.mubr.msk.bf16.gmra.mrb[4].mxu0 %vm381_vm0, %v11801_v27  ;;  %10279 = vmatmul.mubr.msk.bf16.gmra.mrb[4].mxu1 %vm381_vm0, %v11801_v27  ;;  %v11827_v11 = vld [vmem:[%s16497_s0 + $0x48] sm:$0xff]   ;;  %v11835_v13 = vld [vmem:[%s16497_s0 + $0x58] sm:$0xff]   ;;  %v11894_v15 = vld [vmem:[%s16498_s3 + $0x180] ss:$16 sps:$4 sm:$0xff]  }
  0x1b   :  { %542 = vmatprep.mubr.bf16.mxu0 %v13073_v1  ;;  %935 = vmatprep.mubr.bf16.mxu1 %v13073_v1  ;;  %v11896_v16 = vld [vmem:[%s16498_s3 + $0x184] ss:$16 sps:$4 sm:$0xff]   ;;  %v11897_v17 = vld [vmem:[%s16498_s3 + $0x188] ss:$16 sps:$4 sm:$0xff]   ;;  %v11899_v18 = vld [vmem:[%s16498_s3 + $0x18c] ss:$16 sps:$4 sm:$0xff]  }
  0x1c   :  { %3880 = vmatpush1.bf16.msra.mxu0 %v11811_v29  ;;  %4845 = vmatpush1.bf16.msra.mxu1 %v11814_v30  ;;  %v11843_v19 = vld [vmem:[%s16497_s0 + $0x68] sm:$0xff]   ;;  %v11850_v20 = vld [vmem:[%s16497_s0 + $0x70] sm:$0xff]   ;;  %v11851_v25 = vld [vmem:[%s16497_s0 + $0x78] sm:$0xff]  }
  0x1d   :  { %3881 = vmatprep.subr.bf16.mxu0 %v11821_v31  ;;  %4846 = vmatprep.subr.bf16.mxu1 %v11824_v33  ;;  %v11902_v21 = vld [vmem:[%s16498_s3 + $0x1a0] ss:$16 sps:$4 sm:$0xff]   ;;  %v11904_v22 = vld [vmem:[%s16498_s3 + $0x1a4] ss:$16 sps:$4 sm:$0xff]   ;;  %v11905_v23 = vld [vmem:[%s16498_s3 + $0x1a8] ss:$16 sps:$4 sm:$0xff]  }
  0x1e   :  { %v11907_v24 = vld [vmem:[%s16498_s3 + $0x1ac] ss:$16 sps:$4 sm:$0xff]   ;;  %v11858_v26 = vld [vmem:[%s16497_s0 + $0x80] sm:$0xff]   ;;  %v11913_v30 = vld [vmem:[%s16498_s3 + $0x1c8] ss:$16 sps:$4 sm:$0xff]  }
  0x1f   :  { %v11859_v27 = vld [vmem:[%s16497_s0 + $0x88] sm:$0xff]   ;;  %v11910_v28 = vld [vmem:[%s16498_s3 + $0x1c0] ss:$16 sps:$4 sm:$0xff]   ;;  %v11912_v29 = vld [vmem:[%s16498_s3 + $0x1c4] ss:$16 sps:$4 sm:$0xff]  }
  0x20   :  { %3882 = vmatpush1.bf16.msra.mxu0 %v11819_v32  ;;  %4847 = vmatpush1.bf16.msra.mxu1 %v11822_v34  ;;  %v11915_v31 = vld [vmem:[%s16498_s3 + $0x1cc] ss:$16 sps:$4 sm:$0xff]   ;;  %v11860_v32 = vld [vmem:[%s16497_s0 + $0x90] sm:$0xff]  }
  0x21   :  { %3883 = vmatprep.subr.bf16.mxu0 %v11830_v36  ;;  %4848 = vmatprep.subr.bf16.mxu1 %v11833_v38  ;;  %v11867_v33 = vld [vmem:[%s16497_s0 + $0x98] sm:$0xff]   ;;  %v11918_v34 = vld [vmem:[%s16498_s3 + $0x1e0] ss:$16 sps:$4 sm:$0xff]  }
  0x22   :  { %10244 = vmatmul.mubr.msk.bf16.gmra.mrb[8].mxu0 %vm381_vm0, %v11802_v35  ;;  %10280 = vmatmul.mubr.msk.bf16.gmra.mrb[8].mxu1 %vm381_vm0, %v11802_v35  ;;  %v11920_v35 = vld [vmem:[%s16498_s3 + $0x1e4] ss:$16 sps:$4 sm:$0xff]   ;;  %v11921_v36 = vld [vmem:[%s16498_s3 + $0x1e8] ss:$16 sps:$4 sm:$0xff]  }
  0x23   :  { %552 = vmatprep.mubr.bf16.mxu0 %v13073_v1  ;;  %945 = vmatprep.mubr.bf16.mxu1 %v13073_v1  ;;  %v11868_v38 = vld [vmem:[%s16497_s0 + $0xa0] sm:$0xff]  }
  0x24   :  { %3884 = vmatpush1.bf16.msra.mxu0 %v11828_v37  ;;  %4849 = vmatpush1.bf16.msra.mxu1 %v11831_v39  ;;  %v11923_v37 = vld [vmem:[%s16498_s3 + $0x1ec] ss:$16 sps:$4 sm:$0xff]  }
  0x25   :  { %3885 = vmatprep.subr.bf16.mxu0 %v11838_v41  ;;  %4850 = vmatprep.subr.bf16.mxu1 %v11841_v43  ;;  %v11875_v39 = vld [vmem:[%s16497_s0 + $0xa8] sm:$0xff]   ;;  %v11883_v43 = vld [vmem:[%s16497_s0 + $0xb8] sm:$0xff]  }
  0x26   :  { %v11931_v41 = vld [vmem:[%s16498_s3 + $0x20c] ss:$16 sps:$4 sm:$0xff]  }
  0x28   :  { %3886 = vmatpush1.bf16.msra.mxu0 %v11836_v40  ;;  %4851 = vmatpush1.bf16.msra.mxu1 %v11839_v42  ;;  %v11928_v40 = vld [vmem:[%s16498_s3 + $0x204] ss:$16 sps:$4 sm:$0xff]  }
  0x29   :  { %3887 = vmatprep.subr.bf16.mxu0 %v11846_v46  ;;  %4852 = vmatprep.subr.bf16.mxu1 %v11849_v48  ;;  %v11876_v42 = vld [vmem:[%s16497_s0 + $0xb0] sm:$0xff]  }
  0x2a   :  { %10245 = vmatmul.mubr.msk.bf16.gmra.mrb[12].mxu0 %vm381_vm0, %v11809_v44  ;;  %10281 = vmatmul.mubr.msk.bf16.gmra.mrb[12].mxu1 %vm381_vm0, %v11809_v44  ;;  %v11884_v44 = vld [vmem:[%s16497_s0 + $0xc0] sm:$0xff]   ;;  %v11892_v46 = vld [vmem:[%s16497_s0 + $0xd0] sm:$0xff]  }
  0x2b   :  { %562 = vmatprep.mubr.bf16.mxu0 %v13073_v1  ;;  %955 = vmatprep.mubr.bf16.mxu1 %v13073_v1 }
  0x2c   :  { %3888 = vmatpush1.bf16.msra.mxu0 %v11844_v45  ;;  %4853 = vmatpush1.bf16.msra.mxu1 %v11847_v47  ;;  %v11891_v45 = vld [vmem:[%s16497_s0 + $0xc8] sm:$0xff]  }
  0x2d   :  { %3889 = vmatprep.subr.bf16.mxu0 %v11854_v51  ;;  %4854 = vmatprep.subr.bf16.mxu1 %v11857_v53  ;;  %v11893_v51 = vld [vmem:[%s16497_s0 + $0xd8] sm:$0xff]  }
  0x30   :  { %3890 = vmatpush1.bf16.msra.mxu0 %v11852_v50  ;;  %4855 = vmatpush1.bf16.msra.mxu1 %v11855_v52 }
  0x31   :  { %3891 = vmatprep.subr.bf16.mxu0 %v11863_v55  ;;  %4856 = vmatprep.subr.bf16.mxu1 %v11866_v57 }
  0x32   :  { %10246 = vmatmul.mubr.msk.bf16.gmra.mrb[16].mxu0 %vm381_vm0, %v11810_v49  ;;  %10282 = vmatmul.mubr.msk.bf16.gmra.mrb[16].mxu1 %vm381_vm0, %v11810_v49 }
  0x33   :  { %572 = vmatprep.mubr.bf16.mxu0 %v13073_v1  ;;  %965 = vmatprep.mubr.bf16.mxu1 %v13073_v1 }
  0x34   :  { %3892 = vmatpush1.bf16.msra.mxu0 %v11861_v54  ;;  %4857 = vmatpush1.bf16.msra.mxu1 %v11864_v56  ;;  %v13567_v56 = vld [vmem:[%s16499_s2] ss:$0 sm:$0xff] }
  0x35   :  { %3893 = vmatprep.subr.bf16.mxu0 %v11871_v60  ;;  %4858 = vmatprep.subr.bf16.mxu1 %v11874_v62 }
  0x38   :  { %3894 = vmatpush1.bf16.msra.mxu0 %v11869_v59  ;;  %4859 = vmatpush1.bf16.msra.mxu1 %v11872_v61 }
  0x39   :  { %3895 = vmatprep.subr.bf16.mxu0 %v11879_v2  ;;  %4860 = vmatprep.subr.bf16.mxu1 %v11882_v4 }
  0x3a   :  { %10247 = vmatmul.mubr.msk.bf16.gmra.mrb[20].mxu0 %vm381_vm0, %v11817_v58  ;;  %10283 = vmatmul.mubr.msk.bf16.gmra.mrb[20].mxu1 %vm381_vm0, %v11817_v58 }
  0x3b   :  { %582 = vmatprep.mubr.bf16.mxu0 %v13073_v1  ;;  %975 = vmatprep.mubr.bf16.mxu1 %v13073_v1 }
  0x3c   :  { %3896 = vmatpush1.bf16.msra.mxu0 %v11877_v0  ;;  %4861 = vmatpush1.bf16.msra.mxu1 %v11880_v3 }
  0x3d   :  { %3897 = vmatprep.subr.bf16.mxu0 %v11887_v8  ;;  %4862 = vmatprep.subr.bf16.mxu1 %v11890_v10 }
  0x40   :  { %3898 = vmatpush1.bf16.msra.mxu0 %v11885_v7  ;;  %4863 = vmatpush1.bf16.msra.mxu1 %v11888_v9 }
  0x41   :  { %3899 = vmatprep.subr.bf16.mxu0 %v11896_v16  ;;  %4864 = vmatprep.subr.bf16.mxu1 %v11899_v18 }
  0x42   :  { %10248 = vmatmul.mubr.msk.bf16.gmra.mrb[24].mxu0 %vm381_vm0, %v11818_v63  ;;  %10284 = vmatmul.mubr.msk.bf16.gmra.mrb[24].mxu1 %vm381_vm0, %v11818_v63 }
  0x43   :  { %592 = vmatprep.mubr.bf16.mxu0 %v13073_v1  ;;  %985 = vmatprep.mubr.bf16.mxu1 %v13073_v1 }
  0x44   :  { %3900 = vmatpush1.bf16.msra.mxu0 %v11894_v15  ;;  %4865 = vmatpush1.bf16.msra.mxu1 %v11897_v17 }
  0x45   :  { %3901 = vmatprep.subr.bf16.mxu0 %v11904_v22  ;;  %4866 = vmatprep.subr.bf16.mxu1 %v11907_v24 }
  0x48   :  { %3902 = vmatpush1.bf16.msra.mxu0 %v11902_v21  ;;  %4867 = vmatpush1.bf16.msra.mxu1 %v11905_v23 }
  0x49   :  { %3903 = vmatprep.subr.bf16.mxu0 %v11912_v29  ;;  %4868 = vmatprep.subr.bf16.mxu1 %v11915_v31 }
  0x4a   :  { %10249 = vmatmul.mubr.msk.bf16.gmra.mrb[28].mxu0 %vm381_vm0, %v11825_v5  ;;  %10285 = vmatmul.mubr.msk.bf16.gmra.mrb[28].mxu1 %vm381_vm0, %v11825_v5 }
  0x4b   :  { %602 = vmatprep.mubr.bf16.mxu0 %v13073_v1  ;;  %995 = vmatprep.mubr.bf16.mxu1 %v13073_v1 }
  0x4c   :  { %3904 = vmatpush1.bf16.msra.mxu0 %v11910_v28  ;;  %4869 = vmatpush1.bf16.msra.mxu1 %v11913_v30 }
  0x4d   :  { %3905 = vmatprep.subr.bf16.mxu0 %v11920_v35  ;;  %4870 = vmatprep.subr.bf16.mxu1 %v11923_v37 }
  0x50   :  { %3906 = vmatpush1.bf16.msra.mxu0 %v11918_v34  ;;  %4871 = vmatpush1.bf16.msra.mxu1 %v11921_v36 }
  0x51   :  { %4068 = vmatprep.subr.bf16.mxu0 %v11928_v40  ;;  %5033 = vmatprep.subr.bf16.mxu1 %v11931_v41 }
  0x52   :  { %10250 = vmatmul.mubr.msk.bf16.gmra.mrb[32].mxu0 %vm381_vm0, %v11826_v6  ;;  %10286 = vmatmul.mubr.msk.bf16.gmra.mrb[32].mxu1 %vm381_vm0, %v11826_v6  ;;  %v11900_v6 = vld [vmem:[%s16497_s0 + $0xe0] sm:$0xff]  }
  0x53   :  { %612 = vmatprep.mubr.bf16.mxu0 %v13073_v1  ;;  %1005 = vmatprep.mubr.bf16.mxu1 %v13073_v1 }
  0x5a   :  { %10251 = vmatmul.mubr.msk.bf16.gmra.mrb[36].mxu0 %vm381_vm0, %v11827_v11  ;;  %10287 = vmatmul.mubr.msk.bf16.gmra.mrb[36].mxu1 %vm381_vm0, %v11827_v11 }
  0x5b   :  { %622 = vmatprep.mubr.bf16.mxu0 %v13073_v1  ;;  %1015 = vmatprep.mubr.bf16.mxu1 %v13073_v1 }
  0x62   :  { %10252 = vmatmul.mubr.msk.bf16.gmra.mrb[40].mxu0 %vm381_vm0, %v11834_v12  ;;  %10288 = vmatmul.mubr.msk.bf16.gmra.mrb[40].mxu1 %vm381_vm0, %v11834_v12 }
  0x63   :  { %632 = vmatprep.mubr.bf16.mxu0 %v13073_v1  ;;  %1025 = vmatprep.mubr.bf16.mxu1 %v13073_v1 }
  0x6a   :  { %10253 = vmatmul.mubr.msk.bf16.gmra.mrb[44].mxu0 %vm381_vm0, %v11835_v13  ;;  %10289 = vmatmul.mubr.msk.bf16.gmra.mrb[44].mxu1 %vm381_vm0, %v11835_v13 }
  0x6b   :  { %642 = vmatprep.mubr.bf16.mxu0 %v13073_v1  ;;  %1035 = vmatprep.mubr.bf16.mxu1 %v13073_v1 }
  0x72   :  { %10254 = vmatmul.mubr.msk.bf16.gmra.mrb[48].mxu0 %vm381_vm0, %v11842_v14  ;;  %10290 = vmatmul.mubr.msk.bf16.gmra.mrb[48].mxu1 %vm381_vm0, %v11842_v14 }
  0x73   :  { %652 = vmatprep.mubr.bf16.mxu0 %v13073_v1  ;;  %1045 = vmatprep.mubr.bf16.mxu1 %v13073_v1 }
  0x7a   :  { %10255 = vmatmul.mubr.msk.bf16.gmra.mrb[52].mxu0 %vm381_vm0, %v11843_v19  ;;  %10291 = vmatmul.mubr.msk.bf16.gmra.mrb[52].mxu1 %vm381_vm0, %v11843_v19 }
  0x7b   :  { %662 = vmatprep.mubr.bf16.mxu0 %v13073_v1  ;;  %1055 = vmatprep.mubr.bf16.mxu1 %v13073_v1 }
  0x82   :  { %10256 = vmatmul.mubr.msk.bf16.gmra.mrb[56].mxu0 %vm381_vm0, %v11850_v20  ;;  %10292 = vmatmul.mubr.msk.bf16.gmra.mrb[56].mxu1 %vm381_vm0, %v11850_v20 }
  0x83   :  { %672 = vmatprep.mubr.bf16.mxu0 %v13073_v1  ;;  %1065 = vmatprep.mubr.bf16.mxu1 %v13073_v1 }
  0x8a   :  { %10257 = vmatmul.mubr.msk.bf16.gmra.mrb[60].mxu0 %vm381_vm0, %v11851_v25  ;;  %10293 = vmatmul.mubr.msk.bf16.gmra.mrb[60].mxu1 %vm381_vm0, %v11851_v25 }
  0x8b   :  { %682 = vmatprep.mubr.bf16.mxu0 %v13073_v1  ;;  %1075 = vmatprep.mubr.bf16.mxu1 %v13073_v1 }
  0x92   :  { %10258 = vmatmul.mubr.msk.bf16.gmra.mrb[64].mxu0 %vm381_vm0, %v11858_v26  ;;  %10294 = vmatmul.mubr.msk.bf16.gmra.mrb[64].mxu1 %vm381_vm0, %v11858_v26  ;;  %v11901_v26 = vld [vmem:[%s16497_s0 + $0xe8] sm:$0xff]  }
  0x93   :  { %692 = vmatprep.mubr.bf16.mxu0 %v13073_v1  ;;  %1085 = vmatprep.mubr.bf16.mxu1 %v13073_v1 }
  0x9a   :  { %10259 = vmatmul.mubr.msk.bf16.gmra.mrb[68].mxu0 %vm381_vm0, %v11859_v27  ;;  %10295 = vmatmul.mubr.msk.bf16.gmra.mrb[68].mxu1 %vm381_vm0, %v11859_v27 }
  0x9b   :  { %702 = vmatprep.mubr.bf16.mxu0 %v13073_v1  ;;  %1095 = vmatprep.mubr.bf16.mxu1 %v13073_v1 }
  0xa2   :  { %10260 = vmatmul.mubr.msk.bf16.gmra.mrb[72].mxu0 %vm381_vm0, %v11860_v32  ;;  %10296 = vmatmul.mubr.msk.bf16.gmra.mrb[72].mxu1 %vm381_vm0, %v11860_v32 }
  0xa3   :  { %712 = vmatprep.mubr.bf16.mxu0 %v13073_v1  ;;  %1105 = vmatprep.mubr.bf16.mxu1 %v13073_v1 }
  0xaa   :  { %10261 = vmatmul.mubr.msk.bf16.gmra.mrb[76].mxu0 %vm381_vm0, %v11867_v33  ;;  %10297 = vmatmul.mubr.msk.bf16.gmra.mrb[76].mxu1 %vm381_vm0, %v11867_v33 }
  0xab   :  { %722 = vmatprep.mubr.bf16.mxu0 %v13073_v1  ;;  %1115 = vmatprep.mubr.bf16.mxu1 %v13073_v1 }
  0xb2   :  { %10262 = vmatmul.mubr.msk.bf16.gmra.mrb[80].mxu0 %vm381_vm0, %v11868_v38  ;;  %10298 = vmatmul.mubr.msk.bf16.gmra.mrb[80].mxu1 %vm381_vm0, %v11868_v38 }
  0xb3   :  { %732 = vmatprep.mubr.bf16.mxu0 %v13073_v1  ;;  %1125 = vmatprep.mubr.bf16.mxu1 %v13073_v1 }
  0xba   :  { %10263 = vmatmul.mubr.msk.bf16.gmra.mrb[84].mxu0 %vm381_vm0, %v11875_v39  ;;  %10299 = vmatmul.mubr.msk.bf16.gmra.mrb[84].mxu1 %vm381_vm0, %v11875_v39 }
  0xbb   :  { %742 = vmatprep.mubr.bf16.mxu0 %v13073_v1  ;;  %1135 = vmatprep.mubr.bf16.mxu1 %v13073_v1 }
  0xc2   :  { %10264 = vmatmul.mubr.msk.bf16.gmra.mrb[88].mxu0 %vm381_vm0, %v11876_v42  ;;  %10300 = vmatmul.mubr.msk.bf16.gmra.mrb[88].mxu1 %vm381_vm0, %v11876_v42 }
  0xc3   :  { %752 = vmatprep.mubr.bf16.mxu0 %v13073_v1  ;;  %1145 = vmatprep.mubr.bf16.mxu1 %v13073_v1 }
  0xca   :  { %10265 = vmatmul.mubr.msk.bf16.gmra.mrb[92].mxu0 %vm381_vm0, %v11883_v43  ;;  %10301 = vmatmul.mubr.msk.bf16.gmra.mrb[92].mxu1 %vm381_vm0, %v11883_v43 }
  0xcb   :  { %762 = vmatprep.mubr.bf16.mxu0 %v13073_v1  ;;  %1155 = vmatprep.mubr.bf16.mxu1 %v13073_v1 }
  0xd2   :  { %10266 = vmatmul.mubr.msk.bf16.gmra.mrb[96].mxu0 %vm381_vm0, %v11884_v44  ;;  %10302 = vmatmul.mubr.msk.bf16.gmra.mrb[96].mxu1 %vm381_vm0, %v11884_v44 }
  0xd3   :  { %772 = vmatprep.mubr.bf16.mxu0 %v13073_v1  ;;  %1165 = vmatprep.mubr.bf16.mxu1 %v13073_v1 }
  0xda   :  { %10267 = vmatmul.mubr.msk.bf16.gmra.mrb[100].mxu0 %vm381_vm0, %v11891_v45  ;;  %10303 = vmatmul.mubr.msk.bf16.gmra.mrb[100].mxu1 %vm381_vm0, %v11891_v45 }
  0xdb   :  { %782 = vmatprep.mubr.bf16.mxu0 %v13073_v1  ;;  %1175 = vmatprep.mubr.bf16.mxu1 %v13073_v1 }
  0xe2   :  { %10268 = vmatmul.mubr.msk.bf16.gmra.mrb[104].mxu0 %vm381_vm0, %v11892_v46  ;;  %10304 = vmatmul.mubr.msk.bf16.gmra.mrb[104].mxu1 %vm381_vm0, %v11892_v46  ;;  %v11908_v46 = vld [vmem:[%s16497_s0 + $0xf0] sm:$0xff]  }
  0xe3   :  { %792 = vmatprep.mubr.bf16.mxu0 %v13073_v1  ;;  %1185 = vmatprep.mubr.bf16.mxu1 %v13073_v1 }
  0xe5   :  { %v524_v47 = vpop.f32.mrb[0].mxu0  ;;  %v917_v48 = vpop.f32.mrb[0].mxu1 }
  0xe6   :  { %v526_v49 = vpop.f32.mrb[1].mxu0  ;;  %v919_v50 = vpop.f32.mrb[1].mxu1 }
  0xe7   :  { %v1276_v52 = vmax.f32 %v524_v47, %v526_v49  ;;  %v1348_v53 = vmax.f32 %v917_v48, %v919_v50  ;;  %v528_v54 = vpop.f32.mrb[2].mxu0  ;;  %v921_v55 = vpop.f32.mrb[2].mxu1 }
  0xe8   :  { %v530_v57 = vpop.f32.mrb[3].mxu0  ;;  %v923_v58 = vpop.f32.mrb[3].mxu1 }
  0xe9   :  { %v1420_v59 = vmax.f32 %v1276_v52, %v1348_v53  ;;  %v1277_v60 = vmax.f32 %v528_v54, %v530_v57  ;;  %v1349_v61 = vmax.f32 %v921_v55, %v923_v58 }
  0xea   :  { %10269 = vmatmul.mubr.msk.bf16.gmra.mrb[108].mxu0 %vm381_vm0, %v11893_v51  ;;  %10305 = vmatmul.mubr.msk.bf16.gmra.mrb[108].mxu1 %vm381_vm0, %v11893_v51 }
  0xeb   :  { %v1499_v62 = vadd.f32 %v13567_v56, %v1420_v59  ;;  %v1421_v63 = vmax.f32 %v1277_v60, %v1349_v61  ;;  %802 = vmatprep.mubr.bf16.mxu0 %v13073_v1  ;;  %1195 = vmatprep.mubr.bf16.mxu1 %v13073_v1 }
  0xed   :  { %v1500_v0 = vadd.f32 %v13567_v56, %v1421_v63  ;;  %v534_v2 = vpop.f32.mrb[4].mxu0  ;;  %v927_v3 = vpop.f32.mrb[4].mxu1  ;;  %v1571_v7 = vmax.f32 %v1499_v62, 0.0 }
  0xee   :  { %v536_v4 = vpop.f32.mrb[5].mxu0  ;;  %v929_v5 = vpop.f32.mrb[5].mxu1 }
  0xef   :  { %v1572_v8 = vmax.f32 %v1500_v0, 0.0  ;;  %v1278_v9 = vmax.f32 %v534_v2, %v536_v4  ;;  %v1350_v10 = vmax.f32 %v927_v3, %v929_v5  ;;  %v538_v11 = vpop.f32.mrb[6].mxu0  ;;  %v931_v12 = vpop.f32.mrb[6].mxu1  ;;  %v11909_v4 = vld [vmem:[%s16497_s0 + $0xf8] sm:$0xff]  }
  0xf0   :  { %v540_v13 = vpop.f32.mrb[7].mxu0  ;;  %v933_v14 = vpop.f32.mrb[7].mxu1 }
  0xf1   :  { %v13578_v15 = vpack.c.bf16 %v1572_v8, %v1571_v7  ;;  %v1422_v16 = vmax.f32 %v1278_v9, %v1350_v10  ;;  %v1279_v17 = vmax.f32 %v538_v11, %v540_v13  ;;  %v1351_v18 = vmax.f32 %v931_v12, %v933_v14 }
  0xf2   :  { %10270 = vmatmul.mubr.msk.bf16.gmra.mrb[112].mxu0 %vm381_vm0, %v11900_v6  ;;  %10306 = vmatmul.mubr.msk.bf16.gmra.mrb[112].mxu1 %vm381_vm0, %v11900_v6 }
  0xf3   :  { %v1501_v19 = vadd.f32 %v13567_v56, %v1422_v16  ;;  %v1423_v20 = vmax.f32 %v1279_v17, %v1351_v18  ;;  %812 = vmatprep.mubr.bf16.mxu0 %v13073_v1  ;;  %1205 = vmatprep.mubr.bf16.mxu1 %v13073_v1 }
  0xf5   :  { %v1502_v21 = vadd.f32 %v13567_v56, %v1423_v20  ;;  %v544_v22 = vpop.f32.mrb[8].mxu0  ;;  %v937_v23 = vpop.f32.mrb[8].mxu1  ;;  %v1573_v27 = vmax.f32 %v1501_v19, 0.0 }
  0xf6   :  { %v546_v24 = vpop.f32.mrb[9].mxu0  ;;  %v939_v25 = vpop.f32.mrb[9].mxu1 }
  0xf7   :  { %v1574_v28 = vmax.f32 %v1502_v21, 0.0  ;;  %v1280_v29 = vmax.f32 %v544_v22, %v546_v24  ;;  %v1352_v30 = vmax.f32 %v937_v23, %v939_v25  ;;  %v548_v31 = vpop.f32.mrb[10].mxu0  ;;  %v941_v32 = vpop.f32.mrb[10].mxu1  ;;  %v11916_v25 = vld [vmem:[%s16497_s0 + $0x100] sm:$0xff]  }
  0xf8   :  { %v550_v33 = vpop.f32.mrb[11].mxu0  ;;  %v943_v34 = vpop.f32.mrb[11].mxu1 }
  0xf9   :  { %v13589_v35 = vpack.c.bf16 %v1574_v28, %v1573_v27  ;;  %v1424_v36 = vmax.f32 %v1280_v29, %v1352_v30  ;;  %v1281_v37 = vmax.f32 %v548_v31, %v550_v33  ;;  %v1353_v38 = vmax.f32 %v941_v32, %v943_v34 }
  0xfa   :  { %10271 = vmatmul.mubr.msk.bf16.gmra.mrb[116].mxu0 %vm381_vm0, %v11901_v26  ;;  %10307 = vmatmul.mubr.msk.bf16.gmra.mrb[116].mxu1 %vm381_vm0, %v11901_v26 }
  0xfb   :  { %v1503_v39 = vadd.f32 %v13567_v56, %v1424_v36  ;;  %v1425_v40 = vmax.f32 %v1281_v37, %v1353_v38  ;;  %822 = vmatprep.mubr.bf16.mxu0 %v13073_v1  ;;  %1215 = vmatprep.mubr.bf16.mxu1 %v13073_v1 }
  0xfd   :  { %v1504_v41 = vadd.f32 %v13567_v56, %v1425_v40  ;;  %v554_v42 = vpop.f32.mrb[12].mxu0  ;;  %v947_v43 = vpop.f32.mrb[12].mxu1  ;;  %v1575_v47 = vmax.f32 %v1503_v39, 0.0 }
  0xfe   :  { %v556_v44 = vpop.f32.mrb[13].mxu0  ;;  %v949_v45 = vpop.f32.mrb[13].mxu1 }
  0xff   :  { %v1576_v48 = vmax.f32 %v1504_v41, 0.0  ;;  %v1282_v49 = vmax.f32 %v554_v42, %v556_v44  ;;  %v1354_v50 = vmax.f32 %v947_v43, %v949_v45  ;;  %v558_v51 = vpop.f32.mrb[14].mxu0  ;;  %v951_v52 = vpop.f32.mrb[14].mxu1 }
 0x100   :  { %v560_v53 = vpop.f32.mrb[15].mxu0  ;;  %v953_v54 = vpop.f32.mrb[15].mxu1 }
 0x101   :  { %v13600_v55 = vpack.c.bf16 %v1576_v48, %v1575_v47  ;;  %v1426_v57 = vmax.f32 %v1282_v49, %v1354_v50  ;;  %v1283_v58 = vmax.f32 %v558_v51, %v560_v53  ;;  %v1355_v59 = vmax.f32 %v951_v52, %v953_v54 }
 0x102   :  { %10272 = vmatmul.mubr.msk.bf16.gmra.mrb[120].mxu0 %vm381_vm0, %v11908_v46  ;;  %10308 = vmatmul.mubr.msk.bf16.gmra.mrb[120].mxu1 %vm381_vm0, %v11908_v46  ;;  %v11917_v46 = vld [vmem:[%s16497_s0 + $0x108] sm:$0xff]  }
 0x103   :  { %v1505_v60 = vadd.f32 %v13567_v56, %v1426_v57  ;;  %v1427_v61 = vmax.f32 %v1283_v58, %v1355_v59  ;;  %832 = vmatprep.mubr.bf16.mxu0 %v13073_v1  ;;  %1225 = vmatprep.mubr.bf16.mxu1 %v13073_v1 }
 0x105   :  { %v1506_v62 = vadd.f32 %v13567_v56, %v1427_v61  ;;  %v564_v63 = vpop.f32.mrb[16].mxu0  ;;  %v957_v0 = vpop.f32.mrb[16].mxu1  ;;  %v1577_v5 = vmax.f32 %v1505_v60, 0.0 }
 0x106   :  { %v566_v2 = vpop.f32.mrb[17].mxu0  ;;  %v959_v3 = vpop.f32.mrb[17].mxu1 }
 0x107   :  { %v1578_v6 = vmax.f32 %v1506_v62, 0.0  ;;  %v1284_v7 = vmax.f32 %v564_v63, %v566_v2  ;;  %v1356_v8 = vmax.f32 %v957_v0, %v959_v3  ;;  %v568_v9 = vpop.f32.mrb[18].mxu0  ;;  %v961_v10 = vpop.f32.mrb[18].mxu1 }
 0x108   :  { %v570_v11 = vpop.f32.mrb[19].mxu0  ;;  %v963_v12 = vpop.f32.mrb[19].mxu1 }
 0x109   :  { %v13611_v13 = vpack.c.bf16 %v1578_v6, %v1577_v5  ;;  %v1428_v14 = vmax.f32 %v1284_v7, %v1356_v8  ;;  %v1285_v16 = vmax.f32 %v568_v9, %v570_v11  ;;  %v1357_v17 = vmax.f32 %v961_v10, %v963_v12  ;;  %v11924_v5 = vld [vmem:[%s16497_s0 + $0x110] sm:$0xff]  }
 0x10a   :  { %10273 = vmatmul.mubr.msk.bf16.gmra.mrb[124].mxu0 %vm381_vm0, %v11909_v4  ;;  %10309 = vmatmul.mubr.msk.bf16.gmra.mrb[124].mxu1 %vm381_vm0, %v11909_v4 }
 0x10b   :  { %v1507_v18 = vadd.f32 %v13567_v56, %v1428_v14  ;;  %v1429_v19 = vmax.f32 %v1285_v16, %v1357_v17  ;;  %842 = vmatprep.mubr.bf16.mxu0 %v13073_v1  ;;  %1235 = vmatprep.mubr.bf16.mxu1 %v13073_v1 }
 0x10d   :  { %v1508_v20 = vadd.f32 %v13567_v56, %v1429_v19  ;;  %v574_v21 = vpop.f32.mrb[20].mxu0  ;;  %v967_v22 = vpop.f32.mrb[20].mxu1  ;;  %v1579_v26 = vmax.f32 %v1507_v18, 0.0 }
 0x10e   :  { %v576_v23 = vpop.f32.mrb[21].mxu0  ;;  %v969_v24 = vpop.f32.mrb[21].mxu1 }
 0x10f   :  { %v1580_v27 = vmax.f32 %v1508_v20, 0.0  ;;  %v1286_v28 = vmax.f32 %v574_v21, %v576_v23  ;;  %v1358_v29 = vmax.f32 %v967_v22, %v969_v24  ;;  %v578_v30 = vpop.f32.mrb[22].mxu0  ;;  %v971_v31 = vpop.f32.mrb[22].mxu1 }
 0x110   :  { %v580_v32 = vpop.f32.mrb[23].mxu0  ;;  %v973_v33 = vpop.f32.mrb[23].mxu1 }
 0x111   :  { %v13622_v34 = vpack.c.bf16 %v1580_v27, %v1579_v26  ;;  %v1430_v36 = vmax.f32 %v1286_v28, %v1358_v29  ;;  %v1287_v37 = vmax.f32 %v578_v30, %v580_v32  ;;  %v1359_v38 = vmax.f32 %v971_v31, %v973_v33  ;;  %v11925_v27 = vld [vmem:[%s16497_s0 + $0x118] sm:$0xff]  }
 0x112   :  { %10274 = vmatmul.mubr.msk.bf16.gmra.mrb[128].mxu0 %vm381_vm0, %v11916_v25  ;;  %10310 = vmatmul.mubr.msk.bf16.gmra.mrb[128].mxu1 %vm381_vm0, %v11916_v25 }
 0x113   :  { %v1509_v39 = vadd.f32 %v13567_v56, %v1430_v36  ;;  %v1431_v40 = vmax.f32 %v1287_v37, %v1359_v38  ;;  %852 = vmatprep.mubr.bf16.mxu0 %v13073_v1  ;;  %1245 = vmatprep.mubr.bf16.mxu1 %v13073_v1 }
 0x115   :  { %v1510_v41 = vadd.f32 %v13567_v56, %v1431_v40  ;;  %v584_v42 = vpop.f32.mrb[24].mxu0  ;;  %v977_v43 = vpop.f32.mrb[24].mxu1  ;;  %v1581_v47 = vmax.f32 %v1509_v39, 0.0 }
 0x116   :  { %v586_v44 = vpop.f32.mrb[25].mxu0  ;;  %v979_v45 = vpop.f32.mrb[25].mxu1 }
 0x117   :  { %v1582_v48 = vmax.f32 %v1510_v41, 0.0  ;;  %v1288_v49 = vmax.f32 %v584_v42, %v586_v44  ;;  %v1360_v50 = vmax.f32 %v977_v43, %v979_v45  ;;  %v588_v51 = vpop.f32.mrb[26].mxu0  ;;  %v981_v52 = vpop.f32.mrb[26].mxu1 }
 0x118   :  { %v590_v53 = vpop.f32.mrb[27].mxu0  ;;  %v983_v54 = vpop.f32.mrb[27].mxu1 }
 0x119   :  { %v1432_v57 = vmax.f32 %v1288_v49, %v1360_v50  ;;  %v1289_v58 = vmax.f32 %v588_v51, %v590_v53  ;;  %v1361_v59 = vmax.f32 %v981_v52, %v983_v54  ;;  %v13633_v60 = vpack.c.bf16 %v1582_v48, %v1581_v47 }
 0x11a   :  { %10275 = vmatmul.mubr.msk.bf16.gmra.mrb[132].mxu0 %vm381_vm0, %v11917_v46  ;;  %10311 = vmatmul.mubr.msk.bf16.gmra.mrb[132].mxu1 %vm381_vm0, %v11917_v46 }
 0x11b   :  { %v1511_v61 = vadd.f32 %v13567_v56, %v1432_v57  ;;  %v1433_v62 = vmax.f32 %v1289_v58, %v1361_v59  ;;  %862 = vmatprep.mubr.bf16.mxu0 %v13073_v1  ;;  %1255 = vmatprep.mubr.bf16.mxu1 %v13073_v1  ;;  %v11926_v57 = vld [vmem:[%s16498_s3 + $0x200] ss:$16 sps:$4 sm:$0xff]  }
 0x11d   :  { %v1512_v63 = vadd.f32 %v13567_v56, %v1433_v62  ;;  %v594_v0 = vpop.f32.mrb[28].mxu0  ;;  %v987_v2 = vpop.f32.mrb[28].mxu1  ;;  %v1583_v6 = vmax.f32 %v1511_v61, 0.0  ;;  %v11929_v61 = vld [vmem:[%s16498_s3 + $0x208] ss:$16 sps:$4 sm:$0xff]  }
 0x11e   :  { %v596_v3 = vpop.f32.mrb[29].mxu0  ;;  %v989_v4 = vpop.f32.mrb[29].mxu1 }
 0x11f   :  { %v1584_v7 = vmax.f32 %v1512_v63, 0.0  ;;  %v1290_v8 = vmax.f32 %v594_v0, %v596_v3  ;;  %v1362_v9 = vmax.f32 %v987_v2, %v989_v4  ;;  %v598_v10 = vpop.f32.mrb[30].mxu0  ;;  %v991_v11 = vpop.f32.mrb[30].mxu1  ;;  %v11934_v3 = vld [vmem:[%s16498_s3 + $0x224] ss:$16 sps:$4 sm:$0xff]  }
 0x120   :  { %v600_v12 = vpop.f32.mrb[31].mxu0  ;;  %v993_v14 = vpop.f32.mrb[31].mxu1  ;;  %v11937_v4 = vld [vmem:[%s16498_s3 + $0x22c] ss:$16 sps:$4 sm:$0xff]  }
 0x121   :  { %v13644_v16 = vpack.c.bf16 %v1584_v7, %v1583_v6  ;;  %v1434_v17 = vmax.f32 %v1290_v8, %v1362_v9  ;;  %v1291_v18 = vmax.f32 %v598_v10, %v600_v12  ;;  %v1363_v19 = vmax.f32 %v991_v11, %v993_v14  ;;  %v11932_v7 = vld [vmem:[%s16498_s3 + $0x220] ss:$16 sps:$4 sm:$0xff]   ;;  %v11935_v8 = vld [vmem:[%s16498_s3 + $0x228] ss:$16 sps:$4 sm:$0xff]   ;;  %v11943_v12 = vld [vmem:[%s16498_s3 + $0x24c] ss:$16 sps:$4 sm:$0xff]  }
 0x122   :  { %10276 = vmatmul.mubr.msk.bf16.gmra.mrb[136].mxu0 %vm381_vm0, %v11924_v5  ;;  %10312 = vmatmul.mubr.msk.bf16.gmra.mrb[136].mxu1 %vm381_vm0, %v11924_v5 }
 0x123   :  { %v1513_v20 = vadd.f32 %v13567_v56, %v1434_v17  ;;  %v1435_v21 = vmax.f32 %v1291_v18, %v1363_v19  ;;  %872 = vmatprep.mubr.bf16.mxu0 %v13073_v1  ;;  %1265 = vmatprep.mubr.bf16.mxu1 %v13073_v1 }
 0x125   :  { %v1514_v22 = vadd.f32 %v13567_v56, %v1435_v21  ;;  %v604_v23 = vpop.f32.mrb[32].mxu0  ;;  %v997_v24 = vpop.f32.mrb[32].mxu1  ;;  %v1585_v28 = vmax.f32 %v1513_v20, 0.0 }
 0x126   :  { %v606_v25 = vpop.f32.mrb[33].mxu0  ;;  %v999_v26 = vpop.f32.mrb[33].mxu1 }
 0x127   :  { %v1586_v29 = vmax.f32 %v1514_v22, 0.0  ;;  %v1292_v30 = vmax.f32 %v604_v23, %v606_v25  ;;  %v1364_v31 = vmax.f32 %v997_v24, %v999_v26  ;;  %v608_v32 = vpop.f32.mrb[34].mxu0  ;;  %v1001_v33 = vpop.f32.mrb[34].mxu1  ;;  %v11938_v26 = vld [vmem:[%s16498_s3 + $0x240] ss:$16 sps:$4 sm:$0xff]  }
 0x128   :  { %v610_v36 = vpop.f32.mrb[35].mxu0  ;;  %v1003_v37 = vpop.f32.mrb[35].mxu1 }
 0x129   :  { %v13655_v38 = vpack.c.bf16 %v1586_v29, %v1585_v28  ;;  %v1436_v39 = vmax.f32 %v1292_v30, %v1364_v31  ;;  %v1293_v40 = vmax.f32 %v608_v32, %v610_v36  ;;  %v1365_v41 = vmax.f32 %v1001_v33, %v1003_v37  ;;  %v11946_v32 = vld [vmem:[%s16498_s3 + $0x264] ss:$16 sps:$4 sm:$0xff]   ;;  %v11949_v33 = vld [vmem:[%s16498_s3 + $0x26c] ss:$16 sps:$4 sm:$0xff]  }
 0x12a   :  { %10277 = vmatmul.mubr.msk.bf16.gmra.mrb[140].mxu0 %vm381_vm0, %v11925_v27  ;;  %10313 = vmatmul.mubr.msk.bf16.gmra.mrb[140].mxu1 %vm381_vm0, %v11925_v27  ;;  %v11941_v27 = vld [vmem:[%s16498_s3 + $0x248] ss:$16 sps:$4 sm:$0xff]  }
 0x12b   :  { %v1515_v42 = vadd.f32 %v13567_v56, %v1436_v39  ;;  %v1437_v43 = vmax.f32 %v1293_v40, %v1365_v41  ;;  %3907 = vmatprep.mubr.bf16.mxu0 %v13589_v35  ;;  %4872 = vmatprep.mubr.bf16.mxu1 %v13589_v35  ;;  %v11944_v39 = vld [vmem:[%s16498_s3 + $0x260] ss:$16 sps:$4 sm:$0xff]   ;;  %v11947_v40 = vld [vmem:[%s16498_s3 + $0x268] ss:$16 sps:$4 sm:$0xff]  }
 0x12d   :  { %v1516_v44 = vadd.f32 %v13567_v56, %v1437_v43  ;;  %v614_v45 = vpop.f32.mrb[36].mxu0  ;;  %v1007_v46 = vpop.f32.mrb[36].mxu1  ;;  %v1587_v49 = vmax.f32 %v1515_v42, 0.0  ;;  %v11952_v43 = vld [vmem:[%s16498_s3 + $0x284] ss:$16 sps:$4 sm:$0xff]  }
 0x12e   :  { %v616_v47 = vpop.f32.mrb[37].mxu0  ;;  %v1009_v48 = vpop.f32.mrb[37].mxu1 }
 0x12f   :  { %v1588_v50 = vmax.f32 %v1516_v44, 0.0  ;;  %v1294_v51 = vmax.f32 %v614_v45, %v616_v47  ;;  %v1366_v52 = vmax.f32 %v1007_v46, %v1009_v48  ;;  %v618_v53 = vpop.f32.mrb[38].mxu0  ;;  %v1011_v54 = vpop.f32.mrb[38].mxu1 }
 0x130   :  { %v620_v58 = vpop.f32.mrb[39].mxu0  ;;  %v1013_v59 = vpop.f32.mrb[39].mxu1 }
 0x131   :  { %v13669_v62 = vpack.c.bf16 %v1588_v50, %v1587_v49  ;;  %v1438_v63 = vmax.f32 %v1294_v51, %v1366_v52  ;;  %v1295_v0 = vmax.f32 %v618_v53, %v620_v58  ;;  %v1367_v2 = vmax.f32 %v1011_v54, %v1013_v59  ;;  %v11950_v54 = vld [vmem:[%s16498_s3 + $0x280] ss:$16 sps:$4 sm:$0xff]  }
 0x132   :  { %3908 = vmatmul.mubr.bf16.vlgmr.msra.gmra.mrb[144].mxu0 %v13578_v15  ;;  %4873 = vmatmul.mubr.bf16.vlgmr.msra.gmra.mrb[144].mxu1 %v13578_v15  ;;  %v11940_v15 = vld [vmem:[%s16498_s3 + $0x244] ss:$16 sps:$4 sm:$0xff]  }
 0x133   :  { %v1517_v5 = vadd.f32 %v13567_v56, %v1438_v63  ;;  %v1439_v6 = vmax.f32 %v1295_v0, %v1367_v2  ;;  %3917 = vmatprep.mubr.bf16.mxu0 %v13600_v55  ;;  %4069 = vmatpush1.bf16.msra.mxu0 %v11926_v57  ;;  %v11955_v57 = vld [vmem:[%s16498_s3 + $0x28c] ss:$16 sps:$4 sm:$0xff]   ;;  %v11953_v0 = vld [vmem:[%s16498_s3 + $0x288] ss:$16 sps:$4 sm:$0xff]   ;;  %v11958_v2 = vld [vmem:[%s16498_s3 + $0x2a4] ss:$16 sps:$4 sm:$0xff]  }
 0x134   :  { %4882 = vmatprep.mubr.bf16.mxu1 %v13600_v55  ;;  %5034 = vmatpush1.bf16.msra.mxu1 %v11929_v61 }
 0x135   :  { %v1518_v9 = vadd.f32 %v13567_v56, %v1439_v6  ;;  %v624_v10 = vpop.f32.mrb[40].mxu0  ;;  %v1017_v11 = vpop.f32.mrb[40].mxu1  ;;  %4070 = vmatprep.subr.bf16.mxu0 %v11934_v3  ;;  %5035 = vmatprep.subr.bf16.mxu1 %v11937_v4  ;;  %v1589_v18 = vmax.f32 %v1517_v5, 0.0  ;;  %v11961_v3 = vld [vmem:[%s16498_s3 + $0x2ac] ss:$16 sps:$4 sm:$0xff]  }
 0x136   :  { %v626_v14 = vpop.f32.mrb[41].mxu0  ;;  %v1019_v17 = vpop.f32.mrb[41].mxu1  ;;  %v11956_v6 = vld [vmem:[%s16498_s3 + $0x2a0] ss:$16 sps:$4 sm:$0xff]  }
 0x137   :  { %v1590_v19 = vmax.f32 %v1518_v9, 0.0  ;;  %v1296_v20 = vmax.f32 %v624_v10, %v626_v14  ;;  %v1368_v21 = vmax.f32 %v1017_v11, %v1019_v17  ;;  %v628_v22 = vpop.f32.mrb[42].mxu0  ;;  %v1021_v23 = vpop.f32.mrb[42].mxu1  ;;  %4071 = vmatpush1.bf16.msra.mxu0 %v11932_v7  ;;  %v11959_v9 = vld [vmem:[%s16498_s3 + $0x2a8] ss:$16 sps:$4 sm:$0xff]  }
 0x138   :  { %v630_v24 = vpop.f32.mrb[43].mxu0  ;;  %v1023_v25 = vpop.f32.mrb[43].mxu1  ;;  %5036 = vmatpush1.bf16.msra.mxu1 %v11935_v8  ;;  %4072 = vmatprep.subr.bf16.mxu0 %v11940_v15 }
 0x139   :  { %v13701_v28 = vpack.c.bf16 %v1590_v19, %v1589_v18  ;;  %v1440_v29 = vmax.f32 %v1296_v20, %v1368_v21  ;;  %v1297_v30 = vmax.f32 %v628_v22, %v630_v24  ;;  %v1369_v31 = vmax.f32 %v1021_v23, %v1023_v25  ;;  %5037 = vmatprep.subr.bf16.mxu1 %v11943_v12  ;;  %v11964_v23 = vld [vmem:[%s16498_s3 + $0x2c4] ss:$16 sps:$4 sm:$0xff]   ;;  %v11967_v24 = vld [vmem:[%s16498_s3 + $0x2cc] ss:$16 sps:$4 sm:$0xff]  }
 0x13a   :  { %3918 = vmatmul.mubr.bf16.gmra.mrb[148].mxu0 %v13589_v35  ;;  %4883 = vmatmul.mubr.bf16.gmra.mrb[148].mxu1 %v13589_v35 }
 0x13b   :  { %v1519_v36 = vadd.f32 %v13567_v56, %v1440_v29  ;;  %v1441_v37 = vmax.f32 %v1297_v30, %v1369_v31  ;;  %3927 = vmatprep.mubr.bf16.mxu0 %v13611_v13  ;;  %4892 = vmatprep.mubr.bf16.mxu1 %v13611_v13  ;;  %v11962_v30 = vld [vmem:[%s16498_s3 + $0x2c0] ss:$16 sps:$4 sm:$0xff]   ;;  %v11965_v31 = vld [vmem:[%s16498_s3 + $0x2c8] ss:$16 sps:$4 sm:$0xff]  }
 0x13c   :  { %4073 = vmatpush1.bf16.msra.mxu0 %v11938_v26  ;;  %5038 = vmatpush1.bf16.msra.mxu1 %v11941_v27 }
 0x13d   :  { %v1520_v41 = vadd.f32 %v13567_v56, %v1441_v37  ;;  %v634_v35 = vpop.f32.mrb[44].mxu0  ;;  %v1027_v42 = vpop.f32.mrb[44].mxu1  ;;  %4074 = vmatprep.subr.bf16.mxu0 %v11946_v32  ;;  %5039 = vmatprep.subr.bf16.mxu1 %v11949_v33  ;;  %v1591_v46 = vmax.f32 %v1519_v36, 0.0  ;;  %v11970_v32 = vld [vmem:[%s16498_s3 + $0x2e4] ss:$16 sps:$4 sm:$0xff]  }
 0x13e   :  { %v636_v44 = vpop.f32.mrb[45].mxu0  ;;  %v1029_v45 = vpop.f32.mrb[45].mxu1  ;;  %v11973_v33 = vld [vmem:[%s16498_s3 + $0x2ec] ss:$16 sps:$4 sm:$0xff]  }
 0x13f   :  { %v1592_v47 = vmax.f32 %v1520_v41, 0.0  ;;  %v1298_v48 = vmax.f32 %v634_v35, %v636_v44  ;;  %v1370_v49 = vmax.f32 %v1027_v42, %v1029_v45  ;;  %v638_v50 = vpop.f32.mrb[46].mxu0  ;;  %v1031_v51 = vpop.f32.mrb[46].mxu1  ;;  %v11968_v35 = vld [vmem:[%s16498_s3 + $0x2e0] ss:$16 sps:$4 sm:$0xff]  }
 0x140   :  { %v640_v52 = vpop.f32.mrb[47].mxu0  ;;  %v1033_v53 = vpop.f32.mrb[47].mxu1  ;;  %4075 = vmatpush1.bf16.msra.mxu0 %v11944_v39  ;;  %5040 = vmatpush1.bf16.msra.mxu1 %v11947_v40 }
 0x141   :  { %v13730_v58 = vpack.c.bf16 %v1592_v47, %v1591_v46  ;;  %v1442_v59 = vmax.f32 %v1298_v48, %v1370_v49  ;;  %v1299_v61 = vmax.f32 %v638_v50, %v640_v52  ;;  %v1371_v63 = vmax.f32 %v1031_v51, %v1033_v53  ;;  %4076 = vmatprep.subr.bf16.mxu0 %v11952_v43  ;;  %v11971_v52 = vld [vmem:[%s16498_s3 + $0x2e8] ss:$16 sps:$4 sm:$0xff]   ;;  %v11976_v53 = vld [vmem:[%s16498_s3 + $0x304] ss:$16 sps:$4 sm:$0xff]  }
 0x142   :  { %3928 = vmatmul.mubr.bf16.gmra.mrb[152].mxu0 %v13600_v55  ;;  %4893 = vmatmul.mubr.bf16.gmra.mrb[152].mxu1 %v13600_v55 }
 0x143   :  { %v1521_v4 = vadd.f32 %v13567_v56, %v1442_v59  ;;  %v1443_v5 = vmax.f32 %v1299_v61, %v1371_v63  ;;  %3937 = vmatprep.mubr.bf16.mxu0 %v13622_v34  ;;  %4902 = vmatprep.mubr.bf16.mxu1 %v13622_v34  ;;  %v11974_v63 = vld [vmem:[%s16498_s3 + $0x300] ss:$16 sps:$4 sm:$0xff]  }
 0x144   :  { %5041 = vmatprep.subr.bf16.mxu1 %v11955_v57  ;;  %4077 = vmatpush1.bf16.msra.mxu0 %v11950_v54 }
 0x145   :  { %v1522_v7 = vadd.f32 %v13567_v56, %v1443_v5  ;;  %v644_v8 = vpop.f32.mrb[48].mxu0  ;;  %v1037_v15 = vpop.f32.mrb[48].mxu1  ;;  %5042 = vmatpush1.bf16.msra.mxu1 %v11953_v0  ;;  %4078 = vmatprep.subr.bf16.mxu0 %v11958_v2  ;;  %v1593_v12 = vmax.f32 %v1521_v4, 0.0  ;;  %v11979_v0 = vld [vmem:[%s16498_s3 + $0x30c] ss:$16 sps:$4 sm:$0xff]  }
 0x146   :  { %v646_v10 = vpop.f32.mrb[49].mxu0  ;;  %v1039_v11 = vpop.f32.mrb[49].mxu1  ;;  %5043 = vmatprep.subr.bf16.mxu1 %v11961_v3  ;;  %v11982_v2 = vld [vmem:[%s16498_s3 + $0x324] ss:$16 sps:$4 sm:$0xff]   ;;  %v11977_v5 = vld [vmem:[%s16498_s3 + $0x308] ss:$16 sps:$4 sm:$0xff]  }
 0x147   :  { %v1594_v14 = vmax.f32 %v1522_v7, 0.0  ;;  %v1300_v17 = vmax.f32 %v644_v8, %v646_v10  ;;  %v1372_v18 = vmax.f32 %v1037_v15, %v1039_v11  ;;  %v648_v19 = vpop.f32.mrb[50].mxu0  ;;  %v1041_v20 = vpop.f32.mrb[50].mxu1  ;;  %v11985_v15 = vld [vmem:[%s16498_s3 + $0x32c] ss:$16 sps:$4 sm:$0xff]  }
 0x148   :  { %v650_v21 = vpop.f32.mrb[51].mxu0  ;;  %v1043_v22 = vpop.f32.mrb[51].mxu1  ;;  %4079 = vmatpush1.bf16.msra.mxu0 %v11956_v6 }
 0x149   :  { %v13759_v25 = vpack.c.bf16 %v1594_v14, %v1593_v12  ;;  %v1444_v26 = vmax.f32 %v1300_v17, %v1372_v18  ;;  %v1301_v27 = vmax.f32 %v648_v19, %v650_v21  ;;  %v1373_v29 = vmax.f32 %v1041_v20, %v1043_v22  ;;  %5044 = vmatpush1.bf16.msra.mxu1 %v11959_v9  ;;  %v11980_v22 = vld [vmem:[%s16498_s3 + $0x320] ss:$16 sps:$4 sm:$0xff]  }
 0x14a   :  { %3938 = vmatmul.mubr.bf16.gmra.mrb[156].mxu0 %v13611_v13  ;;  %4903 = vmatmul.mubr.bf16.gmra.mrb[156].mxu1 %v13611_v13 }
 0x14b   :  { %v1523_v36 = vadd.f32 %v13567_v56, %v1444_v26  ;;  %v1445_v37 = vmax.f32 %v1301_v27, %v1373_v29  ;;  %3947 = vmatprep.mubr.bf16.mxu0 %v13655_v38  ;;  %4912 = vmatprep.mubr.bf16.mxu1 %v13655_v38 }
 0x14c   :  { %4080 = vmatprep.subr.bf16.mxu0 %v11964_v23  ;;  %5045 = vmatprep.subr.bf16.mxu1 %v11967_v24  ;;  %v11983_v23 = vld [vmem:[%s16498_s3 + $0x328] ss:$16 sps:$4 sm:$0xff]  }
 0x14d   :  { %v1524_v39 = vadd.f32 %v13567_v56, %v1445_v37  ;;  %v654_v40 = vpop.f32.mrb[52].mxu0  ;;  %v1047_v41 = vpop.f32.mrb[52].mxu1  ;;  %4081 = vmatpush1.bf16.msra.mxu0 %v11962_v30  ;;  %5046 = vmatpush1.bf16.msra.mxu1 %v11965_v31  ;;  %v1595_v44 = vmax.f32 %v1523_v36, 0.0  ;;  %v11988_v30 = vld [vmem:[%s16498_s3 + $0x344] ss:$16 sps:$4 sm:$0xff]  }
 0x14e   :  { %v656_v42 = vpop.f32.mrb[53].mxu0  ;;  %v1049_v43 = vpop.f32.mrb[53].mxu1  ;;  %4082 = vmatprep.subr.bf16.mxu0 %v11970_v32  ;;  %5047 = vmatprep.subr.bf16.mxu1 %v11973_v33  ;;  %v11991_v31 = vld [vmem:[%s16498_s3 + $0x34c] ss:$16 sps:$4 sm:$0xff]   ;;  %v11986_v36 = vld [vmem:[%s16498_s3 + $0x340] ss:$16 sps:$4 sm:$0xff]  }
 0x14f   :  { %v1596_v45 = vmax.f32 %v1524_v39, 0.0  ;;  %v1302_v46 = vmax.f32 %v654_v40, %v656_v42  ;;  %v1374_v47 = vmax.f32 %v1047_v41, %v1049_v43  ;;  %v658_v48 = vpop.f32.mrb[54].mxu0  ;;  %v1051_v49 = vpop.f32.mrb[54].mxu1  ;;  %v11989_v37 = vld [vmem:[%s16498_s3 + $0x348] ss:$16 sps:$4 sm:$0xff]  }
 0x150   :  { %v660_v50 = vpop.f32.mrb[55].mxu0  ;;  %v1053_v51 = vpop.f32.mrb[55].mxu1 }
 0x151   :  { %v13788_v54 = vpack.c.bf16 %v1596_v45, %v1595_v44  ;;  %v1446_v57 = vmax.f32 %v1302_v46, %v1374_v47  ;;  %v1303_v59 = vmax.f32 %v658_v48, %v660_v50  ;;  %v1375_v61 = vmax.f32 %v1051_v49, %v1053_v51  ;;  %4083 = vmatpush1.bf16.msra.mxu0 %v11968_v35  ;;  %v11994_v35 = vld [vmem:[%s16498_s3 + $0x364] ss:$16 sps:$4 sm:$0xff]  }
 0x152   :  { %3948 = vmatmul.mubr.bf16.gmra.mrb[160].mxu0 %v13644_v16  ;;  %4913 = vmatmul.mubr.bf16.gmra.mrb[160].mxu1 %v13644_v16 }
 0x153   :  { %v1525_v3 = vadd.f32 %v13567_v56, %v1446_v57  ;;  %v1447_v4 = vmax.f32 %v1303_v59, %v1375_v61  ;;  %3957 = vmatprep.mubr.bf16.mxu0 %v13669_v62  ;;  %4922 = vmatprep.mubr.bf16.mxu1 %v13669_v62 }
 0x154   :  { %5048 = vmatpush1.bf16.msra.mxu1 %v11971_v52  ;;  %4084 = vmatprep.subr.bf16.mxu0 %v11976_v53  ;;  %v11992_v52 = vld [vmem:[%s16498_s3 + $0x360] ss:$16 sps:$4 sm:$0xff]   ;;  %v11997_v53 = vld [vmem:[%s16498_s3 + $0x36c] ss:$16 sps:$4 sm:$0xff]  }
 0x155   :  { %v1526_v6 = vadd.f32 %v13567_v56, %v1447_v4  ;;  %v664_v7 = vpop.f32.mrb[56].mxu0  ;;  %v1057_v8 = vpop.f32.mrb[56].mxu1  ;;  %5049 = vmatprep.subr.bf16.mxu1 %v11979_v0  ;;  %4085 = vmatpush1.bf16.msra.mxu0 %v11974_v63  ;;  %v1597_v11 = vmax.f32 %v1525_v3, 0.0  ;;  %v11995_v0 = vld [vmem:[%s16498_s3 + $0x368] ss:$16 sps:$4 sm:$0xff]  }
 0x156   :  { %v666_v9 = vpop.f32.mrb[57].mxu0  ;;  %v1059_v10 = vpop.f32.mrb[57].mxu1  ;;  %4086 = vmatprep.subr.bf16.mxu0 %v11982_v2  ;;  %v12000_v2 = vld [vmem:[%s16498_s3 + $0x384] ss:$16 sps:$4 sm:$0xff]   ;;  %v12003_v3 = vld [vmem:[%s16498_s3 + $0x38c] ss:$16 sps:$4 sm:$0xff]  }
 0x157   :  { %v1598_v12 = vmax.f32 %v1526_v6, 0.0  ;;  %v1304_v14 = vmax.f32 %v664_v7, %v666_v9  ;;  %v1376_v17 = vmax.f32 %v1057_v8, %v1059_v10  ;;  %v668_v18 = vpop.f32.mrb[58].mxu0  ;;  %v1061_v19 = vpop.f32.mrb[58].mxu1  ;;  %v11998_v6 = vld [vmem:[%s16498_s3 + $0x380] ss:$16 sps:$4 sm:$0xff]  }
 0x158   :  { %v670_v20 = vpop.f32.mrb[59].mxu0  ;;  %v1063_v21 = vpop.f32.mrb[59].mxu1  ;;  %5050 = vmatpush1.bf16.msra.mxu1 %v11977_v5  ;;  %v12001_v9 = vld [vmem:[%s16498_s3 + $0x388] ss:$16 sps:$4 sm:$0xff]  }
 0x159   :  { %v13817_v24 = vpack.c.bf16 %v1598_v12, %v1597_v11  ;;  %v1448_v26 = vmax.f32 %v1304_v14, %v1376_v17  ;;  %v1305_v27 = vmax.f32 %v668_v18, %v670_v20  ;;  %v1377_v29 = vmax.f32 %v1061_v19, %v1063_v21  ;;  %5051 = vmatprep.subr.bf16.mxu1 %v11985_v15 }
 0x15a   :  { %3958 = vmatmul.mubr.bf16.gmra.mrb[164].mxu0 %v13655_v38  ;;  %4923 = vmatmul.mubr.bf16.gmra.mrb[164].mxu1 %v13655_v38 }
 0x15b   :  { %v1527_v32 = vadd.f32 %v13567_v56, %v1448_v26  ;;  %v1449_v33 = vmax.f32 %v1305_v27, %v1377_v29  ;;  %3967 = vmatprep.mubr.bf16.mxu0 %v13701_v28  ;;  %4932 = vmatprep.mubr.bf16.mxu1 %v13701_v28  ;;  %v12009_v26 = vld [vmem:[%s16498_s3 + $0x3ac] ss:$16 sps:$4 sm:$0xff]  }
 0x15c   :  { %4087 = vmatpush1.bf16.msra.mxu0 %v11980_v22  ;;  %5052 = vmatpush1.bf16.msra.mxu1 %v11983_v23  ;;  %v12006_v23 = vld [vmem:[%s16498_s3 + $0x3a4] ss:$16 sps:$4 sm:$0xff]  }
 0x15d   :  { %v1528_v39 = vadd.f32 %v13567_v56, %v1449_v33  ;;  %v674_v40 = vpop.f32.mrb[60].mxu0  ;;  %v1067_v41 = vpop.f32.mrb[60].mxu1  ;;  %4088 = vmatprep.subr.bf16.mxu0 %v11988_v30  ;;  %5053 = vmatprep.subr.bf16.mxu1 %v11991_v31  ;;  %v1599_v44 = vmax.f32 %v1527_v32, 0.0  ;;  %v12004_v32 = vld [vmem:[%s16498_s3 + $0x3a0] ss:$16 sps:$4 sm:$0xff]  }
 0x15e   :  { %v676_v42 = vpop.f32.mrb[61].mxu0  ;;  %v1069_v43 = vpop.f32.mrb[61].mxu1  ;;  %v12007_v33 = vld [vmem:[%s16498_s3 + $0x3a8] ss:$16 sps:$4 sm:$0xff]  }
 0x15f   :  { %v1600_v45 = vmax.f32 %v1528_v39, 0.0  ;;  %v1306_v46 = vmax.f32 %v674_v40, %v676_v42  ;;  %v1378_v47 = vmax.f32 %v1067_v41, %v1069_v43  ;;  %v678_v48 = vpop.f32.mrb[62].mxu0  ;;  %v1071_v49 = vpop.f32.mrb[62].mxu1  ;;  %v12010_v43 = vld [vmem:[%s16498_s3 + $0x3c0] ss:$16 sps:$4 sm:$0xff]  }
 0x160   :  { %v680_v50 = vpop.f32.mrb[63].mxu0  ;;  %v1073_v51 = vpop.f32.mrb[63].mxu1  ;;  %4089 = vmatpush1.bf16.msra.mxu0 %v11986_v36  ;;  %5054 = vmatpush1.bf16.msra.mxu1 %v11989_v37  ;;  %v12012_v36 = vld [vmem:[%s16498_s3 + $0x3c4] ss:$16 sps:$4 sm:$0xff]   ;;  %v12015_v37 = vld [vmem:[%s16498_s3 + $0x3cc] ss:$16 sps:$4 sm:$0xff]  }
 0x161   :  { %v13846_v57 = vpack.c.bf16 %v1600_v45, %v1599_v44  ;;  %v1450_v59 = vmax.f32 %v1306_v46, %v1378_v47  ;;  %v1307_v61 = vmax.f32 %v678_v48, %v680_v50  ;;  %v1379_v63 = vmax.f32 %v1071_v49, %v1073_v51  ;;  %4090 = vmatprep.subr.bf16.mxu0 %v11994_v35 }
 0x162   :  { %3968 = vmatmul.mubr.bf16.gmra.mrb[168].mxu0 %v13669_v62  ;;  %4933 = vmatmul.mubr.bf16.gmra.mrb[168].mxu1 %v13669_v62 }
 0x163   :  { %v1529_v4 = vadd.f32 %v13567_v56, %v1450_v59  ;;  %v1451_v5 = vmax.f32 %v1307_v61, %v1379_v63  ;;  %3977 = vmatprep.mubr.bf16.mxu0 %v13730_v58  ;;  %4942 = vmatprep.mubr.bf16.mxu1 %v13730_v58  ;;  %v12018_v59 = vld [vmem:[%s16498_s3 + $0x3e4] ss:$16 sps:$4 sm:$0xff]  }
 0x164   :  { %5055 = vmatprep.subr.bf16.mxu1 %v11997_v53  ;;  %4091 = vmatpush1.bf16.msra.mxu0 %v11992_v52  ;;  %v12013_v53 = vld [vmem:[%s16498_s3 + $0x3c8] ss:$16 sps:$4 sm:$0xff]  }
 0x165   :  { %v1530_v7 = vadd.f32 %v13567_v56, %v1451_v5  ;;  %v684_v8 = vpop.f32.mrb[64].mxu0  ;;  %v1077_v15 = vpop.f32.mrb[64].mxu1  ;;  %5056 = vmatpush1.bf16.msra.mxu1 %v11995_v0  ;;  %4092 = vmatprep.subr.bf16.mxu0 %v12000_v2  ;;  %v1601_v12 = vmax.f32 %v1529_v4, 0.0  ;;  %v12021_v4 = vld [vmem:[%s16498_s3 + $0x3ec] ss:$16 sps:$4 sm:$0xff]  }
 0x166   :  { %v686_v10 = vpop.f32.mrb[65].mxu0  ;;  %v1079_v11 = vpop.f32.mrb[65].mxu1  ;;  %5057 = vmatprep.subr.bf16.mxu1 %v12003_v3  ;;  %v12016_v3 = vld [vmem:[%s16498_s3 + $0x3e0] ss:$16 sps:$4 sm:$0xff]   ;;  %v12024_v5 = vld [vmem:[%s16498_s3 + $0x404] ss:$16 sps:$4 sm:$0xff]  }
 0x167   :  { %v1602_v14 = vmax.f32 %v1530_v7, 0.0  ;;  %v1308_v17 = vmax.f32 %v684_v8, %v686_v10  ;;  %v1380_v18 = vmax.f32 %v1077_v15, %v1079_v11  ;;  %v688_v19 = vpop.f32.mrb[66].mxu0  ;;  %v1081_v20 = vpop.f32.mrb[66].mxu1  ;;  %v12019_v15 = vld [vmem:[%s16498_s3 + $0x3e8] ss:$16 sps:$4 sm:$0xff]  }
 0x168   :  { %v690_v21 = vpop.f32.mrb[67].mxu0  ;;  %v1083_v22 = vpop.f32.mrb[67].mxu1  ;;  %4093 = vmatpush1.bf16.msra.mxu0 %v11998_v6  ;;  %v13920_v6 = vld [vmem:[%s16499_s2] ss:$0 sm:$0xff] }
 0x169   :  { %v13875_v27 = vpack.c.bf16 %v1602_v14, %v1601_v12  ;;  %v1452_v29 = vmax.f32 %v1308_v17, %v1380_v18  ;;  %v1309_v30 = vmax.f32 %v688_v19, %v690_v21  ;;  %v1381_v31 = vmax.f32 %v1081_v20, %v1083_v22  ;;  %5058 = vmatpush1.bf16.msra.mxu1 %v12001_v9  ;;  %v12027_v12 = vld [vmem:[%s16498_s3 + $0x40c] ss:$16 sps:$4 sm:$0xff]  }
 0x16a   :  { %3978 = vmatmul.mubr.bf16.gmra.mrb[172].mxu0 %v13701_v28  ;;  %4943 = vmatmul.mubr.bf16.gmra.mrb[172].mxu1 %v13701_v28 }
 0x16b   :  { %v1531_v39 = vadd.f32 %v13567_v56, %v1452_v29  ;;  %v1453_v40 = vmax.f32 %v1309_v30, %v1381_v31  ;;  %3987 = vmatprep.mubr.bf16.mxu0 %v13817_v24  ;;  %4952 = vmatprep.mubr.bf16.mxu1 %v13817_v24 }
 0x16c   :  { %4094 = vmatprep.subr.bf16.mxu0 %v12006_v23  ;;  %5059 = vmatprep.subr.bf16.mxu1 %v12009_v26 }
 0x16d   :  { %v1532_v41 = vadd.f32 %v13567_v56, %v1453_v40  ;;  %v694_v35 = vpop.f32.mrb[68].mxu0  ;;  %v1087_v42 = vpop.f32.mrb[68].mxu1  ;;  %4095 = vmatpush1.bf16.msra.mxu0 %v12004_v32  ;;  %5060 = vmatpush1.bf16.msra.mxu1 %v12007_v33  ;;  %v1603_v46 = vmax.f32 %v1531_v39, 0.0 }
 0x16e   :  { %v696_v44 = vpop.f32.mrb[69].mxu0  ;;  %v1089_v45 = vpop.f32.mrb[69].mxu1  ;;  %4096 = vmatprep.subr.bf16.mxu0 %v12012_v36  ;;  %5061 = vmatprep.subr.bf16.mxu1 %v12015_v37 }
 0x16f   :  { %v1604_v47 = vmax.f32 %v1532_v41, 0.0  ;;  %v1310_v48 = vmax.f32 %v694_v35, %v696_v44  ;;  %v1382_v49 = vmax.f32 %v1087_v42, %v1089_v45  ;;  %v698_v50 = vpop.f32.mrb[70].mxu0  ;;  %v1091_v51 = vpop.f32.mrb[70].mxu1 }
 0x170   :  { %v700_v52 = vpop.f32.mrb[71].mxu0  ;;  %v1093_v56 = vpop.f32.mrb[71].mxu1 }
 0x171   :  { %v13904_v61 = vpack.c.bf16 %v1604_v47, %v1603_v46  ;;  %v1454_v63 = vmax.f32 %v1310_v48, %v1382_v49  ;;  %v1311_v0 = vmax.f32 %v698_v50, %v700_v52  ;;  %v1383_v2 = vmax.f32 %v1091_v51, %v1093_v56  ;;  %4097 = vmatpush1.bf16.msra.mxu0 %v12010_v43 }
 0x172   :  { %3988 = vmatmul.mubr.bf16.gmra.mrb[176].mxu0 %v13788_v54  ;;  %4953 = vmatmul.mubr.bf16.gmra.mrb[176].mxu1 %v13788_v54 }
 0x173   :  { %v1533_v7 = vadd.f32 %v13920_v6, %v1454_v63  ;;  %v1455_v8 = vmax.f32 %v1311_v0, %v1383_v2  ;;  %3997 = vmatprep.mubr.bf16.mxu0 %v13846_v57  ;;  %4962 = vmatprep.mubr.bf16.mxu1 %v13846_v57 }
 0x174   :  { %5062 = vmatpush1.bf16.msra.mxu1 %v12013_v53  ;;  %4098 = vmatprep.subr.bf16.mxu0 %v12018_v59 }
 0x175   :  { %v1534_v9 = vadd.f32 %v13920_v6, %v1455_v8  ;;  %v704_v10 = vpop.f32.mrb[72].mxu0  ;;  %v1097_v11 = vpop.f32.mrb[72].mxu1  ;;  %5063 = vmatprep.subr.bf16.mxu1 %v12021_v4  ;;  %4099 = vmatpush1.bf16.msra.mxu0 %v12016_v3  ;;  %v1605_v18 = vmax.f32 %v1533_v7, 0.0 }
 0x176   :  { %v706_v14 = vpop.f32.mrb[73].mxu0  ;;  %v1099_v17 = vpop.f32.mrb[73].mxu1  ;;  %4261 = vmatprep.subr.bf16.mxu0 %v12024_v5 }
 0x177   :  { %v1606_v19 = vmax.f32 %v1534_v9, 0.0  ;;  %v1312_v20 = vmax.f32 %v704_v10, %v706_v14  ;;  %v1384_v21 = vmax.f32 %v1097_v11, %v1099_v17  ;;  %v708_v22 = vpop.f32.mrb[74].mxu0  ;;  %v1101_v23 = vpop.f32.mrb[74].mxu1 }
 0x178   :  { %v710_v26 = vpop.f32.mrb[75].mxu0  ;;  %v1103_v29 = vpop.f32.mrb[75].mxu1  ;;  %5064 = vmatpush1.bf16.msra.mxu1 %v12019_v15 }
 0x179   :  { %v13932_v30 = vpack.c.bf16 %v1606_v19, %v1605_v18  ;;  %v1456_v31 = vmax.f32 %v1312_v20, %v1384_v21  ;;  %v1313_v32 = vmax.f32 %v708_v22, %v710_v26  ;;  %v1385_v33 = vmax.f32 %v1101_v23, %v1103_v29  ;;  %5226 = vmatprep.subr.bf16.mxu1 %v12027_v12 }
 0x17a   :  { %3998 = vmatmul.mubr.bf16.gmra.mrb[180].mxu0 %v13817_v24  ;;  %4963 = vmatmul.mubr.bf16.gmra.mrb[180].mxu1 %v13817_v24 }
 0x17b   :  { %v1535_v36 = vadd.f32 %v13920_v6, %v1456_v31  ;;  %v1457_v37 = vmax.f32 %v1313_v32, %v1385_v33  ;;  %4007 = vmatprep.mubr.bf16.mxu0 %v13875_v27  ;;  %4972 = vmatprep.mubr.bf16.mxu1 %v13875_v27 }
 0x17d   :  { %v1536_v39 = vadd.f32 %v13920_v6, %v1457_v37  ;;  %v714_v40 = vpop.f32.mrb[76].mxu0  ;;  %v1107_v41 = vpop.f32.mrb[76].mxu1  ;;  %v1607_v43 = vmax.f32 %v1535_v36, 0.0 }
 0x17e   :  { %v716_v35 = vpop.f32.mrb[77].mxu0  ;;  %v1109_v42 = vpop.f32.mrb[77].mxu1 }
 0x17f   :  { %v1608_v44 = vmax.f32 %v1536_v39, 0.0  ;;  %v1314_v45 = vmax.f32 %v714_v40, %v716_v35  ;;  %v1386_v46 = vmax.f32 %v1107_v41, %v1109_v42  ;;  %v718_v47 = vpop.f32.mrb[78].mxu0  ;;  %v1111_v48 = vpop.f32.mrb[78].mxu1 }
 0x180   :  { %v720_v49 = vpop.f32.mrb[79].mxu0  ;;  %v1113_v50 = vpop.f32.mrb[79].mxu1 }
 0x181   :  { %v13940_v51 = vpack.c.bf16 %v1608_v44, %v1607_v43  ;;  %v1458_v52 = vmax.f32 %v1314_v45, %v1386_v46  ;;  %v1315_v56 = vmax.f32 %v718_v47, %v720_v49  ;;  %v1387_v53 = vmax.f32 %v1111_v48, %v1113_v50 }
 0x182   :  { %4008 = vmatmul.mubr.bf16.gmra.mrb[184].mxu0 %v13846_v57  ;;  %4973 = vmatmul.mubr.bf16.gmra.mrb[184].mxu1 %v13846_v57 }
 0x183   :  { %v1537_v59 = vadd.f32 %v13920_v6, %v1458_v52  ;;  %v1459_v63 = vmax.f32 %v1315_v56, %v1387_v53  ;;  %4017 = vmatprep.mubr.bf16.mxu0 %v13904_v61  ;;  %4982 = vmatprep.mubr.bf16.mxu1 %v13904_v61 }
 0x185   :  { %v1538_v0 = vadd.f32 %v13920_v6, %v1459_v63  ;;  %v724_v2 = vpop.f32.mrb[80].mxu0  ;;  %v1117_v3 = vpop.f32.mrb[80].mxu1  ;;  %v1609_v7 = vmax.f32 %v1537_v59, 0.0 }
 0x186   :  { %v726_v4 = vpop.f32.mrb[81].mxu0  ;;  %v1119_v5 = vpop.f32.mrb[81].mxu1 }
 0x187   :  { %v1610_v8 = vmax.f32 %v1538_v0, 0.0  ;;  %v1316_v15 = vmax.f32 %v724_v2, %v726_v4  ;;  %v1388_v9 = vmax.f32 %v1117_v3, %v1119_v5  ;;  %v728_v10 = vpop.f32.mrb[82].mxu0  ;;  %v1121_v11 = vpop.f32.mrb[82].mxu1 }
 0x188   :  { %v730_v12 = vpop.f32.mrb[83].mxu0  ;;  %v1123_v14 = vpop.f32.mrb[83].mxu1 }
 0x189   :  { %v13948_v17 = vpack.c.bf16 %v1610_v8, %v1609_v7  ;;  %v1460_v18 = vmax.f32 %v1316_v15, %v1388_v9  ;;  %v1317_v19 = vmax.f32 %v728_v10, %v730_v12  ;;  %v1389_v20 = vmax.f32 %v1121_v11, %v1123_v14 }
 0x18a   :  { %4018 = vmatmul.mubr.bf16.gmra.mrb[188].mxu0 %v13875_v27  ;;  %4983 = vmatmul.mubr.bf16.gmra.mrb[188].mxu1 %v13875_v27 }
 0x18b   :  { %v1539_v21 = vadd.f32 %v13920_v6, %v1460_v18  ;;  %v1461_v22 = vmax.f32 %v1317_v19, %v1389_v20  ;;  %4027 = vmatprep.mubr.bf16.mxu0 %v13948_v17  ;;  %4992 = vmatprep.mubr.bf16.mxu1 %v13948_v17 }
 0x18d   :  { %v1540_v23 = vadd.f32 %v13920_v6, %v1461_v22  ;;  %v734_v26 = vpop.f32.mrb[84].mxu0  ;;  %v1127_v29 = vpop.f32.mrb[84].mxu1  ;;  %v1611_v33 = vmax.f32 %v1539_v21, 0.0 }
 0x18e   :  { %v736_v31 = vpop.f32.mrb[85].mxu0  ;;  %v1129_v32 = vpop.f32.mrb[85].mxu1 }
 0x18f   :  { %v1612_v36 = vmax.f32 %v1540_v23, 0.0  ;;  %v1318_v37 = vmax.f32 %v734_v26, %v736_v31  ;;  %v1390_v39 = vmax.f32 %v1127_v29, %v1129_v32  ;;  %v738_v40 = vpop.f32.mrb[86].mxu0  ;;  %v1131_v41 = vpop.f32.mrb[86].mxu1 }
 0x190   :  { %v740_v35 = vpop.f32.mrb[87].mxu0  ;;  %v1133_v42 = vpop.f32.mrb[87].mxu1 }
 0x191   :  { %v13956_v43 = vpack.c.bf16 %v1612_v36, %v1611_v33  ;;  %v1462_v44 = vmax.f32 %v1318_v37, %v1390_v39  ;;  %v1319_v45 = vmax.f32 %v738_v40, %v740_v35  ;;  %v1391_v46 = vmax.f32 %v1131_v41, %v1133_v42 }
 0x192   :  { %4028 = vmatmul.mubr.bf16.gmra.mrb[192].mxu0 %v13940_v51  ;;  %4993 = vmatmul.mubr.bf16.gmra.mrb[192].mxu1 %v13940_v51 }
 0x193   :  { %v1541_v47 = vadd.f32 %v13920_v6, %v1462_v44  ;;  %v1463_v48 = vmax.f32 %v1319_v45, %v1391_v46  ;;  %4037 = vmatprep.mubr.bf16.mxu0 %v13956_v43  ;;  %5002 = vmatprep.mubr.bf16.mxu1 %v13956_v43 }
 0x195   :  { %v1542_v49 = vadd.f32 %v13920_v6, %v1463_v48  ;;  %v744_v50 = vpop.f32.mrb[88].mxu0  ;;  %v1137_v52 = vpop.f32.mrb[88].mxu1  ;;  %v1613_v59 = vmax.f32 %v1541_v47, 0.0 }
 0x196   :  { %v746_v56 = vpop.f32.mrb[89].mxu0  ;;  %v1139_v53 = vpop.f32.mrb[89].mxu1 }
 0x197   :  { %v1614_v63 = vmax.f32 %v1542_v49, 0.0  ;;  %v1320_v0 = vmax.f32 %v744_v50, %v746_v56  ;;  %v1392_v2 = vmax.f32 %v1137_v52, %v1139_v53  ;;  %v748_v3 = vpop.f32.mrb[90].mxu0  ;;  %v1141_v4 = vpop.f32.mrb[90].mxu1 }
 0x198   :  { %v750_v5 = vpop.f32.mrb[91].mxu0  ;;  %v1143_v7 = vpop.f32.mrb[91].mxu1 }
 0x199   :  { %v13964_v8 = vpack.c.bf16 %v1614_v63, %v1613_v59  ;;  %v1464_v15 = vmax.f32 %v1320_v0, %v1392_v2  ;;  %v1321_v9 = vmax.f32 %v748_v3, %v750_v5  ;;  %v1393_v10 = vmax.f32 %v1141_v4, %v1143_v7 }
 0x19a   :  { %4038 = vmatmul.mubr.bf16.gmra.mrb[196].mxu0 %v13948_v17  ;;  %5003 = vmatmul.mubr.bf16.gmra.mrb[196].mxu1 %v13948_v17 }
 0x19b   :  { %v1543_v11 = vadd.f32 %v13920_v6, %v1464_v15  ;;  %v1465_v12 = vmax.f32 %v1321_v9, %v1393_v10  ;;  %4047 = vmatprep.mubr.bf16.mxu0 %v13964_v8  ;;  %5012 = vmatprep.mubr.bf16.mxu1 %v13964_v8 }
 0x19d   :  { %v1544_v14 = vadd.f32 %v13920_v6, %v1465_v12  ;;  %v754_v18 = vpop.f32.mrb[92].mxu0  ;;  %v1147_v19 = vpop.f32.mrb[92].mxu1  ;;  %v1615_v22 = vmax.f32 %v1543_v11, 0.0 }
 0x19e   :  { %v756_v20 = vpop.f32.mrb[93].mxu0  ;;  %v1149_v21 = vpop.f32.mrb[93].mxu1 }
 0x19f   :  { %v1616_v23 = vmax.f32 %v1544_v14, 0.0  ;;  %v1322_v26 = vmax.f32 %v754_v18, %v756_v20  ;;  %v1394_v29 = vmax.f32 %v1147_v19, %v1149_v21  ;;  %v758_v31 = vpop.f32.mrb[94].mxu0  ;;  %v1151_v32 = vpop.f32.mrb[94].mxu1 }
 0x1a0   :  { %v760_v33 = vpop.f32.mrb[95].mxu0  ;;  %v1153_v36 = vpop.f32.mrb[95].mxu1 }
 0x1a1   :  { %v13972_v37 = vpack.c.bf16 %v1616_v23, %v1615_v22  ;;  %v1466_v39 = vmax.f32 %v1322_v26, %v1394_v29  ;;  %v1323_v40 = vmax.f32 %v758_v31, %v760_v33  ;;  %v1395_v41 = vmax.f32 %v1151_v32, %v1153_v36  ;;  %v12022_v26 = vld [vmem:[%s16498_s3 + $0x400] ss:$16 sps:$4 sm:$0xff]  }
 0x1a2   :  { %4048 = vmatmul.mubr.bf16.gmra.mrb[200].mxu0 %v13956_v43  ;;  %5013 = vmatmul.mubr.bf16.gmra.mrb[200].mxu1 %v13956_v43 }
 0x1a3   :  { %v1545_v35 = vadd.f32 %v13920_v6, %v1466_v39  ;;  %v1467_v42 = vmax.f32 %v1323_v40, %v1395_v41  ;;  %4057 = vmatprep.mubr.bf16.mxu0 %v13972_v37  ;;  %5022 = vmatprep.mubr.bf16.mxu1 %v13972_v37  ;;  %v12030_v40 = vld [vmem:[%s16498_s3 + $0x424] ss:$16 sps:$4 sm:$0xff]   ;;  %v12033_v41 = vld [vmem:[%s16498_s3 + $0x42c] ss:$16 sps:$4 sm:$0xff]  }
 0x1a5   :  { %v1546_v44 = vadd.f32 %v13920_v6, %v1467_v42  ;;  %v764_v45 = vpop.f32.mrb[96].mxu0  ;;  %v1157_v46 = vpop.f32.mrb[96].mxu1  ;;  %v1617_v49 = vmax.f32 %v1545_v35, 0.0 }
 0x1a6   :  { %v766_v47 = vpop.f32.mrb[97].mxu0  ;;  %v1159_v48 = vpop.f32.mrb[97].mxu1 }
 0x1a7   :  { %v1618_v50 = vmax.f32 %v1546_v44, 0.0  ;;  %v1324_v52 = vmax.f32 %v764_v45, %v766_v47  ;;  %v1396_v56 = vmax.f32 %v1157_v46, %v1159_v48  ;;  %v768_v53 = vpop.f32.mrb[98].mxu0  ;;  %v1161_v59 = vpop.f32.mrb[98].mxu1  ;;  %v12028_v44 = vld [vmem:[%s16498_s3 + $0x420] ss:$16 sps:$4 sm:$0xff]  }
 0x1a8   :  { %v770_v63 = vpop.f32.mrb[99].mxu0  ;;  %v1163_v0 = vpop.f32.mrb[99].mxu1  ;;  %v12031_v45 = vld [vmem:[%s16498_s3 + $0x428] ss:$16 sps:$4 sm:$0xff]  }
 0x1a9   :  { %v13980_v2 = vpack.c.bf16 %v1618_v50, %v1617_v49  ;;  %v1468_v3 = vmax.f32 %v1324_v52, %v1396_v56  ;;  %v1325_v4 = vmax.f32 %v768_v53, %v770_v63  ;;  %v1397_v5 = vmax.f32 %v1161_v59, %v1163_v0  ;;  %v12039_v49 = vld [vmem:[%s16498_s3 + $0x44c] ss:$16 sps:$4 sm:$0xff]  }
 0x1aa   :  { %4058 = vmatmul.mubr.bf16.gmra.mrb[204].mxu0 %v13964_v8  ;;  %5023 = vmatmul.mubr.bf16.gmra.mrb[204].mxu1 %v13964_v8 }
 0x1ab   :  { %v1547_v7 = vadd.f32 %v13920_v6, %v1468_v3  ;;  %v1469_v15 = vmax.f32 %v1325_v4, %v1397_v5  ;;  %4100 = vmatprep.mubr.bf16.mxu0 %v13644_v16  ;;  %5065 = vmatprep.mubr.bf16.mxu1 %v13644_v16  ;;  %v12025_v16 = vld [vmem:[%s16498_s3 + $0x408] ss:$16 sps:$4 sm:$0xff]  }
 0x1ad   :  { %v1548_v9 = vadd.f32 %v13920_v6, %v1469_v15  ;;  %v774_v10 = vpop.f32.mrb[100].mxu0  ;;  %v1167_v11 = vpop.f32.mrb[100].mxu1  ;;  %v1619_v18 = vmax.f32 %v1547_v7, 0.0  ;;  %v12034_v7 = vld [vmem:[%s16498_s3 + $0x440] ss:$16 sps:$4 sm:$0xff]  }
 0x1ae   :  { %v776_v12 = vpop.f32.mrb[101].mxu0  ;;  %v1169_v14 = vpop.f32.mrb[101].mxu1  ;;  %v12037_v15 = vld [vmem:[%s16498_s3 + $0x448] ss:$16 sps:$4 sm:$0xff]  }
 0x1af   :  { %v1620_v19 = vmax.f32 %v1548_v9, 0.0  ;;  %v1326_v20 = vmax.f32 %v774_v10, %v776_v12  ;;  %v1398_v21 = vmax.f32 %v1167_v11, %v1169_v14  ;;  %v778_v22 = vpop.f32.mrb[102].mxu0  ;;  %v1171_v23 = vpop.f32.mrb[102].mxu1  ;;  %v12042_v14 = vld [vmem:[%s16498_s3 + $0x464] ss:$16 sps:$4 sm:$0xff]  }
 0x1b0   :  { %v780_v29 = vpop.f32.mrb[103].mxu0  ;;  %v1173_v31 = vpop.f32.mrb[103].mxu1 }
 0x1b1   :  { %v13994_v32 = vpack.c.bf16 %v1620_v19, %v1619_v18  ;;  %v1470_v33 = vmax.f32 %v1326_v20, %v1398_v21  ;;  %v1327_v36 = vmax.f32 %v778_v22, %v780_v29  ;;  %v1399_v39 = vmax.f32 %v1171_v23, %v1173_v31  ;;  %v12045_v18 = vld [vmem:[%s16498_s3 + $0x46c] ss:$16 sps:$4 sm:$0xff]   ;;  %v12040_v21 = vld [vmem:[%s16498_s3 + $0x460] ss:$16 sps:$4 sm:$0xff]   ;;  %v12043_v22 = vld [vmem:[%s16498_s3 + $0x468] ss:$16 sps:$4 sm:$0xff]  }
 0x1b2   :  { %4101 = vmatmul.mubr.bf16.vlgmr.msra.gmra.mrb[144].mxu0 %v13600_v55  ;;  %5066 = vmatmul.mubr.bf16.vlgmr.msra.gmra.mrb[144].mxu1 %v13600_v55  ;;  %v12036_v55 = vld [vmem:[%s16498_s3 + $0x444] ss:$16 sps:$4 sm:$0xff]  }
 0x1b3   :  { %v1549_v35 = vadd.f32 %v13920_v6, %v1470_v33  ;;  %v1471_v42 = vmax.f32 %v1327_v36, %v1399_v39  ;;  %4110 = vmatprep.mubr.bf16.mxu0 %v13655_v38  ;;  %4262 = vmatpush1.bf16.msra.mxu0 %v12022_v26  ;;  %v12048_v29 = vld [vmem:[%s16498_s3 + $0x484] ss:$16 sps:$4 sm:$0xff]  }
 0x1b4   :  { %5075 = vmatprep.mubr.bf16.mxu1 %v13655_v38  ;;  %5227 = vmatpush1.bf16.msra.mxu1 %v12025_v16 }
 0x1b5   :  { %v1550_v46 = vadd.f32 %v13920_v6, %v1471_v42  ;;  %v784_v47 = vpop.f32.mrb[104].mxu0  ;;  %v1177_v48 = vpop.f32.mrb[104].mxu1  ;;  %4263 = vmatprep.subr.bf16.mxu0 %v12030_v40  ;;  %5228 = vmatprep.subr.bf16.mxu1 %v12033_v41  ;;  %v1621_v56 = vmax.f32 %v1549_v35, 0.0 }
 0x1b6   :  { %v786_v50 = vpop.f32.mrb[105].mxu0  ;;  %v1179_v52 = vpop.f32.mrb[105].mxu1 }
 0x1b7   :  { %v1622_v53 = vmax.f32 %v1550_v46, 0.0  ;;  %v1328_v59 = vmax.f32 %v784_v47, %v786_v50  ;;  %v1400_v63 = vmax.f32 %v1177_v48, %v1179_v52  ;;  %v788_v0 = vpop.f32.mrb[106].mxu0  ;;  %v1181_v3 = vpop.f32.mrb[106].mxu1  ;;  %4264 = vmatpush1.bf16.msra.mxu0 %v12028_v44  ;;  %v12049_v50 = vld [vmem:[%s16498_s3 + $0x488] ss:$16 sps:$4 sm:$0xff]  }
 0x1b8   :  { %v790_v4 = vpop.f32.mrb[107].mxu0  ;;  %v1183_v5 = vpop.f32.mrb[107].mxu1  ;;  %5229 = vmatpush1.bf16.msra.mxu1 %v12031_v45  ;;  %4265 = vmatprep.subr.bf16.mxu0 %v12036_v55  ;;  %v12046_v45 = vld [vmem:[%s16498_s3 + $0x480] ss:$16 sps:$4 sm:$0xff]   ;;  %v12051_v55 = vld [vmem:[%s16498_s3 + $0x48c] ss:$16 sps:$4 sm:$0xff]  }
 0x1b9   :  { %v14026_v9 = vpack.c.bf16 %v1622_v53, %v1621_v56  ;;  %v1472_v10 = vmax.f32 %v1328_v59, %v1400_v63  ;;  %v1329_v11 = vmax.f32 %v788_v0, %v790_v4  ;;  %v1401_v12 = vmax.f32 %v1181_v3, %v1183_v5  ;;  %5230 = vmatprep.subr.bf16.mxu1 %v12039_v49  ;;  %v12054_v52 = vld [vmem:[%s16498_s3 + $0x4a4] ss:$16 sps:$4 sm:$0xff]   ;;  %v12057_v56 = vld [vmem:[%s16498_s3 + $0x4ac] ss:$16 sps:$4 sm:$0xff]   ;;  %v12052_v63 = vld [vmem:[%s16498_s3 + $0x4a0] ss:$16 sps:$4 sm:$0xff]  }
 0x1ba   :  { %4111 = vmatmul.mubr.bf16.gmra.mrb[148].mxu0 %v13611_v13  ;;  %5076 = vmatmul.mubr.bf16.gmra.mrb[148].mxu1 %v13611_v13  ;;  %v12055_v4 = vld [vmem:[%s16498_s3 + $0x4a8] ss:$16 sps:$4 sm:$0xff]  }
 0x1bb   :  { %v1551_v19 = vadd.f32 %v13920_v6, %v1472_v10  ;;  %v1473_v20 = vmax.f32 %v1329_v11, %v1401_v12  ;;  %4120 = vmatprep.mubr.bf16.mxu0 %v13669_v62  ;;  %5085 = vmatprep.mubr.bf16.mxu1 %v13669_v62 }
 0x1bc   :  { %4266 = vmatpush1.bf16.msra.mxu0 %v12034_v7  ;;  %5231 = vmatpush1.bf16.msra.mxu1 %v12037_v15 }
 0x1bd   :  { %v1552_v23 = vadd.f32 %v13920_v6, %v1473_v20  ;;  %v794_v13 = vpop.f32.mrb[108].mxu0  ;;  %v1187_v26 = vpop.f32.mrb[108].mxu1  ;;  %4267 = vmatprep.subr.bf16.mxu0 %v12042_v14  ;;  %5232 = vmatprep.subr.bf16.mxu1 %v12045_v18  ;;  %v1623_v33 = vmax.f32 %v1551_v19, 0.0 }
 0x1be   :  { %v796_v31 = vpop.f32.mrb[109].mxu0  ;;  %v1189_v16 = vpop.f32.mrb[109].mxu1 }
 0x1bf   :  { %v1624_v36 = vmax.f32 %v1552_v23, 0.0  ;;  %v1330_v39 = vmax.f32 %v794_v13, %v796_v31  ;;  %v1402_v40 = vmax.f32 %v1187_v26, %v1189_v16  ;;  %v798_v41 = vpop.f32.mrb[110].mxu0  ;;  %v1191_v35 = vpop.f32.mrb[110].mxu1  ;;  %v12058_v31 = vld [vmem:[%s16498_s3 + $0x4c0] ss:$16 sps:$4 sm:$0xff]  }
 0x1c0   :  { %v800_v42 = vpop.f32.mrb[111].mxu0  ;;  %v1193_v44 = vpop.f32.mrb[111].mxu1  ;;  %4268 = vmatpush1.bf16.msra.mxu0 %v12040_v21  ;;  %5233 = vmatpush1.bf16.msra.mxu1 %v12043_v22  ;;  %v12060_v21 = vld [vmem:[%s16498_s3 + $0x4c4] ss:$16 sps:$4 sm:$0xff]   ;;  %v12063_v22 = vld [vmem:[%s16498_s3 + $0x4cc] ss:$16 sps:$4 sm:$0xff]  }
 0x1c1   :  { %v14055_v46 = vpack.c.bf16 %v1624_v36, %v1623_v33  ;;  %v1474_v47 = vmax.f32 %v1330_v39, %v1402_v40  ;;  %v1331_v48 = vmax.f32 %v798_v41, %v800_v42  ;;  %v1403_v49 = vmax.f32 %v1191_v35, %v1193_v44  ;;  %4269 = vmatprep.subr.bf16.mxu0 %v12048_v29  ;;  %v12061_v16 = vld [vmem:[%s16498_s3 + $0x4c8] ss:$16 sps:$4 sm:$0xff]   ;;  %v12066_v33 = vld [vmem:[%s16498_s3 + $0x4e4] ss:$16 sps:$4 sm:$0xff]   ;;  %v12069_v36 = vld [vmem:[%s16498_s3 + $0x4ec] ss:$16 sps:$4 sm:$0xff]  }
 0x1c2   :  { %4121 = vmatmul.mubr.bf16.gmra.mrb[152].mxu0 %v13622_v34  ;;  %5086 = vmatmul.mubr.bf16.gmra.mrb[152].mxu1 %v13622_v34  ;;  %v12064_v42 = vld [vmem:[%s16498_s3 + $0x4e0] ss:$16 sps:$4 sm:$0xff]  }
 0x1c3   :  { %v1553_v53 = vadd.f32 %v13920_v6, %v1474_v47  ;;  %v1475_v59 = vmax.f32 %v1331_v48, %v1403_v49  ;;  %4130 = vmatprep.mubr.bf16.mxu0 %v13701_v28  ;;  %5095 = vmatprep.mubr.bf16.mxu1 %v13701_v28 }
 0x1c4   :  { %5234 = vmatprep.subr.bf16.mxu1 %v12051_v55  ;;  %4270 = vmatpush1.bf16.msra.mxu0 %v12046_v45 }
 0x1c5   :  { %v1554_v0 = vadd.f32 %v13920_v6, %v1475_v59  ;;  %v804_v34 = vpop.f32.mrb[112].mxu0  ;;  %v1197_v3 = vpop.f32.mrb[112].mxu1  ;;  %5235 = vmatpush1.bf16.msra.mxu1 %v12049_v50  ;;  %4271 = vmatprep.subr.bf16.mxu0 %v12054_v52  ;;  %v1625_v15 = vmax.f32 %v1553_v53, 0.0  ;;  %v12067_v59 = vld [vmem:[%s16498_s3 + $0x4e8] ss:$16 sps:$4 sm:$0xff]  }
 0x1c6   :  { %v806_v5 = vpop.f32.mrb[113].mxu0  ;;  %v1199_v7 = vpop.f32.mrb[113].mxu1  ;;  %5236 = vmatprep.subr.bf16.mxu1 %v12057_v56 }
 0x1c7   :  { %v1626_v10 = vmax.f32 %v1554_v0, 0.0  ;;  %v1332_v11 = vmax.f32 %v804_v34, %v806_v5  ;;  %v1404_v12 = vmax.f32 %v1197_v3, %v1199_v7  ;;  %v808_v14 = vpop.f32.mrb[114].mxu0  ;;  %v1201_v18 = vpop.f32.mrb[114].mxu1  ;;  %v12070_v5 = vld [vmem:[%s16498_s3 + $0x500] ss:$16 sps:$4 sm:$0xff]  }
 0x1c8   :  { %v810_v19 = vpop.f32.mrb[115].mxu0  ;;  %v1203_v20 = vpop.f32.mrb[115].mxu1  ;;  %4272 = vmatpush1.bf16.msra.mxu0 %v12052_v63  ;;  %v12072_v63 = vld [vmem:[%s16498_s3 + $0x504] ss:$16 sps:$4 sm:$0xff]   ;;  %v12075_v7 = vld [vmem:[%s16498_s3 + $0x50c] ss:$16 sps:$4 sm:$0xff]  }
 0x1c9   :  { %v14084_v23 = vpack.c.bf16 %v1626_v10, %v1625_v15  ;;  %v1476_v13 = vmax.f32 %v1332_v11, %v1404_v12  ;;  %v1333_v26 = vmax.f32 %v808_v14, %v810_v19  ;;  %v1405_v29 = vmax.f32 %v1201_v18, %v1203_v20  ;;  %5237 = vmatpush1.bf16.msra.mxu1 %v12055_v4  ;;  %v12078_v15 = vld [vmem:[%s16498_s3 + $0x524] ss:$16 sps:$4 sm:$0xff]   ;;  %v12073_v12 = vld [vmem:[%s16498_s3 + $0x508] ss:$16 sps:$4 sm:$0xff]   ;;  %v12081_v20 = vld [vmem:[%s16498_s3 + $0x52c] ss:$16 sps:$4 sm:$0xff]  }
 0x1ca   :  { %4131 = vmatmul.mubr.bf16.gmra.mrb[156].mxu0 %v13633_v60  ;;  %5096 = vmatmul.mubr.bf16.gmra.mrb[156].mxu1 %v13633_v60 }
 0x1cb   :  { %v1555_v39 = vadd.f32 %v13920_v6, %v1476_v13  ;;  %v1477_v40 = vmax.f32 %v1333_v26, %v1405_v29  ;;  %4140 = vmatprep.mubr.bf16.mxu0 %v13788_v54  ;;  %5105 = vmatprep.mubr.bf16.mxu1 %v13788_v54 }
 0x1cc   :  { %4273 = vmatprep.subr.bf16.mxu0 %v12060_v21  ;;  %5238 = vmatprep.subr.bf16.mxu1 %v12063_v22 }
 0x1cd   :  { %v1556_v41 = vadd.f32 %v13920_v6, %v1477_v40  ;;  %v814_v60 = vpop.f32.mrb[116].mxu0  ;;  %v1207_v35 = vpop.f32.mrb[116].mxu1  ;;  %4274 = vmatpush1.bf16.msra.mxu0 %v12058_v31  ;;  %5239 = vmatpush1.bf16.msra.mxu1 %v12061_v16  ;;  %v1627_v55 = vmax.f32 %v1555_v39, 0.0  ;;  %v12076_v40 = vld [vmem:[%s16498_s3 + $0x520] ss:$16 sps:$4 sm:$0xff]  }
 0x1ce   :  { %v816_v44 = vpop.f32.mrb[117].mxu0  ;;  %v1209_v45 = vpop.f32.mrb[117].mxu1  ;;  %4275 = vmatprep.subr.bf16.mxu0 %v12066_v33  ;;  %5240 = vmatprep.subr.bf16.mxu1 %v12069_v36 }
 0x1cf   :  { %v1628_v47 = vmax.f32 %v1556_v41, 0.0  ;;  %v1334_v48 = vmax.f32 %v814_v60, %v816_v44  ;;  %v1406_v49 = vmax.f32 %v1207_v35, %v1209_v45  ;;  %v818_v50 = vpop.f32.mrb[118].mxu0  ;;  %v1211_v52 = vpop.f32.mrb[118].mxu1  ;;  %v12079_v41 = vld [vmem:[%s16498_s3 + $0x528] ss:$16 sps:$4 sm:$0xff]  }
 0x1d0   :  { %v820_v56 = vpop.f32.mrb[119].mxu0  ;;  %v1213_v53 = vpop.f32.mrb[119].mxu1  ;;  %v12084_v45 = vld [vmem:[%s16498_s3 + $0x544] ss:$16 sps:$4 sm:$0xff]  }
 0x1d1   :  { %v14113_v0 = vpack.c.bf16 %v1628_v47, %v1627_v55  ;;  %v1478_v34 = vmax.f32 %v1334_v48, %v1406_v49  ;;  %v1335_v3 = vmax.f32 %v818_v50, %v820_v56  ;;  %v1407_v4 = vmax.f32 %v1211_v52, %v1213_v53  ;;  %4276 = vmatpush1.bf16.msra.mxu0 %v12064_v42  ;;  %v12087_v55 = vld [vmem:[%s16498_s3 + $0x54c] ss:$16 sps:$4 sm:$0xff]   ;;  %v12082_v49 = vld [vmem:[%s16498_s3 + $0x540] ss:$16 sps:$4 sm:$0xff]   ;;  %v12085_v50 = vld [vmem:[%s16498_s3 + $0x548] ss:$16 sps:$4 sm:$0xff]  }
 0x1d2   :  { %4141 = vmatmul.mubr.bf16.gmra.mrb[160].mxu0 %v13669_v62  ;;  %5106 = vmatmul.mubr.bf16.gmra.mrb[160].mxu1 %v13669_v62 }
 0x1d3   :  { %v1557_v10 = vadd.f32 %v13920_v6, %v1478_v34  ;;  %v1479_v11 = vmax.f32 %v1335_v3, %v1407_v4  ;;  %4150 = vmatprep.mubr.bf16.mxu0 %v13817_v24  ;;  %5115 = vmatprep.mubr.bf16.mxu1 %v13817_v24 }
 0x1d4   :  { %5241 = vmatpush1.bf16.msra.mxu1 %v12067_v59  ;;  %4277 = vmatprep.subr.bf16.mxu0 %v12072_v63  ;;  %v12090_v59 = vld [vmem:[%s16498_s3 + $0x564] ss:$16 sps:$4 sm:$0xff]   ;;  %v12093_v63 = vld [vmem:[%s16498_s3 + $0x56c] ss:$16 sps:$4 sm:$0xff]  }
 0x1d5   :  { %v1558_v14 = vadd.f32 %v13920_v6, %v1479_v11  ;;  %v824_v18 = vpop.f32.mrb[120].mxu0  ;;  %v1217_v19 = vpop.f32.mrb[120].mxu1  ;;  %5242 = vmatprep.subr.bf16.mxu1 %v12075_v7  ;;  %4278 = vmatpush1.bf16.msra.mxu0 %v12070_v5  ;;  %v1629_v13 = vmax.f32 %v1557_v10, 0.0  ;;  %v12088_v11 = vld [vmem:[%s16498_s3 + $0x560] ss:$16 sps:$4 sm:$0xff]  }
 0x1d6   :  { %v826_v21 = vpop.f32.mrb[121].mxu0  ;;  %v1219_v22 = vpop.f32.mrb[121].mxu1  ;;  %4279 = vmatprep.subr.bf16.mxu0 %v12078_v15 }
 0x1d7   :  { %v1630_v26 = vmax.f32 %v1558_v14, 0.0  ;;  %v1336_v29 = vmax.f32 %v824_v18, %v826_v21  ;;  %v1408_v31 = vmax.f32 %v1217_v19, %v1219_v22  ;;  %v828_v16 = vpop.f32.mrb[122].mxu0  ;;  %v1221_v33 = vpop.f32.mrb[122].mxu1  ;;  %v12091_v19 = vld [vmem:[%s16498_s3 + $0x568] ss:$16 sps:$4 sm:$0xff]  }
 0x1d8   :  { %v830_v36 = vpop.f32.mrb[123].mxu0  ;;  %v1223_v39 = vpop.f32.mrb[123].mxu1  ;;  %5243 = vmatpush1.bf16.msra.mxu1 %v12073_v12 }
 0x1d9   :  { %v14142_v60 = vpack.c.bf16 %v1630_v26, %v1629_v13  ;;  %v1480_v35 = vmax.f32 %v1336_v29, %v1408_v31  ;;  %v1337_v42 = vmax.f32 %v828_v16, %v830_v36  ;;  %v1409_v44 = vmax.f32 %v1221_v33, %v1223_v39  ;;  %5244 = vmatprep.subr.bf16.mxu1 %v12081_v20  ;;  %v12096_v13 = vld [vmem:[%s16498_s3 + $0x584] ss:$16 sps:$4 sm:$0xff]   ;;  %v12099_v26 = vld [vmem:[%s16498_s3 + $0x58c] ss:$16 sps:$4 sm:$0xff]   ;;  %v12094_v33 = vld [vmem:[%s16498_s3 + $0x580] ss:$16 sps:$4 sm:$0xff]  }
 0x1da   :  { %4151 = vmatmul.mubr.bf16.gmra.mrb[164].mxu0 %v13701_v28  ;;  %5116 = vmatmul.mubr.bf16.gmra.mrb[164].mxu1 %v13701_v28  ;;  %v12097_v36 = vld [vmem:[%s16498_s3 + $0x588] ss:$16 sps:$4 sm:$0xff]  }
 0x1db   :  { %v1481_v47 = vmax.f32 %v1337_v42, %v1409_v44  ;;  %4160 = vmatprep.mubr.bf16.mxu0 %v13846_v57  ;;  %5125 = vmatprep.mubr.bf16.mxu1 %v13846_v57  ;;  %v1559_v48 = vadd.f32 %v13920_v6, %v1480_v35  ;;  %v12102_v35 = vld [vmem:[%s16498_s3 + $0x5a4] ss:$16 sps:$4 sm:$0xff]  }
 0x1dc   :  { %4280 = vmatpush1.bf16.msra.mxu0 %v12076_v40  ;;  %5245 = vmatpush1.bf16.msra.mxu1 %v12079_v41 }
 0x1dd   :  { %v1560_v52 = vadd.f32 %v13920_v6, %v1481_v47  ;;  %v834_v56 = vpop.f32.mrb[124].mxu0  ;;  %v1227_v53 = vpop.f32.mrb[124].mxu1  ;;  %4281 = vmatprep.subr.bf16.mxu0 %v12084_v45  ;;  %5246 = vmatprep.subr.bf16.mxu1 %v12087_v55  ;;  %v1631_v12 = vmax.f32 %v1559_v48, 0.0 }
 0x1de   :  { %v836_v34 = vpop.f32.mrb[125].mxu0  ;;  %v1229_v3 = vpop.f32.mrb[125].mxu1 }
 0x1df   :  { %v1632_v4 = vmax.f32 %v1560_v52, 0.0  ;;  %v1338_v5 = vmax.f32 %v834_v56, %v836_v34  ;;  %v1410_v7 = vmax.f32 %v1227_v53, %v1229_v3  ;;  %v838_v15 = vpop.f32.mrb[126].mxu0  ;;  %v1231_v10 = vpop.f32.mrb[126].mxu1  ;;  %v12100_v53 = vld [vmem:[%s16498_s3 + $0x5a0] ss:$16 sps:$4 sm:$0xff]  }
 0x1e0   :  { %v840_v14 = vpop.f32.mrb[127].mxu0  ;;  %v1233_v18 = vpop.f32.mrb[127].mxu1  ;;  %4282 = vmatpush1.bf16.msra.mxu0 %v12082_v49  ;;  %5247 = vmatpush1.bf16.msra.mxu1 %v12085_v50 }
 0x1e1   :  { %v1482_v20 = vmax.f32 %v1338_v5, %v1410_v7  ;;  %v1339_v21 = vmax.f32 %v838_v15, %v840_v14  ;;  %v1411_v22 = vmax.f32 %v1231_v10, %v1233_v18  ;;  %4283 = vmatprep.subr.bf16.mxu0 %v12090_v59  ;;  %5248 = vmatprep.subr.bf16.mxu1 %v12093_v63  ;;  %v12105_v59 = vld [vmem:[%s16498_s3 + $0x5ac] ss:$16 sps:$4 sm:$0xff]   ;;  %v12103_v5 = vld [vmem:[%s16498_s3 + $0x5a8] ss:$16 sps:$4 sm:$0xff]   ;;  %v12108_v7 = vld [vmem:[%s16498_s3 + $0x5c4] ss:$16 sps:$4 sm:$0xff]  }
 0x1e2   :  { %4161 = vmatmul.mubr.bf16.gmra.mrb[168].mxu0 %v13730_v58  ;;  %5126 = vmatmul.mubr.bf16.gmra.mrb[168].mxu1 %v13730_v58  ;;  %v14182_v29 = vpack.c.bf16 %v1632_v4, %v1631_v12  ;;  %v12111_v15 = vld [vmem:[%s16498_s3 + $0x5cc] ss:$16 sps:$4 sm:$0xff]   ;;  %v12106_v12 = vld [vmem:[%s16498_s3 + $0x5c0] ss:$16 sps:$4 sm:$0xff]  }
 0x1e3   :  { %v1561_v31 = vadd.f32 %v13920_v6, %v1482_v20  ;;  %v1483_v16 = vmax.f32 %v1339_v21, %v1411_v22  ;;  %4170 = vmatprep.mubr.bf16.mxu0 %v13875_v27  ;;  %5135 = vmatprep.mubr.bf16.mxu1 %v13875_v27  ;;  %v12109_v20 = vld [vmem:[%s16498_s3 + $0x5c8] ss:$16 sps:$4 sm:$0xff]  }
 0x1e4   :  { %4284 = vmatpush1.bf16.msra.mxu0 %v12088_v11  ;;  %5249 = vmatpush1.bf16.msra.mxu1 %v12091_v19 }
 0x1e5   :  { %v1562_v39 = vadd.f32 %v13920_v6, %v1483_v16  ;;  %v844_v40 = vpop.f32.mrb[128].mxu0  ;;  %v1237_v41 = vpop.f32.mrb[128].mxu1  ;;  %4285 = vmatprep.subr.bf16.mxu0 %v12096_v13  ;;  %5250 = vmatprep.subr.bf16.mxu1 %v12099_v26  ;;  %v1633_v45 = vmax.f32 %v1561_v31, 0.0 }
 0x1e6   :  { %v846_v42 = vpop.f32.mrb[129].mxu0  ;;  %v1239_v44 = vpop.f32.mrb[129].mxu1 }
 0x1e7   :  { %v1634_v55 = vmax.f32 %v1562_v39, 0.0  ;;  %v1340_v47 = vmax.f32 %v844_v40, %v846_v42  ;;  %v1412_v48 = vmax.f32 %v1237_v41, %v1239_v44  ;;  %v848_v49 = vpop.f32.mrb[130].mxu0  ;;  %v1241_v50 = vpop.f32.mrb[130].mxu1  ;;  %v12114_v41 = vld [vmem:[%s16498_s3 + $0x5e4] ss:$16 sps:$4 sm:$0xff]  }
 0x1e8   :  { %v850_v52 = vpop.f32.mrb[131].mxu0  ;;  %v1243_v56 = vpop.f32.mrb[131].mxu1  ;;  %4286 = vmatpush1.bf16.msra.mxu0 %v12094_v33  ;;  %5251 = vmatpush1.bf16.msra.mxu1 %v12097_v36 }
 0x1e9   :  { %v14203_v63 = vpack.c.bf16 %v1634_v55, %v1633_v45  ;;  %v1484_v34 = vmax.f32 %v1340_v47, %v1412_v48  ;;  %v1341_v3 = vmax.f32 %v848_v49, %v850_v52  ;;  %v1413_v4 = vmax.f32 %v1241_v50, %v1243_v56  ;;  %4287 = vmatprep.subr.bf16.mxu0 %v12102_v35  ;;  %v12117_v35 = vld [vmem:[%s16498_s3 + $0x5ec] ss:$16 sps:$4 sm:$0xff]   ;;  %v12112_v47 = vld [vmem:[%s16498_s3 + $0x5e0] ss:$16 sps:$4 sm:$0xff]   ;;  %v12115_v48 = vld [vmem:[%s16498_s3 + $0x5e8] ss:$16 sps:$4 sm:$0xff]  }
 0x1ea   :  { %4171 = vmatmul.mubr.bf16.gmra.mrb[172].mxu0 %v13759_v25  ;;  %5136 = vmatmul.mubr.bf16.gmra.mrb[172].mxu1 %v13759_v25  ;;  %v12120_v49 = vld [vmem:[%s16498_s3 + $0x604] ss:$16 sps:$4 sm:$0xff]   ;;  %v12123_v50 = vld [vmem:[%s16498_s3 + $0x60c] ss:$16 sps:$4 sm:$0xff]  }
 0x1eb   :  { %v1563_v10 = vadd.f32 %v13920_v6, %v1484_v34  ;;  %v1485_v11 = vmax.f32 %v1341_v3, %v1413_v4  ;;  %4180 = vmatprep.mubr.bf16.mxu0 %v13940_v51  ;;  %5145 = vmatprep.mubr.bf16.mxu1 %v13940_v51 }
 0x1ec   :  { %5252 = vmatprep.subr.bf16.mxu1 %v12105_v59  ;;  %4288 = vmatpush1.bf16.msra.mxu0 %v12100_v53 }
 0x1ed   :  { %v1564_v14 = vadd.f32 %v13920_v6, %v1485_v11  ;;  %v854_v18 = vpop.f32.mrb[132].mxu0  ;;  %v1247_v19 = vpop.f32.mrb[132].mxu1  ;;  %5253 = vmatpush1.bf16.msra.mxu1 %v12103_v5  ;;  %4289 = vmatprep.subr.bf16.mxu0 %v12108_v7  ;;  %v1635_v13 = vmax.f32 %v1563_v10, 0.0 }
 0x1ee   :  { %v856_v21 = vpop.f32.mrb[133].mxu0  ;;  %v1249_v22 = vpop.f32.mrb[133].mxu1  ;;  %5254 = vmatprep.subr.bf16.mxu1 %v12111_v15 }
 0x1ef   :  { %v1636_v26 = vmax.f32 %v1564_v14, 0.0  ;;  %v1342_v31 = vmax.f32 %v854_v18, %v856_v21  ;;  %v1414_v16 = vmax.f32 %v1247_v19, %v1249_v22  ;;  %v858_v33 = vpop.f32.mrb[134].mxu0  ;;  %v1251_v36 = vpop.f32.mrb[134].mxu1  ;;  %v13071_v22 = vld [vmem:[%s16499_s2] ss:$0 sm:$0xff] }
 0x1f0   :  { %v860_v39 = vpop.f32.mrb[135].mxu0  ;;  %v1253_v40 = vpop.f32.mrb[135].mxu1  ;;  %4290 = vmatpush1.bf16.msra.mxu0 %v12106_v12 }
 0x1f1   :  { %v14232_v42 = vpack.c.bf16 %v1636_v26, %v1635_v13  ;;  %v1486_v44 = vmax.f32 %v1342_v31, %v1414_v16  ;;  %v1343_v45 = vmax.f32 %v858_v33, %v860_v39  ;;  %v1415_v55 = vmax.f32 %v1251_v36, %v1253_v40  ;;  %5255 = vmatpush1.bf16.msra.mxu1 %v12109_v20 }
 0x1f2   :  { %4181 = vmatmul.mubr.bf16.gmra.mrb[176].mxu0 %v13846_v57  ;;  %5146 = vmatmul.mubr.bf16.gmra.mrb[176].mxu1 %v13846_v57 }
 0x1f3   :  { %v1565_v52 = vadd.f32 %v13920_v6, %v1486_v44  ;;  %v1487_v56 = vmax.f32 %v1343_v45, %v1415_v55  ;;  %4190 = vmatprep.mubr.bf16.mxu0 %v13948_v17  ;;  %5155 = vmatprep.mubr.bf16.mxu1 %v13948_v17 }
 0x1f4   :  { %4291 = vmatprep.subr.bf16.mxu0 %v12114_v41  ;;  %5256 = vmatprep.subr.bf16.mxu1 %v12117_v35 }
 0x1f5   :  { %v1566_v53 = vadd.f32 %v13920_v6, %v1487_v56  ;;  %v864_v59 = vpop.f32.mrb[136].mxu0  ;;  %v1257_v34 = vpop.f32.mrb[136].mxu1  ;;  %4292 = vmatpush1.bf16.msra.mxu0 %v12112_v47  ;;  %5257 = vmatpush1.bf16.msra.mxu1 %v12115_v48  ;;  %v1637_v5 = vmax.f32 %v1565_v52, 0.0 }
 0x1f6   :  { %v866_v3 = vpop.f32.mrb[137].mxu0  ;;  %v1259_v4 = vpop.f32.mrb[137].mxu1  ;;  %4454 = vmatprep.subr.bf16.mxu0 %v12120_v49  ;;  %5419 = vmatprep.subr.bf16.mxu1 %v12123_v50 }
 0x1f7   :  { %v1638_v7 = vmax.f32 %v1566_v53, 0.0  ;;  %v1344_v15 = vmax.f32 %v864_v59, %v866_v3  ;;  %v1416_v10 = vmax.f32 %v1257_v34, %v1259_v4  ;;  %v868_v11 = vpop.f32.mrb[138].mxu0  ;;  %v1261_v12 = vpop.f32.mrb[138].mxu1 }
 0x1f8   :  { %v870_v14 = vpop.f32.mrb[139].mxu0  ;;  %v1263_v18 = vpop.f32.mrb[139].mxu1 }
 0x1f9   :  { %v14252_v19 = vpack.c.bf16 %v1638_v7, %v1637_v5  ;;  %v1488_v20 = vmax.f32 %v1344_v15, %v1416_v10  ;;  %v1345_v6 = vmax.f32 %v868_v11, %v870_v14  ;;  %v1417_v21 = vmax.f32 %v1261_v12, %v1263_v18  ;;  %v12118_v7 = vld [vmem:[%s16498_s3 + $0x600] ss:$16 sps:$4 sm:$0xff]   ;;  %v12121_v15 = vld [vmem:[%s16498_s3 + $0x608] ss:$16 sps:$4 sm:$0xff]   ;;  %v12126_v10 = vld [vmem:[%s16498_s3 + $0x624] ss:$16 sps:$4 sm:$0xff]  }
 0x1fa   :  { %4191 = vmatmul.mubr.bf16.gmra.mrb[180].mxu0 %v13875_v27  ;;  %5156 = vmatmul.mubr.bf16.gmra.mrb[180].mxu1 %v13875_v27  ;;  %v12129_v11 = vld [vmem:[%s16498_s3 + $0x62c] ss:$16 sps:$4 sm:$0xff]   ;;  %v12124_v12 = vld [vmem:[%s16498_s3 + $0x620] ss:$16 sps:$4 sm:$0xff]   ;;  %v12127_v14 = vld [vmem:[%s16498_s3 + $0x628] ss:$16 sps:$4 sm:$0xff]  }
 0x1fb   :  { %v1567_v13 = vadd.f32 %v13071_v22, %v1488_v20  ;;  %v1489_v26 = vmax.f32 %v1345_v6, %v1417_v21  ;;  %4200 = vmatprep.mubr.bf16.mxu0 %v13956_v43  ;;  %5165 = vmatprep.mubr.bf16.mxu1 %v13956_v43  ;;  %v12132_v18 = vld [vmem:[%s16498_s3 + $0x644] ss:$16 sps:$4 sm:$0xff]   ;;  %v12130_v20 = vld [vmem:[%s16498_s3 + $0x640] ss:$16 sps:$4 sm:$0xff]   ;;  %v12133_v6 = vld [vmem:[%s16498_s3 + $0x648] ss:$16 sps:$4 sm:$0xff]  }
 0x1fc   :  { %v12138_v21 = vld [vmem:[%s16498_s3 + $0x664] ss:$16 sps:$4 sm:$0xff]  }
 0x1fd   :  { %v1568_v31 = vadd.f32 %v13071_v22, %v1489_v26  ;;  %v874_v16 = vpop.f32.mrb[140].mxu0  ;;  %v1267_v33 = vpop.f32.mrb[140].mxu1  ;;  %v1639_v40 = vmax.f32 %v1567_v13, 0.0  ;;  %v12136_v13 = vld [vmem:[%s16498_s3 + $0x660] ss:$16 sps:$4 sm:$0xff]  }
 0x1fe   :  { %v876_v36 = vpop.f32.mrb[141].mxu0  ;;  %v1269_v39 = vpop.f32.mrb[141].mxu1  ;;  %v12139_v26 = vld [vmem:[%s16498_s3 + $0x668] ss:$16 sps:$4 sm:$0xff]  }
 0x1ff   :  { %v1640_v41 = vmax.f32 %v1568_v31, 0.0  ;;  %v1346_v35 = vmax.f32 %v874_v16, %v876_v36  ;;  %v1418_v44 = vmax.f32 %v1267_v33, %v1269_v39  ;;  %v878_v45 = vpop.f32.mrb[142].mxu0  ;;  %v1271_v55 = vpop.f32.mrb[142].mxu1  ;;  %v12147_v31 = vld [vmem:[%s16498_s3 + $0x68c] ss:$16 sps:$4 sm:$0xff]  }
 0x200   :  { %v880_v47 = vpop.f32.mrb[143].mxu0  ;;  %v1273_v48 = vpop.f32.mrb[143].mxu1  ;;  %v12142_v16 = vld [vmem:[%s16498_s3 + $0x680] ss:$16 sps:$4 sm:$0xff]   ;;  %v12145_v33 = vld [vmem:[%s16498_s3 + $0x688] ss:$16 sps:$4 sm:$0xff]  }
 0x201   :  { %v14261_v49 = vpack.c.bf16 %v1640_v41, %v1639_v40  ;;  %v1490_v50 = vmax.f32 %v1346_v35, %v1418_v44  ;;  %v1347_v52 = vmax.f32 %v878_v45, %v880_v47  ;;  %v1419_v56 = vmax.f32 %v1271_v55, %v1273_v48  ;;  %v12150_v36 = vld [vmem:[%s16498_s3 + $0x6a4] ss:$16 sps:$4 sm:$0xff]   ;;  %v12153_v39 = vld [vmem:[%s16498_s3 + $0x6ac] ss:$16 sps:$4 sm:$0xff]   ;;  %v12148_v40 = vld [vmem:[%s16498_s3 + $0x6a0] ss:$16 sps:$4 sm:$0xff]  }
 0x202   :  { %4201 = vmatmul.mubr.bf16.gmra.mrb[184].mxu0 %v13904_v61  ;;  %5166 = vmatmul.mubr.bf16.gmra.mrb[184].mxu1 %v13904_v61  ;;  %v12151_v41 = vld [vmem:[%s16498_s3 + $0x6a8] ss:$16 sps:$4 sm:$0xff]   ;;  %v12154_v35 = vld [vmem:[%s16498_s3 + $0x6c0] ss:$16 sps:$4 sm:$0xff]   ;;  %v12162_v45 = vld [vmem:[%s16498_s3 + $0x6e4] ss:$16 sps:$4 sm:$0xff]  }
 0x203   :  { %v1569_v53 = vadd.f32 %v13071_v22, %v1490_v50  ;;  %v1491_v59 = vmax.f32 %v1347_v52, %v1419_v56  ;;  %4210 = vmatprep.mubr.bf16.mxu0 %v13964_v8  ;;  %5175 = vmatprep.mubr.bf16.mxu1 %v13964_v8  ;;  %v12157_v44 = vld [vmem:[%s16498_s3 + $0x6c8] ss:$16 sps:$4 sm:$0xff]   ;;  %v12165_v55 = vld [vmem:[%s16498_s3 + $0x6ec] ss:$16 sps:$4 sm:$0xff]   ;;  %v12160_v47 = vld [vmem:[%s16498_s3 + $0x6e0] ss:$16 sps:$4 sm:$0xff]  }
 0x204   :  { %v12163_v48 = vld [vmem:[%s16498_s3 + $0x6e8] ss:$16 sps:$4 sm:$0xff]   ;;  %v12171_v50 = vld [vmem:[%s16498_s3 + $0x70c] ss:$16 sps:$4 sm:$0xff]   ;;  %v12166_v52 = vld [vmem:[%s16498_s3 + $0x700] ss:$16 sps:$4 sm:$0xff]  }
 0x205   :  { %v1570_v34 = vadd.f32 %v13071_v22, %v1491_v59  ;;  %v1641_v3 = vmax.f32 %v1569_v53, 0.0  ;;  %v12141_v22 = vld [vmem:[%s16498_s3 + $0x66c] ss:$16 sps:$4 sm:$0xff]   ;;  %v12169_v56 = vld [vmem:[%s16498_s3 + $0x708] ss:$16 sps:$4 sm:$0xff]  }
 0x206   :  { %v12174_v53 = vld [vmem:[%s16498_s3 + $0x724] ss:$16 sps:$4 sm:$0xff]   ;;  %v12177_v59 = vld [vmem:[%s16498_s3 + $0x72c] ss:$16 sps:$4 sm:$0xff]  }
 0x207   :  { %v1642_v4 = vmax.f32 %v1570_v34, 0.0  ;;  %v12172_v34 = vld [vmem:[%s16498_s3 + $0x720] ss:$16 sps:$4 sm:$0xff]  }
 0x209   :  { %v14267_v5 = vpack.c.bf16 %v1642_v4, %v1641_v3  ;;  %v12175_v3 = vld [vmem:[%s16498_s3 + $0x728] ss:$16 sps:$4 sm:$0xff]   ;;  %v12180_v4 = vld [vmem:[%s16498_s3 + $0x744] ss:$16 sps:$4 sm:$0xff]  }
 0x20a   :  { %4211 = vmatmul.mubr.bf16.gmra.mrb[188].mxu0 %v13932_v30  ;;  %5176 = vmatmul.mubr.bf16.gmra.mrb[188].mxu1 %v13932_v30 }
 0x20b   :  { %4220 = vmatprep.mubr.bf16.mxu0 %v13994_v32  ;;  %5185 = vmatprep.mubr.bf16.mxu1 %v13994_v32 }
 0x212   :  { %4221 = vmatmul.mubr.bf16.gmra.mrb[192].mxu0 %v13956_v43  ;;  %5186 = vmatmul.mubr.bf16.gmra.mrb[192].mxu1 %v13956_v43 }
 0x213   :  { %4230 = vmatprep.mubr.bf16.mxu0 %v14026_v9  ;;  %5195 = vmatprep.mubr.bf16.mxu1 %v14026_v9 }
 0x21a   :  { %4231 = vmatmul.mubr.bf16.gmra.mrb[196].mxu0 %v13964_v8  ;;  %5196 = vmatmul.mubr.bf16.gmra.mrb[196].mxu1 %v13964_v8 }
 0x21b   :  { %4240 = vmatprep.mubr.bf16.mxu0 %v14055_v46  ;;  %5205 = vmatprep.mubr.bf16.mxu1 %v14055_v46 }
 0x222   :  { %4241 = vmatmul.mubr.bf16.gmra.mrb[200].mxu0 %v13972_v37  ;;  %5206 = vmatmul.mubr.bf16.gmra.mrb[200].mxu1 %v13972_v37 }
 0x223   :  { %4250 = vmatprep.mubr.bf16.mxu0 %v14084_v23  ;;  %5215 = vmatprep.mubr.bf16.mxu1 %v14084_v23 }
 0x22a   :  { %4251 = vmatmul.mubr.bf16.gmra.mrb[204].mxu0 %v13980_v2  ;;  %5216 = vmatmul.mubr.bf16.gmra.mrb[204].mxu1 %v13980_v2 }
 0x22b   :  { %4293 = vmatprep.mubr.bf16.mxu0 %v13669_v62  ;;  %5258 = vmatprep.mubr.bf16.mxu1 %v13669_v62 }
 0x232   :  { %4294 = vmatmul.mubr.bf16.vlgmr.msra.gmra.mrb[144].mxu0 %v13655_v38  ;;  %5259 = vmatmul.mubr.bf16.vlgmr.msra.gmra.mrb[144].mxu1 %v13655_v38  ;;  %v12135_v38 = vld [vmem:[%s16498_s3 + $0x64c] ss:$16 sps:$4 sm:$0xff]  }
 0x233   :  { %4303 = vmatprep.mubr.bf16.mxu0 %v13701_v28  ;;  %4455 = vmatpush1.bf16.msra.mxu0 %v12118_v7  ;;  %v12183_v7 = vld [vmem:[%s16498_s3 + $0x74c] ss:$16 sps:$4 sm:$0xff]  }
 0x234   :  { %5268 = vmatprep.mubr.bf16.mxu1 %v13701_v28  ;;  %5420 = vmatpush1.bf16.msra.mxu1 %v12121_v15  ;;  %v12178_v15 = vld [vmem:[%s16498_s3 + $0x740] ss:$16 sps:$4 sm:$0xff]  }
 0x235   :  { %4456 = vmatprep.subr.bf16.mxu0 %v12126_v10  ;;  %5421 = vmatprep.subr.bf16.mxu1 %v12129_v11  ;;  %v12181_v10 = vld [vmem:[%s16498_s3 + $0x748] ss:$16 sps:$4 sm:$0xff]   ;;  %v12186_v11 = vld [vmem:[%s16498_s3 + $0x764] ss:$16 sps:$4 sm:$0xff]  }
 0x237   :  { %4457 = vmatpush1.bf16.msra.mxu0 %v12124_v12  ;;  %v12189_v12 = vld [vmem:[%s16498_s3 + $0x76c] ss:$16 sps:$4 sm:$0xff]  }
 0x238   :  { %5422 = vmatpush1.bf16.msra.mxu1 %v12127_v14  ;;  %4458 = vmatprep.subr.bf16.mxu0 %v12132_v18  ;;  %v12184_v14 = vld [vmem:[%s16498_s3 + $0x760] ss:$16 sps:$4 sm:$0xff]   ;;  %v12187_v18 = vld [vmem:[%s16498_s3 + $0x768] ss:$16 sps:$4 sm:$0xff]  }
 0x239   :  { %5423 = vmatprep.subr.bf16.mxu1 %v12135_v38  ;;  %v12192_v38 = vld [vmem:[%s16498_s3 + $0x784] ss:$16 sps:$4 sm:$0xff]  }
 0x23a   :  { %4304 = vmatmul.mubr.bf16.gmra.mrb[148].mxu0 %v13669_v62  ;;  %5269 = vmatmul.mubr.bf16.gmra.mrb[148].mxu1 %v13669_v62  ;;  %v12144_v62 = vld [vmem:[%s16498_s3 + $0x684] ss:$16 sps:$4 sm:$0xff]  }
 0x23b   :  { %4313 = vmatprep.mubr.bf16.mxu0 %v13730_v58  ;;  %5278 = vmatprep.mubr.bf16.mxu1 %v13730_v58 }
 0x23c   :  { %4459 = vmatpush1.bf16.msra.mxu0 %v12130_v20  ;;  %5424 = vmatpush1.bf16.msra.mxu1 %v12133_v6  ;;  %v12195_v20 = vld [vmem:[%s16498_s3 + $0x78c] ss:$16 sps:$4 sm:$0xff]   ;;  %v12190_v6 = vld [vmem:[%s16498_s3 + $0x780] ss:$16 sps:$4 sm:$0xff]  }
 0x23d   :  { %4460 = vmatprep.subr.bf16.mxu0 %v12138_v21  ;;  %5425 = vmatprep.subr.bf16.mxu1 %v12141_v22  ;;  %v12193_v21 = vld [vmem:[%s16498_s3 + $0x788] ss:$16 sps:$4 sm:$0xff]   ;;  %v12198_v22 = vld [vmem:[%s16498_s3 + $0x7a4] ss:$16 sps:$4 sm:$0xff]  }
 0x240   :  { %4461 = vmatpush1.bf16.msra.mxu0 %v12136_v13  ;;  %5426 = vmatpush1.bf16.msra.mxu1 %v12139_v26  ;;  %v12201_v13 = vld [vmem:[%s16498_s3 + $0x7ac] ss:$16 sps:$4 sm:$0xff]   ;;  %v12196_v26 = vld [vmem:[%s16498_s3 + $0x7a0] ss:$16 sps:$4 sm:$0xff]  }
 0x241   :  { %4462 = vmatprep.subr.bf16.mxu0 %v12144_v62  ;;  %5427 = vmatprep.subr.bf16.mxu1 %v12147_v31  ;;  %v12199_v62 = vld [vmem:[%s16498_s3 + $0x7a8] ss:$16 sps:$4 sm:$0xff]   ;;  %v12204_v31 = vld [vmem:[%s16498_s3 + $0x7c4] ss:$16 sps:$4 sm:$0xff]  }
 0x242   :  { %4314 = vmatmul.mubr.bf16.gmra.mrb[152].mxu0 %v13701_v28  ;;  %5279 = vmatmul.mubr.bf16.gmra.mrb[152].mxu1 %v13701_v28  ;;  %v12156_v28 = vld [vmem:[%s16498_s3 + $0x6c4] ss:$16 sps:$4 sm:$0xff]  }
 0x243   :  { %4323 = vmatprep.mubr.bf16.mxu0 %v13759_v25  ;;  %5288 = vmatprep.mubr.bf16.mxu1 %v13759_v25  ;;  %v12159_v25 = vld [vmem:[%s16498_s3 + $0x6cc] ss:$16 sps:$4 sm:$0xff]  }
 0x244   :  { %4463 = vmatpush1.bf16.msra.mxu0 %v12142_v16  ;;  %5428 = vmatpush1.bf16.msra.mxu1 %v12145_v33  ;;  %v12207_v16 = vld [vmem:[%s16498_s3 + $0x7cc] ss:$16 sps:$4 sm:$0xff]   ;;  %v12202_v33 = vld [vmem:[%s16498_s3 + $0x7c0] ss:$16 sps:$4 sm:$0xff]  }
 0x245   :  { %4464 = vmatprep.subr.bf16.mxu0 %v12150_v36  ;;  %5429 = vmatprep.subr.bf16.mxu1 %v12153_v39  ;;  %v12205_v36 = vld [vmem:[%s16498_s3 + $0x7c8] ss:$16 sps:$4 sm:$0xff]   ;;  %v12210_v39 = vld [vmem:[%s16498_s3 + $0x7e4] ss:$16 sps:$4 sm:$0xff]  }
 0x248   :  { %4465 = vmatpush1.bf16.msra.mxu0 %v12148_v40  ;;  %5430 = vmatpush1.bf16.msra.mxu1 %v12151_v41  ;;  %v12213_v40 = vld [vmem:[%s16498_s3 + $0x7ec] ss:$16 sps:$4 sm:$0xff]   ;;  %v12208_v41 = vld [vmem:[%s16498_s3 + $0x7e0] ss:$16 sps:$4 sm:$0xff]  }
 0x249   :  { %4466 = vmatprep.subr.bf16.mxu0 %v12156_v28  ;;  %5431 = vmatprep.subr.bf16.mxu1 %v12159_v25  ;;  %v12211_v28 = vld [vmem:[%s16498_s3 + $0x7e8] ss:$16 sps:$4 sm:$0xff]   ;;  %v12216_v25 = vld [vmem:[%s16498_s3 + $0x804] ss:$16 sps:$4 sm:$0xff]  }
 0x24a   :  { %4324 = vmatmul.mubr.bf16.gmra.mrb[156].mxu0 %v13730_v58  ;;  %5289 = vmatmul.mubr.bf16.gmra.mrb[156].mxu1 %v13730_v58  ;;  %v12168_v58 = vld [vmem:[%s16498_s3 + $0x704] ss:$16 sps:$4 sm:$0xff]  }
 0x24b   :  { %4333 = vmatprep.mubr.bf16.mxu0 %v13846_v57  ;;  %5298 = vmatprep.mubr.bf16.mxu1 %v13846_v57 }
 0x24c   :  { %4467 = vmatpush1.bf16.msra.mxu0 %v12154_v35  ;;  %5432 = vmatpush1.bf16.msra.mxu1 %v12157_v44  ;;  %v12219_v35 = vld [vmem:[%s16498_s3 + $0x80c] ss:$16 sps:$4 sm:$0xff]   ;;  %v12214_v44 = vld [vmem:[%s16498_s3 + $0x800] ss:$16 sps:$4 sm:$0xff]  }
 0x24d   :  { %4468 = vmatprep.subr.bf16.mxu0 %v12162_v45  ;;  %5433 = vmatprep.subr.bf16.mxu1 %v12165_v55  ;;  %v12217_v45 = vld [vmem:[%s16498_s3 + $0x808] ss:$16 sps:$4 sm:$0xff]   ;;  %v12222_v55 = vld [vmem:[%s16498_s3 + $0x824] ss:$16 sps:$4 sm:$0xff]  }
 0x250   :  { %4469 = vmatpush1.bf16.msra.mxu0 %v12160_v47  ;;  %5434 = vmatpush1.bf16.msra.mxu1 %v12163_v48  ;;  %v12225_v47 = vld [vmem:[%s16498_s3 + $0x82c] ss:$16 sps:$4 sm:$0xff]   ;;  %v12220_v48 = vld [vmem:[%s16498_s3 + $0x820] ss:$16 sps:$4 sm:$0xff]  }
 0x251   :  { %4470 = vmatprep.subr.bf16.mxu0 %v12168_v58  ;;  %5435 = vmatprep.subr.bf16.mxu1 %v12171_v50  ;;  %v12223_v58 = vld [vmem:[%s16498_s3 + $0x828] ss:$16 sps:$4 sm:$0xff]   ;;  %v12228_v50 = vld [vmem:[%s16498_s3 + $0x844] ss:$16 sps:$4 sm:$0xff]  }
 0x252   :  { %4334 = vmatmul.mubr.bf16.gmra.mrb[160].mxu0 %v13817_v24  ;;  %5299 = vmatmul.mubr.bf16.gmra.mrb[160].mxu1 %v13817_v24 }
 0x253   :  { %4343 = vmatprep.mubr.bf16.mxu0 %v13875_v27  ;;  %5308 = vmatprep.mubr.bf16.mxu1 %v13875_v27 }
 0x254   :  { %4471 = vmatpush1.bf16.msra.mxu0 %v12166_v52  ;;  %5436 = vmatpush1.bf16.msra.mxu1 %v12169_v56  ;;  %v12226_v52 = vld [vmem:[%s16498_s3 + $0x840] ss:$16 sps:$4 sm:$0xff]   ;;  %v12229_v56 = vld [vmem:[%s16498_s3 + $0x848] ss:$16 sps:$4 sm:$0xff]  }
 0x255   :  { %4472 = vmatprep.subr.bf16.mxu0 %v12174_v53  ;;  %5437 = vmatprep.subr.bf16.mxu1 %v12177_v59  ;;  %v12234_v53 = vld [vmem:[%s16498_s3 + $0x864] ss:$16 sps:$4 sm:$0xff]   ;;  %v12237_v59 = vld [vmem:[%s16498_s3 + $0x86c] ss:$16 sps:$4 sm:$0xff]  }
 0x258   :  { %4473 = vmatpush1.bf16.msra.mxu0 %v12172_v34  ;;  %5438 = vmatpush1.bf16.msra.mxu1 %v12175_v3  ;;  %v12232_v34 = vld [vmem:[%s16498_s3 + $0x860] ss:$16 sps:$4 sm:$0xff]   ;;  %v12235_v3 = vld [vmem:[%s16498_s3 + $0x868] ss:$16 sps:$4 sm:$0xff]  }
 0x259   :  { %4474 = vmatprep.subr.bf16.mxu0 %v12180_v4  ;;  %5439 = vmatprep.subr.bf16.mxu1 %v12183_v7  ;;  %v12243_v4 = vld [vmem:[%s16498_s3 + $0x88c] ss:$16 sps:$4 sm:$0xff]   ;;  %v12238_v7 = vld [vmem:[%s16498_s3 + $0x880] ss:$16 sps:$4 sm:$0xff]  }
 0x25a   :  { %4344 = vmatmul.mubr.bf16.gmra.mrb[164].mxu0 %v13846_v57  ;;  %5309 = vmatmul.mubr.bf16.gmra.mrb[164].mxu1 %v13846_v57 }
 0x25b   :  { %4353 = vmatprep.mubr.bf16.mxu0 %v13904_v61  ;;  %5318 = vmatprep.mubr.bf16.mxu1 %v13904_v61 }
 0x25c   :  { %4475 = vmatpush1.bf16.msra.mxu0 %v12178_v15  ;;  %5440 = vmatpush1.bf16.msra.mxu1 %v12181_v10  ;;  %v12241_v15 = vld [vmem:[%s16498_s3 + $0x888] ss:$16 sps:$4 sm:$0xff]   ;;  %v12246_v10 = vld [vmem:[%s16498_s3 + $0x8a4] ss:$16 sps:$4 sm:$0xff]  }
 0x25d   :  { %4476 = vmatprep.subr.bf16.mxu0 %v12186_v11  ;;  %5441 = vmatprep.subr.bf16.mxu1 %v12189_v12  ;;  %v12249_v11 = vld [vmem:[%s16498_s3 + $0x8ac] ss:$16 sps:$4 sm:$0xff]   ;;  %v12244_v12 = vld [vmem:[%s16498_s3 + $0x8a0] ss:$16 sps:$4 sm:$0xff]  }
 0x260   :  { %4477 = vmatpush1.bf16.msra.mxu0 %v12184_v14  ;;  %5442 = vmatpush1.bf16.msra.mxu1 %v12187_v18  ;;  %v12247_v14 = vld [vmem:[%s16498_s3 + $0x8a8] ss:$16 sps:$4 sm:$0xff]   ;;  %v12252_v18 = vld [vmem:[%s16498_s3 + $0x8c4] ss:$16 sps:$4 sm:$0xff]  }
 0x261   :  { %4478 = vmatprep.subr.bf16.mxu0 %v12192_v38  ;;  %5443 = vmatprep.subr.bf16.mxu1 %v12195_v20  ;;  %v12255_v38 = vld [vmem:[%s16498_s3 + $0x8cc] ss:$16 sps:$4 sm:$0xff]   ;;  %v12250_v20 = vld [vmem:[%s16498_s3 + $0x8c0] ss:$16 sps:$4 sm:$0xff]  }
 0x262   :  { %4354 = vmatmul.mubr.bf16.gmra.mrb[168].mxu0 %v13875_v27  ;;  %5319 = vmatmul.mubr.bf16.gmra.mrb[168].mxu1 %v13875_v27 }
 0x263   :  { %4363 = vmatprep.mubr.bf16.mxu0 %v13932_v30  ;;  %5328 = vmatprep.mubr.bf16.mxu1 %v13932_v30 }
 0x264   :  { %4479 = vmatpush1.bf16.msra.mxu0 %v12190_v6  ;;  %5444 = vmatpush1.bf16.msra.mxu1 %v12193_v21  ;;  %v12253_v6 = vld [vmem:[%s16498_s3 + $0x8c8] ss:$16 sps:$4 sm:$0xff]   ;;  %v12258_v21 = vld [vmem:[%s16498_s3 + $0x8e4] ss:$16 sps:$4 sm:$0xff]  }
 0x265   :  { %4480 = vmatprep.subr.bf16.mxu0 %v12198_v22  ;;  %5445 = vmatprep.subr.bf16.mxu1 %v12201_v13  ;;  %v12261_v22 = vld [vmem:[%s16498_s3 + $0x8ec] ss:$16 sps:$4 sm:$0xff]   ;;  %v12256_v13 = vld [vmem:[%s16498_s3 + $0x8e0] ss:$16 sps:$4 sm:$0xff]  }
 0x268   :  { %4481 = vmatpush1.bf16.msra.mxu0 %v12196_v26  ;;  %5446 = vmatpush1.bf16.msra.mxu1 %v12199_v62  ;;  %v12259_v26 = vld [vmem:[%s16498_s3 + $0x8e8] ss:$16 sps:$4 sm:$0xff]   ;;  %v12268_v62 = vld [vmem:[%s16500_s5 + $0x20] ss:$16 sps:$4 sm:$0xff]  }
 0x269   :  { %4482 = vmatprep.subr.bf16.mxu0 %v12204_v31  ;;  %5447 = vmatprep.subr.bf16.mxu1 %v12207_v16  ;;  %v12271_v31 = vld [vmem:[%s16500_s5 + $0x28] ss:$16 sps:$4 sm:$0xff]   ;;  %v12279_v16 = vld [vmem:[%s16500_s5 + $0x4c] ss:$16 sps:$4 sm:$0xff]  }
 0x26a   :  { %4364 = vmatmul.mubr.bf16.gmra.mrb[172].mxu0 %v13904_v61  ;;  %5329 = vmatmul.mubr.bf16.gmra.mrb[172].mxu1 %v13904_v61 }
 0x26b   :  { %4373 = vmatprep.mubr.bf16.mxu0 %v13956_v43  ;;  %5338 = vmatprep.mubr.bf16.mxu1 %v13956_v43 }
 0x26c   :  { %4483 = vmatpush1.bf16.msra.mxu0 %v12202_v33  ;;  %5448 = vmatpush1.bf16.msra.mxu1 %v12205_v36  ;;  %v12274_v33 = vld [vmem:[%s16500_s5 + $0x40] ss:$16 sps:$4 sm:$0xff]   ;;  %v12277_v36 = vld [vmem:[%s16500_s5 + $0x48] ss:$16 sps:$4 sm:$0xff]  }
 0x26d   :  { %4484 = vmatprep.subr.bf16.mxu0 %v12210_v39  ;;  %5449 = vmatprep.subr.bf16.mxu1 %v12213_v40  ;;  %v12282_v39 = vld [vmem:[%s16500_s5 + $0x64] ss:$16 sps:$4 sm:$0xff]   ;;  %v12285_v40 = vld [vmem:[%s16500_s5 + $0x6c] ss:$16 sps:$4 sm:$0xff]  }
 0x270   :  { %4485 = vmatpush1.bf16.msra.mxu0 %v12208_v41  ;;  %5450 = vmatpush1.bf16.msra.mxu1 %v12211_v28  ;;  %v12280_v41 = vld [vmem:[%s16500_s5 + $0x60] ss:$16 sps:$4 sm:$0xff]   ;;  %v12283_v28 = vld [vmem:[%s16500_s5 + $0x68] ss:$16 sps:$4 sm:$0xff]  }
 0x271   :  { %4647 = vmatprep.subr.bf16.mxu0 %v12216_v25  ;;  %5612 = vmatprep.subr.bf16.mxu1 %v12219_v35  ;;  %v12291_v25 = vld [vmem:[%s16500_s5 + $0x8c] ss:$16 sps:$4 sm:$0xff]   ;;  %v12286_v35 = vld [vmem:[%s16500_s5 + $0x80] ss:$16 sps:$4 sm:$0xff]  }
 0x272   :  { %4374 = vmatmul.mubr.bf16.gmra.mrb[176].mxu0 %v13948_v17  ;;  %5339 = vmatmul.mubr.bf16.gmra.mrb[176].mxu1 %v13948_v17 }
 0x273   :  { %4383 = vmatprep.mubr.bf16.mxu0 %v13964_v8  ;;  %5348 = vmatprep.mubr.bf16.mxu1 %v13964_v8 }
 0x27a   :  { %4384 = vmatmul.mubr.bf16.gmra.mrb[180].mxu0 %v13956_v43  ;;  %5349 = vmatmul.mubr.bf16.gmra.mrb[180].mxu1 %v13956_v43 }
 0x27b   :  { %4393 = vmatprep.mubr.bf16.mxu0 %v13972_v37  ;;  %5358 = vmatprep.mubr.bf16.mxu1 %v13972_v37 }
 0x282   :  { %4394 = vmatmul.mubr.bf16.gmra.mrb[184].mxu0 %v13964_v8  ;;  %5359 = vmatmul.mubr.bf16.gmra.mrb[184].mxu1 %v13964_v8 }
 0x283   :  { %4403 = vmatprep.mubr.bf16.mxu0 %v13980_v2  ;;  %5368 = vmatprep.mubr.bf16.mxu1 %v13980_v2 }
 0x28a   :  { %4404 = vmatmul.mubr.bf16.gmra.mrb[188].mxu0 %v13972_v37  ;;  %5369 = vmatmul.mubr.bf16.gmra.mrb[188].mxu1 %v13972_v37 }
 0x28b   :  { %4413 = vmatprep.mubr.bf16.mxu0 %v14055_v46  ;;  %5378 = vmatprep.mubr.bf16.mxu1 %v14055_v46 }
 0x292   :  { %4414 = vmatmul.mubr.bf16.gmra.mrb[192].mxu0 %v14026_v9  ;;  %5379 = vmatmul.mubr.bf16.gmra.mrb[192].mxu1 %v14026_v9 }
 0x293   :  { %4423 = vmatprep.mubr.bf16.mxu0 %v14084_v23  ;;  %5388 = vmatprep.mubr.bf16.mxu1 %v14084_v23 }
 0x29a   :  { %4424 = vmatmul.mubr.bf16.gmra.mrb[196].mxu0 %v14055_v46  ;;  %5389 = vmatmul.mubr.bf16.gmra.mrb[196].mxu1 %v14055_v46 }
 0x29b   :  { %4433 = vmatprep.mubr.bf16.mxu0 %v14113_v0  ;;  %5398 = vmatprep.mubr.bf16.mxu1 %v14113_v0 }
 0x2a2   :  { %4434 = vmatmul.mubr.bf16.gmra.mrb[200].mxu0 %v14084_v23  ;;  %5399 = vmatmul.mubr.bf16.gmra.mrb[200].mxu1 %v14084_v23 }
 0x2a3   :  { %4443 = vmatprep.mubr.bf16.mxu0 %v14142_v60  ;;  %5408 = vmatprep.mubr.bf16.mxu1 %v14142_v60 }
 0x2aa   :  { %4444 = vmatmul.mubr.bf16.gmra.mrb[204].mxu0 %v14113_v0  ;;  %5409 = vmatmul.mubr.bf16.gmra.mrb[204].mxu1 %v14113_v0 }
 0x2ab   :  { %4486 = vmatprep.mubr.bf16.mxu0 %v13817_v24  ;;  %5451 = vmatprep.mubr.bf16.mxu1 %v13817_v24 }
 0x2b2   :  { %4487 = vmatmul.mubr.bf16.vlgmr.msra.gmra.mrb[144].mxu0 %v13788_v54  ;;  %5452 = vmatmul.mubr.bf16.vlgmr.msra.gmra.mrb[144].mxu1 %v13788_v54  ;;  %v12231_v54 = vld [vmem:[%s16498_s3 + $0x84c] ss:$16 sps:$4 sm:$0xff]  }
 0x2b3   :  { %4496 = vmatprep.mubr.bf16.mxu0 %v13846_v57  ;;  %4648 = vmatpush1.bf16.msra.mxu0 %v12214_v44  ;;  %v12289_v44 = vld [vmem:[%s16500_s5 + $0x88] ss:$16 sps:$4 sm:$0xff]  }
 0x2b4   :  { %5461 = vmatprep.mubr.bf16.mxu1 %v13846_v57  ;;  %5613 = vmatpush1.bf16.msra.mxu1 %v12217_v45  ;;  %v12294_v45 = vld [vmem:[%s16500_s5 + $0xa4] ss:$16 sps:$4 sm:$0xff]  }
 0x2b5   :  { %4649 = vmatprep.subr.bf16.mxu0 %v12222_v55  ;;  %5614 = vmatprep.subr.bf16.mxu1 %v12225_v47  ;;  %v12297_v55 = vld [vmem:[%s16500_s5 + $0xac] ss:$16 sps:$4 sm:$0xff]   ;;  %v12292_v47 = vld [vmem:[%s16500_s5 + $0xa0] ss:$16 sps:$4 sm:$0xff]  }
 0x2b7   :  { %4650 = vmatpush1.bf16.msra.mxu0 %v12220_v48  ;;  %v12295_v48 = vld [vmem:[%s16500_s5 + $0xa8] ss:$16 sps:$4 sm:$0xff]  }
 0x2b8   :  { %5615 = vmatpush1.bf16.msra.mxu1 %v12223_v58  ;;  %4651 = vmatprep.subr.bf16.mxu0 %v12228_v50  ;;  %v12300_v58 = vld [vmem:[%s16500_s5 + $0xc4] ss:$16 sps:$4 sm:$0xff]   ;;  %v12298_v50 = vld [vmem:[%s16500_s5 + $0xc0] ss:$16 sps:$4 sm:$0xff]  }
 0x2b9   :  { %5616 = vmatprep.subr.bf16.mxu1 %v12231_v54  ;;  %v12301_v54 = vld [vmem:[%s16500_s5 + $0xc8] ss:$16 sps:$4 sm:$0xff]  }
 0x2ba   :  { %4497 = vmatmul.mubr.bf16.gmra.mrb[148].mxu0 %v13817_v24  ;;  %5462 = vmatmul.mubr.bf16.gmra.mrb[148].mxu1 %v13817_v24  ;;  %v12240_v24 = vld [vmem:[%s16498_s3 + $0x884] ss:$16 sps:$4 sm:$0xff]  }
 0x2bb   :  { %4506 = vmatprep.mubr.bf16.mxu0 %v13875_v27  ;;  %5471 = vmatprep.mubr.bf16.mxu1 %v13875_v27 }
 0x2bc   :  { %4652 = vmatpush1.bf16.msra.mxu0 %v12226_v52  ;;  %5617 = vmatpush1.bf16.msra.mxu1 %v12229_v56  ;;  %v12306_v52 = vld [vmem:[%s16500_s5 + $0xe4] ss:$16 sps:$4 sm:$0xff]   ;;  %v12309_v56 = vld [vmem:[%s16500_s5 + $0xec] ss:$16 sps:$4 sm:$0xff]  }
 0x2bd   :  { %4653 = vmatprep.subr.bf16.mxu0 %v12234_v53  ;;  %5618 = vmatprep.subr.bf16.mxu1 %v12237_v59  ;;  %v12304_v53 = vld [vmem:[%s16500_s5 + $0xe0] ss:$16 sps:$4 sm:$0xff]   ;;  %v12307_v59 = vld [vmem:[%s16500_s5 + $0xe8] ss:$16 sps:$4 sm:$0xff]  }
 0x2c0   :  { %4654 = vmatpush1.bf16.msra.mxu0 %v12232_v34  ;;  %5619 = vmatpush1.bf16.msra.mxu1 %v12235_v3  ;;  %v12312_v34 = vld [vmem:[%s16500_s5 + $0x104] ss:$16 sps:$4 sm:$0xff]   ;;  %v12310_v3 = vld [vmem:[%s16500_s5 + $0x100] ss:$16 sps:$4 sm:$0xff]  }
 0x2c1   :  { %4655 = vmatprep.subr.bf16.mxu0 %v12240_v24  ;;  %5620 = vmatprep.subr.bf16.mxu1 %v12243_v4  ;;  %v12313_v24 = vld [vmem:[%s16500_s5 + $0x108] ss:$16 sps:$4 sm:$0xff]   ;;  %v12318_v4 = vld [vmem:[%s16500_s5 + $0x124] ss:$16 sps:$4 sm:$0xff]  }
 0x2c2   :  { %4507 = vmatmul.mubr.bf16.gmra.mrb[152].mxu0 %v13846_v57  ;;  %5472 = vmatmul.mubr.bf16.gmra.mrb[152].mxu1 %v13846_v57 }
 0x2c3   :  { %4516 = vmatprep.mubr.bf16.mxu0 %v13904_v61  ;;  %5481 = vmatprep.mubr.bf16.mxu1 %v13904_v61 }
 0x2c4   :  { %4656 = vmatpush1.bf16.msra.mxu0 %v12238_v7  ;;  %5621 = vmatpush1.bf16.msra.mxu1 %v12241_v15  ;;  %v12321_v7 = vld [vmem:[%s16500_s5 + $0x12c] ss:$16 sps:$4 sm:$0xff]   ;;  %v12316_v15 = vld [vmem:[%s16500_s5 + $0x120] ss:$16 sps:$4 sm:$0xff]  }
 0x2c5   :  { %4657 = vmatprep.subr.bf16.mxu0 %v12246_v10  ;;  %5622 = vmatprep.subr.bf16.mxu1 %v12249_v11  ;;  %v12319_v10 = vld [vmem:[%s16500_s5 + $0x128] ss:$16 sps:$4 sm:$0xff]   ;;  %v12324_v11 = vld [vmem:[%s16500_s5 + $0x144] ss:$16 sps:$4 sm:$0xff]  }
 0x2c8   :  { %4658 = vmatpush1.bf16.msra.mxu0 %v12244_v12  ;;  %5623 = vmatpush1.bf16.msra.mxu1 %v12247_v14  ;;  %v12322_v12 = vld [vmem:[%s16500_s5 + $0x140] ss:$16 sps:$4 sm:$0xff]   ;;  %v12325_v14 = vld [vmem:[%s16500_s5 + $0x148] ss:$16 sps:$4 sm:$0xff]  }
 0x2c9   :  { %4659 = vmatprep.subr.bf16.mxu0 %v12252_v18  ;;  %5624 = vmatprep.subr.bf16.mxu1 %v12255_v38  ;;  %v12330_v18 = vld [vmem:[%s16500_s5 + $0x164] ss:$16 sps:$4 sm:$0xff]   ;;  %v12333_v38 = vld [vmem:[%s16500_s5 + $0x16c] ss:$16 sps:$4 sm:$0xff]  }
 0x2ca   :  { %4517 = vmatmul.mubr.bf16.gmra.mrb[156].mxu0 %v13875_v27  ;;  %5482 = vmatmul.mubr.bf16.gmra.mrb[156].mxu1 %v13875_v27 }
 0x2cb   :  { %4526 = vmatprep.mubr.bf16.mxu0 %v13948_v17  ;;  %5491 = vmatprep.mubr.bf16.mxu1 %v13948_v17 }
 0x2cc   :  { %4660 = vmatpush1.bf16.msra.mxu0 %v12250_v20  ;;  %5625 = vmatpush1.bf16.msra.mxu1 %v12253_v6  ;;  %v12328_v20 = vld [vmem:[%s16500_s5 + $0x160] ss:$16 sps:$4 sm:$0xff]   ;;  %v12331_v6 = vld [vmem:[%s16500_s5 + $0x168] ss:$16 sps:$4 sm:$0xff]  }
 0x2cd   :  { %4661 = vmatprep.subr.bf16.mxu0 %v12258_v21  ;;  %5626 = vmatprep.subr.bf16.mxu1 %v12261_v22  ;;  %v12336_v21 = vld [vmem:[%s16500_s5 + $0x184] ss:$16 sps:$4 sm:$0xff]   ;;  %v12334_v22 = vld [vmem:[%s16500_s5 + $0x180] ss:$16 sps:$4 sm:$0xff]  }
 0x2d0   :  { %4662 = vmatpush1.bf16.msra.mxu0 %v12256_v13  ;;  %5627 = vmatpush1.bf16.msra.mxu1 %v12259_v26  ;;  %v12337_v13 = vld [vmem:[%s16500_s5 + $0x188] ss:$16 sps:$4 sm:$0xff]   ;;  %v12342_v26 = vld [vmem:[%s16500_s5 + $0x1a4] ss:$16 sps:$4 sm:$0xff]  }
 0x2d2   :  { %4527 = vmatmul.mubr.bf16.gmra.mrb[160].mxu0 %v13940_v51  ;;  %5492 = vmatmul.mubr.bf16.gmra.mrb[160].mxu1 %v13940_v51  ;;  %v12264_v51 = vld [vmem:[%s16500_s5 + $0x4] ss:$16 sps:$4 sm:$0xff]  }
 0x2d3   :  { %4536 = vmatprep.mubr.bf16.mxu0 %v13956_v43  ;;  %5501 = vmatprep.mubr.bf16.mxu1 %v13956_v43 }
 0x2d4   :  { %9114 = vmatprep.subr.bf16.mxu0 %v12264_v51  ;;  %v12340_v51 = vld [vmem:[%s16500_s5 + $0x1a0] ss:$16 sps:$4 sm:$0xff]  }
 0x2da   :  { %4537 = vmatmul.mubr.bf16.gmra.mrb[164].mxu0 %v13948_v17  ;;  %5502 = vmatmul.mubr.bf16.gmra.mrb[164].mxu1 %v13948_v17  ;;  %v12267_v17 = vld [vmem:[%s16500_s5 + $0xc] ss:$16 sps:$4 sm:$0xff]  }
 0x2db   :  { %4546 = vmatprep.mubr.bf16.mxu0 %v13964_v8  ;;  %5511 = vmatprep.mubr.bf16.mxu1 %v13964_v8 }
 0x2dc   :  { %9458 = vmatprep.subr.bf16.mxu1 %v12267_v17  ;;  %v12357_v17 = vld [vmem:[%s16500_s5 + $0x1ec] ss:$16 sps:$4 sm:$0xff]  }
 0x2e2   :  { %4547 = vmatmul.mubr.bf16.gmra.mrb[168].mxu0 %v13956_v43  ;;  %5512 = vmatmul.mubr.bf16.gmra.mrb[168].mxu1 %v13956_v43 }
 0x2e3   :  { %4556 = vmatprep.mubr.bf16.mxu0 %v13972_v37  ;;  %5521 = vmatprep.mubr.bf16.mxu1 %v13972_v37 }
 0x2ea   :  { %4557 = vmatmul.mubr.bf16.gmra.mrb[172].mxu0 %v13964_v8  ;;  %5522 = vmatmul.mubr.bf16.gmra.mrb[172].mxu1 %v13964_v8 }
 0x2eb   :  { %4566 = vmatprep.mubr.bf16.mxu0 %v14026_v9  ;;  %5531 = vmatprep.mubr.bf16.mxu1 %v14026_v9 }
 0x2f2   :  { %4567 = vmatmul.mubr.bf16.gmra.mrb[176].mxu0 %v13994_v32  ;;  %5532 = vmatmul.mubr.bf16.gmra.mrb[176].mxu1 %v13994_v32  ;;  %v12262_v32 = vld [vmem:[%s16500_s5] ss:$16 sps:$4 sm:$0xff]  }
 0x2f3   :  { %4576 = vmatprep.mubr.bf16.mxu0 %v14055_v46  ;;  %5541 = vmatprep.mubr.bf16.mxu1 %v14055_v46 }
 0x2fa   :  { %4577 = vmatmul.mubr.bf16.gmra.mrb[180].mxu0 %v14026_v9  ;;  %5542 = vmatmul.mubr.bf16.gmra.mrb[180].mxu1 %v14026_v9  ;;  %v12265_v9 = vld [vmem:[%s16500_s5 + $0x8] ss:$16 sps:$4 sm:$0xff]  }
 0x2fb   :  { %4586 = vmatprep.mubr.bf16.mxu0 %v14084_v23  ;;  %5551 = vmatprep.mubr.bf16.mxu1 %v14084_v23 }
 0x302   :  { %4587 = vmatmul.mubr.bf16.gmra.mrb[184].mxu0 %v14055_v46  ;;  %5552 = vmatmul.mubr.bf16.gmra.mrb[184].mxu1 %v14055_v46 }
 0x303   :  { %4596 = vmatprep.mubr.bf16.mxu0 %v14113_v0  ;;  %5561 = vmatprep.mubr.bf16.mxu1 %v14113_v0 }
 0x30a   :  { %4597 = vmatmul.mubr.bf16.gmra.mrb[188].mxu0 %v14084_v23  ;;  %5562 = vmatmul.mubr.bf16.gmra.mrb[188].mxu1 %v14084_v23 }
 0x30b   :  { %4606 = vmatprep.mubr.bf16.mxu0 %v14203_v63  ;;  %5571 = vmatprep.mubr.bf16.mxu1 %v14203_v63 }
 0x312   :  { %4607 = vmatmul.mubr.bf16.gmra.mrb[192].mxu0 %v14182_v29  ;;  %5572 = vmatmul.mubr.bf16.gmra.mrb[192].mxu1 %v14182_v29  ;;  %v12270_v29 = vld [vmem:[%s16500_s5 + $0x24] ss:$16 sps:$4 sm:$0xff]  }
 0x313   :  { %4616 = vmatprep.mubr.bf16.mxu0 %v14232_v42  ;;  %5581 = vmatprep.mubr.bf16.mxu1 %v14232_v42 }
 0x31a   :  { %4617 = vmatmul.mubr.bf16.gmra.mrb[196].mxu0 %v14203_v63  ;;  %5582 = vmatmul.mubr.bf16.gmra.mrb[196].mxu1 %v14203_v63  ;;  %v12273_v63 = vld [vmem:[%s16500_s5 + $0x2c] ss:$16 sps:$4 sm:$0xff]  }
 0x31b   :  { %4626 = vmatprep.mubr.bf16.mxu0 %v14252_v19  ;;  %5591 = vmatprep.mubr.bf16.mxu1 %v14252_v19 }
 0x322   :  { %4627 = vmatmul.mubr.bf16.gmra.mrb[200].mxu0 %v14232_v42  ;;  %5592 = vmatmul.mubr.bf16.gmra.mrb[200].mxu1 %v14232_v42 }
 0x323   :  { %4636 = vmatprep.mubr.bf16.mxu0 %v14261_v49  ;;  %5601 = vmatprep.mubr.bf16.mxu1 %v14261_v49 }
 0x32a   :  { %4637 = vmatmul.mubr.bf16.gmra.mrb[204].mxu0 %v14252_v19  ;;  %5602 = vmatmul.mubr.bf16.gmra.mrb[204].mxu1 %v14252_v19 }
 0x32b   :  { %4679 = vmatprep.mubr.bf16.mxu0 %v13073_v1  ;;  %5644 = vmatprep.mubr.bf16.mxu1 %v13073_v1 }
 0x332   :  { %4680 = vmatmul.mubr.bf16.vlgmr.msra.gmra.mrb[144].mxu0 %v13846_v57  ;;  %5645 = vmatmul.mubr.bf16.vlgmr.msra.gmra.mrb[144].mxu1 %v13846_v57  ;;  %v12276_v57 = vld [vmem:[%s16500_s5 + $0x44] ss:$16 sps:$4 sm:$0xff]  }
 0x333   :  { %4689 = vmatprep.mubr.bf16.mxu0 %v13073_v1  ;;  %5654 = vmatprep.mubr.bf16.mxu1 %v13073_v1 }
 0x334   :  { %9115 = vmatpush1.bf16.msra.mxu0 %v12262_v32  ;;  %9459 = vmatpush1.bf16.msra.mxu1 %v12265_v9  ;;  %v12352_v32 = vld [vmem:[%s16500_s5 + $0x1e0] ss:$16 sps:$4 sm:$0xff]   ;;  %v12355_v9 = vld [vmem:[%s16500_s5 + $0x1e8] ss:$16 sps:$4 sm:$0xff]  }
 0x335   :  { %9116 = vmatprep.subr.bf16.mxu0 %v12270_v29  ;;  %9460 = vmatprep.subr.bf16.mxu1 %v12273_v63  ;;  %v12360_v29 = vld [vmem:[%s16500_s5 + $0x204] ss:$16 sps:$4 sm:$0xff]   ;;  %v12363_v63 = vld [vmem:[%s16500_s5 + $0x20c] ss:$16 sps:$4 sm:$0xff]  }
 0x338   :  { %9117 = vmatpush1.bf16.msra.mxu0 %v12268_v62  ;;  %9461 = vmatpush1.bf16.msra.mxu1 %v12271_v31 }
 0x339   :  { %9118 = vmatprep.subr.bf16.mxu0 %v12276_v57  ;;  %9462 = vmatprep.subr.bf16.mxu1 %v12279_v16 }
 0x33a   :  { %4690 = vmatmul.mubr.bf16.gmra.mrb[148].mxu0 %v13875_v27  ;;  %5655 = vmatmul.mubr.bf16.gmra.mrb[148].mxu1 %v13875_v27  ;;  %v12288_v27 = vld [vmem:[%s16500_s5 + $0x84] ss:$16 sps:$4 sm:$0xff]  }
 0x33b   :  { %4699 = vmatprep.mubr.bf16.mxu0 %v13073_v1  ;;  %5664 = vmatprep.mubr.bf16.mxu1 %v13073_v1 }
 0x33c   :  { %9119 = vmatpush1.bf16.msra.mxu0 %v12274_v33  ;;  %9463 = vmatpush1.bf16.msra.mxu1 %v12277_v36 }
 0x33d   :  { %9120 = vmatprep.subr.bf16.mxu0 %v12282_v39  ;;  %9464 = vmatprep.subr.bf16.mxu1 %v12285_v40 }
 0x340   :  { %9121 = vmatpush1.bf16.msra.mxu0 %v12280_v41  ;;  %9465 = vmatpush1.bf16.msra.mxu1 %v12283_v28 }
 0x341   :  { %9122 = vmatprep.subr.bf16.mxu0 %v12288_v27  ;;  %9466 = vmatprep.subr.bf16.mxu1 %v12291_v25 }
 0x342   :  { %4700 = vmatmul.mubr.bf16.gmra.mrb[152].mxu0 %v13904_v61  ;;  %5665 = vmatmul.mubr.bf16.gmra.mrb[152].mxu1 %v13904_v61  ;;  %v12303_v61 = vld [vmem:[%s16500_s5 + $0xcc] ss:$16 sps:$4 sm:$0xff]  }
 0x343   :  { %4709 = vmatprep.mubr.bf16.mxu0 %v13073_v1  ;;  %5674 = vmatprep.mubr.bf16.mxu1 %v13073_v1 }
 0x344   :  { %9123 = vmatpush1.bf16.msra.mxu0 %v12286_v35  ;;  %9467 = vmatpush1.bf16.msra.mxu1 %v12289_v44 }
 0x345   :  { %9124 = vmatprep.subr.bf16.mxu0 %v12294_v45  ;;  %9468 = vmatprep.subr.bf16.mxu1 %v12297_v55 }
 0x348   :  { %9125 = vmatpush1.bf16.msra.mxu0 %v12292_v47  ;;  %9469 = vmatpush1.bf16.msra.mxu1 %v12295_v48 }
 0x349   :  { %9126 = vmatprep.subr.bf16.mxu0 %v12300_v58  ;;  %9470 = vmatprep.subr.bf16.mxu1 %v12303_v61 }
 0x34a   :  { %4710 = vmatmul.mubr.bf16.gmra.mrb[156].mxu0 %v13932_v30  ;;  %5675 = vmatmul.mubr.bf16.gmra.mrb[156].mxu1 %v13932_v30  ;;  %v12315_v30 = vld [vmem:[%s16500_s5 + $0x10c] ss:$16 sps:$4 sm:$0xff]  }
 0x34b   :  { %4719 = vmatprep.mubr.bf16.mxu0 %v13073_v1  ;;  %5684 = vmatprep.mubr.bf16.mxu1 %v13073_v1 }
 0x34c   :  { %9127 = vmatpush1.bf16.msra.mxu0 %v12298_v50  ;;  %9471 = vmatpush1.bf16.msra.mxu1 %v12301_v54 }
 0x34d   :  { %9128 = vmatprep.subr.bf16.mxu0 %v12306_v52  ;;  %9472 = vmatprep.subr.bf16.mxu1 %v12309_v56 }
 0x350   :  { %9129 = vmatpush1.bf16.msra.mxu0 %v12304_v53  ;;  %9473 = vmatpush1.bf16.msra.mxu1 %v12307_v59 }
 0x351   :  { %9130 = vmatprep.subr.bf16.mxu0 %v12312_v34  ;;  %9474 = vmatprep.subr.bf16.mxu1 %v12315_v30 }
 0x352   :  { %4720 = vmatmul.mubr.bf16.gmra.mrb[160].mxu0 %v13956_v43  ;;  %5685 = vmatmul.mubr.bf16.gmra.mrb[160].mxu1 %v13956_v43  ;;  %v12327_v43 = vld [vmem:[%s16500_s5 + $0x14c] ss:$16 sps:$4 sm:$0xff]  }
 0x353   :  { %4729 = vmatprep.mubr.bf16.mxu0 %v13073_v1  ;;  %5694 = vmatprep.mubr.bf16.mxu1 %v13073_v1 }
 0x354   :  { %9131 = vmatpush1.bf16.msra.mxu0 %v12310_v3  ;;  %9475 = vmatpush1.bf16.msra.mxu1 %v12313_v24 }
 0x355   :  { %9132 = vmatprep.subr.bf16.mxu0 %v12318_v4  ;;  %9476 = vmatprep.subr.bf16.mxu1 %v12321_v7 }
 0x358   :  { %9133 = vmatpush1.bf16.msra.mxu0 %v12316_v15  ;;  %9477 = vmatpush1.bf16.msra.mxu1 %v12319_v10 }
 0x359   :  { %9134 = vmatprep.subr.bf16.mxu0 %v12324_v11  ;;  %9478 = vmatprep.subr.bf16.mxu1 %v12327_v43 }
 0x35a   :  { %4730 = vmatmul.mubr.bf16.gmra.mrb[164].mxu0 %v13964_v8  ;;  %5695 = vmatmul.mubr.bf16.gmra.mrb[164].mxu1 %v13964_v8  ;;  %v12339_v8 = vld [vmem:[%s16500_s5 + $0x18c] ss:$16 sps:$4 sm:$0xff]  }
 0x35b   :  { %4739 = vmatprep.mubr.bf16.mxu0 %v13073_v1  ;;  %5704 = vmatprep.mubr.bf16.mxu1 %v13073_v1 }
 0x35c   :  { %9135 = vmatpush1.bf16.msra.mxu0 %v12322_v12  ;;  %9479 = vmatpush1.bf16.msra.mxu1 %v12325_v14 }
 0x35d   :  { %9136 = vmatprep.subr.bf16.mxu0 %v12330_v18  ;;  %9480 = vmatprep.subr.bf16.mxu1 %v12333_v38 }
 0x360   :  { %9137 = vmatpush1.bf16.msra.mxu0 %v12328_v20  ;;  %9481 = vmatpush1.bf16.msra.mxu1 %v12331_v6 }
 0x361   :  { %9138 = vmatprep.subr.bf16.mxu0 %v12336_v21  ;;  %9482 = vmatprep.subr.bf16.mxu1 %v12339_v8 }
 0x362   :  { %4740 = vmatmul.mubr.bf16.gmra.mrb[168].mxu0 %v13972_v37  ;;  %5705 = vmatmul.mubr.bf16.gmra.mrb[168].mxu1 %v13972_v37  ;;  %v12343_v37 = vld [vmem:[%s16500_s5 + $0x1a8] ss:$16 sps:$4 sm:$0xff]  }
 0x363   :  { %4749 = vmatprep.mubr.bf16.mxu0 %v13073_v1  ;;  %5714 = vmatprep.mubr.bf16.mxu1 %v13073_v1 }
 0x364   :  { %9139 = vmatpush1.bf16.msra.mxu0 %v12334_v22  ;;  %9483 = vmatpush1.bf16.msra.mxu1 %v12337_v13 }
 0x365   :  { %9140 = vmatprep.subr.bf16.mxu0 %v12342_v26 }
 0x368   :  { %9141 = vmatpush1.bf16.msra.mxu0 %v12340_v51 }
 0x36a   :  { %4750 = vmatmul.mubr.bf16.gmra.mrb[172].mxu0 %v13980_v2  ;;  %5715 = vmatmul.mubr.bf16.gmra.mrb[172].mxu1 %v13980_v2  ;;  %v12345_v2 = vld [vmem:[%s16500_s5 + $0x1ac] ss:$16 sps:$4 sm:$0xff]  }
 0x36b   :  { %4759 = vmatprep.mubr.bf16.mxu0 %v13073_v1  ;;  %5724 = vmatprep.mubr.bf16.mxu1 %v13073_v1 }
 0x36c   :  { %9484 = vmatprep.subr.bf16.mxu1 %v12345_v2  ;;  %v12361_v2 = vld [vmem:[%s16500_s5 + $0x208] ss:$16 sps:$4 sm:$0xff]  }
 0x36d   :  { %9485 = vmatpush1.bf16.msra.mxu1 %v12343_v37  ;;  %v12358_v37 = vld [vmem:[%s16500_s5 + $0x200] ss:$16 sps:$4 sm:$0xff]  }
 0x372   :  { %4760 = vmatmul.mubr.bf16.gmra.mrb[176].mxu0 %v14055_v46  ;;  %5725 = vmatmul.mubr.bf16.gmra.mrb[176].mxu1 %v14055_v46  ;;  %v12346_v46 = vld [vmem:[%s16500_s5 + $0x1c0] ss:$16 sps:$4 sm:$0xff]  }
 0x373   :  { %4769 = vmatprep.mubr.bf16.mxu0 %v13073_v1  ;;  %5734 = vmatprep.mubr.bf16.mxu1 %v13073_v1 }
 0x37a   :  { %4770 = vmatmul.mubr.bf16.gmra.mrb[180].mxu0 %v14084_v23  ;;  %5735 = vmatmul.mubr.bf16.gmra.mrb[180].mxu1 %v14084_v23  ;;  %v12348_v23 = vld [vmem:[%s16500_s5 + $0x1c4] ss:$16 sps:$4 sm:$0xff]  }
 0x37b   :  { %4779 = vmatprep.mubr.bf16.mxu0 %v13073_v1  ;;  %5744 = vmatprep.mubr.bf16.mxu1 %v13073_v1 }
 0x37c   :  { %9142 = vmatprep.subr.bf16.mxu0 %v12348_v23  ;;  %v12369_v23 = vld [vmem:[%s16500_s5 + $0x22c] ss:$16 sps:$4 sm:$0xff]  }
 0x37d   :  { %9143 = vmatpush1.bf16.msra.mxu0 %v12346_v46  ;;  %v12366_v46 = vld [vmem:[%s16500_s5 + $0x224] ss:$16 sps:$4 sm:$0xff]  }
 0x382   :  { %4780 = vmatmul.mubr.bf16.gmra.mrb[184].mxu0 %v14113_v0  ;;  %5745 = vmatmul.mubr.bf16.gmra.mrb[184].mxu1 %v14113_v0  ;;  %v12351_v0 = vld [vmem:[%s16500_s5 + $0x1cc] ss:$16 sps:$4 sm:$0xff]  }
 0x383   :  { %4789 = vmatprep.mubr.bf16.mxu0 %v13073_v1  ;;  %5754 = vmatprep.mubr.bf16.mxu1 %v13073_v1 }
 0x384   :  { %9486 = vmatprep.subr.bf16.mxu1 %v12351_v0 }
 0x38a   :  { %4790 = vmatmul.mubr.bf16.gmra.mrb[188].mxu0 %v14142_v60  ;;  %5755 = vmatmul.mubr.bf16.gmra.mrb[188].mxu1 %v14142_v60  ;;  %v12349_v60 = vld [vmem:[%s16500_s5 + $0x1c8] ss:$16 sps:$4 sm:$0xff]  }
 0x38b   :  { %4799 = vmatprep.mubr.bf16.mxu0 %v13073_v1  ;;  %5764 = vmatprep.mubr.bf16.mxu1 %v13073_v1 }
 0x38c   :  { %9487 = vmatpush1.bf16.msra.mxu1 %v12349_v60 }
 0x38d   :  { %9488 = vmatprep.subr.bf16.mxu1 %v12357_v17 }
 0x390   :  { %9489 = vmatpush1.bf16.msra.mxu1 %v12355_v9  ;;  %v12364_v9 = vld [vmem:[%s16500_s5 + $0x220] ss:$16 sps:$4 sm:$0xff]  }
 0x391   :  { %9501 = vmatprep.subr.bf16.mxu1 %v12363_v63 }
 0x392   :  { %4800 = vmatmul.mubr.bf16.gmra.mrb[192].mxu0 %v14232_v42  ;;  %5765 = vmatmul.mubr.bf16.gmra.mrb[192].mxu1 %v14232_v42  ;;  %v12354_v42 = vld [vmem:[%s16500_s5 + $0x1e4] ss:$16 sps:$4 sm:$0xff]  }
 0x393   :  { %4809 = vmatprep.mubr.bf16.mxu0 %v13073_v1  ;;  %5774 = vmatprep.mubr.bf16.mxu1 %v13073_v1 }
 0x394   :  { %9144 = vmatprep.subr.bf16.mxu0 %v12354_v42 }
 0x395   :  { %9145 = vmatpush1.bf16.msra.mxu0 %v12352_v32 }
 0x396   :  { %9157 = vmatprep.subr.bf16.mxu0 %v12360_v29 }
 0x39a   :  { %4810 = vmatmul.mubr.bf16.gmra.mrb[196].mxu0 %v14252_v19  ;;  %5775 = vmatmul.mubr.bf16.gmra.mrb[196].mxu1 %v14252_v19 }
 0x39b   :  { %4819 = vmatprep.mubr.bf16.mxu0 %v13073_v1  ;;  %5784 = vmatprep.mubr.bf16.mxu1 %v13073_v1 }
 0x3a2   :  { %4820 = vmatmul.mubr.bf16.gmra.mrb[200].mxu0 %v14261_v49  ;;  %5785 = vmatmul.mubr.bf16.gmra.mrb[200].mxu1 %v14261_v49  ;;  %v14962_v49 = vld [vmem:[%s16501_s4] ss:$0 sm:$0xff] }
 0x3a3   :  { %4829 = vmatprep.mubr.bf16.mxu0 %v13073_v1  ;;  %5794 = vmatprep.mubr.bf16.mxu1 %v13073_v1 }
 0x3aa   :  { %4830 = vmatmul.mubr.bf16.gmra.mrb[204].mxu0 %v14267_v5  ;;  %5795 = vmatmul.mubr.bf16.gmra.mrb[204].mxu1 %v14267_v5 }
 0x405   :  { %v4681_v19 = vpop.f32.mrb[144].mxu0  ;;  %v5646_v62 = vpop.f32.mrb[144].mxu1 }
 0x406   :  { %v4683_v31 = vpop.f32.mrb[145].mxu0  ;;  %v5648_v57 = vpop.f32.mrb[145].mxu1 }
 0x407   :  { %v5805_v16 = vmax.f32 %v4681_v19, %v4683_v31  ;;  %v5837_v33 = vmax.f32 %v5646_v62, %v5648_v57  ;;  %v4685_v36 = vpop.f32.mrb[146].mxu0  ;;  %v5650_v39 = vpop.f32.mrb[146].mxu1  ;;  %v12367_v19 = vld [vmem:[%s16500_s5 + $0x228] ss:$16 sps:$4 sm:$0xff]   ;;  %v12372_v62 = vld [vmem:[%s16500_s5 + $0x244] ss:$16 sps:$4 sm:$0xff]  }
 0x408   :  { %v4687_v40 = vpop.f32.mrb[147].mxu0  ;;  %v5652_v41 = vpop.f32.mrb[147].mxu1 }
 0x409   :  { %v5869_v1 = vmax.f32 %v5805_v16, %v5837_v33  ;;  %v5806_v28 = vmax.f32 %v4685_v36, %v4687_v40  ;;  %v5838_v27 = vmax.f32 %v5650_v39, %v5652_v41  ;;  %v12375_v40 = vld [vmem:[%s16500_s5 + $0x24c] ss:$16 sps:$4 sm:$0xff]  }
 0x40b   :  { %v5908_v5 = vadd.f32 %v14962_v49, %v5869_v1  ;;  %v5870_v25 = vmax.f32 %v5806_v28, %v5838_v27 }
 0x40d   :  { %v5909_v35 = vadd.f32 %v14962_v49, %v5870_v25  ;;  %v4691_v44 = vpop.f32.mrb[148].mxu0  ;;  %v5656_v45 = vpop.f32.mrb[148].mxu1  ;;  %v5940_v48 = vmax.f32 %v5908_v5, 0.0 }
 0x40e   :  { %v4693_v55 = vpop.f32.mrb[149].mxu0  ;;  %v5658_v47 = vpop.f32.mrb[149].mxu1 }
 0x40f   :  { %v5941_v58 = vmax.f32 %v5909_v35, 0.0  ;;  %v5807_v61 = vmax.f32 %v4691_v44, %v4693_v55  ;;  %v5839_v50 = vmax.f32 %v5656_v45, %v5658_v47  ;;  %v4695_v54 = vpop.f32.mrb[150].mxu0  ;;  %v5660_v52 = vpop.f32.mrb[150].mxu1  ;;  %v12370_v35 = vld [vmem:[%s16500_s5 + $0x240] ss:$16 sps:$4 sm:$0xff]  }
 0x410   :  { %v4697_v56 = vpop.f32.mrb[151].mxu0  ;;  %v5662_v53 = vpop.f32.mrb[151].mxu1  ;;  %v12373_v44 = vld [vmem:[%s16500_s5 + $0x248] ss:$16 sps:$4 sm:$0xff]   ;;  %v12378_v45 = vld [vmem:[%s16500_s5 + $0x264] ss:$16 sps:$4 sm:$0xff]  }
 0x411   :  { %v5972_v59 = vpack.c.bf16 %v5941_v58, %v5940_v48  ;;  %v5871_v34 = vmax.f32 %v5807_v61, %v5839_v50  ;;  %v5808_v30 = vmax.f32 %v4695_v54, %v4697_v56  ;;  %v5840_v3 = vmax.f32 %v5660_v52, %v5662_v53  ;;  %v12381_v48 = vld [vmem:[%s16500_s5 + $0x26c] ss:$16 sps:$4 sm:$0xff]   ;;  %v12376_v54 = vld [vmem:[%s16500_s5 + $0x260] ss:$16 sps:$4 sm:$0xff]   ;;  %v12379_v53 = vld [vmem:[%s16500_s5 + $0x268] ss:$16 sps:$4 sm:$0xff]  }
 0x413   :  { %v5910_v24 = vadd.f32 %v14962_v49, %v5871_v34  ;;  %v5872_v4 = vmax.f32 %v5808_v30, %v5840_v3 }
 0x415   :  { %v5911_v7 = vadd.f32 %v14962_v49, %v5872_v4  ;;  %v4701_v15 = vpop.f32.mrb[152].mxu0  ;;  %v5666_v10 = vpop.f32.mrb[152].mxu1  ;;  %v5942_v12 = vmax.f32 %v5910_v24, 0.0 }
 0x416   :  { %v4703_v11 = vpop.f32.mrb[153].mxu0  ;;  %v5668_v43 = vpop.f32.mrb[153].mxu1 }
 0x417   :  { %v5943_v14 = vmax.f32 %v5911_v7, 0.0  ;;  %v5809_v18 = vmax.f32 %v4701_v15, %v4703_v11  ;;  %v5841_v38 = vmax.f32 %v5666_v10, %v5668_v43  ;;  %v4705_v20 = vpop.f32.mrb[154].mxu0  ;;  %v5670_v6 = vpop.f32.mrb[154].mxu1  ;;  %v12387_v15 = vld [vmem:[%s16500_s5 + $0x28c] ss:$16 sps:$4 sm:$0xff]  }
 0x418   :  { %v4707_v21 = vpop.f32.mrb[155].mxu0  ;;  %v5672_v8 = vpop.f32.mrb[155].mxu1 }
 0x419   :  { %v5873_v22 = vmax.f32 %v5809_v18, %v5841_v38  ;;  %v5810_v13 = vmax.f32 %v4705_v20, %v4707_v21  ;;  %v5842_v26 = vmax.f32 %v5670_v6, %v5672_v8  ;;  %v5973_v51 = vpack.c.bf16 %v5943_v14, %v5942_v12  ;;  %v12382_v18 = vld [vmem:[%s16500_s5 + $0x280] ss:$16 sps:$4 sm:$0xff]   ;;  %v12385_v20 = vld [vmem:[%s16500_s5 + $0x288] ss:$16 sps:$4 sm:$0xff]   ;;  %v12390_v6 = vld [vmem:[%s16500_s5 + $0x2a4] ss:$16 sps:$4 sm:$0xff]  }
 0x41b   :  { %v5912_v0 = vadd.f32 %v14962_v49, %v5873_v22  ;;  %v5874_v60 = vmax.f32 %v5810_v13, %v5842_v26  ;;  %9146 = vmatprep.mubr.bf16.mxu0 %v5973_v51  ;;  %9490 = vmatprep.mubr.bf16.mxu1 %v5973_v51  ;;  %v12393_v22 = vld [vmem:[%s16500_s5 + $0x2ac] ss:$16 sps:$4 sm:$0xff]  }
 0x41c   :  { %9147 = vmatmul.mubr.bf16.vlgmr.msra.gmra.mrb[208].mxu0 %v5972_v59  ;;  %9491 = vmatmul.mubr.bf16.vlgmr.msra.gmra.mrb[208].mxu1 %v5972_v59  ;;  %v12384_v59 = vld [vmem:[%s16500_s5 + $0x284] ss:$16 sps:$4 sm:$0xff]  }
 0x41d   :  { %v5913_v42 = vadd.f32 %v14962_v49, %v5874_v60  ;;  %9158 = vmatpush1.bf16.msra.mxu0 %v12358_v37  ;;  %9502 = vmatpush1.bf16.msra.mxu1 %v12361_v2  ;;  %v4711_v17 = vpop.f32.mrb[156].mxu0  ;;  %v5676_v32 = vpop.f32.mrb[156].mxu1  ;;  %v5944_v31 = vmax.f32 %v5912_v0, 0.0  ;;  %v12388_v37 = vld [vmem:[%s16500_s5 + $0x2a0] ss:$16 sps:$4 sm:$0xff]  }
 0x41e   :  { %v4713_v29 = vpop.f32.mrb[157].mxu0  ;;  %v5678_v63 = vpop.f32.mrb[157].mxu1  ;;  %9159 = vmatprep.subr.bf16.mxu0 %v12366_v46  ;;  %9503 = vmatprep.subr.bf16.mxu1 %v12369_v23  ;;  %v12391_v23 = vld [vmem:[%s16500_s5 + $0x2a8] ss:$16 sps:$4 sm:$0xff]   ;;  %v12396_v0 = vld [vmem:[%s16500_s5 + $0x2c4] ss:$16 sps:$4 sm:$0xff]  }
 0x41f   :  { %v5945_v57 = vmax.f32 %v5913_v42, 0.0  ;;  %v5811_v16 = vmax.f32 %v4711_v17, %v4713_v29  ;;  %v5843_v33 = vmax.f32 %v5676_v32, %v5678_v63  ;;  %v4715_v36 = vpop.f32.mrb[158].mxu0  ;;  %v5680_v39 = vpop.f32.mrb[158].mxu1  ;;  %v12399_v63 = vld [vmem:[%s16500_s5 + $0x2cc] ss:$16 sps:$4 sm:$0xff]  }
 0x420   :  { %v4717_v41 = vpop.f32.mrb[159].mxu0  ;;  %v5682_v1 = vpop.f32.mrb[159].mxu1 }
 0x421   :  { %v14994_v28 = vpack.c.bf16 %v5945_v57, %v5944_v31  ;;  %v5875_v27 = vmax.f32 %v5811_v16, %v5843_v33  ;;  %v5812_v5 = vmax.f32 %v4715_v36, %v4717_v41  ;;  %v5844_v25 = vmax.f32 %v5680_v39, %v5682_v1  ;;  %9160 = vmatpush1.bf16.msra.mxu0 %v12364_v9  ;;  %v12394_v36 = vld [vmem:[%s16500_s5 + $0x2c0] ss:$16 sps:$4 sm:$0xff]   ;;  %v12397_v39 = vld [vmem:[%s16500_s5 + $0x2c8] ss:$16 sps:$4 sm:$0xff]  }
 0x422   :  { %9504 = vmatpush1.bf16.msra.mxu1 %v12367_v19  ;;  %9161 = vmatprep.subr.bf16.mxu0 %v12372_v62 }
 0x423   :  { %v5914_v55 = vadd.f32 %v14962_v49, %v5875_v27  ;;  %v5876_v47 = vmax.f32 %v5812_v5, %v5844_v25  ;;  %9505 = vmatprep.subr.bf16.mxu1 %v12375_v40  ;;  %v12402_v40 = vld [vmem:[%s16500_s5 + $0x2e4] ss:$16 sps:$4 sm:$0xff]   ;;  %v12405_v27 = vld [vmem:[%s16500_s5 + $0x2ec] ss:$16 sps:$4 sm:$0xff]  }
 0x425   :  { %v5915_v58 = vadd.f32 %v14962_v49, %v5876_v47  ;;  %9162 = vmatpush1.bf16.msra.mxu0 %v12370_v35  ;;  %v4721_v61 = vpop.f32.mrb[160].mxu0  ;;  %v5686_v50 = vpop.f32.mrb[160].mxu1  ;;  %v5946_v34 = vmax.f32 %v5914_v55, 0.0  ;;  %v12403_v47 = vld [vmem:[%s16500_s5 + $0x2e8] ss:$16 sps:$4 sm:$0xff]  }
 0x426   :  { %9506 = vmatpush1.bf16.msra.mxu1 %v12373_v44  ;;  %v4723_v52 = vpop.f32.mrb[161].mxu0  ;;  %v5688_v56 = vpop.f32.mrb[161].mxu1  ;;  %9163 = vmatprep.subr.bf16.mxu0 %v12378_v45  ;;  %v12400_v44 = vld [vmem:[%s16500_s5 + $0x2e0] ss:$16 sps:$4 sm:$0xff]  }
 0x427   :  { %v5947_v30 = vmax.f32 %v5915_v58, 0.0  ;;  %v5813_v3 = vmax.f32 %v4721_v61, %v4723_v52  ;;  %v5845_v24 = vmax.f32 %v5686_v50, %v5688_v56  ;;  %v4725_v4 = vpop.f32.mrb[162].mxu0  ;;  %v5690_v7 = vpop.f32.mrb[162].mxu1  ;;  %9507 = vmatprep.subr.bf16.mxu1 %v12381_v48  ;;  %v12408_v48 = vld [vmem:[%s16500_s5 + $0x304] ss:$16 sps:$4 sm:$0xff]  }
 0x428   :  { %v4727_v10 = vpop.f32.mrb[163].mxu0  ;;  %v5692_v11 = vpop.f32.mrb[163].mxu1 }
 0x429   :  { %v5877_v43 = vmax.f32 %v5813_v3, %v5845_v24  ;;  %v5814_v12 = vmax.f32 %v4725_v4, %v4727_v10  ;;  %v5846_v14 = vmax.f32 %v5690_v7, %v5692_v11  ;;  %9164 = vmatpush1.bf16.msra.mxu0 %v12376_v54  ;;  %v5975_v38 = vpack.c.bf16 %v5947_v30, %v5946_v34  ;;  %v12406_v4 = vld [vmem:[%s16500_s5 + $0x300] ss:$16 sps:$4 sm:$0xff]   ;;  %v12414_v10 = vld [vmem:[%s16500_s5 + $0x324] ss:$16 sps:$4 sm:$0xff]  }
 0x42a   :  { %9508 = vmatpush1.bf16.msra.mxu1 %v12379_v53  ;;  %9165 = vmatprep.subr.bf16.mxu0 %v12384_v59  ;;  %v12411_v53 = vld [vmem:[%s16500_s5 + $0x30c] ss:$16 sps:$4 sm:$0xff]  }
 0x42b   :  { %v5916_v21 = vadd.f32 %v14962_v49, %v5877_v43  ;;  %v5878_v8 = vmax.f32 %v5814_v12, %v5846_v14  ;;  %9189 = vmatprep.mubr.bf16.mxu0 %v5975_v38  ;;  %9509 = vmatprep.subr.bf16.mxu1 %v12387_v15  ;;  %v12409_v15 = vld [vmem:[%s16500_s5 + $0x308] ss:$16 sps:$4 sm:$0xff]   ;;  %v12417_v12 = vld [vmem:[%s16500_s5 + $0x32c] ss:$16 sps:$4 sm:$0xff]  }
 0x42c   :  { %9533 = vmatprep.mubr.bf16.mxu1 %v5975_v38 }
 0x42d   :  { %v5917_v13 = vadd.f32 %v14962_v49, %v5878_v8  ;;  %9166 = vmatpush1.bf16.msra.mxu0 %v12382_v18  ;;  %v4731_v26 = vpop.f32.mrb[164].mxu0  ;;  %v5696_v51 = vpop.f32.mrb[164].mxu1  ;;  %v5948_v60 = vmax.f32 %v5916_v21, 0.0  ;;  %v12415_v8 = vld [vmem:[%s16500_s5 + $0x328] ss:$16 sps:$4 sm:$0xff]  }
 0x42e   :  { %9510 = vmatpush1.bf16.msra.mxu1 %v12385_v20  ;;  %v4733_v2 = vpop.f32.mrb[165].mxu0  ;;  %v5698_v46 = vpop.f32.mrb[165].mxu1  ;;  %9167 = vmatprep.subr.bf16.mxu0 %v12390_v6  ;;  %v12412_v20 = vld [vmem:[%s16500_s5 + $0x320] ss:$16 sps:$4 sm:$0xff]  }
 0x42f   :  { %v5949_v42 = vmax.f32 %v5917_v13, 0.0  ;;  %v5815_v17 = vmax.f32 %v4731_v26, %v4733_v2  ;;  %v5847_v32 = vmax.f32 %v5696_v51, %v5698_v46  ;;  %v4735_v9 = vpop.f32.mrb[166].mxu0  ;;  %v5700_v29 = vpop.f32.mrb[166].mxu1  ;;  %9511 = vmatprep.subr.bf16.mxu1 %v12393_v22  ;;  %v12420_v22 = vld [vmem:[%s16500_s5 + $0x344] ss:$16 sps:$4 sm:$0xff]  }
 0x430   :  { %v4737_v19 = vpop.f32.mrb[167].mxu0  ;;  %v5702_v62 = vpop.f32.mrb[167].mxu1 }
 0x431   :  { %v15048_v31 = vpack.c.bf16 %v5949_v42, %v5948_v60  ;;  %v5879_v57 = vmax.f32 %v5815_v17, %v5847_v32  ;;  %v5816_v16 = vmax.f32 %v4735_v9, %v4737_v19  ;;  %v5848_v33 = vmax.f32 %v5700_v29, %v5702_v62  ;;  %9168 = vmatpush1.bf16.msra.mxu0 %v12388_v37  ;;  %v12418_v29 = vld [vmem:[%s16500_s5 + $0x340] ss:$16 sps:$4 sm:$0xff]   ;;  %v12426_v19 = vld [vmem:[%s16500_s5 + $0x364] ss:$16 sps:$4 sm:$0xff]  }
 0x432   :  { %9512 = vmatpush1.bf16.msra.mxu1 %v12391_v23  ;;  %9169 = vmatprep.subr.bf16.mxu0 %v12396_v0  ;;  %v12423_v23 = vld [vmem:[%s16500_s5 + $0x34c] ss:$16 sps:$4 sm:$0xff]  }
 0x433   :  { %v5918_v41 = vadd.f32 %v14962_v49, %v5879_v57  ;;  %v5880_v1 = vmax.f32 %v5816_v16, %v5848_v33  ;;  %9513 = vmatprep.subr.bf16.mxu1 %v12399_v63  ;;  %v12421_v63 = vld [vmem:[%s16500_s5 + $0x348] ss:$16 sps:$4 sm:$0xff]   ;;  %v12429_v16 = vld [vmem:[%s16500_s5 + $0x36c] ss:$16 sps:$4 sm:$0xff]  }
 0x435   :  { %v5919_v5 = vadd.f32 %v14962_v49, %v5880_v1  ;;  %9170 = vmatpush1.bf16.msra.mxu0 %v12394_v36  ;;  %v4741_v25 = vpop.f32.mrb[168].mxu0  ;;  %v5706_v35 = vpop.f32.mrb[168].mxu1  ;;  %v5950_v58 = vmax.f32 %v5918_v41, 0.0 }
 0x436   :  { %9514 = vmatpush1.bf16.msra.mxu1 %v12397_v39  ;;  %v4743_v45 = vpop.f32.mrb[169].mxu0  ;;  %v5708_v55 = vpop.f32.mrb[169].mxu1  ;;  %9171 = vmatprep.subr.bf16.mxu0 %v12402_v40  ;;  %v12424_v40 = vld [vmem:[%s16500_s5 + $0x360] ss:$16 sps:$4 sm:$0xff]  }
 0x437   :  { %v5951_v61 = vmax.f32 %v5919_v5, 0.0  ;;  %v5817_v50 = vmax.f32 %v4741_v25, %v4743_v45  ;;  %v5849_v54 = vmax.f32 %v5706_v35, %v5708_v55  ;;  %v4745_v52 = vpop.f32.mrb[170].mxu0  ;;  %v5710_v56 = vpop.f32.mrb[170].mxu1  ;;  %9515 = vmatprep.subr.bf16.mxu1 %v12405_v27  ;;  %v12427_v27 = vld [vmem:[%s16500_s5 + $0x368] ss:$16 sps:$4 sm:$0xff]  }
 0x438   :  { %v4747_v59 = vpop.f32.mrb[171].mxu0  ;;  %v5712_v34 = vpop.f32.mrb[171].mxu1  ;;  %v12432_v5 = vld [vmem:[%s16500_s5 + $0x384] ss:$16 sps:$4 sm:$0xff]  }
 0x439   :  { %v5881_v30 = vmax.f32 %v5817_v50, %v5849_v54  ;;  %v5818_v3 = vmax.f32 %v4745_v52, %v4747_v59  ;;  %v5850_v24 = vmax.f32 %v5710_v56, %v5712_v34  ;;  %9172 = vmatpush1.bf16.msra.mxu0 %v12400_v44  ;;  %v15079_v7 = vpack.c.bf16 %v5951_v61, %v5950_v58  ;;  %v12430_v56 = vld [vmem:[%s16500_s5 + $0x380] ss:$16 sps:$4 sm:$0xff]   ;;  %v12433_v59 = vld [vmem:[%s16500_s5 + $0x388] ss:$16 sps:$4 sm:$0xff]   ;;  %v12438_v34 = vld [vmem:[%s16500_s5 + $0x3a4] ss:$16 sps:$4 sm:$0xff]  }
 0x43a   :  { %9516 = vmatpush1.bf16.msra.mxu1 %v12403_v47  ;;  %9173 = vmatprep.subr.bf16.mxu0 %v12408_v48  ;;  %v12435_v48 = vld [vmem:[%s16500_s5 + $0x38c] ss:$16 sps:$4 sm:$0xff]  }
 0x43b   :  { %v5920_v11 = vadd.f32 %v14962_v49, %v5881_v30  ;;  %v5882_v43 = vmax.f32 %v5818_v3, %v5850_v24  ;;  %9517 = vmatprep.subr.bf16.mxu1 %v12411_v53  ;;  %v12441_v24 = vld [vmem:[%s16500_s5 + $0x3ac] ss:$16 sps:$4 sm:$0xff]  }
 0x43d   :  { %v5921_v14 = vadd.f32 %v14962_v49, %v5882_v43  ;;  %9174 = vmatpush1.bf16.msra.mxu0 %v12406_v4  ;;  %v4751_v18 = vpop.f32.mrb[172].mxu0  ;;  %v5716_v38 = vpop.f32.mrb[172].mxu1  ;;  %v5952_v13 = vmax.f32 %v5920_v11, 0.0  ;;  %v12436_v11 = vld [vmem:[%s16500_s5 + $0x3a0] ss:$16 sps:$4 sm:$0xff]  }
 0x43e   :  { %9518 = vmatpush1.bf16.msra.mxu1 %v12409_v15  ;;  %v4753_v6 = vpop.f32.mrb[173].mxu0  ;;  %v5718_v21 = vpop.f32.mrb[173].mxu1  ;;  %9175 = vmatprep.subr.bf16.mxu0 %v12414_v10 }
 0x43f   :  { %v5953_v26 = vmax.f32 %v5921_v14, 0.0  ;;  %v5819_v51 = vmax.f32 %v4751_v18, %v4753_v6  ;;  %v5851_v37 = vmax.f32 %v5716_v38, %v5718_v21  ;;  %v4755_v2 = vpop.f32.mrb[174].mxu0  ;;  %v5720_v46 = vpop.f32.mrb[174].mxu1  ;;  %9519 = vmatprep.subr.bf16.mxu1 %v12417_v12  ;;  %v12439_v14 = vld [vmem:[%s16500_s5 + $0x3a8] ss:$16 sps:$4 sm:$0xff]  }
 0x440   :  { %v4757_v0 = vpop.f32.mrb[175].mxu0  ;;  %v5722_v60 = vpop.f32.mrb[175].mxu1  ;;  %v12444_v18 = vld [vmem:[%s16500_s5 + $0x3c4] ss:$16 sps:$4 sm:$0xff]  }
 0x441   :  { %v15104_v42 = vpack.c.bf16 %v5953_v26, %v5952_v13  ;;  %v5883_v17 = vmax.f32 %v5819_v51, %v5851_v37  ;;  %v5820_v32 = vmax.f32 %v4755_v2, %v4757_v0  ;;  %v5852_v9 = vmax.f32 %v5720_v46, %v5722_v60  ;;  %9176 = vmatpush1.bf16.msra.mxu0 %v12412_v20  ;;  %v12447_v13 = vld [vmem:[%s16500_s5 + $0x3cc] ss:$16 sps:$4 sm:$0xff]   ;;  %v12442_v0 = vld [vmem:[%s16500_s5 + $0x3c0] ss:$16 sps:$4 sm:$0xff]   ;;  %v12445_v60 = vld [vmem:[%s16500_s5 + $0x3c8] ss:$16 sps:$4 sm:$0xff]  }
 0x442   :  { %9520 = vmatpush1.bf16.msra.mxu1 %v12415_v8  ;;  %9177 = vmatprep.subr.bf16.mxu0 %v12420_v22 }
 0x443   :  { %v5922_v62 = vadd.f32 %v14962_v49, %v5883_v17  ;;  %v5884_v57 = vmax.f32 %v5820_v32, %v5852_v9  ;;  %9521 = vmatprep.subr.bf16.mxu1 %v12423_v23  ;;  %v12450_v17 = vld [vmem:[%s16500_s5 + $0x3e4] ss:$16 sps:$4 sm:$0xff]  }
 0x445   :  { %v5923_v33 = vadd.f32 %v14962_v49, %v5884_v57  ;;  %9178 = vmatpush1.bf16.msra.mxu0 %v12418_v29  ;;  %v4761_v36 = vpop.f32.mrb[176].mxu0  ;;  %v5726_v39 = vpop.f32.mrb[176].mxu1  ;;  %v5954_v25 = vmax.f32 %v5922_v62, 0.0  ;;  %v12453_v29 = vld [vmem:[%s16500_s5 + $0x3ec] ss:$16 sps:$4 sm:$0xff]  }
 0x446   :  { %9522 = vmatpush1.bf16.msra.mxu1 %v12421_v63  ;;  %v4763_v41 = vpop.f32.mrb[177].mxu0  ;;  %v5728_v1 = vpop.f32.mrb[177].mxu1  ;;  %9179 = vmatprep.subr.bf16.mxu0 %v12426_v19  ;;  %v12448_v57 = vld [vmem:[%s16500_s5 + $0x3e0] ss:$16 sps:$4 sm:$0xff]  }
 0x447   :  { %v5955_v35 = vmax.f32 %v5923_v33, 0.0  ;;  %v5821_v44 = vmax.f32 %v4761_v36, %v4763_v41  ;;  %v5853_v45 = vmax.f32 %v5726_v39, %v5728_v1  ;;  %v4765_v55 = vpop.f32.mrb[178].mxu0  ;;  %v5730_v47 = vpop.f32.mrb[178].mxu1  ;;  %9523 = vmatprep.subr.bf16.mxu1 %v12429_v16  ;;  %v12451_v36 = vld [vmem:[%s16500_s5 + $0x3e8] ss:$16 sps:$4 sm:$0xff]  }
 0x448   :  { %v4767_v58 = vpop.f32.mrb[179].mxu0  ;;  %v5732_v61 = vpop.f32.mrb[179].mxu1  ;;  %v12456_v39 = vld [vmem:[%s16500_s5 + $0x404] ss:$16 sps:$4 sm:$0xff]  }
 0x449   :  { %v5885_v50 = vmax.f32 %v5821_v44, %v5853_v45  ;;  %v5822_v54 = vmax.f32 %v4765_v55, %v4767_v58  ;;  %v5854_v52 = vmax.f32 %v5730_v47, %v5732_v61  ;;  %9180 = vmatpush1.bf16.msra.mxu0 %v12424_v40  ;;  %v15135_v53 = vpack.c.bf16 %v5955_v35, %v5954_v25  ;;  %v12459_v35 = vld [vmem:[%s16500_s5 + $0x40c] ss:$16 sps:$4 sm:$0xff]   ;;  %v12454_v58 = vld [vmem:[%s16500_s5 + $0x400] ss:$16 sps:$4 sm:$0xff]  }
 0x44a   :  { %9524 = vmatpush1.bf16.msra.mxu1 %v12427_v27  ;;  %9181 = vmatprep.subr.bf16.mxu0 %v12432_v5 }
 0x44b   :  { %v5924_v30 = vadd.f32 %v14962_v49, %v5885_v50  ;;  %v5886_v3 = vmax.f32 %v5822_v54, %v5854_v52  ;;  %9525 = vmatprep.subr.bf16.mxu1 %v12435_v48  ;;  %v12457_v50 = vld [vmem:[%s16500_s5 + $0x408] ss:$16 sps:$4 sm:$0xff]  }
 0x44d   :  { %v5925_v4 = vadd.f32 %v14962_v49, %v5886_v3  ;;  %9182 = vmatpush1.bf16.msra.mxu0 %v12430_v56  ;;  %v4771_v15 = vpop.f32.mrb[180].mxu0  ;;  %v5736_v10 = vpop.f32.mrb[180].mxu1  ;;  %v5956_v38 = vmax.f32 %v5924_v30, 0.0  ;;  %v12462_v56 = vld [vmem:[%s16500_s5 + $0x424] ss:$16 sps:$4 sm:$0xff]  }
 0x44e   :  { %9526 = vmatpush1.bf16.msra.mxu1 %v12433_v59  ;;  %v4773_v43 = vpop.f32.mrb[181].mxu0  ;;  %v5738_v12 = vpop.f32.mrb[181].mxu1  ;;  %9183 = vmatprep.subr.bf16.mxu0 %v12438_v34  ;;  %v12465_v59 = vld [vmem:[%s16500_s5 + $0x42c] ss:$16 sps:$4 sm:$0xff]  }
 0x44f   :  { %v5957_v20 = vmax.f32 %v5925_v4, 0.0  ;;  %v5823_v6 = vmax.f32 %v4771_v15, %v4773_v43  ;;  %v5855_v21 = vmax.f32 %v5736_v10, %v5738_v12  ;;  %v4775_v8 = vpop.f32.mrb[182].mxu0  ;;  %v5740_v22 = vpop.f32.mrb[182].mxu1  ;;  %9527 = vmatprep.subr.bf16.mxu1 %v12441_v24  ;;  %v12460_v24 = vld [vmem:[%s16500_s5 + $0x420] ss:$16 sps:$4 sm:$0xff]  }
 0x450   :  { %v4777_v26 = vpop.f32.mrb[183].mxu0  ;;  %v5742_v51 = vpop.f32.mrb[183].mxu1  ;;  %v12463_v10 = vld [vmem:[%s16500_s5 + $0x428] ss:$16 sps:$4 sm:$0xff]  }
 0x451   :  { %v15160_v37 = vpack.c.bf16 %v5957_v20, %v5956_v38  ;;  %v5887_v2 = vmax.f32 %v5823_v6, %v5855_v21  ;;  %v5824_v46 = vmax.f32 %v4775_v8, %v4777_v26  ;;  %v5856_v23 = vmax.f32 %v5740_v22, %v5742_v51  ;;  %9184 = vmatpush1.bf16.msra.mxu0 %v12436_v11  ;;  %v12471_v20 = vld [vmem:[%s16500_s5 + $0x44c] ss:$16 sps:$4 sm:$0xff]   ;;  %v12469_v51 = vld [vmem:[%s16500_s5 + $0x448] ss:$16 sps:$4 sm:$0xff]  }
 0x452   :  { %9528 = vmatpush1.bf16.msra.mxu1 %v12439_v14  ;;  %9185 = vmatprep.subr.bf16.mxu0 %v12444_v18 }
 0x453   :  { %v5926_v32 = vadd.f32 %v14962_v49, %v5887_v2  ;;  %v5888_v9 = vmax.f32 %v5824_v46, %v5856_v23  ;;  %9529 = vmatprep.subr.bf16.mxu1 %v12447_v13  ;;  %v12474_v2 = vld [vmem:[%s16500_s5 + $0x464] ss:$16 sps:$4 sm:$0xff]  }
 0x455   :  { %v5927_v63 = vadd.f32 %v14962_v49, %v5888_v9  ;;  %9186 = vmatpush1.bf16.msra.mxu0 %v12442_v0  ;;  %v4781_v19 = vpop.f32.mrb[184].mxu0  ;;  %v5746_v62 = vpop.f32.mrb[184].mxu1  ;;  %v5958_v40 = vmax.f32 %v5926_v32, 0.0  ;;  %v12477_v0 = vld [vmem:[%s16500_s5 + $0x46c] ss:$16 sps:$4 sm:$0xff]  }
 0x456   :  { %9530 = vmatpush1.bf16.msra.mxu1 %v12445_v60  ;;  %v4783_v16 = vpop.f32.mrb[185].mxu0  ;;  %v5748_v33 = vpop.f32.mrb[185].mxu1  ;;  %9187 = vmatprep.subr.bf16.mxu0 %v12450_v17  ;;  %v12472_v9 = vld [vmem:[%s16500_s5 + $0x460] ss:$16 sps:$4 sm:$0xff]  }
 0x457   :  { %v5959_v41 = vmax.f32 %v5927_v63, 0.0  ;;  %v5825_v1 = vmax.f32 %v4781_v19, %v4783_v16  ;;  %v5857_v27 = vmax.f32 %v5746_v62, %v5748_v33  ;;  %v4785_v5 = vpop.f32.mrb[186].mxu0  ;;  %v5750_v25 = vpop.f32.mrb[186].mxu1  ;;  %9531 = vmatprep.subr.bf16.mxu1 %v12453_v29  ;;  %v12475_v19 = vld [vmem:[%s16500_s5 + $0x468] ss:$16 sps:$4 sm:$0xff]  }
 0x458   :  { %v4787_v44 = vpop.f32.mrb[187].mxu0  ;;  %v5752_v45 = vpop.f32.mrb[187].mxu1  ;;  %v12480_v62 = vld [vmem:[%s16500_s5 + $0x484] ss:$16 sps:$4 sm:$0xff]  }
 0x459   :  { %v5889_v55 = vmax.f32 %v5825_v1, %v5857_v27  ;;  %v5826_v47 = vmax.f32 %v4785_v5, %v4787_v44  ;;  %v5858_v48 = vmax.f32 %v5750_v25, %v5752_v45  ;;  %9188 = vmatpush1.bf16.msra.mxu0 %v12448_v57  ;;  %v15191_v61 = vpack.c.bf16 %v5959_v41, %v5958_v40  ;;  %v12483_v41 = vld [vmem:[%s16500_s5 + $0x48c] ss:$16 sps:$4 sm:$0xff]   ;;  %v12478_v44 = vld [vmem:[%s16500_s5 + $0x480] ss:$16 sps:$4 sm:$0xff]  }
 0x45a   :  { %9532 = vmatpush1.bf16.msra.mxu1 %v12451_v36  ;;  %9200 = vmatprep.subr.bf16.mxu0 %v12456_v39 }
 0x45b   :  { %v5928_v54 = vadd.f32 %v14962_v49, %v5889_v55  ;;  %v5890_v52 = vmax.f32 %v5826_v47, %v5858_v48  ;;  %9544 = vmatprep.subr.bf16.mxu1 %v12459_v35  ;;  %v12481_v55 = vld [vmem:[%s16500_s5 + $0x488] ss:$16 sps:$4 sm:$0xff]   ;;  %v12486_v47 = vld [vmem:[%s16500_s5 + $0x4a4] ss:$16 sps:$4 sm:$0xff]  }
 0x45c   :  { %9190 = vmatmul.mubr.bf16.vlgmr.msra.gmra.mrb[208].mxu0 %v14994_v28 }
 0x45d   :  { %v5929_v34 = vadd.f32 %v14962_v49, %v5890_v52  ;;  %9534 = vmatmul.mubr.bf16.vlgmr.msra.gmra.mrb[208].mxu1 %v14994_v28  ;;  %9201 = vmatpush1.bf16.msra.mxu0 %v12454_v58  ;;  %v4791_v30 = vpop.f32.mrb[188].mxu0  ;;  %v5756_v3 = vpop.f32.mrb[188].mxu1  ;;  %v12468_v28 = vld [vmem:[%s16500_s5 + $0x444] ss:$16 sps:$4 sm:$0xff]   ;;  %v5960_v11 = vmax.f32 %v5928_v54, 0.0 }
 0x45e   :  { %9232 = vmatprep.mubr.bf16.mxu0 %v15079_v7  ;;  %9545 = vmatpush1.bf16.msra.mxu1 %v12457_v50  ;;  %v4793_v4 = vpop.f32.mrb[189].mxu0  ;;  %v5758_v15 = vpop.f32.mrb[189].mxu1  ;;  %v12489_v50 = vld [vmem:[%s16500_s5 + $0x4ac] ss:$16 sps:$4 sm:$0xff]  }
 0x45f   :  { %v5961_v43 = vmax.f32 %v5929_v34, 0.0  ;;  %9576 = vmatprep.mubr.bf16.mxu1 %v15079_v7  ;;  %v5827_v12 = vmax.f32 %v4791_v30, %v4793_v4  ;;  %v5859_v14 = vmax.f32 %v5756_v3, %v5758_v15  ;;  %v4795_v18 = vpop.f32.mrb[190].mxu0  ;;  %v5760_v38 = vpop.f32.mrb[190].mxu1  ;;  %9202 = vmatprep.subr.bf16.mxu0 %v12462_v56  ;;  %v12466_v7 = vld [vmem:[%s16500_s5 + $0x440] ss:$16 sps:$4 sm:$0xff]  }
 0x460   :  { %9546 = vmatprep.subr.bf16.mxu1 %v12465_v59  ;;  %v4797_v6 = vpop.f32.mrb[191].mxu0  ;;  %v5762_v21 = vpop.f32.mrb[191].mxu1  ;;  %v12484_v59 = vld [vmem:[%s16500_s5 + $0x4a0] ss:$16 sps:$4 sm:$0xff]   ;;  %v12487_v3 = vld [vmem:[%s16500_s5 + $0x4a8] ss:$16 sps:$4 sm:$0xff]  }
 0x461   :  { %v15220_v8 = vpack.c.bf16 %v5961_v43, %v5960_v11  ;;  %v5891_v22 = vmax.f32 %v5827_v12, %v5859_v14  ;;  %v5828_v13 = vmax.f32 %v4795_v18, %v4797_v6  ;;  %v5860_v26 = vmax.f32 %v5760_v38, %v5762_v21  ;;  %9203 = vmatpush1.bf16.msra.mxu0 %v12460_v24  ;;  %v12492_v24 = vld [vmem:[%s16500_s5 + $0x4c4] ss:$16 sps:$4 sm:$0xff]   ;;  %v12495_v12 = vld [vmem:[%s16500_s5 + $0x4cc] ss:$16 sps:$4 sm:$0xff]  }
 0x462   :  { %9547 = vmatpush1.bf16.msra.mxu1 %v12463_v10  ;;  %9204 = vmatprep.subr.bf16.mxu0 %v12468_v28 }
 0x463   :  { %v5930_v46 = vadd.f32 %v14962_v49, %v5891_v22  ;;  %v5892_v23 = vmax.f32 %v5828_v13, %v5860_v26  ;;  %9548 = vmatprep.subr.bf16.mxu1 %v12471_v20  ;;  %v12490_v22 = vld [vmem:[%s16500_s5 + $0x4c0] ss:$16 sps:$4 sm:$0xff]   ;;  %v12493_v13 = vld [vmem:[%s16500_s5 + $0x4c8] ss:$16 sps:$4 sm:$0xff]   ;;  %v12498_v26 = vld [vmem:[%s16500_s5 + $0x4e4] ss:$16 sps:$4 sm:$0xff]  }
 0x465   :  { %v5931_v60 = vadd.f32 %v14962_v49, %v5892_v23  ;;  %9205 = vmatpush1.bf16.msra.mxu0 %v12466_v7  ;;  %v4801_v17 = vpop.f32.mrb[192].mxu0  ;;  %v5766_v32 = vpop.f32.mrb[192].mxu1  ;;  %v5962_v57 = vmax.f32 %v5930_v46, 0.0 }
 0x466   :  { %9549 = vmatpush1.bf16.msra.mxu1 %v12469_v51  ;;  %v4803_v29 = vpop.f32.mrb[193].mxu0  ;;  %v5768_v63 = vpop.f32.mrb[193].mxu1  ;;  %9206 = vmatprep.subr.bf16.mxu0 %v12474_v2  ;;  %v12501_v2 = vld [vmem:[%s16500_s5 + $0x4ec] ss:$16 sps:$4 sm:$0xff]  }
 0x467   :  { %v5963_v16 = vmax.f32 %v5931_v60, 0.0  ;;  %v5829_v33 = vmax.f32 %v4801_v17, %v4803_v29  ;;  %v5861_v36 = vmax.f32 %v5766_v32, %v5768_v63  ;;  %v4805_v39 = vpop.f32.mrb[194].mxu0  ;;  %v5770_v40 = vpop.f32.mrb[194].mxu1  ;;  %9550 = vmatprep.subr.bf16.mxu1 %v12477_v0  ;;  %v12496_v60 = vld [vmem:[%s16500_s5 + $0x4e0] ss:$16 sps:$4 sm:$0xff]  }
 0x468   :  { %v4807_v1 = vpop.f32.mrb[195].mxu0  ;;  %v5772_v27 = vpop.f32.mrb[195].mxu1  ;;  %v12504_v29 = vld [vmem:[%s16500_s5 + $0x504] ss:$16 sps:$4 sm:$0xff]  }
 0x469   :  { %v5893_v5 = vmax.f32 %v5829_v33, %v5861_v36  ;;  %v5830_v25 = vmax.f32 %v4805_v39, %v4807_v1  ;;  %v5862_v35 = vmax.f32 %v5770_v40, %v5772_v27  ;;  %9207 = vmatpush1.bf16.msra.mxu0 %v12472_v9  ;;  %v15251_v45 = vpack.c.bf16 %v5963_v16, %v5962_v57  ;;  %v12499_v9 = vld [vmem:[%s16500_s5 + $0x4e8] ss:$16 sps:$4 sm:$0xff]   ;;  %v12507_v36 = vld [vmem:[%s16500_s5 + $0x50c] ss:$16 sps:$4 sm:$0xff]  }
 0x46a   :  { %9551 = vmatpush1.bf16.msra.mxu1 %v12475_v19  ;;  %9208 = vmatprep.subr.bf16.mxu0 %v12480_v62 }
 0x46b   :  { %v5932_v48 = vadd.f32 %v14962_v49, %v5893_v5  ;;  %v5894_v58 = vmax.f32 %v5830_v25, %v5862_v35  ;;  %9552 = vmatprep.subr.bf16.mxu1 %v12483_v41  ;;  %v12502_v5 = vld [vmem:[%s16500_s5 + $0x500] ss:$16 sps:$4 sm:$0xff]   ;;  %v12505_v35 = vld [vmem:[%s16500_s5 + $0x508] ss:$16 sps:$4 sm:$0xff]  }
 0x46d   :  { %v5933_v54 = vadd.f32 %v14962_v49, %v5894_v58  ;;  %9209 = vmatpush1.bf16.msra.mxu0 %v12478_v44  ;;  %v4811_v52 = vpop.f32.mrb[196].mxu0  ;;  %v5776_v56 = vpop.f32.mrb[196].mxu1  ;;  %v5964_v4 = vmax.f32 %v5932_v48, 0.0  ;;  %v12510_v44 = vld [vmem:[%s16500_s5 + $0x524] ss:$16 sps:$4 sm:$0xff]  }
 0x46e   :  { %9553 = vmatpush1.bf16.msra.mxu1 %v12481_v55  ;;  %v4813_v34 = vpop.f32.mrb[197].mxu0  ;;  %v5778_v30 = vpop.f32.mrb[197].mxu1  ;;  %9210 = vmatprep.subr.bf16.mxu0 %v12486_v47  ;;  %v12513_v48 = vld [vmem:[%s16500_s5 + $0x52c] ss:$16 sps:$4 sm:$0xff]  }
 0x46f   :  { %v5965_v15 = vmax.f32 %v5933_v54, 0.0  ;;  %v5831_v10 = vmax.f32 %v4811_v52, %v4813_v34  ;;  %v5863_v28 = vmax.f32 %v5776_v56, %v5778_v30  ;;  %v4815_v11 = vpop.f32.mrb[198].mxu0  ;;  %v5780_v43 = vpop.f32.mrb[198].mxu1  ;;  %9554 = vmatprep.subr.bf16.mxu1 %v12489_v50  ;;  %v12508_v52 = vld [vmem:[%s16500_s5 + $0x520] ss:$16 sps:$4 sm:$0xff]  }
 0x470   :  { %v4817_v14 = vpop.f32.mrb[199].mxu0  ;;  %v5782_v18 = vpop.f32.mrb[199].mxu1  ;;  %v12511_v34 = vld [vmem:[%s16500_s5 + $0x528] ss:$16 sps:$4 sm:$0xff]   ;;  %v12516_v30 = vld [vmem:[%s16500_s5 + $0x544] ss:$16 sps:$4 sm:$0xff]  }
 0x471   :  { %v15276_v38 = vpack.c.bf16 %v5965_v15, %v5964_v4  ;;  %v5895_v20 = vmax.f32 %v5831_v10, %v5863_v28  ;;  %v5832_v6 = vmax.f32 %v4815_v11, %v4817_v14  ;;  %v5864_v21 = vmax.f32 %v5780_v43, %v5782_v18  ;;  %9211 = vmatpush1.bf16.msra.mxu0 %v12484_v59  ;;  %v12519_v11 = vld [vmem:[%s16500_s5 + $0x54c] ss:$16 sps:$4 sm:$0xff]  }
 0x472   :  { %9555 = vmatpush1.bf16.msra.mxu1 %v12487_v3  ;;  %9212 = vmatprep.subr.bf16.mxu0 %v12492_v24 }
 0x473   :  { %v5934_v7 = vadd.f32 %v14962_v49, %v5895_v20  ;;  %v5896_v51 = vmax.f32 %v5832_v6, %v5864_v21  ;;  %9556 = vmatprep.subr.bf16.mxu1 %v12495_v12  ;;  %v12514_v21 = vld [vmem:[%s16500_s5 + $0x540] ss:$16 sps:$4 sm:$0xff]  }
 0x475   :  { %v5935_v46 = vadd.f32 %v14962_v49, %v5896_v51  ;;  %9213 = vmatpush1.bf16.msra.mxu0 %v12490_v22  ;;  %v4821_v23 = vpop.f32.mrb[200].mxu0  ;;  %v5786_v0 = vpop.f32.mrb[200].mxu1  ;;  %v5966_v63 = vmax.f32 %v5934_v7, 0.0  ;;  %v12517_v22 = vld [vmem:[%s16500_s5 + $0x548] ss:$16 sps:$4 sm:$0xff]  }
 0x476   :  { %9557 = vmatpush1.bf16.msra.mxu1 %v12493_v13  ;;  %v4823_v17 = vpop.f32.mrb[201].mxu0  ;;  %v5788_v32 = vpop.f32.mrb[201].mxu1  ;;  %9214 = vmatprep.subr.bf16.mxu0 %v12498_v26  ;;  %v12522_v13 = vld [vmem:[%s16500_s5 + $0x564] ss:$16 sps:$4 sm:$0xff]   ;;  %v12525_v51 = vld [vmem:[%s16500_s5 + $0x56c] ss:$16 sps:$4 sm:$0xff]  }
 0x477   :  { %v5967_v19 = vmax.f32 %v5935_v46, 0.0  ;;  %v5833_v62 = vmax.f32 %v4821_v23, %v4823_v17  ;;  %v5865_v57 = vmax.f32 %v5786_v0, %v5788_v32  ;;  %v4825_v16 = vpop.f32.mrb[202].mxu0  ;;  %v5790_v33 = vpop.f32.mrb[202].mxu1  ;;  %9558 = vmatprep.subr.bf16.mxu1 %v12501_v2  ;;  %v13072_v2 = vld [vmem:[%s16501_s4] ss:$0 sm:$0xff] }
 0x478   :  { %v4827_v39 = vpop.f32.mrb[203].mxu0  ;;  %v5792_v40 = vpop.f32.mrb[203].mxu1  ;;  %v12520_v23 = vld [vmem:[%s16500_s5 + $0x560] ss:$16 sps:$4 sm:$0xff]   ;;  %v12528_v0 = vld [vmem:[%s16500_s5 + $0x584] ss:$16 sps:$4 sm:$0xff]  }
 0x479   :  { %v5897_v41 = vmax.f32 %v5833_v62, %v5865_v57  ;;  %v5834_v1 = vmax.f32 %v4825_v16, %v4827_v39  ;;  %v5866_v27 = vmax.f32 %v5790_v33, %v5792_v40  ;;  %9215 = vmatpush1.bf16.msra.mxu0 %v12496_v60  ;;  %v15307_v25 = vpack.c.bf16 %v5967_v19, %v5966_v63  ;;  %v12531_v32 = vld [vmem:[%s16500_s5 + $0x58c] ss:$16 sps:$4 sm:$0xff]   ;;  %v12529_v63 = vld [vmem:[%s16500_s5 + $0x588] ss:$16 sps:$4 sm:$0xff]   ;;  %v12534_v19 = vld [vmem:[%s16500_s5 + $0x5a4] ss:$16 sps:$4 sm:$0xff]  }
 0x47a   :  { %9559 = vmatpush1.bf16.msra.mxu1 %v12499_v9  ;;  %9216 = vmatprep.subr.bf16.mxu0 %v12504_v29  ;;  %v12526_v9 = vld [vmem:[%s16500_s5 + $0x580] ss:$16 sps:$4 sm:$0xff]   ;;  %v12537_v62 = vld [vmem:[%s16500_s5 + $0x5ac] ss:$16 sps:$4 sm:$0xff]   ;;  %v12535_v16 = vld [vmem:[%s16500_s5 + $0x5a8] ss:$16 sps:$4 sm:$0xff]  }
 0x47b   :  { %v5936_v55 = vadd.f32 %v14962_v49, %v5897_v41  ;;  %v5898_v47 = vmax.f32 %v5834_v1, %v5866_v27  ;;  %9560 = vmatprep.subr.bf16.mxu1 %v12507_v36  ;;  %v12532_v57 = vld [vmem:[%s16500_s5 + $0x5a0] ss:$16 sps:$4 sm:$0xff]   ;;  %v12540_v33 = vld [vmem:[%s16500_s5 + $0x5c4] ss:$16 sps:$4 sm:$0xff]   ;;  %v12543_v36 = vld [vmem:[%s16500_s5 + $0x5cc] ss:$16 sps:$4 sm:$0xff]  }
 0x47c   :  { %v12538_v39 = vld [vmem:[%s16500_s5 + $0x5c0] ss:$16 sps:$4 sm:$0xff]   ;;  %v12541_v40 = vld [vmem:[%s16500_s5 + $0x5c8] ss:$16 sps:$4 sm:$0xff]   ;;  %v12546_v41 = vld [vmem:[%s16500_s5 + $0x5e4] ss:$16 sps:$4 sm:$0xff]  }
 0x47d   :  { %v5937_v58 = vadd.f32 %v14962_v49, %v5898_v47  ;;  %9217 = vmatpush1.bf16.msra.mxu0 %v12502_v5  ;;  %v4831_v50 = vpop.f32.mrb[204].mxu0  ;;  %v5796_v54 = vpop.f32.mrb[204].mxu1  ;;  %v5968_v3 = vmax.f32 %v5936_v55, 0.0  ;;  %v12549_v1 = vld [vmem:[%s16500_s5 + $0x5ec] ss:$16 sps:$4 sm:$0xff]  }
 0x47e   :  { %9561 = vmatpush1.bf16.msra.mxu1 %v12505_v35  ;;  %v4833_v56 = vpop.f32.mrb[205].mxu0  ;;  %v5798_v59 = vpop.f32.mrb[205].mxu1  ;;  %9218 = vmatprep.subr.bf16.mxu0 %v12510_v44  ;;  %v12544_v27 = vld [vmem:[%s16500_s5 + $0x5e0] ss:$16 sps:$4 sm:$0xff]   ;;  %v12547_v5 = vld [vmem:[%s16500_s5 + $0x5e8] ss:$16 sps:$4 sm:$0xff]  }
 0x47f   :  { %v5969_v24 = vmax.f32 %v5937_v58, 0.0  ;;  %v5835_v4 = vmax.f32 %v4831_v50, %v4833_v56  ;;  %v5867_v15 = vmax.f32 %v5796_v54, %v5798_v59  ;;  %v4835_v10 = vpop.f32.mrb[206].mxu0  ;;  %v5800_v28 = vpop.f32.mrb[206].mxu1  ;;  %9562 = vmatprep.subr.bf16.mxu1 %v12513_v48  ;;  %v12552_v35 = vld [vmem:[%s16500_s5 + $0x604] ss:$16 sps:$4 sm:$0xff]  }
 0x480   :  { %v4837_v43 = vpop.f32.mrb[207].mxu0  ;;  %v5802_v12 = vpop.f32.mrb[207].mxu1  ;;  %v12555_v44 = vld [vmem:[%s16500_s5 + $0x60c] ss:$16 sps:$4 sm:$0xff]   ;;  %v12550_v55 = vld [vmem:[%s16500_s5 + $0x600] ss:$16 sps:$4 sm:$0xff]  }
 0x481   :  { %v15332_v14 = vpack.c.bf16 %v5969_v24, %v5968_v3  ;;  %v5899_v18 = vmax.f32 %v5835_v4, %v5867_v15  ;;  %v5836_v20 = vmax.f32 %v4835_v10, %v4837_v43  ;;  %v5868_v6 = vmax.f32 %v5800_v28, %v5802_v12  ;;  %9219 = vmatpush1.bf16.msra.mxu0 %v12508_v52  ;;  %v12553_v47 = vld [vmem:[%s16500_s5 + $0x608] ss:$16 sps:$4 sm:$0xff]   ;;  %v12558_v48 = vld [vmem:[%s16500_s5 + $0x624] ss:$16 sps:$4 sm:$0xff]   ;;  %v12561_v58 = vld [vmem:[%s16500_s5 + $0x62c] ss:$16 sps:$4 sm:$0xff]  }
 0x482   :  { %9563 = vmatpush1.bf16.msra.mxu1 %v12511_v34  ;;  %9220 = vmatprep.subr.bf16.mxu0 %v12516_v30  ;;  %v12556_v50 = vld [vmem:[%s16500_s5 + $0x620] ss:$16 sps:$4 sm:$0xff]   ;;  %v12559_v54 = vld [vmem:[%s16500_s5 + $0x628] ss:$16 sps:$4 sm:$0xff]   ;;  %v12564_v52 = vld [vmem:[%s16500_s5 + $0x644] ss:$16 sps:$4 sm:$0xff]  }
 0x483   :  { %v5938_v26 = vadd.f32 %v14962_v49, %v5899_v18  ;;  %v5900_v7 = vmax.f32 %v5836_v20, %v5868_v6  ;;  %9564 = vmatprep.subr.bf16.mxu1 %v12519_v11  ;;  %v12523_v49 = vld [vmem:[%s16500_s5 + $0x568] ss:$16 sps:$4 sm:$0xff]   ;;  %v12562_v56 = vld [vmem:[%s16500_s5 + $0x640] ss:$16 sps:$4 sm:$0xff]   ;;  %v12573_v34 = vld [vmem:[%s16500_s5 + $0x66c] ss:$16 sps:$4 sm:$0xff]  }
 0x484   :  { %v12565_v59 = vld [vmem:[%s16500_s5 + $0x648] ss:$16 sps:$4 sm:$0xff]   ;;  %v12568_v30 = vld [vmem:[%s16500_s5 + $0x660] ss:$16 sps:$4 sm:$0xff]   ;;  %v12576_v24 = vld [vmem:[%s16500_s5 + $0x684] ss:$16 sps:$4 sm:$0xff]  }
 0x485   :  { %v5939_v46 = vadd.f32 %v13072_v2, %v5900_v7  ;;  %9221 = vmatpush1.bf16.msra.mxu0 %v12514_v21  ;;  %v5970_v60 = vmax.f32 %v5938_v26, 0.0  ;;  %v12571_v3 = vld [vmem:[%s16500_s5 + $0x668] ss:$16 sps:$4 sm:$0xff]   ;;  %v12579_v4 = vld [vmem:[%s16500_s5 + $0x68c] ss:$16 sps:$4 sm:$0xff]  }
 0x486   :  { %9565 = vmatpush1.bf16.msra.mxu1 %v12517_v22  ;;  %9222 = vmatprep.subr.bf16.mxu0 %v12522_v13  ;;  %v12574_v15 = vld [vmem:[%s16500_s5 + $0x680] ss:$16 sps:$4 sm:$0xff]   ;;  %v12577_v10 = vld [vmem:[%s16500_s5 + $0x688] ss:$16 sps:$4 sm:$0xff]   ;;  %v12582_v28 = vld [vmem:[%s16500_s5 + $0x6a4] ss:$16 sps:$4 sm:$0xff]  }
 0x487   :  { %v5971_v17 = vmax.f32 %v5939_v46, 0.0  ;;  %9566 = vmatprep.subr.bf16.mxu1 %v12525_v51  ;;  %v12585_v11 = vld [vmem:[%s16500_s5 + $0x6ac] ss:$16 sps:$4 sm:$0xff]   ;;  %v12580_v43 = vld [vmem:[%s16500_s5 + $0x6a0] ss:$16 sps:$4 sm:$0xff]  }
 0x488   :  { %v12583_v12 = vld [vmem:[%s16500_s5 + $0x6a8] ss:$16 sps:$4 sm:$0xff]   ;;  %v12588_v18 = vld [vmem:[%s16500_s5 + $0x6c4] ss:$16 sps:$4 sm:$0xff]   ;;  %v12591_v20 = vld [vmem:[%s16500_s5 + $0x6cc] ss:$16 sps:$4 sm:$0xff]  }
 0x489   :  { %9223 = vmatpush1.bf16.msra.mxu0 %v12520_v23  ;;  %v15365_v29 = vpack.c.bf16 %v5971_v17, %v5970_v60  ;;  %v12586_v6 = vld [vmem:[%s16500_s5 + $0x6c0] ss:$16 sps:$4 sm:$0xff]   ;;  %v12589_v21 = vld [vmem:[%s16500_s5 + $0x6c8] ss:$16 sps:$4 sm:$0xff]   ;;  %v12594_v22 = vld [vmem:[%s16500_s5 + $0x6e4] ss:$16 sps:$4 sm:$0xff]  }
 0x48a   :  { %9567 = vmatpush1.bf16.msra.mxu1 %v12523_v49  ;;  %9224 = vmatprep.subr.bf16.mxu0 %v12528_v0  ;;  %v12597_v13 = vld [vmem:[%s16500_s5 + $0x6ec] ss:$16 sps:$4 sm:$0xff]   ;;  %v12592_v26 = vld [vmem:[%s16500_s5 + $0x6e0] ss:$16 sps:$4 sm:$0xff]   ;;  %v12595_v7 = vld [vmem:[%s16500_s5 + $0x6e8] ss:$16 sps:$4 sm:$0xff]  }
 0x48b   :  { %9568 = vmatprep.subr.bf16.mxu1 %v12531_v32  ;;  %v12600_v51 = vld [vmem:[%s16500_s5 + $0x704] ss:$16 sps:$4 sm:$0xff]   ;;  %v12603_v2 = vld [vmem:[%s16500_s5 + $0x70c] ss:$16 sps:$4 sm:$0xff]   ;;  %v12598_v46 = vld [vmem:[%s16500_s5 + $0x700] ss:$16 sps:$4 sm:$0xff]  }
 0x48c   :  { %v12601_v23 = vld [vmem:[%s16500_s5 + $0x708] ss:$16 sps:$4 sm:$0xff]   ;;  %v12606_v49 = vld [vmem:[%s16500_s5 + $0x724] ss:$16 sps:$4 sm:$0xff]   ;;  %v12609_v0 = vld [vmem:[%s16500_s5 + $0x72c] ss:$16 sps:$4 sm:$0xff]  }
 0x48d   :  { %9225 = vmatpush1.bf16.msra.mxu0 %v12526_v9  ;;  %v12604_v60 = vld [vmem:[%s16500_s5 + $0x720] ss:$16 sps:$4 sm:$0xff]   ;;  %v12607_v17 = vld [vmem:[%s16500_s5 + $0x728] ss:$16 sps:$4 sm:$0xff]   ;;  %v12612_v32 = vld [vmem:[%s16500_s5 + $0x744] ss:$16 sps:$4 sm:$0xff]  }
 0x48e   :  { %9569 = vmatpush1.bf16.msra.mxu1 %v12529_v63  ;;  %9226 = vmatprep.subr.bf16.mxu0 %v12534_v19  ;;  %v12615_v9 = vld [vmem:[%s16500_s5 + $0x74c] ss:$16 sps:$4 sm:$0xff]   ;;  %v12610_v63 = vld [vmem:[%s16500_s5 + $0x740] ss:$16 sps:$4 sm:$0xff]   ;;  %v12613_v19 = vld [vmem:[%s16500_s5 + $0x748] ss:$16 sps:$4 sm:$0xff]  }
 0x48f   :  { %9570 = vmatprep.subr.bf16.mxu1 %v12537_v62  ;;  %v12618_v62 = vld [vmem:[%s16500_s5 + $0x764] ss:$16 sps:$4 sm:$0xff]  }
 0x491   :  { %9227 = vmatpush1.bf16.msra.mxu0 %v12532_v57  ;;  %v12621_v57 = vld [vmem:[%s16500_s5 + $0x76c] ss:$16 sps:$4 sm:$0xff]  }
 0x492   :  { %9571 = vmatpush1.bf16.msra.mxu1 %v12535_v16  ;;  %9228 = vmatprep.subr.bf16.mxu0 %v12540_v33  ;;  %v12616_v16 = vld [vmem:[%s16500_s5 + $0x760] ss:$16 sps:$4 sm:$0xff]   ;;  %v12619_v33 = vld [vmem:[%s16500_s5 + $0x768] ss:$16 sps:$4 sm:$0xff]  }
 0x493   :  { %9572 = vmatprep.subr.bf16.mxu1 %v12543_v36  ;;  %v12624_v36 = vld [vmem:[%s16500_s5 + $0x784] ss:$16 sps:$4 sm:$0xff]  }
 0x495   :  { %9229 = vmatpush1.bf16.msra.mxu0 %v12538_v39  ;;  %v12627_v39 = vld [vmem:[%s16500_s5 + $0x78c] ss:$16 sps:$4 sm:$0xff]  }
 0x496   :  { %9573 = vmatpush1.bf16.msra.mxu1 %v12541_v40  ;;  %9230 = vmatprep.subr.bf16.mxu0 %v12546_v41  ;;  %v12622_v40 = vld [vmem:[%s16500_s5 + $0x780] ss:$16 sps:$4 sm:$0xff]   ;;  %v12625_v41 = vld [vmem:[%s16500_s5 + $0x788] ss:$16 sps:$4 sm:$0xff]  }
 0x497   :  { %9574 = vmatprep.subr.bf16.mxu1 %v12549_v1  ;;  %v12630_v1 = vld [vmem:[%s16500_s5 + $0x7a4] ss:$16 sps:$4 sm:$0xff]  }
 0x499   :  { %9231 = vmatpush1.bf16.msra.mxu0 %v12544_v27  ;;  %v12633_v27 = vld [vmem:[%s16500_s5 + $0x7ac] ss:$16 sps:$4 sm:$0xff]  }
 0x49a   :  { %9575 = vmatpush1.bf16.msra.mxu1 %v12547_v5  ;;  %9243 = vmatprep.subr.bf16.mxu0 %v12552_v35  ;;  %v12628_v5 = vld [vmem:[%s16500_s5 + $0x7a0] ss:$16 sps:$4 sm:$0xff]   ;;  %v12631_v35 = vld [vmem:[%s16500_s5 + $0x7a8] ss:$16 sps:$4 sm:$0xff]  }
 0x49b   :  { %9587 = vmatprep.subr.bf16.mxu1 %v12555_v44  ;;  %v12636_v44 = vld [vmem:[%s16500_s5 + $0x7c4] ss:$16 sps:$4 sm:$0xff]  }
 0x49c   :  { %9233 = vmatmul.mubr.bf16.vlgmr.msra.gmra.mrb[208].mxu0 %v15048_v31 }
 0x49d   :  { %9577 = vmatmul.mubr.bf16.vlgmr.msra.gmra.mrb[208].mxu1 %v15048_v31  ;;  %9244 = vmatpush1.bf16.msra.mxu0 %v12550_v55  ;;  %v12567_v31 = vld [vmem:[%s16500_s5 + $0x64c] ss:$16 sps:$4 sm:$0xff]  }
 0x49e   :  { %9275 = vmatprep.mubr.bf16.mxu0 %v15135_v53  ;;  %9588 = vmatpush1.bf16.msra.mxu1 %v12553_v47  ;;  %v12639_v55 = vld [vmem:[%s16500_s5 + $0x7cc] ss:$16 sps:$4 sm:$0xff]   ;;  %v12634_v47 = vld [vmem:[%s16500_s5 + $0x7c0] ss:$16 sps:$4 sm:$0xff]  }
 0x49f   :  { %9619 = vmatprep.mubr.bf16.mxu1 %v15135_v53  ;;  %9245 = vmatprep.subr.bf16.mxu0 %v12558_v48  ;;  %v12570_v53 = vld [vmem:[%s16500_s5 + $0x664] ss:$16 sps:$4 sm:$0xff]   ;;  %v12637_v48 = vld [vmem:[%s16500_s5 + $0x7c8] ss:$16 sps:$4 sm:$0xff]  }
 0x4a0   :  { %9589 = vmatprep.subr.bf16.mxu1 %v12561_v58  ;;  %v12642_v58 = vld [vmem:[%s16500_s5 + $0x7e4] ss:$16 sps:$4 sm:$0xff]  }
 0x4a1   :  { %9246 = vmatpush1.bf16.msra.mxu0 %v12556_v50  ;;  %v12645_v50 = vld [vmem:[%s16500_s5 + $0x7ec] ss:$16 sps:$4 sm:$0xff]  }
 0x4a2   :  { %9590 = vmatpush1.bf16.msra.mxu1 %v12559_v54  ;;  %9247 = vmatprep.subr.bf16.mxu0 %v12564_v52  ;;  %v12640_v54 = vld [vmem:[%s16500_s5 + $0x7e0] ss:$16 sps:$4 sm:$0xff]   ;;  %v12643_v52 = vld [vmem:[%s16500_s5 + $0x7e8] ss:$16 sps:$4 sm:$0xff]  }
 0x4a3   :  { %9591 = vmatprep.subr.bf16.mxu1 %v12567_v31  ;;  %v12648_v31 = vld [vmem:[%s16500_s5 + $0x804] ss:$16 sps:$4 sm:$0xff]  }
 0x4a5   :  { %9248 = vmatpush1.bf16.msra.mxu0 %v12562_v56  ;;  %v12651_v56 = vld [vmem:[%s16500_s5 + $0x80c] ss:$16 sps:$4 sm:$0xff]  }
 0x4a6   :  { %9592 = vmatpush1.bf16.msra.mxu1 %v12565_v59  ;;  %9249 = vmatprep.subr.bf16.mxu0 %v12570_v53  ;;  %v12646_v59 = vld [vmem:[%s16500_s5 + $0x800] ss:$16 sps:$4 sm:$0xff]   ;;  %v12649_v53 = vld [vmem:[%s16500_s5 + $0x808] ss:$16 sps:$4 sm:$0xff]  }
 0x4a7   :  { %9593 = vmatprep.subr.bf16.mxu1 %v12573_v34  ;;  %v12654_v34 = vld [vmem:[%s16500_s5 + $0x824] ss:$16 sps:$4 sm:$0xff]  }
 0x4a9   :  { %9250 = vmatpush1.bf16.msra.mxu0 %v12568_v30  ;;  %v12657_v30 = vld [vmem:[%s16500_s5 + $0x82c] ss:$16 sps:$4 sm:$0xff]  }
 0x4aa   :  { %9594 = vmatpush1.bf16.msra.mxu1 %v12571_v3  ;;  %9251 = vmatprep.subr.bf16.mxu0 %v12576_v24  ;;  %v12652_v3 = vld [vmem:[%s16500_s5 + $0x820] ss:$16 sps:$4 sm:$0xff]   ;;  %v12655_v24 = vld [vmem:[%s16500_s5 + $0x828] ss:$16 sps:$4 sm:$0xff]  }
 0x4ab   :  { %9595 = vmatprep.subr.bf16.mxu1 %v12579_v4  ;;  %v12660_v4 = vld [vmem:[%s16500_s5 + $0x844] ss:$16 sps:$4 sm:$0xff]  }
 0x4ad   :  { %9252 = vmatpush1.bf16.msra.mxu0 %v12574_v15  ;;  %v12658_v15 = vld [vmem:[%s16500_s5 + $0x840] ss:$16 sps:$4 sm:$0xff]  }
 0x4ae   :  { %9596 = vmatpush1.bf16.msra.mxu1 %v12577_v10  ;;  %9253 = vmatprep.subr.bf16.mxu0 %v12582_v28  ;;  %v12661_v10 = vld [vmem:[%s16500_s5 + $0x848] ss:$16 sps:$4 sm:$0xff]   ;;  %v12669_v28 = vld [vmem:[%s16500_s5 + $0x86c] ss:$16 sps:$4 sm:$0xff]  }
 0x4af   :  { %9597 = vmatprep.subr.bf16.mxu1 %v12585_v11  ;;  %v12664_v11 = vld [vmem:[%s16500_s5 + $0x860] ss:$16 sps:$4 sm:$0xff]  }
 0x4b1   :  { %9254 = vmatpush1.bf16.msra.mxu0 %v12580_v43  ;;  %v12667_v43 = vld [vmem:[%s16500_s5 + $0x868] ss:$16 sps:$4 sm:$0xff]  }
 0x4b2   :  { %9598 = vmatpush1.bf16.msra.mxu1 %v12583_v12  ;;  %9255 = vmatprep.subr.bf16.mxu0 %v12588_v18  ;;  %v12672_v12 = vld [vmem:[%s16500_s5 + $0x884] ss:$16 sps:$4 sm:$0xff]   ;;  %v12675_v18 = vld [vmem:[%s16500_s5 + $0x88c] ss:$16 sps:$4 sm:$0xff]  }
 0x4b3   :  { %9599 = vmatprep.subr.bf16.mxu1 %v12591_v20  ;;  %v12670_v20 = vld [vmem:[%s16500_s5 + $0x880] ss:$16 sps:$4 sm:$0xff]  }
 0x4b5   :  { %9256 = vmatpush1.bf16.msra.mxu0 %v12586_v6  ;;  %v12673_v6 = vld [vmem:[%s16500_s5 + $0x888] ss:$16 sps:$4 sm:$0xff]  }
 0x4b6   :  { %9600 = vmatpush1.bf16.msra.mxu1 %v12589_v21  ;;  %9257 = vmatprep.subr.bf16.mxu0 %v12594_v22  ;;  %v12678_v21 = vld [vmem:[%s16500_s5 + $0x8a4] ss:$16 sps:$4 sm:$0xff]   ;;  %v12681_v22 = vld [vmem:[%s16500_s5 + $0x8ac] ss:$16 sps:$4 sm:$0xff]  }
 0x4b7   :  { %9601 = vmatprep.subr.bf16.mxu1 %v12597_v13  ;;  %v12676_v13 = vld [vmem:[%s16500_s5 + $0x8a0] ss:$16 sps:$4 sm:$0xff]  }
 0x4b9   :  { %9258 = vmatpush1.bf16.msra.mxu0 %v12592_v26  ;;  %v12679_v26 = vld [vmem:[%s16500_s5 + $0x8a8] ss:$16 sps:$4 sm:$0xff]  }
 0x4ba   :  { %9602 = vmatpush1.bf16.msra.mxu1 %v12595_v7  ;;  %9259 = vmatprep.subr.bf16.mxu0 %v12600_v51  ;;  %v12684_v7 = vld [vmem:[%s16500_s5 + $0x8c4] ss:$16 sps:$4 sm:$0xff]   ;;  %v12687_v51 = vld [vmem:[%s16500_s5 + $0x8cc] ss:$16 sps:$4 sm:$0xff]  }
 0x4bb   :  { %9603 = vmatprep.subr.bf16.mxu1 %v12603_v2  ;;  %v12682_v2 = vld [vmem:[%s16500_s5 + $0x8c0] ss:$16 sps:$4 sm:$0xff]  }
 0x4bd   :  { %9260 = vmatpush1.bf16.msra.mxu0 %v12598_v46  ;;  %v12685_v46 = vld [vmem:[%s16500_s5 + $0x8c8] ss:$16 sps:$4 sm:$0xff]  }
 0x4be   :  { %9604 = vmatpush1.bf16.msra.mxu1 %v12601_v23  ;;  %9261 = vmatprep.subr.bf16.mxu0 %v12606_v49  ;;  %v12690_v23 = vld [vmem:[%s16500_s5 + $0x8e4] ss:$16 sps:$4 sm:$0xff]   ;;  %v12693_v49 = vld [vmem:[%s16500_s5 + $0x8ec] ss:$16 sps:$4 sm:$0xff]  }
 0x4bf   :  { %9605 = vmatprep.subr.bf16.mxu1 %v12609_v0  ;;  %v12688_v0 = vld [vmem:[%s16500_s5 + $0x8e0] ss:$16 sps:$4 sm:$0xff]  }
 0x4c1   :  { %9262 = vmatpush1.bf16.msra.mxu0 %v12604_v60  ;;  %v12691_v60 = vld [vmem:[%s16500_s5 + $0x8e8] ss:$16 sps:$4 sm:$0xff]  }
 0x4c2   :  { %9606 = vmatpush1.bf16.msra.mxu1 %v12607_v17  ;;  %9263 = vmatprep.subr.bf16.mxu0 %v12612_v32  ;;  %v12696_v17 = vld [vmem:[%s16500_s5 + $0x904] ss:$16 sps:$4 sm:$0xff]   ;;  %v12699_v32 = vld [vmem:[%s16500_s5 + $0x90c] ss:$16 sps:$4 sm:$0xff]  }
 0x4c3   :  { %9607 = vmatprep.subr.bf16.mxu1 %v12615_v9  ;;  %v12694_v9 = vld [vmem:[%s16500_s5 + $0x900] ss:$16 sps:$4 sm:$0xff]  }
 0x4c5   :  { %9264 = vmatpush1.bf16.msra.mxu0 %v12610_v63  ;;  %v12697_v63 = vld [vmem:[%s16500_s5 + $0x908] ss:$16 sps:$4 sm:$0xff]  }
 0x4c6   :  { %9608 = vmatpush1.bf16.msra.mxu1 %v12613_v19  ;;  %9265 = vmatprep.subr.bf16.mxu0 %v12618_v62  ;;  %v12702_v19 = vld [vmem:[%s16500_s5 + $0x924] ss:$16 sps:$4 sm:$0xff]   ;;  %v12705_v62 = vld [vmem:[%s16500_s5 + $0x92c] ss:$16 sps:$4 sm:$0xff]  }
 0x4c7   :  { %9609 = vmatprep.subr.bf16.mxu1 %v12621_v57  ;;  %v12700_v57 = vld [vmem:[%s16500_s5 + $0x920] ss:$16 sps:$4 sm:$0xff]  }
 0x4c9   :  { %9266 = vmatpush1.bf16.msra.mxu0 %v12616_v16  ;;  %v12703_v16 = vld [vmem:[%s16500_s5 + $0x928] ss:$16 sps:$4 sm:$0xff]  }
 0x4ca   :  { %9610 = vmatpush1.bf16.msra.mxu1 %v12619_v33  ;;  %9267 = vmatprep.subr.bf16.mxu0 %v12624_v36  ;;  %v12708_v33 = vld [vmem:[%s16500_s5 + $0x944] ss:$16 sps:$4 sm:$0xff]   ;;  %v12711_v36 = vld [vmem:[%s16500_s5 + $0x94c] ss:$16 sps:$4 sm:$0xff]  }
 0x4cb   :  { %9611 = vmatprep.subr.bf16.mxu1 %v12627_v39  ;;  %v12706_v39 = vld [vmem:[%s16500_s5 + $0x940] ss:$16 sps:$4 sm:$0xff]  }
 0x4cd   :  { %9268 = vmatpush1.bf16.msra.mxu0 %v12622_v40  ;;  %v12709_v40 = vld [vmem:[%s16500_s5 + $0x948] ss:$16 sps:$4 sm:$0xff]  }
 0x4ce   :  { %9612 = vmatpush1.bf16.msra.mxu1 %v12625_v41  ;;  %9269 = vmatprep.subr.bf16.mxu0 %v12630_v1  ;;  %v12714_v41 = vld [vmem:[%s16500_s5 + $0x964] ss:$16 sps:$4 sm:$0xff]   ;;  %v12717_v1 = vld [vmem:[%s16500_s5 + $0x96c] ss:$16 sps:$4 sm:$0xff]  }
 0x4cf   :  { %9613 = vmatprep.subr.bf16.mxu1 %v12633_v27  ;;  %v12712_v27 = vld [vmem:[%s16500_s5 + $0x960] ss:$16 sps:$4 sm:$0xff]  }
 0x4d1   :  { %9270 = vmatpush1.bf16.msra.mxu0 %v12628_v5  ;;  %v12715_v5 = vld [vmem:[%s16500_s5 + $0x968] ss:$16 sps:$4 sm:$0xff]  }
 0x4d2   :  { %9614 = vmatpush1.bf16.msra.mxu1 %v12631_v35  ;;  %9271 = vmatprep.subr.bf16.mxu0 %v12636_v44  ;;  %v12720_v35 = vld [vmem:[%s16500_s5 + $0x984] ss:$16 sps:$4 sm:$0xff]   ;;  %v12723_v44 = vld [vmem:[%s16500_s5 + $0x98c] ss:$16 sps:$4 sm:$0xff]  }
 0x4d3   :  { %9615 = vmatprep.subr.bf16.mxu1 %v12639_v55  ;;  %v12718_v55 = vld [vmem:[%s16500_s5 + $0x980] ss:$16 sps:$4 sm:$0xff]  }
 0x4d5   :  { %9272 = vmatpush1.bf16.msra.mxu0 %v12634_v47  ;;  %v12721_v47 = vld [vmem:[%s16500_s5 + $0x988] ss:$16 sps:$4 sm:$0xff]  }
 0x4d6   :  { %9616 = vmatpush1.bf16.msra.mxu1 %v12637_v48  ;;  %9273 = vmatprep.subr.bf16.mxu0 %v12642_v58  ;;  %v12726_v48 = vld [vmem:[%s16500_s5 + $0x9a4] ss:$16 sps:$4 sm:$0xff]   ;;  %v12729_v58 = vld [vmem:[%s16500_s5 + $0x9ac] ss:$16 sps:$4 sm:$0xff]  }
 0x4d7   :  { %9617 = vmatprep.subr.bf16.mxu1 %v12645_v50  ;;  %v12724_v50 = vld [vmem:[%s16500_s5 + $0x9a0] ss:$16 sps:$4 sm:$0xff]  }
 0x4d9   :  { %9274 = vmatpush1.bf16.msra.mxu0 %v12640_v54  ;;  %v12727_v54 = vld [vmem:[%s16500_s5 + $0x9a8] ss:$16 sps:$4 sm:$0xff]  }
 0x4da   :  { %9618 = vmatpush1.bf16.msra.mxu1 %v12643_v52  ;;  %9286 = vmatprep.subr.bf16.mxu0 %v12648_v31  ;;  %v12732_v52 = vld [vmem:[%s16500_s5 + $0x9c4] ss:$16 sps:$4 sm:$0xff]   ;;  %v12735_v31 = vld [vmem:[%s16500_s5 + $0x9cc] ss:$16 sps:$4 sm:$0xff]  }
 0x4db   :  { %9630 = vmatprep.subr.bf16.mxu1 %v12651_v56  ;;  %v12730_v56 = vld [vmem:[%s16500_s5 + $0x9c0] ss:$16 sps:$4 sm:$0xff]  }
 0x4dc   :  { %9276 = vmatmul.mubr.bf16.vlgmr.msra.gmra.mrb[208].mxu0 %v15104_v42 }
 0x4dd   :  { %9620 = vmatmul.mubr.bf16.vlgmr.msra.gmra.mrb[208].mxu1 %v15104_v42  ;;  %9287 = vmatpush1.bf16.msra.mxu0 %v12646_v59  ;;  %v12663_v42 = vld [vmem:[%s16500_s5 + $0x84c] ss:$16 sps:$4 sm:$0xff]   ;;  %v12733_v59 = vld [vmem:[%s16500_s5 + $0x9c8] ss:$16 sps:$4 sm:$0xff]  }
 0x4de   :  { %9318 = vmatprep.mubr.bf16.mxu0 %v15191_v61  ;;  %9631 = vmatpush1.bf16.msra.mxu1 %v12649_v53  ;;  %v12738_v53 = vld [vmem:[%s16500_s5 + $0x9e4] ss:$16 sps:$4 sm:$0xff]  }
 0x4df   :  { %9662 = vmatprep.mubr.bf16.mxu1 %v15191_v61  ;;  %9288 = vmatprep.subr.bf16.mxu0 %v12654_v34  ;;  %v12666_v61 = vld [vmem:[%s16500_s5 + $0x864] ss:$16 sps:$4 sm:$0xff]   ;;  %v12741_v34 = vld [vmem:[%s16500_s5 + $0x9ec] ss:$16 sps:$4 sm:$0xff]  }
 0x4e0   :  { %9632 = vmatprep.subr.bf16.mxu1 %v12657_v30  ;;  %v12736_v30 = vld [vmem:[%s16500_s5 + $0x9e0] ss:$16 sps:$4 sm:$0xff]  }
 0x4e1   :  { %9289 = vmatpush1.bf16.msra.mxu0 %v12652_v3  ;;  %v12739_v3 = vld [vmem:[%s16500_s5 + $0x9e8] ss:$16 sps:$4 sm:$0xff]  }
 0x4e2   :  { %9633 = vmatpush1.bf16.msra.mxu1 %v12655_v24  ;;  %9290 = vmatprep.subr.bf16.mxu0 %v12660_v4  ;;  %v12744_v24 = vld [vmem:[%s16500_s5 + $0xa04] ss:$16 sps:$4 sm:$0xff]   ;;  %v12747_v4 = vld [vmem:[%s16500_s5 + $0xa0c] ss:$16 sps:$4 sm:$0xff]  }
 0x4e3   :  { %9634 = vmatprep.subr.bf16.mxu1 %v12663_v42  ;;  %v12742_v42 = vld [vmem:[%s16500_s5 + $0xa00] ss:$16 sps:$4 sm:$0xff]  }
 0x4e5   :  { %9291 = vmatpush1.bf16.msra.mxu0 %v12658_v15  ;;  %v12745_v15 = vld [vmem:[%s16500_s5 + $0xa08] ss:$16 sps:$4 sm:$0xff]  }
 0x4e6   :  { %9635 = vmatpush1.bf16.msra.mxu1 %v12661_v10  ;;  %9292 = vmatprep.subr.bf16.mxu0 %v12666_v61  ;;  %v12750_v10 = vld [vmem:[%s16500_s5 + $0xa24] ss:$16 sps:$4 sm:$0xff]   ;;  %v12753_v61 = vld [vmem:[%s16500_s5 + $0xa2c] ss:$16 sps:$4 sm:$0xff]  }
 0x4e7   :  { %9636 = vmatprep.subr.bf16.mxu1 %v12669_v28  ;;  %v12748_v28 = vld [vmem:[%s16500_s5 + $0xa20] ss:$16 sps:$4 sm:$0xff]  }
 0x4e9   :  { %9293 = vmatpush1.bf16.msra.mxu0 %v12664_v11  ;;  %v12751_v11 = vld [vmem:[%s16500_s5 + $0xa28] ss:$16 sps:$4 sm:$0xff]  }
 0x4ea   :  { %9637 = vmatpush1.bf16.msra.mxu1 %v12667_v43  ;;  %9294 = vmatprep.subr.bf16.mxu0 %v12672_v12  ;;  %v12756_v43 = vld [vmem:[%s16500_s5 + $0xa44] ss:$16 sps:$4 sm:$0xff]   ;;  %v12754_v12 = vld [vmem:[%s16500_s5 + $0xa40] ss:$16 sps:$4 sm:$0xff]  }
 0x4eb   :  { %9638 = vmatprep.subr.bf16.mxu1 %v12675_v18  ;;  %v12757_v18 = vld [vmem:[%s16500_s5 + $0xa48] ss:$16 sps:$4 sm:$0xff]  }
 0x4ed   :  { %9295 = vmatpush1.bf16.msra.mxu0 %v12670_v20  ;;  %v12765_v20 = vld [vmem:[%s16500_s5 + $0xa6c] ss:$16 sps:$4 sm:$0xff]  }
 0x4ee   :  { %9639 = vmatpush1.bf16.msra.mxu1 %v12673_v6  ;;  %9296 = vmatprep.subr.bf16.mxu0 %v12678_v21  ;;  %v12760_v6 = vld [vmem:[%s16500_s5 + $0xa60] ss:$16 sps:$4 sm:$0xff]   ;;  %v12763_v21 = vld [vmem:[%s16500_s5 + $0xa68] ss:$16 sps:$4 sm:$0xff]  }
 0x4ef   :  { %9640 = vmatprep.subr.bf16.mxu1 %v12681_v22  ;;  %v12768_v22 = vld [vmem:[%s16500_s5 + $0xa84] ss:$16 sps:$4 sm:$0xff]  }
 0x4f1   :  { %9297 = vmatpush1.bf16.msra.mxu0 %v12676_v13  ;;  %v12771_v13 = vld [vmem:[%s16500_s5 + $0xa8c] ss:$16 sps:$4 sm:$0xff]  }
 0x4f2   :  { %9641 = vmatpush1.bf16.msra.mxu1 %v12679_v26  ;;  %9298 = vmatprep.subr.bf16.mxu0 %v12684_v7  ;;  %v12766_v26 = vld [vmem:[%s16500_s5 + $0xa80] ss:$16 sps:$4 sm:$0xff]   ;;  %v12769_v7 = vld [vmem:[%s16500_s5 + $0xa88] ss:$16 sps:$4 sm:$0xff]  }
 0x4f3   :  { %9642 = vmatprep.subr.bf16.mxu1 %v12687_v51  ;;  %v12774_v51 = vld [vmem:[%s16500_s5 + $0xaa4] ss:$16 sps:$4 sm:$0xff]  }
 0x4f5   :  { %9299 = vmatpush1.bf16.msra.mxu0 %v12682_v2  ;;  %v12777_v2 = vld [vmem:[%s16500_s5 + $0xaac] ss:$16 sps:$4 sm:$0xff]  }
 0x4f6   :  { %9643 = vmatpush1.bf16.msra.mxu1 %v12685_v46  ;;  %9300 = vmatprep.subr.bf16.mxu0 %v12690_v23  ;;  %v12772_v46 = vld [vmem:[%s16500_s5 + $0xaa0] ss:$16 sps:$4 sm:$0xff]   ;;  %v12775_v23 = vld [vmem:[%s16500_s5 + $0xaa8] ss:$16 sps:$4 sm:$0xff]  }
 0x4f7   :  { %9644 = vmatprep.subr.bf16.mxu1 %v12693_v49  ;;  %v12780_v49 = vld [vmem:[%s16500_s5 + $0xac4] ss:$16 sps:$4 sm:$0xff]  }
 0x4f9   :  { %9301 = vmatpush1.bf16.msra.mxu0 %v12688_v0  ;;  %v12783_v0 = vld [vmem:[%s16500_s5 + $0xacc] ss:$16 sps:$4 sm:$0xff]  }
 0x4fa   :  { %9645 = vmatpush1.bf16.msra.mxu1 %v12691_v60  ;;  %9302 = vmatprep.subr.bf16.mxu0 %v12696_v17  ;;  %v12778_v60 = vld [vmem:[%s16500_s5 + $0xac0] ss:$16 sps:$4 sm:$0xff]   ;;  %v12781_v17 = vld [vmem:[%s16500_s5 + $0xac8] ss:$16 sps:$4 sm:$0xff]  }
 0x4fb   :  { %9646 = vmatprep.subr.bf16.mxu1 %v12699_v32  ;;  %v12786_v32 = vld [vmem:[%s16500_s5 + $0xae4] ss:$16 sps:$4 sm:$0xff]  }
 0x4fd   :  { %9303 = vmatpush1.bf16.msra.mxu0 %v12694_v9  ;;  %v12789_v9 = vld [vmem:[%s16500_s5 + $0xaec] ss:$16 sps:$4 sm:$0xff]  }
 0x4fe   :  { %9647 = vmatpush1.bf16.msra.mxu1 %v12697_v63  ;;  %9304 = vmatprep.subr.bf16.mxu0 %v12702_v19  ;;  %v12784_v63 = vld [vmem:[%s16500_s5 + $0xae0] ss:$16 sps:$4 sm:$0xff]   ;;  %v12787_v19 = vld [vmem:[%s16500_s5 + $0xae8] ss:$16 sps:$4 sm:$0xff]  }
 0x4ff   :  { %9648 = vmatprep.subr.bf16.mxu1 %v12705_v62  ;;  %v12792_v62 = vld [vmem:[%s16500_s5 + $0xb04] ss:$16 sps:$4 sm:$0xff]  }
 0x501   :  { %9305 = vmatpush1.bf16.msra.mxu0 %v12700_v57  ;;  %v12795_v57 = vld [vmem:[%s16500_s5 + $0xb0c] ss:$16 sps:$4 sm:$0xff]  }
 0x502   :  { %9649 = vmatpush1.bf16.msra.mxu1 %v12703_v16  ;;  %9306 = vmatprep.subr.bf16.mxu0 %v12708_v33  ;;  %v12790_v16 = vld [vmem:[%s16500_s5 + $0xb00] ss:$16 sps:$4 sm:$0xff]   ;;  %v12793_v33 = vld [vmem:[%s16500_s5 + $0xb08] ss:$16 sps:$4 sm:$0xff]  }
 0x503   :  { %9650 = vmatprep.subr.bf16.mxu1 %v12711_v36  ;;  %v12798_v36 = vld [vmem:[%s16500_s5 + $0xb24] ss:$16 sps:$4 sm:$0xff]  }
 0x505   :  { %9307 = vmatpush1.bf16.msra.mxu0 %v12706_v39  ;;  %v12801_v39 = vld [vmem:[%s16500_s5 + $0xb2c] ss:$16 sps:$4 sm:$0xff]  }
 0x506   :  { %9651 = vmatpush1.bf16.msra.mxu1 %v12709_v40  ;;  %9308 = vmatprep.subr.bf16.mxu0 %v12714_v41  ;;  %v12796_v40 = vld [vmem:[%s16500_s5 + $0xb20] ss:$16 sps:$4 sm:$0xff]   ;;  %v12799_v41 = vld [vmem:[%s16500_s5 + $0xb28] ss:$16 sps:$4 sm:$0xff]  }
 0x507   :  { %9652 = vmatprep.subr.bf16.mxu1 %v12717_v1  ;;  %v12804_v1 = vld [vmem:[%s16500_s5 + $0xb44] ss:$16 sps:$4 sm:$0xff]  }
 0x509   :  { %9309 = vmatpush1.bf16.msra.mxu0 %v12712_v27  ;;  %v12807_v27 = vld [vmem:[%s16500_s5 + $0xb4c] ss:$16 sps:$4 sm:$0xff]  }
 0x50a   :  { %9653 = vmatpush1.bf16.msra.mxu1 %v12715_v5  ;;  %9310 = vmatprep.subr.bf16.mxu0 %v12720_v35  ;;  %v12802_v5 = vld [vmem:[%s16500_s5 + $0xb40] ss:$16 sps:$4 sm:$0xff]   ;;  %v12805_v35 = vld [vmem:[%s16500_s5 + $0xb48] ss:$16 sps:$4 sm:$0xff]  }
 0x50b   :  { %9654 = vmatprep.subr.bf16.mxu1 %v12723_v44  ;;  %v12810_v44 = vld [vmem:[%s16500_s5 + $0xb64] ss:$16 sps:$4 sm:$0xff]  }
 0x50d   :  { %9311 = vmatpush1.bf16.msra.mxu0 %v12718_v55  ;;  %v12813_v55 = vld [vmem:[%s16500_s5 + $0xb6c] ss:$16 sps:$4 sm:$0xff]  }
 0x50e   :  { %9655 = vmatpush1.bf16.msra.mxu1 %v12721_v47  ;;  %9312 = vmatprep.subr.bf16.mxu0 %v12726_v48  ;;  %v12808_v47 = vld [vmem:[%s16500_s5 + $0xb60] ss:$16 sps:$4 sm:$0xff]   ;;  %v12811_v48 = vld [vmem:[%s16500_s5 + $0xb68] ss:$16 sps:$4 sm:$0xff]  }
 0x50f   :  { %9656 = vmatprep.subr.bf16.mxu1 %v12729_v58  ;;  %v12816_v58 = vld [vmem:[%s16500_s5 + $0xb84] ss:$16 sps:$4 sm:$0xff]  }
 0x511   :  { %9313 = vmatpush1.bf16.msra.mxu0 %v12724_v50  ;;  %v12819_v50 = vld [vmem:[%s16500_s5 + $0xb8c] ss:$16 sps:$4 sm:$0xff]  }
 0x512   :  { %9657 = vmatpush1.bf16.msra.mxu1 %v12727_v54  ;;  %9314 = vmatprep.subr.bf16.mxu0 %v12732_v52  ;;  %v12814_v54 = vld [vmem:[%s16500_s5 + $0xb80] ss:$16 sps:$4 sm:$0xff]   ;;  %v12817_v52 = vld [vmem:[%s16500_s5 + $0xb88] ss:$16 sps:$4 sm:$0xff]  }
 0x513   :  { %9658 = vmatprep.subr.bf16.mxu1 %v12735_v31  ;;  %v12822_v31 = vld [vmem:[%s16500_s5 + $0xba4] ss:$16 sps:$4 sm:$0xff]  }
 0x515   :  { %9315 = vmatpush1.bf16.msra.mxu0 %v12730_v56  ;;  %v12825_v56 = vld [vmem:[%s16500_s5 + $0xbac] ss:$16 sps:$4 sm:$0xff]  }
 0x516   :  { %9659 = vmatpush1.bf16.msra.mxu1 %v12733_v59  ;;  %9316 = vmatprep.subr.bf16.mxu0 %v12738_v53  ;;  %v12820_v59 = vld [vmem:[%s16500_s5 + $0xba0] ss:$16 sps:$4 sm:$0xff]   ;;  %v12823_v53 = vld [vmem:[%s16500_s5 + $0xba8] ss:$16 sps:$4 sm:$0xff]  }
 0x517   :  { %9660 = vmatprep.subr.bf16.mxu1 %v12741_v34  ;;  %v12828_v34 = vld [vmem:[%s16500_s5 + $0xbc4] ss:$16 sps:$4 sm:$0xff]  }
 0x519   :  { %9317 = vmatpush1.bf16.msra.mxu0 %v12736_v30  ;;  %v12831_v30 = vld [vmem:[%s16500_s5 + $0xbcc] ss:$16 sps:$4 sm:$0xff]  }
 0x51a   :  { %9661 = vmatpush1.bf16.msra.mxu1 %v12739_v3  ;;  %9329 = vmatprep.subr.bf16.mxu0 %v12744_v24  ;;  %v12826_v3 = vld [vmem:[%s16500_s5 + $0xbc0] ss:$16 sps:$4 sm:$0xff]   ;;  %v12829_v24 = vld [vmem:[%s16500_s5 + $0xbc8] ss:$16 sps:$4 sm:$0xff]  }
 0x51b   :  { %9673 = vmatprep.subr.bf16.mxu1 %v12747_v4  ;;  %v12834_v4 = vld [vmem:[%s16500_s5 + $0xbe4] ss:$16 sps:$4 sm:$0xff]  }
 0x51c   :  { %9319 = vmatmul.mubr.bf16.vlgmr.msra.gmra.mrb[208].mxu0 %v15160_v37 }
 0x51d   :  { %9663 = vmatmul.mubr.bf16.vlgmr.msra.gmra.mrb[208].mxu1 %v15160_v37  ;;  %9330 = vmatpush1.bf16.msra.mxu0 %v12742_v42  ;;  %v12759_v37 = vld [vmem:[%s16500_s5 + $0xa4c] ss:$16 sps:$4 sm:$0xff]  }
 0x51e   :  { %9361 = vmatprep.mubr.bf16.mxu0 %v15251_v45  ;;  %9674 = vmatpush1.bf16.msra.mxu1 %v12745_v15  ;;  %v12837_v42 = vld [vmem:[%s16500_s5 + $0xbec] ss:$16 sps:$4 sm:$0xff]   ;;  %v12832_v15 = vld [vmem:[%s16500_s5 + $0xbe0] ss:$16 sps:$4 sm:$0xff]  }
 0x51f   :  { %9705 = vmatprep.mubr.bf16.mxu1 %v15251_v45  ;;  %9331 = vmatprep.subr.bf16.mxu0 %v12750_v10  ;;  %v12762_v45 = vld [vmem:[%s16500_s5 + $0xa64] ss:$16 sps:$4 sm:$0xff]   ;;  %v12835_v10 = vld [vmem:[%s16500_s5 + $0xbe8] ss:$16 sps:$4 sm:$0xff]  }
 0x520   :  { %9675 = vmatprep.subr.bf16.mxu1 %v12753_v61  ;;  %v12840_v61 = vld [vmem:[%s16500_s5 + $0xc04] ss:$16 sps:$4 sm:$0xff]  }
 0x521   :  { %9332 = vmatpush1.bf16.msra.mxu0 %v12748_v28  ;;  %v12843_v28 = vld [vmem:[%s16500_s5 + $0xc0c] ss:$16 sps:$4 sm:$0xff]  }
 0x522   :  { %9676 = vmatpush1.bf16.msra.mxu1 %v12751_v11  ;;  %9333 = vmatprep.subr.bf16.mxu0 %v12756_v43  ;;  %v12838_v11 = vld [vmem:[%s16500_s5 + $0xc00] ss:$16 sps:$4 sm:$0xff]   ;;  %v12841_v43 = vld [vmem:[%s16500_s5 + $0xc08] ss:$16 sps:$4 sm:$0xff]  }
 0x523   :  { %9677 = vmatprep.subr.bf16.mxu1 %v12759_v37  ;;  %v12846_v37 = vld [vmem:[%s16500_s5 + $0xc24] ss:$16 sps:$4 sm:$0xff]  }
 0x525   :  { %9334 = vmatpush1.bf16.msra.mxu0 %v12754_v12  ;;  %v12849_v12 = vld [vmem:[%s16500_s5 + $0xc2c] ss:$16 sps:$4 sm:$0xff]  }
 0x526   :  { %9678 = vmatpush1.bf16.msra.mxu1 %v12757_v18  ;;  %9335 = vmatprep.subr.bf16.mxu0 %v12762_v45  ;;  %v12844_v18 = vld [vmem:[%s16500_s5 + $0xc20] ss:$16 sps:$4 sm:$0xff]   ;;  %v12847_v45 = vld [vmem:[%s16500_s5 + $0xc28] ss:$16 sps:$4 sm:$0xff]  }
 0x527   :  { %9679 = vmatprep.subr.bf16.mxu1 %v12765_v20  ;;  %v12852_v20 = vld [vmem:[%s16500_s5 + $0xc44] ss:$16 sps:$4 sm:$0xff]  }
 0x529   :  { %9336 = vmatpush1.bf16.msra.mxu0 %v12760_v6  ;;  %v12850_v6 = vld [vmem:[%s16500_s5 + $0xc40] ss:$16 sps:$4 sm:$0xff]  }
 0x52a   :  { %9680 = vmatpush1.bf16.msra.mxu1 %v12763_v21  ;;  %9337 = vmatprep.subr.bf16.mxu0 %v12768_v22  ;;  %v12853_v21 = vld [vmem:[%s16500_s5 + $0xc48] ss:$16 sps:$4 sm:$0xff]   ;;  %v12861_v22 = vld [vmem:[%s16500_s5 + $0xc6c] ss:$16 sps:$4 sm:$0xff]  }
 0x52b   :  { %9681 = vmatprep.subr.bf16.mxu1 %v12771_v13  ;;  %v12856_v13 = vld [vmem:[%s16500_s5 + $0xc60] ss:$16 sps:$4 sm:$0xff]  }
 0x52d   :  { %9338 = vmatpush1.bf16.msra.mxu0 %v12766_v26  ;;  %v12859_v26 = vld [vmem:[%s16500_s5 + $0xc68] ss:$16 sps:$4 sm:$0xff]  }
 0x52e   :  { %9682 = vmatpush1.bf16.msra.mxu1 %v12769_v7  ;;  %9339 = vmatprep.subr.bf16.mxu0 %v12774_v51  ;;  %v12864_v7 = vld [vmem:[%s16500_s5 + $0xc84] ss:$16 sps:$4 sm:$0xff]   ;;  %v12867_v51 = vld [vmem:[%s16500_s5 + $0xc8c] ss:$16 sps:$4 sm:$0xff]  }
 0x52f   :  { %9683 = vmatprep.subr.bf16.mxu1 %v12777_v2  ;;  %v12862_v2 = vld [vmem:[%s16500_s5 + $0xc80] ss:$16 sps:$4 sm:$0xff]  }
 0x531   :  { %9340 = vmatpush1.bf16.msra.mxu0 %v12772_v46  ;;  %v12865_v46 = vld [vmem:[%s16500_s5 + $0xc88] ss:$16 sps:$4 sm:$0xff]  }
 0x532   :  { %9684 = vmatpush1.bf16.msra.mxu1 %v12775_v23  ;;  %9341 = vmatprep.subr.bf16.mxu0 %v12780_v49  ;;  %v12870_v23 = vld [vmem:[%s16500_s5 + $0xca4] ss:$16 sps:$4 sm:$0xff]   ;;  %v12873_v49 = vld [vmem:[%s16500_s5 + $0xcac] ss:$16 sps:$4 sm:$0xff]  }
 0x533   :  { %9685 = vmatprep.subr.bf16.mxu1 %v12783_v0  ;;  %v12868_v0 = vld [vmem:[%s16500_s5 + $0xca0] ss:$16 sps:$4 sm:$0xff]  }
 0x535   :  { %9342 = vmatpush1.bf16.msra.mxu0 %v12778_v60  ;;  %v12871_v60 = vld [vmem:[%s16500_s5 + $0xca8] ss:$16 sps:$4 sm:$0xff]  }
 0x536   :  { %9686 = vmatpush1.bf16.msra.mxu1 %v12781_v17  ;;  %9343 = vmatprep.subr.bf16.mxu0 %v12786_v32  ;;  %v12876_v17 = vld [vmem:[%s16500_s5 + $0xcc4] ss:$16 sps:$4 sm:$0xff]   ;;  %v12879_v32 = vld [vmem:[%s16500_s5 + $0xccc] ss:$16 sps:$4 sm:$0xff]  }
 0x537   :  { %9687 = vmatprep.subr.bf16.mxu1 %v12789_v9  ;;  %v12874_v9 = vld [vmem:[%s16500_s5 + $0xcc0] ss:$16 sps:$4 sm:$0xff]  }
 0x539   :  { %9344 = vmatpush1.bf16.msra.mxu0 %v12784_v63  ;;  %v12877_v63 = vld [vmem:[%s16500_s5 + $0xcc8] ss:$16 sps:$4 sm:$0xff]  }
 0x53a   :  { %9688 = vmatpush1.bf16.msra.mxu1 %v12787_v19  ;;  %9345 = vmatprep.subr.bf16.mxu0 %v12792_v62  ;;  %v12882_v19 = vld [vmem:[%s16500_s5 + $0xce4] ss:$16 sps:$4 sm:$0xff]   ;;  %v12880_v62 = vld [vmem:[%s16500_s5 + $0xce0] ss:$16 sps:$4 sm:$0xff]  }
 0x53b   :  { %9689 = vmatprep.subr.bf16.mxu1 %v12795_v57  ;;  %v12885_v57 = vld [vmem:[%s16500_s5 + $0xcec] ss:$16 sps:$4 sm:$0xff]  }
 0x53d   :  { %9346 = vmatpush1.bf16.msra.mxu0 %v12790_v16  ;;  %v12883_v16 = vld [vmem:[%s16500_s5 + $0xce8] ss:$16 sps:$4 sm:$0xff]  }
 0x53e   :  { %9690 = vmatpush1.bf16.msra.mxu1 %v12793_v33  ;;  %9347 = vmatprep.subr.bf16.mxu0 %v12798_v36  ;;  %v12888_v33 = vld [vmem:[%s16500_s5 + $0xd04] ss:$16 sps:$4 sm:$0xff]   ;;  %v12891_v36 = vld [vmem:[%s16500_s5 + $0xd0c] ss:$16 sps:$4 sm:$0xff]  }
 0x53f   :  { %9691 = vmatprep.subr.bf16.mxu1 %v12801_v39  ;;  %v12886_v39 = vld [vmem:[%s16500_s5 + $0xd00] ss:$16 sps:$4 sm:$0xff]  }
 0x541   :  { %9348 = vmatpush1.bf16.msra.mxu0 %v12796_v40  ;;  %v12889_v40 = vld [vmem:[%s16500_s5 + $0xd08] ss:$16 sps:$4 sm:$0xff]  }
 0x542   :  { %9692 = vmatpush1.bf16.msra.mxu1 %v12799_v41  ;;  %9349 = vmatprep.subr.bf16.mxu0 %v12804_v1  ;;  %v12894_v41 = vld [vmem:[%s16500_s5 + $0xd24] ss:$16 sps:$4 sm:$0xff]   ;;  %v12897_v1 = vld [vmem:[%s16500_s5 + $0xd2c] ss:$16 sps:$4 sm:$0xff]  }
 0x543   :  { %9693 = vmatprep.subr.bf16.mxu1 %v12807_v27  ;;  %v12892_v27 = vld [vmem:[%s16500_s5 + $0xd20] ss:$16 sps:$4 sm:$0xff]  }
 0x545   :  { %9350 = vmatpush1.bf16.msra.mxu0 %v12802_v5  ;;  %v12895_v5 = vld [vmem:[%s16500_s5 + $0xd28] ss:$16 sps:$4 sm:$0xff]  }
 0x546   :  { %9694 = vmatpush1.bf16.msra.mxu1 %v12805_v35  ;;  %9351 = vmatprep.subr.bf16.mxu0 %v12810_v44  ;;  %v12900_v35 = vld [vmem:[%s16500_s5 + $0xd44] ss:$16 sps:$4 sm:$0xff]   ;;  %v12903_v44 = vld [vmem:[%s16500_s5 + $0xd4c] ss:$16 sps:$4 sm:$0xff]  }
 0x547   :  { %9695 = vmatprep.subr.bf16.mxu1 %v12813_v55  ;;  %v12898_v55 = vld [vmem:[%s16500_s5 + $0xd40] ss:$16 sps:$4 sm:$0xff]  }
 0x549   :  { %9352 = vmatpush1.bf16.msra.mxu0 %v12808_v47  ;;  %v12901_v47 = vld [vmem:[%s16500_s5 + $0xd48] ss:$16 sps:$4 sm:$0xff]  }
 0x54a   :  { %9696 = vmatpush1.bf16.msra.mxu1 %v12811_v48  ;;  %9353 = vmatprep.subr.bf16.mxu0 %v12816_v58  ;;  %v12906_v48 = vld [vmem:[%s16500_s5 + $0xd64] ss:$16 sps:$4 sm:$0xff]   ;;  %v12909_v58 = vld [vmem:[%s16500_s5 + $0xd6c] ss:$16 sps:$4 sm:$0xff]  }
 0x54b   :  { %9697 = vmatprep.subr.bf16.mxu1 %v12819_v50  ;;  %v12904_v50 = vld [vmem:[%s16500_s5 + $0xd60] ss:$16 sps:$4 sm:$0xff]  }
 0x54d   :  { %9354 = vmatpush1.bf16.msra.mxu0 %v12814_v54  ;;  %v12907_v54 = vld [vmem:[%s16500_s5 + $0xd68] ss:$16 sps:$4 sm:$0xff]  }
 0x54e   :  { %9698 = vmatpush1.bf16.msra.mxu1 %v12817_v52  ;;  %9355 = vmatprep.subr.bf16.mxu0 %v12822_v31  ;;  %v12912_v52 = vld [vmem:[%s16500_s5 + $0xd84] ss:$16 sps:$4 sm:$0xff]   ;;  %v12915_v31 = vld [vmem:[%s16500_s5 + $0xd8c] ss:$16 sps:$4 sm:$0xff]  }
 0x54f   :  { %9699 = vmatprep.subr.bf16.mxu1 %v12825_v56  ;;  %v12910_v56 = vld [vmem:[%s16500_s5 + $0xd80] ss:$16 sps:$4 sm:$0xff]  }
 0x551   :  { %9356 = vmatpush1.bf16.msra.mxu0 %v12820_v59  ;;  %v12913_v59 = vld [vmem:[%s16500_s5 + $0xd88] ss:$16 sps:$4 sm:$0xff]  }
 0x552   :  { %9700 = vmatpush1.bf16.msra.mxu1 %v12823_v53  ;;  %9357 = vmatprep.subr.bf16.mxu0 %v12828_v34  ;;  %v12918_v53 = vld [vmem:[%s16500_s5 + $0xda4] ss:$16 sps:$4 sm:$0xff]   ;;  %v12921_v34 = vld [vmem:[%s16500_s5 + $0xdac] ss:$16 sps:$4 sm:$0xff]  }
 0x553   :  { %9701 = vmatprep.subr.bf16.mxu1 %v12831_v30  ;;  %v12916_v30 = vld [vmem:[%s16500_s5 + $0xda0] ss:$16 sps:$4 sm:$0xff]  }
 0x555   :  { %9358 = vmatpush1.bf16.msra.mxu0 %v12826_v3  ;;  %v12919_v3 = vld [vmem:[%s16500_s5 + $0xda8] ss:$16 sps:$4 sm:$0xff]  }
 0x556   :  { %9702 = vmatpush1.bf16.msra.mxu1 %v12829_v24  ;;  %9359 = vmatprep.subr.bf16.mxu0 %v12834_v4  ;;  %v12924_v24 = vld [vmem:[%s16500_s5 + $0xdc4] ss:$16 sps:$4 sm:$0xff]   ;;  %v12927_v4 = vld [vmem:[%s16500_s5 + $0xdcc] ss:$16 sps:$4 sm:$0xff]  }
 0x557   :  { %9703 = vmatprep.subr.bf16.mxu1 %v12837_v42  ;;  %v12922_v42 = vld [vmem:[%s16500_s5 + $0xdc0] ss:$16 sps:$4 sm:$0xff]  }
 0x559   :  { %9360 = vmatpush1.bf16.msra.mxu0 %v12832_v15  ;;  %v12925_v15 = vld [vmem:[%s16500_s5 + $0xdc8] ss:$16 sps:$4 sm:$0xff]  }
 0x55a   :  { %9704 = vmatpush1.bf16.msra.mxu1 %v12835_v10  ;;  %9372 = vmatprep.subr.bf16.mxu0 %v12840_v61  ;;  %v12930_v10 = vld [vmem:[%s16500_s5 + $0xde4] ss:$16 sps:$4 sm:$0xff]   ;;  %v12933_v61 = vld [vmem:[%s16500_s5 + $0xdec] ss:$16 sps:$4 sm:$0xff]  }
 0x55b   :  { %9716 = vmatprep.subr.bf16.mxu1 %v12843_v28  ;;  %v12928_v28 = vld [vmem:[%s16500_s5 + $0xde0] ss:$16 sps:$4 sm:$0xff]  }
 0x55c   :  { %9362 = vmatmul.mubr.bf16.vlgmr.msra.gmra.mrb[208].mxu0 %v15220_v8 }
 0x55d   :  { %9706 = vmatmul.mubr.bf16.vlgmr.msra.gmra.mrb[208].mxu1 %v15220_v8  ;;  %9373 = vmatpush1.bf16.msra.mxu0 %v12838_v11  ;;  %v12855_v8 = vld [vmem:[%s16500_s5 + $0xc4c] ss:$16 sps:$4 sm:$0xff]   ;;  %v12931_v11 = vld [vmem:[%s16500_s5 + $0xde8] ss:$16 sps:$4 sm:$0xff]  }
 0x55e   :  { %9404 = vmatprep.mubr.bf16.mxu0 %v15307_v25  ;;  %9717 = vmatpush1.bf16.msra.mxu1 %v12841_v43  ;;  %v12936_v43 = vld [vmem:[%s16500_s5 + $0xe04] ss:$16 sps:$4 sm:$0xff]  }
 0x55f   :  { %9748 = vmatprep.mubr.bf16.mxu1 %v15307_v25  ;;  %9374 = vmatprep.subr.bf16.mxu0 %v12846_v37  ;;  %v12858_v25 = vld [vmem:[%s16500_s5 + $0xc64] ss:$16 sps:$4 sm:$0xff]   ;;  %v12939_v37 = vld [vmem:[%s16500_s5 + $0xe0c] ss:$16 sps:$4 sm:$0xff]  }
 0x560   :  { %9718 = vmatprep.subr.bf16.mxu1 %v12849_v12  ;;  %v12934_v12 = vld [vmem:[%s16500_s5 + $0xe00] ss:$16 sps:$4 sm:$0xff]  }
 0x561   :  { %9375 = vmatpush1.bf16.msra.mxu0 %v12844_v18  ;;  %v12937_v18 = vld [vmem:[%s16500_s5 + $0xe08] ss:$16 sps:$4 sm:$0xff]  }
 0x562   :  { %9719 = vmatpush1.bf16.msra.mxu1 %v12847_v45  ;;  %9376 = vmatprep.subr.bf16.mxu0 %v12852_v20  ;;  %v12942_v45 = vld [vmem:[%s16500_s5 + $0xe24] ss:$16 sps:$4 sm:$0xff]   ;;  %v12945_v20 = vld [vmem:[%s16500_s5 + $0xe2c] ss:$16 sps:$4 sm:$0xff]  }
 0x563   :  { %9720 = vmatprep.subr.bf16.mxu1 %v12855_v8  ;;  %v12940_v8 = vld [vmem:[%s16500_s5 + $0xe20] ss:$16 sps:$4 sm:$0xff]  }
 0x565   :  { %9377 = vmatpush1.bf16.msra.mxu0 %v12850_v6  ;;  %v12943_v6 = vld [vmem:[%s16500_s5 + $0xe28] ss:$16 sps:$4 sm:$0xff]  }
 0x566   :  { %9721 = vmatpush1.bf16.msra.mxu1 %v12853_v21  ;;  %9378 = vmatprep.subr.bf16.mxu0 %v12858_v25  ;;  %v12948_v21 = vld [vmem:[%s16500_s5 + $0xe44] ss:$16 sps:$4 sm:$0xff]   ;;  %v12946_v25 = vld [vmem:[%s16500_s5 + $0xe40] ss:$16 sps:$4 sm:$0xff]  }
 0x567   :  { %9722 = vmatprep.subr.bf16.mxu1 %v12861_v22  ;;  %v12949_v22 = vld [vmem:[%s16500_s5 + $0xe48] ss:$16 sps:$4 sm:$0xff]  }
 0x569   :  { %9379 = vmatpush1.bf16.msra.mxu0 %v12856_v13  ;;  %v12957_v13 = vld [vmem:[%s16500_s5 + $0xe6c] ss:$16 sps:$4 sm:$0xff]  }
 0x56a   :  { %9723 = vmatpush1.bf16.msra.mxu1 %v12859_v26  ;;  %9380 = vmatprep.subr.bf16.mxu0 %v12864_v7  ;;  %v12952_v26 = vld [vmem:[%s16500_s5 + $0xe60] ss:$16 sps:$4 sm:$0xff]   ;;  %v12955_v7 = vld [vmem:[%s16500_s5 + $0xe68] ss:$16 sps:$4 sm:$0xff]  }
 0x56b   :  { %9724 = vmatprep.subr.bf16.mxu1 %v12867_v51  ;;  %v12960_v51 = vld [vmem:[%s16500_s5 + $0xe84] ss:$16 sps:$4 sm:$0xff]  }
 0x56d   :  { %9381 = vmatpush1.bf16.msra.mxu0 %v12862_v2  ;;  %v12963_v2 = vld [vmem:[%s16500_s5 + $0xe8c] ss:$16 sps:$4 sm:$0xff]  }
 0x56e   :  { %9725 = vmatpush1.bf16.msra.mxu1 %v12865_v46  ;;  %9382 = vmatprep.subr.bf16.mxu0 %v12870_v23  ;;  %v12958_v46 = vld [vmem:[%s16500_s5 + $0xe80] ss:$16 sps:$4 sm:$0xff]   ;;  %v12961_v23 = vld [vmem:[%s16500_s5 + $0xe88] ss:$16 sps:$4 sm:$0xff]  }
 0x56f   :  { %9726 = vmatprep.subr.bf16.mxu1 %v12873_v49  ;;  %v12966_v49 = vld [vmem:[%s16500_s5 + $0xea4] ss:$16 sps:$4 sm:$0xff]  }
 0x571   :  { %9383 = vmatpush1.bf16.msra.mxu0 %v12868_v0  ;;  %v12969_v0 = vld [vmem:[%s16500_s5 + $0xeac] ss:$16 sps:$4 sm:$0xff]  }
 0x572   :  { %9727 = vmatpush1.bf16.msra.mxu1 %v12871_v60  ;;  %9384 = vmatprep.subr.bf16.mxu0 %v12876_v17  ;;  %v12964_v60 = vld [vmem:[%s16500_s5 + $0xea0] ss:$16 sps:$4 sm:$0xff]   ;;  %v12967_v17 = vld [vmem:[%s16500_s5 + $0xea8] ss:$16 sps:$4 sm:$0xff]  }
 0x573   :  { %9728 = vmatprep.subr.bf16.mxu1 %v12879_v32  ;;  %v12972_v32 = vld [vmem:[%s16500_s5 + $0xec4] ss:$16 sps:$4 sm:$0xff]  }
 0x575   :  { %9385 = vmatpush1.bf16.msra.mxu0 %v12874_v9  ;;  %v12975_v9 = vld [vmem:[%s16500_s5 + $0xecc] ss:$16 sps:$4 sm:$0xff]  }
 0x576   :  { %9729 = vmatpush1.bf16.msra.mxu1 %v12877_v63  ;;  %9386 = vmatprep.subr.bf16.mxu0 %v12882_v19  ;;  %v12970_v63 = vld [vmem:[%s16500_s5 + $0xec0] ss:$16 sps:$4 sm:$0xff]   ;;  %v12973_v19 = vld [vmem:[%s16500_s5 + $0xec8] ss:$16 sps:$4 sm:$0xff]  }
 0x577   :  { %9730 = vmatprep.subr.bf16.mxu1 %v12885_v57  ;;  %v12981_v57 = vld [vmem:[%s16500_s5 + $0xeec] ss:$16 sps:$4 sm:$0xff]  }
 0x579   :  { %9387 = vmatpush1.bf16.msra.mxu0 %v12880_v62  ;;  %v12978_v62 = vld [vmem:[%s16500_s5 + $0xee4] ss:$16 sps:$4 sm:$0xff]  }
 0x57a   :  { %9731 = vmatpush1.bf16.msra.mxu1 %v12883_v16  ;;  %9388 = vmatprep.subr.bf16.mxu0 %v12888_v33  ;;  %v12976_v16 = vld [vmem:[%s16500_s5 + $0xee0] ss:$16 sps:$4 sm:$0xff]   ;;  %v12979_v33 = vld [vmem:[%s16500_s5 + $0xee8] ss:$16 sps:$4 sm:$0xff]  }
 0x57b   :  { %9732 = vmatprep.subr.bf16.mxu1 %v12891_v36  ;;  %v12984_v36 = vld [vmem:[%s16500_s5 + $0xf04] ss:$16 sps:$4 sm:$0xff]  }
 0x57d   :  { %9389 = vmatpush1.bf16.msra.mxu0 %v12886_v39  ;;  %v12987_v39 = vld [vmem:[%s16500_s5 + $0xf0c] ss:$16 sps:$4 sm:$0xff]  }
 0x57e   :  { %9733 = vmatpush1.bf16.msra.mxu1 %v12889_v40  ;;  %9390 = vmatprep.subr.bf16.mxu0 %v12894_v41  ;;  %v12982_v40 = vld [vmem:[%s16500_s5 + $0xf00] ss:$16 sps:$4 sm:$0xff]   ;;  %v12985_v41 = vld [vmem:[%s16500_s5 + $0xf08] ss:$16 sps:$4 sm:$0xff]  }
 0x57f   :  { %9734 = vmatprep.subr.bf16.mxu1 %v12897_v1  ;;  %v12990_v1 = vld [vmem:[%s16500_s5 + $0xf24] ss:$16 sps:$4 sm:$0xff]  }
 0x581   :  { %9391 = vmatpush1.bf16.msra.mxu0 %v12892_v27  ;;  %v12993_v27 = vld [vmem:[%s16500_s5 + $0xf2c] ss:$16 sps:$4 sm:$0xff]  }
 0x582   :  { %9735 = vmatpush1.bf16.msra.mxu1 %v12895_v5  ;;  %9392 = vmatprep.subr.bf16.mxu0 %v12900_v35  ;;  %v12988_v5 = vld [vmem:[%s16500_s5 + $0xf20] ss:$16 sps:$4 sm:$0xff]   ;;  %v12991_v35 = vld [vmem:[%s16500_s5 + $0xf28] ss:$16 sps:$4 sm:$0xff]  }
 0x583   :  { %9736 = vmatprep.subr.bf16.mxu1 %v12903_v44  ;;  %v12996_v44 = vld [vmem:[%s16500_s5 + $0xf44] ss:$16 sps:$4 sm:$0xff]  }
 0x585   :  { %9393 = vmatpush1.bf16.msra.mxu0 %v12898_v55  ;;  %v12999_v55 = vld [vmem:[%s16500_s5 + $0xf4c] ss:$16 sps:$4 sm:$0xff]  }
 0x586   :  { %9737 = vmatpush1.bf16.msra.mxu1 %v12901_v47  ;;  %9394 = vmatprep.subr.bf16.mxu0 %v12906_v48  ;;  %v12994_v47 = vld [vmem:[%s16500_s5 + $0xf40] ss:$16 sps:$4 sm:$0xff]   ;;  %v12997_v48 = vld [vmem:[%s16500_s5 + $0xf48] ss:$16 sps:$4 sm:$0xff]  }
 0x587   :  { %9738 = vmatprep.subr.bf16.mxu1 %v12909_v58  ;;  %v13002_v58 = vld [vmem:[%s16500_s5 + $0xf64] ss:$16 sps:$4 sm:$0xff]  }
 0x589   :  { %9395 = vmatpush1.bf16.msra.mxu0 %v12904_v50  ;;  %v13005_v50 = vld [vmem:[%s16500_s5 + $0xf6c] ss:$16 sps:$4 sm:$0xff]  }
 0x58a   :  { %9739 = vmatpush1.bf16.msra.mxu1 %v12907_v54  ;;  %9396 = vmatprep.subr.bf16.mxu0 %v12912_v52  ;;  %v13000_v54 = vld [vmem:[%s16500_s5 + $0xf60] ss:$16 sps:$4 sm:$0xff]   ;;  %v13003_v52 = vld [vmem:[%s16500_s5 + $0xf68] ss:$16 sps:$4 sm:$0xff]  }
 0x58b   :  { %9740 = vmatprep.subr.bf16.mxu1 %v12915_v31  ;;  %v13008_v31 = vld [vmem:[%s16500_s5 + $0xf84] ss:$16 sps:$4 sm:$0xff]  }
 0x58d   :  { %9397 = vmatpush1.bf16.msra.mxu0 %v12910_v56  ;;  %v13011_v56 = vld [vmem:[%s16500_s5 + $0xf8c] ss:$16 sps:$4 sm:$0xff]  }
 0x58e   :  { %9741 = vmatpush1.bf16.msra.mxu1 %v12913_v59  ;;  %9398 = vmatprep.subr.bf16.mxu0 %v12918_v53  ;;  %v13006_v59 = vld [vmem:[%s16500_s5 + $0xf80] ss:$16 sps:$4 sm:$0xff]   ;;  %v13009_v53 = vld [vmem:[%s16500_s5 + $0xf88] ss:$16 sps:$4 sm:$0xff]  }
 0x58f   :  { %9742 = vmatprep.subr.bf16.mxu1 %v12921_v34  ;;  %v13014_v34 = vld [vmem:[%s16500_s5 + $0xfa4] ss:$16 sps:$4 sm:$0xff]  }
 0x591   :  { %9399 = vmatpush1.bf16.msra.mxu0 %v12916_v30  ;;  %v13017_v30 = vld [vmem:[%s16500_s5 + $0xfac] ss:$16 sps:$4 sm:$0xff]  }
 0x592   :  { %9743 = vmatpush1.bf16.msra.mxu1 %v12919_v3  ;;  %9400 = vmatprep.subr.bf16.mxu0 %v12924_v24  ;;  %v13012_v3 = vld [vmem:[%s16500_s5 + $0xfa0] ss:$16 sps:$4 sm:$0xff]   ;;  %v13015_v24 = vld [vmem:[%s16500_s5 + $0xfa8] ss:$16 sps:$4 sm:$0xff]  }
 0x593   :  { %9744 = vmatprep.subr.bf16.mxu1 %v12927_v4  ;;  %v13020_v4 = vld [vmem:[%s16500_s5 + $0xfc4] ss:$16 sps:$4 sm:$0xff]  }
 0x595   :  { %9401 = vmatpush1.bf16.msra.mxu0 %v12922_v42  ;;  %v13023_v42 = vld [vmem:[%s16500_s5 + $0xfcc] ss:$16 sps:$4 sm:$0xff]  }
 0x596   :  { %9745 = vmatpush1.bf16.msra.mxu1 %v12925_v15  ;;  %9402 = vmatprep.subr.bf16.mxu0 %v12930_v10  ;;  %v13018_v15 = vld [vmem:[%s16500_s5 + $0xfc0] ss:$16 sps:$4 sm:$0xff]   ;;  %v13021_v10 = vld [vmem:[%s16500_s5 + $0xfc8] ss:$16 sps:$4 sm:$0xff]  }
 0x597   :  { %9746 = vmatprep.subr.bf16.mxu1 %v12933_v61  ;;  %v13026_v61 = vld [vmem:[%s16500_s5 + $0xfe4] ss:$16 sps:$4 sm:$0xff]  }
 0x599   :  { %9403 = vmatpush1.bf16.msra.mxu0 %v12928_v28  ;;  %v13029_v28 = vld [vmem:[%s16500_s5 + $0xfec] ss:$16 sps:$4 sm:$0xff]  }
 0x59a   :  { %9747 = vmatpush1.bf16.msra.mxu1 %v12931_v11  ;;  %9415 = vmatprep.subr.bf16.mxu0 %v12936_v43  ;;  %v13024_v11 = vld [vmem:[%s16500_s5 + $0xfe0] ss:$16 sps:$4 sm:$0xff]   ;;  %v13027_v43 = vld [vmem:[%s16500_s5 + $0xfe8] ss:$16 sps:$4 sm:$0xff]  }
 0x59b   :  { %9759 = vmatprep.subr.bf16.mxu1 %v12939_v37  ;;  %v13030_v37 = vld [vmem:[%s16502_s7 + $0x40] sm:$0xff]  }
 0x59c   :  { %9405 = vmatmul.mubr.bf16.vlgmr.msra.gmra.mrb[208].mxu0 %v15276_v38 }
 0x59d   :  { %9749 = vmatmul.mubr.bf16.vlgmr.msra.gmra.mrb[208].mxu1 %v15276_v38  ;;  %9416 = vmatpush1.bf16.msra.mxu0 %v12934_v12  ;;  %v12951_v38 = vld [vmem:[%s16500_s5 + $0xe4c] ss:$16 sps:$4 sm:$0xff]   ;;  %v13031_v12 = vld [vmem:[%s16502_s7 + $0xc0] sm:$0xff]  }
 0x59e   :  { %9447 = vmatprep.mubr.bf16.mxu0 %v15365_v29  ;;  %9760 = vmatpush1.bf16.msra.mxu1 %v12937_v18  ;;  %v13032_v18 = vld [vmem:[%s16502_s7] sm:$0xff]  }
 0x59f   :  { %9791 = vmatprep.mubr.bf16.mxu1 %v15365_v29  ;;  %9417 = vmatprep.subr.bf16.mxu0 %v12942_v45  ;;  %v12954_v29 = vld [vmem:[%s16500_s5 + $0xe64] ss:$16 sps:$4 sm:$0xff]  }
 0x5a0   :  { %9761 = vmatprep.subr.bf16.mxu1 %v12945_v20  ;;  %v13033_v45 = vld [vmem:[%s16502_s7 + $0x80] sm:$0xff]   ;;  %v13034_v20 = vld [vmem:[%s16502_s7 + $0x48] sm:$0xff]  }
 0x5a1   :  { %9418 = vmatpush1.bf16.msra.mxu0 %v12940_v8  ;;  %v13035_v8 = vld [vmem:[%s16502_s7 + $0xc8] sm:$0xff]  }
 0x5a2   :  { %9762 = vmatpush1.bf16.msra.mxu1 %v12943_v6  ;;  %9419 = vmatprep.subr.bf16.mxu0 %v12948_v21  ;;  %v13036_v6 = vld [vmem:[%s16502_s7 + $0x8] sm:$0xff]  }
 0x5a3   :  { %9763 = vmatprep.subr.bf16.mxu1 %v12951_v38  ;;  %v13037_v21 = vld [vmem:[%s16502_s7 + $0x88] sm:$0xff]   ;;  %v13038_v38 = vld [vmem:[%s16502_s7 + $0x50] sm:$0xff]  }
 0x5a5   :  { %9420 = vmatpush1.bf16.msra.mxu0 %v12946_v25  ;;  %v13040_v25 = vld [vmem:[%s16502_s7 + $0x10] sm:$0xff]  }
 0x5a6   :  { %9764 = vmatpush1.bf16.msra.mxu1 %v12949_v22  ;;  %9421 = vmatprep.subr.bf16.mxu0 %v12954_v29  ;;  %v13041_v22 = vld [vmem:[%s16502_s7 + $0x90] sm:$0xff]   ;;  %v13042_v29 = vld [vmem:[%s16502_s7 + $0x58] sm:$0xff]  }
 0x5a7   :  { %9765 = vmatprep.subr.bf16.mxu1 %v12957_v13  ;;  %v13043_v13 = vld [vmem:[%s16502_s7 + $0xd8] sm:$0xff]  }
 0x5a9   :  { %9422 = vmatpush1.bf16.msra.mxu0 %v12952_v26  ;;  %v13044_v26 = vld [vmem:[%s16502_s7 + $0x18] sm:$0xff]  }
 0x5aa   :  { %9766 = vmatpush1.bf16.msra.mxu1 %v12955_v7  ;;  %9423 = vmatprep.subr.bf16.mxu0 %v12960_v51  ;;  %v13045_v7 = vld [vmem:[%s16502_s7 + $0x98] sm:$0xff]   ;;  %v13046_v51 = vld [vmem:[%s16502_s7 + $0x60] sm:$0xff]  }
 0x5ab   :  { %9767 = vmatprep.subr.bf16.mxu1 %v12963_v2  ;;  %v13047_v2 = vld [vmem:[%s16502_s7 + $0xe0] sm:$0xff]  }
 0x5ad   :  { %9424 = vmatpush1.bf16.msra.mxu0 %v12958_v46  ;;  %v13048_v46 = vld [vmem:[%s16502_s7 + $0x20] sm:$0xff]  }
 0x5ae   :  { %9768 = vmatpush1.bf16.msra.mxu1 %v12961_v23  ;;  %9425 = vmatprep.subr.bf16.mxu0 %v12966_v49  ;;  %v13049_v23 = vld [vmem:[%s16502_s7 + $0xa0] sm:$0xff]   ;;  %v13050_v49 = vld [vmem:[%s16502_s7 + $0x68] sm:$0xff]  }
 0x5af   :  { %9769 = vmatprep.subr.bf16.mxu1 %v12969_v0  ;;  %v13051_v0 = vld [vmem:[%s16502_s7 + $0xe8] sm:$0xff]  }
 0x5b1   :  { %9426 = vmatpush1.bf16.msra.mxu0 %v12964_v60  ;;  %v13052_v60 = vld [vmem:[%s16502_s7 + $0x28] sm:$0xff]  }
 0x5b2   :  { %9770 = vmatpush1.bf16.msra.mxu1 %v12967_v17  ;;  %9427 = vmatprep.subr.bf16.mxu0 %v12972_v32  ;;  %v13053_v17 = vld [vmem:[%s16502_s7 + $0xa8] sm:$0xff]   ;;  %v13054_v32 = vld [vmem:[%s16502_s7 + $0x70] sm:$0xff]  }
 0x5b3   :  { %9771 = vmatprep.subr.bf16.mxu1 %v12975_v9  ;;  %v13055_v9 = vld [vmem:[%s16502_s7 + $0xf0] sm:$0xff]  }
 0x5b5   :  { %9428 = vmatpush1.bf16.msra.mxu0 %v12970_v63  ;;  %v13056_v63 = vld [vmem:[%s16502_s7 + $0x30] sm:$0xff]  }
 0x5b6   :  { %9772 = vmatpush1.bf16.msra.mxu1 %v12973_v19  ;;  %9429 = vmatprep.subr.bf16.mxu0 %v12978_v62  ;;  %v13057_v19 = vld [vmem:[%s16502_s7 + $0xb0] sm:$0xff]   ;;  %v13058_v62 = vld [vmem:[%s16502_s7 + $0x78] sm:$0xff]  }
 0x5b7   :  { %9773 = vmatprep.subr.bf16.mxu1 %v12981_v57  ;;  %v13059_v57 = vld [vmem:[%s16502_s7 + $0xf8] sm:$0xff]  }
 0x5b9   :  { %9430 = vmatpush1.bf16.msra.mxu0 %v12976_v16  ;;  %v13060_v16 = vld [vmem:[%s16502_s7 + $0x38] sm:$0xff]  }
 0x5ba   :  { %9774 = vmatpush1.bf16.msra.mxu1 %v12979_v33  ;;  %9431 = vmatprep.subr.bf16.mxu0 %v12984_v36  ;;  %v13061_v33 = vld [vmem:[%s16502_s7 + $0xb8] sm:$0xff]   ;;  %v6534_v36 = vlaneseq }
 0x5bb   :  { %9775 = vmatprep.subr.bf16.mxu1 %v12987_v39 }
 0x5bc   :  { %v6535_v39 = vshrl.u32 %v6534_v36, 7 }
 0x5bd   :  { %9432 = vmatpush1.bf16.msra.mxu0 %v12982_v40 }
 0x5be   :  { %9776 = vmatpush1.bf16.msra.mxu1 %v12985_v41  ;;  %9433 = vmatprep.subr.bf16.mxu0 %v12990_v1  ;;  %v6536_v40 = vsub.s32 0, %v6535_v39  ;;  %v6532_v41 = vld [vmem:[%s16503_s6] sm:$0xf]  ;;  %v6544_v1 = vsub.s32 2, %v6535_v39 }
 0x5bf   :  { %9777 = vmatprep.subr.bf16.mxu1 %v12993_v27  ;;  %v6540_v27 = vsub.s32 1, %v6535_v39 }
 0x5c1   :  { %9434 = vmatpush1.bf16.msra.mxu0 %v12988_v5  ;;  %v6548_v5 = vsub.s32 3, %v6535_v39 }
 0x5c2   :  { %9778 = vmatpush1.bf16.msra.mxu1 %v12991_v35  ;;  %9435 = vmatprep.subr.bf16.mxu0 %v12996_v44  ;;  %v6537_v35 = vrot.slane %v6532_v41, %v6536_v40  ;;  %v6545_v44 = vrot.slane %v6532_v41, %v6544_v1 }
 0x5c3   :  { %9779 = vmatprep.subr.bf16.mxu1 %v12999_v55  ;;  %v6541_v55 = vrot.slane %v6532_v41, %v6540_v27 }
 0x5c5   :  { %9436 = vmatpush1.bf16.msra.mxu0 %v12994_v47  ;;  %v6549_v47 = vrot.slane %v6532_v41, %v6548_v5 }
 0x5c6   :  { %9780 = vmatpush1.bf16.msra.mxu1 %v12997_v48  ;;  %9437 = vmatprep.subr.bf16.mxu0 %v13002_v58 }
 0x5c7   :  { %9781 = vmatprep.subr.bf16.mxu1 %v13005_v50 }
 0x5c9   :  { %9438 = vmatpush1.bf16.msra.mxu0 %v13000_v54 }
 0x5ca   :  { %9782 = vmatpush1.bf16.msra.mxu1 %v13003_v52  ;;  %9439 = vmatprep.subr.bf16.mxu0 %v13008_v31 }
 0x5cb   :  { %9783 = vmatprep.subr.bf16.mxu1 %v13011_v56 }
 0x5cd   :  { %9440 = vmatpush1.bf16.msra.mxu0 %v13006_v59 }
 0x5ce   :  { %9784 = vmatpush1.bf16.msra.mxu1 %v13009_v53  ;;  %9441 = vmatprep.subr.bf16.mxu0 %v13014_v34 }
 0x5cf   :  { %9785 = vmatprep.subr.bf16.mxu1 %v13017_v30 }
 0x5d1   :  { %9442 = vmatpush1.bf16.msra.mxu0 %v13012_v3 }
 0x5d2   :  { %9786 = vmatpush1.bf16.msra.mxu1 %v13015_v24  ;;  %9443 = vmatprep.subr.bf16.mxu0 %v13020_v4 }
 0x5d3   :  { %9787 = vmatprep.subr.bf16.mxu1 %v13023_v42 }
 0x5d5   :  { %9444 = vmatpush1.bf16.msra.mxu0 %v13018_v15 }
 0x5d6   :  { %9788 = vmatpush1.bf16.msra.mxu1 %v13021_v10  ;;  %9445 = vmatprep.subr.bf16.mxu0 %v13026_v61 }
 0x5d7   :  { %9789 = vmatprep.subr.bf16.mxu1 %v13029_v28 }
 0x5d9   :  { %9446 = vmatpush1.bf16.msra.mxu0 %v13024_v11 }
 0x5da   :  { %9790 = vmatpush1.bf16.msra.mxu1 %v13027_v43  ;;  %11149 = vmatprep.subr.bf16.mxu0 %v13030_v37 }
 0x5db   :  { %11171 = vmatprep.subr.bf16.mxu1 %v13031_v12 }
 0x5dc   :  { %9448 = vmatmul.mubr.bf16.vlgmr.msra.gmra.mrb[208].mxu0 %v15332_v14 }
 0x5dd   :  { %9792 = vmatmul.mubr.bf16.vlgmr.msra.gmra.mrb[208].mxu1 %v15332_v14  ;;  %11150 = vmatpush3.bf16.msra.mxu0 %v13032_v18  ;;  %v13039_v14 = vld [vmem:[%s16502_s7 + $0xd0] sm:$0xff]  }
 0x5de   :  { %11172 = vmatpush3.bf16.msra.mxu1 %v13033_v45  ;;  %11151 = vmatprep.subr.bf16.mxu0 %v13034_v20 }
 0x5df   :  { %11173 = vmatprep.subr.bf16.mxu1 %v13035_v8 }
 0x5e1   :  { %11152 = vmatpush3.bf16.msra.mxu0 %v13036_v6 }
 0x5e2   :  { %11174 = vmatpush3.bf16.msra.mxu1 %v13037_v21  ;;  %11153 = vmatprep.subr.bf16.mxu0 %v13038_v38 }
 0x5e3   :  { %11175 = vmatprep.subr.bf16.mxu1 %v13039_v14  ;;  %v11116_v14 = vld [vmem:[%s16504_s8] ss:$0 sm:$0xff] }
 0x5e5   :  { %11154 = vmatpush3.bf16.msra.mxu0 %v13040_v25 }
 0x5e6   :  { %11176 = vmatpush3.bf16.msra.mxu1 %v13041_v22  ;;  %11155 = vmatprep.subr.bf16.mxu0 %v13042_v29  ;;  %v10160_v22 = vand.u32 127, %v6534_v36 }
 0x5e7   :  { %11177 = vmatprep.subr.bf16.mxu1 %v13043_v13 }
 0x5e8   :  { %vm10161_vm1 = vcmp.lt.s32.totalorder %v10160_v22, 10 }
 0x5e9   :  { %11156 = vmatpush3.bf16.msra.mxu0 %v13044_v26 }
 0x5ea   :  { %11178 = vmatpush3.bf16.msra.mxu1 %v13045_v7  ;;  %11157 = vmatprep.subr.bf16.mxu0 %v13046_v51 }
 0x5eb   :  { %11179 = vmatprep.subr.bf16.mxu1 %v13047_v2 }
 0x5ed   :  { %11158 = vmatpush3.bf16.msra.mxu0 %v13048_v46 }
 0x5ee   :  { %11180 = vmatpush3.bf16.msra.mxu1 %v13049_v23  ;;  %11159 = vmatprep.subr.bf16.mxu0 %v13050_v49 }
 0x5ef   :  { %11181 = vmatprep.subr.bf16.mxu1 %v13051_v0 }
 0x5f1   :  { %11160 = vmatpush3.bf16.msra.mxu0 %v13052_v60 }
 0x5f2   :  { %11182 = vmatpush3.bf16.msra.mxu1 %v13053_v17  ;;  %11161 = vmatprep.subr.bf16.mxu0 %v13054_v32 }
 0x5f3   :  { %11183 = vmatprep.subr.bf16.mxu1 %v13055_v9 }
 0x5f5   :  { %11162 = vmatpush3.bf16.msra.mxu0 %v13056_v63 }
 0x5f6   :  { %11184 = vmatpush3.bf16.msra.mxu1 %v13057_v19  ;;  %11163 = vmatprep.subr.bf16.mxu0 %v13058_v62 }
 0x5f7   :  { %11185 = vmatprep.subr.bf16.mxu1 %v13059_v57 }
 0x5f9   :  { %11164 = vmatpush3.bf16.msra.mxu0 %v13060_v16 }
 0x5fa   :  { %11186 = vmatpush3.bf16.msra.mxu1 %v13061_v33 }
 0x6af   :  { %v9449_v48 = vpop.f32.mrb[208].mxu0 }
 0x6b0   :  { %v11193_v58 = vadd.f32 %v9449_v48, %v6537_v35  ;;  %v9793_v50 = vpop.f32.mrb[208].mxu1  ;;  %v9451_v54 = vpop.f32.mrb[209].mxu0 }
 0x6b1   :  { %v11197_v52 = vadd.f32 %v9793_v50, %v6545_v44  ;;  %v11194_v31 = vadd.f32 %v9451_v54, %v6541_v55  ;;  %v9795_v56 = vpop.f32.mrb[209].mxu1  ;;  %v9453_v59 = vpop.f32.mrb[210].mxu0 }
 0x6b2   :  { %v11198_v53 = vadd.f32 %v9795_v56, %v6549_v47  ;;  %v11195_v34 = vadd.f32 %v9453_v59, %v6537_v35  ;;  %v9797_v30 = vpop.f32.mrb[210].mxu1  ;;  %v9455_v3 = vpop.f32.mrb[211].mxu0  ;;  %v9802_v15 = vmax.f32 %v11193_v58, 0.0 }
 0x6b3   :  { %v11199_v24 = vadd.f32 %v9797_v30, %v6545_v44  ;;  %v11196_v4 = vadd.f32 %v9455_v3, %v6541_v55  ;;  %v9799_v42 = vpop.f32.mrb[211].mxu1  ;;  %v9804_v28 = vmax.f32 %v11197_v52, 0.0  ;;  %v9803_v11 = vmax.f32 %v11194_v31, 0.0 }
 0x6b4   :  { %v9806_v10 = vmax.f32 %v11195_v34, 0.0  ;;  %v11200_v61 = vadd.f32 %v9799_v42, %v6549_v47  ;;  %v9805_v12 = vmax.f32 %v11198_v53, 0.0 }
 0x6b5   :  { %v9808_v43 = vmax.f32 %v11199_v24, 0.0  ;;  %v9807_v37 = vmax.f32 %v11196_v4, 0.0 }
 0x6b6   :  { %v9810_v18 = vpack.c.bf16 %v9806_v10, %v9802_v15  ;;  %v9809_v45 = vmax.f32 %v11200_v61, 0.0 }
 0x6b7   :  { %v9812_v20 = vpack.c.bf16 %v9808_v43, %v9804_v28  ;;  %v9811_v8 = vpack.c.bf16 %v9807_v37, %v9803_v11 }
 0x6b8   :  { %v9813_v6 = vpack.c.bf16 %v9809_v45, %v9805_v12 }
 0x6b9   :  { %10109 = vmatprep.mubr.bf16.mxu0 %v9811_v8 }
 0x6ba   :  { %10150 = vmatprep.mubr.bf16.mxu1 %v9813_v6  ;;  %10110 = vmatmul.mubr.bf16.vlgmr.msra.gmra.mrb[212].mxu0 %v9810_v18 }
 0x6bb   :  { %10151 = vmatmul.mubr.bf16.vlgmr.msra.gmra.mrb[212].mxu1 %v9812_v20 }
 0x78d   :  { %v11165_v21 = vpop.f32.mrb[212].mxu0 }
 0x78e   :  { %v11187_v38 = vpop.f32.mrb[212].mxu1  ;;  %v11166_v25 = vpop.f32.mrb[213].mxu0 }
 0x78f   :  { %v11167_v29 = vadd.f32 %v11166_v25, %v11165_v21  ;;  %v11188_v13 = vpop.f32.mrb[213].mxu1  ;;  %v11168_v26 = vpop.f32.mrb[214].mxu0 }
 0x790   :  { %v11189_v7 = vadd.f32 %v11188_v13, %v11187_v38  ;;  %v11190_v51 = vpop.f32.mrb[214].mxu1  ;;  %v11169_v2 = vpop.f32.mrb[215].mxu0 }
 0x791   :  { %v10112_v46 = vadd.f32 %v11167_v29, %v11116_v14  ;;  %v11170_v23 = vadd.f32 %v11169_v2, %v11168_v26  ;;  %v11191_v49 = vpop.f32.mrb[215].mxu1 }
 0x792   :  { %v11192_v0 = vadd.f32 %v11191_v49, %v11190_v51 }
 0x793   :  { %v10115_v60 = vadd.f32 %v11170_v23, %v11116_v14  ;;  %v10153_v17 = vadd.f32 %v11189_v7, %v10112_v46 }
 0x795   :  { %v10162_v32 = vsel %vm10161_vm1, %v10153_v17, -1e+30  ;;  %v10156_v9 = vadd.f32 %v11192_v0, %v10115_v60 }
 0x796   :  { %10164 = vmax.xlane.f32.xlu0 %v10162_v32 }
 0x797   :  { %v10163_v63 = vsel %vm10161_vm1, %v10156_v9, -1e+30 }
 0x79a   :  { %10166 = vmax.xlane.f32.xlu0 %v10163_v63 }
 0x823   :  { %v10165_v19 = vpop.xlane.xlu0 %10164 }
 0x824   :  { %v10168_v62 = vsub.f32 %v10162_v32, %v10165_v19 }
 0x826   :  { %v10170_v57 = vmul.f32 1.442695, %v10168_v62 }
 0x827   :  { %v10167_v16 = vpop.xlane.xlu0 %10166 }
 0x828   :  { %v10169_v33 = vsub.f32 %v10163_v63, %v10167_v16  ;;  %13062 = vpow2.f32 %v10170_v57 }
 0x82a   :  { %v10172_v36 = vmul.f32 1.442695, %v10169_v33 }
 0x82c   :  { %13064 = vpow2.f32 %v10172_v36 }
 0x832   :  { %v13063_v39 = vpop.eup %13062 }
 0x833   :  { %10174 = vadd.xlane.f32.xlu1 %v13063_v39 }
 0x836   :  { %v13065_v40 = vpop.eup %13064 }
 0x837   :  { %10176 = vadd.xlane.f32.xlu1 %v13065_v40 }
 0x8c0   :  { %v10175_v41 = vpop.xlane.xlu1 %10174 }
 0x8c1   :  { %13066 = vlog2.f32 %v10175_v41 }
 0x8c4   :  { %v10177_v1 = vpop.xlane.xlu1 %10176 }
 0x8c5   :  { %13068 = vlog2.f32 %v10177_v1 }
 0x8cb   :  { %v13067_v27 = vpop.eup %13066 }
 0x8cc   :  { %v10179_v5 = vmul.f32 0.6931472, %v13067_v27 }
 0x8ce   :  { %v10182_v35 = vsub.f32 %v10168_v62, %v10179_v5 }
 0x8cf   :  { %v13069_v44 = vpop.eup %13068 }
 0x8d0   :  { %10184 = vst [vmem:[%s16505_s9] sm:$0xff] %v10182_v35  ;;  %v10181_v55 = vmul.f32 0.6931472, %v13069_v44 }
 0x8d2   :  { %v10183_v47 = vsub.f32 %v10169_v33, %v10181_v55 }
 0x8d4   :  { %10185 = vst [vmem:[%s16505_s9 + $0x8] sm:$0xff] %v10183_v47 }

</bundles_post_ra>
